<compile_context>
chip_gen: v5e
topology: v5e:2x2
jax: 0.10.0
libtpu: 0.0.40
codegen_flags: <defaults>
</compile_context>

<pallas_src>
import math
import functools

import jax
import jax.numpy as jnp
from jax.experimental import pallas as pl
from jax.experimental.pallas import tpu as pltpu

NEG_INF = -1e30


# --------------------------- in-kernel helpers ---------------------------

def _layernorm(y, g, b, eps=1e-5):
    mu = jnp.mean(y, axis=-1, keepdims=True)
    var = jnp.mean((y - mu) ** 2, axis=-1, keepdims=True)
    return (y - mu) * jax.lax.rsqrt(var + eps) * g + b


def _mha(q, k, v, bias, *, H, Dh, scale):
    """Head-batched multi-head attention on VMEM-resident values.

    q: (Sq, H*Dh) f32, k/v: (Sk, H*Dh) f32, bias broadcastable to (Sq, Sk).
    Returns the concatenated head outputs (Sq, H*Dh) in f32 (kept in vregs).
    """
    Sq, Sk = q.shape[0], k.shape[0]
    # (S, E) -> (H, S, Dh): split lanes into heads, put head dim leading
    # (batched contraction, matches the flash-attention einsum pattern).
    q3 = jnp.transpose(q.reshape(Sq, H, Dh), (1, 0, 2)).astype(jnp.bfloat16)
    k3 = jnp.transpose(k.reshape(Sk, H, Dh), (1, 0, 2)).astype(jnp.bfloat16)
    v3 = jnp.transpose(v.reshape(Sk, H, Dh), (1, 0, 2)).astype(jnp.bfloat16)

    s = jnp.einsum('hqd,hkd->hqk', q3, k3,
                   preferred_element_type=jnp.float32) * scale   # (H,Sq,Sk) f32
    s = s + bias[None, :, :]
    m = jnp.max(s, axis=-1, keepdims=True)
    p = jnp.exp(s - m)
    p = p * pl.reciprocal(jnp.sum(p, axis=-1, keepdims=True), approx=True)
    o = jnp.einsum('hqk,hkd->hqd', p.astype(jnp.bfloat16), v3,
                   preferred_element_type=jnp.float32)            # (H,Sq,Dh) f32
    return jnp.transpose(o, (1, 0, 2)).reshape(Sq, H * Dh)        # (Sq, E)


# ----------------------------- Pallas kernels -----------------------------

def _encoder_layer_kernel(x_ref, mask_ref, kpm_ref,
                          wqkv_ref, bqkv_ref, wo_ref, bo_ref,
                          ln1g_ref, ln1b_ref,
                          w1_ref, b1_ref, w2_ref, b2_ref,
                          ln2g_ref, ln2b_ref,
                          o_ref, *, S, H, Dh, scale):
    E = H * Dh
    n = pl.program_id(0)
    x = x_ref[...]                                            # (S, E) f32
    bias = mask_ref[...] + kpm_ref[pl.ds(n, 1), :]            # (S, S) built in-kernel

    # fused QKV projection + head-batched self-attention + out-proj
    qkv = (jnp.dot(x.astype(jnp.bfloat16), wqkv_ref[...],
                   preferred_element_type=jnp.float32) + bqkv_ref[...])
    attn = _mha(qkv[:, :E], qkv[:, E:2 * E], qkv[:, 2 * E:], bias,
                H=H, Dh=Dh, scale=scale)
    a = (jnp.dot(attn.astype(jnp.bfloat16), wo_ref[...],
                 preferred_element_type=jnp.float32) + bo_ref[...])
    x = _layernorm(x + a, ln1g_ref[...], ln1b_ref[...])       # post-norm

    # feed-forward (linear -> ReLU -> linear), residual, LN
    f = (jnp.dot(x.astype(jnp.bfloat16), w1_ref[...],
                 preferred_element_type=jnp.float32) + b1_ref[...])
    f = jnp.maximum(f, 0.0)
    f = (jnp.dot(f.astype(jnp.bfloat16), w2_ref[...],
                 preferred_element_type=jnp.float32) + b2_ref[...])
    o_ref[...] = _layernorm(x + f, ln2g_ref[...], ln2b_ref[...])


def _decoder_layer_kernel(x_ref, mem_ref, tmask_ref, tkpm_ref, mkpm_ref,
                          wqkv_ref, bqkv_ref, wo1_ref, bo1_ref,
                          ln1g_ref, ln1b_ref,
                          wq_ref, bq_ref, wkv_ref, bkv_ref, wo2_ref, bo2_ref,
                          ln2g_ref, ln2b_ref,
                          w1_ref, b1_ref, w2_ref, b2_ref,
                          ln3g_ref, ln3b_ref,
                          *rest, St, Ss, H, Dh, scale, fuse_out):
    if fuse_out:
        wout_ref, bout_ref, o_ref = rest
    else:
        (o_ref,) = rest
    E = H * Dh
    n = pl.program_id(0)
    x = x_ref[...]                                            # (St, E)
    mem = mem_ref[...]                                        # (Ss, E)

    # --- masked self-attention ---
    self_bias = tmask_ref[...] + tkpm_ref[pl.ds(n, 1), :]     # (St, St)
    qkv = (jnp.dot(x.astype(jnp.bfloat16), wqkv_ref[...],
                   preferred_element_type=jnp.float32) + bqkv_ref[...])
    a = _mha(qkv[:, :E], qkv[:, E:2 * E], qkv[:, 2 * E:], self_bias,
             H=H, Dh=Dh, scale=scale)
    a = (jnp.dot(a.astype(jnp.bfloat16), wo1_ref[...],
                 preferred_element_type=jnp.float32) + bo1_ref[...])
    x = _layernorm(x + a, ln1g_ref[...], ln1b_ref[...])

    # --- cross-attention over encoder memory (memory_mask is None) ---
    cross_bias = mkpm_ref[pl.ds(n, 1), :]                     # (1, Ss) broadcasts
    q = (jnp.dot(x.astype(jnp.bfloat16), wq_ref[...],
                 preferred_element_type=jnp.float32) + bq_ref[...])
    kv = (jnp.dot(mem.astype(jnp.bfloat16), wkv_ref[...],
                  preferred_element_type=jnp.float32) + bkv_ref[...])
    c = _mha(q, kv[:, :E], kv[:, E:], cross_bias, H=H, Dh=Dh, scale=scale)
    c = (jnp.dot(c.astype(jnp.bfloat16), wo2_ref[...],
                 preferred_element_type=jnp.float32) + bo2_ref[...])
    x = _layernorm(x + c, ln2g_ref[...], ln2b_ref[...])

    # --- feed-forward ---
    f = (jnp.dot(x.astype(jnp.bfloat16), w1_ref[...],
                 preferred_element_type=jnp.float32) + b1_ref[...])
    f = jnp.maximum(f, 0.0)
    f = (jnp.dot(f.astype(jnp.bfloat16), w2_ref[...],
                 preferred_element_type=jnp.float32) + b2_ref[...])
    y = _layernorm(x + f, ln3g_ref[...], ln3b_ref[...])

    if fuse_out:
        # fused final vocab projection (lane-padded to a multiple of 128)
        o_ref[...] = (jnp.dot(y.astype(jnp.bfloat16), wout_ref[...],
                              preferred_element_type=jnp.float32) + bout_ref[...])
    else:
        o_ref[...] = y


# --------------------------- pallas_call wrappers ---------------------------

def _const_spec(shape):
    """Full-array block with a constant index_map -> stays VMEM-resident."""
    nd = len(shape)
    return pl.BlockSpec(tuple(shape), lambda n, _nd=nd: (0,) * _nd)


_COMPILER_PARAMS = pltpu.CompilerParams(
    dimension_semantics=("parallel",),           # shard batch over TCs on v7x
    vmem_limit_bytes=32 * 1024 * 1024,
)


def encoder_layer(x, p, attn_mask, kpm_add, *, N, S, H):
    M, E = x.shape
    Dh = E // H
    sa = p["self_attn"]
    args = (x, attn_mask, kpm_add,
            sa["w_qkv"], sa["b_qkv"], sa["w_o"], sa["b_o"],
            p["ln1_g"], p["ln1_b"],
            p["w1"], p["b1"], p["w2"], p["b2"],
            p["ln2_g"], p["ln2_b"])
    in_specs = [pl.BlockSpec((S, E), lambda n: (n, 0))]           # per-n rows
    in_specs += [_const_spec(a.shape) for a in args[1:]]
    kern = functools.partial(_encoder_layer_kernel,
                             S=S, H=H, Dh=Dh, scale=1.0 / math.sqrt(Dh))
    return pl.pallas_call(
        kern,
        out_shape=jax.ShapeDtypeStruct((M, E), jnp.float32),
        grid=(N,),
        in_specs=in_specs,
        out_specs=pl.BlockSpec((S, E), lambda n: (n, 0)),
        compiler_params=_COMPILER_PARAMS,
    )(*args)


def decoder_layer(x, memory, p, tgt_mask, tgt_kpm_add, mem_kpm_add,
                  *, N, St, Ss, H, out_proj=None):
    M, E = x.shape
    Dh = E // H
    sa, ca = p["self_attn"], p["cross_attn"]
    args = [x, memory, tgt_mask, tgt_kpm_add, mem_kpm_add,
            sa["w_qkv"], sa["b_qkv"], sa["w_o"], sa["b_o"],
            p["ln1_g"], p["ln1_b"],
            ca["w_q"], ca["b_q"], ca["w_kv"], ca["b_kv"], ca["w_o"], ca["b_o"],
            p["ln2_g"], p["ln2_b"],
            p["w1"], p["b1"], p["w2"], p["b2"],
            p["ln3_g"], p["ln3_b"]]
    fuse_out = out_proj is not None
    if fuse_out:
        args += [out_proj[0], out_proj[1]]
        out_dim = out_proj[0].shape[1]
    else:
        out_dim = E
    in_specs = [pl.BlockSpec((St, E), lambda n: (n, 0)),
                pl.BlockSpec((Ss, E), lambda n: (n, 0))]
    in_specs += [_const_spec(a.shape) for a in args[2:]]
    kern = functools.partial(_decoder_layer_kernel,
                             St=St, Ss=Ss, H=H, Dh=Dh,
                             scale=1.0 / math.sqrt(Dh), fuse_out=fuse_out)
    return pl.pallas_call(
        kern,
        out_shape=jax.ShapeDtypeStruct((M, out_dim), jnp.float32),
        grid=(N,),
        in_specs=in_specs,
        out_specs=pl.BlockSpec((St, out_dim), lambda n: (n, 0)),
        compiler_params=_COMPILER_PARAMS,
    )(*args)


# --------------------------- model building blocks ---------------------------

def positional_encoding_table(max_len, d_model):
    position = jnp.arange(max_len, dtype=jnp.float32)[:, None]
    div_term = jnp.exp(jnp.arange(0, d_model, 2, dtype=jnp.float32)
                       * (-math.log(10000.0) / d_model))
    pe = jnp.zeros((max_len, d_model), jnp.float32)
    pe = pe.at[:, 0::2].set(jnp.sin(position * div_term))
    pe = pe.at[:, 1::2].set(jnp.cos(position * div_term))
    return pe                                                 # (max_len, d_model)


@functools.partial(jax.jit, static_argnames=("d_model", "nhead", "ntoken"))
def transformer_forward(params, src, tgt, src_mask, tgt_mask,
                        src_kpm, tgt_kpm, mem_kpm, *, d_model, nhead, ntoken):
    Ss, N = src.shape
    St = tgt.shape[0]
    E = d_model
    emb_scale = math.sqrt(d_model)
    pe = params["pe"]

    # tiny additive masks only (no dense (N,Sq,Sk) bias ever materialized)
    src_mask_f = src_mask.astype(jnp.float32)                 # (Ss, Ss)
    tgt_mask_f = tgt_mask.astype(jnp.float32)                 # (St, St)
    src_kpm_add = jnp.where(src_kpm, NEG_INF, 0.0).astype(jnp.float32)   # (N, Ss)
    tgt_kpm_add = jnp.where(tgt_kpm, NEG_INF, 0.0).astype(jnp.float32)   # (N, St)
    mem_kpm_add = jnp.where(mem_kpm, NEG_INF, 0.0).astype(jnp.float32)   # (N, Ss)

    # encoder: embedding * sqrt(d_model) + positional encoding (dropout = identity)
    x = jnp.take(params["enc_emb"], src.T, axis=0) * emb_scale + pe[:Ss][None]
    x = x.reshape(N * Ss, E)                                  # batch-major rows (n, s)
    for p in params["enc_layers"]:
        x = encoder_layer(x, p, src_mask_f, src_kpm_add, N=N, S=Ss, H=nhead)
    memory = x

    # decoder (final vocab projection fused into the last layer kernel)
    y = jnp.take(params["dec_emb"], tgt.T, axis=0) * emb_scale + pe[:St][None]
    y = y.reshape(N * St, E)
    n_dec = len(params["dec_layers"])
    for i, p in enumerate(params["dec_layers"]):
        fuse = (i == n_dec - 1)
        y = decoder_layer(y, memory, p, tgt_mask_f, tgt_kpm_add, mem_kpm_add,
                          N=N, St=St, Ss=Ss, H=nhead,
                          out_proj=((params["out_w"], params["out_b"])
                                    if fuse else None))

    # un-pad vocab and return seq-major (St, N, ntoken)
    out = y.reshape(N, St, -1)[:, :, :ntoken].transpose(1, 0, 2)
    return out


# ------------------------------ parameter init ------------------------------

def init_params(key, ntoken, d_model, nhead, nenc, ndec, dff):
    cnt = [0]

    def nk():
        cnt[0] += 1
        return jax.random.fold_in(key, cnt[0])

    def w(shape, scale=0.02, dtype=jnp.bfloat16):
        # matmul weights stored pre-transposed (in, out) and in bf16 (MXU-native)
        return (scale * jax.random.normal(nk(), shape, dtype=jnp.float32)).astype(dtype)

    def zeros(shape):
        return jnp.zeros(shape, jnp.float32)

    def ones(shape):
        return jnp.ones(shape, jnp.float32)

    E = d_model

    def self_attn():
        return {"w_qkv": w((E, 3 * E)), "b_qkv": zeros((1, 3 * E)),
                "w_o": w((E, E)), "b_o": zeros((1, E))}

    def cross_attn():
        return {"w_q": w((E, E)), "b_q": zeros((1, E)),
                "w_kv": w((E, 2 * E)), "b_kv": zeros((1, 2 * E)),
                "w_o": w((E, E)), "b_o": zeros((1, E))}

    def enc_layer():
        return {"self_attn": self_attn(),
                "w1": w((E, dff)), "b1": zeros((1, dff)),
                "w2": w((dff, E)), "b2": zeros((1, E)),
                "ln1_g": ones((1, E)), "ln1_b": zeros((1, E)),
                "ln2_g": ones((1, E)), "ln2_b": zeros((1, E))}

    def dec_layer():
        return {"self_attn": self_attn(), "cross_attn": cross_attn(),
                "w1": w((E, dff)), "b1": zeros((1, dff)),
                "w2": w((dff, E)), "b2": zeros((1, E)),
                "ln1_g": ones((1, E)), "ln1_b": zeros((1, E)),
                "ln2_g": ones((1, E)), "ln2_b": zeros((1, E)),
                "ln3_g": ones((1, E)), "ln3_b": zeros((1, E))}

    vpad = ((ntoken + 127) // 128) * 128                      # lane-dense output width
    out_w = jnp.pad(w((E, ntoken)), ((0, 0), (0, vpad - ntoken)))
    out_b = zeros((1, vpad))

    return {"enc_emb": w((ntoken, E), 1.0, jnp.float32),
            "dec_emb": w((ntoken, E), 1.0, jnp.float32),
            "pe": positional_encoding_table(5000, E),
            "enc_layers": [enc_layer() for _ in range(nenc)],
            "dec_layers": [dec_layer() for _ in range(ndec)],
            "out_w": out_w,
            "out_b": out_b}


# ----------------------------------- main -----------------------------------

if __name__ == "__main__":
    ntoken, d_model, nhead = 96, 64, 8
    num_enc, num_dec, dff = 2, 2, 128
    S_src, S_tgt, N = 8, 8, 2

    key = jax.random.PRNGKey(0)
    pkey, skey, tkey = jax.random.split(key, 3)

    params = init_params(pkey, ntoken, d_model, nhead, num_enc, num_dec, dff)

    src = jax.random.randint(skey, (S_src, N), 0, ntoken, dtype=jnp.int32)
    tgt = jax.random.randint(tkey, (S_tgt, N), 0, ntoken, dtype=jnp.int32)

    src_mask = jnp.zeros((S_src, S_src), jnp.float32)
    tgt_mask = jnp.where(jnp.triu(jnp.ones((S_tgt, S_tgt), bool), k=1),
                         NEG_INF, 0.0).astype(jnp.float32)    # causal mask
    src_kpm = jnp.zeros((N, S_src), bool)
    tgt_kpm = jnp.zeros((N, S_tgt), bool)
    mem_kpm = jnp.zeros((N, S_src), bool)

    out = transformer_forward(params, src, tgt, src_mask, tgt_mask,
                              src_kpm, tgt_kpm, mem_kpm,
                              d_model=d_model, nhead=nhead, ntoken=ntoken)
    jax.block_until_ready(out)
    assert out.shape == (S_tgt, N, ntoken), out.shape
    assert bool(jnp.all(jnp.isfinite(out)))
    print("KERNEL_OK")
</pallas_src>

<mosaic_0001>
module attributes {stable_mosaic.version = 11 : i64} {
  func.func @_decoder_layer_kernel(%arg0: i32, %arg1: memref<8x64xf32, #tpu.memory_space<vmem>>, %arg2: memref<8x64xf32, #tpu.memory_space<vmem>>, %arg3: memref<8x8xf32, #tpu.memory_space<vmem>>, %arg4: memref<2x8xf32, #tpu.memory_space<vmem>>, %arg5: memref<2x8xf32, #tpu.memory_space<vmem>>, %arg6: memref<64x192xbf16, #tpu.memory_space<vmem>>, %arg7: memref<1x192xf32, #tpu.memory_space<vmem>>, %arg8: memref<64x64xbf16, #tpu.memory_space<vmem>>, %arg9: memref<1x64xf32, #tpu.memory_space<vmem>>, %arg10: memref<1x64xf32, #tpu.memory_space<vmem>>, %arg11: memref<1x64xf32, #tpu.memory_space<vmem>>, %arg12: memref<64x64xbf16, #tpu.memory_space<vmem>>, %arg13: memref<1x64xf32, #tpu.memory_space<vmem>>, %arg14: memref<64x128xbf16, #tpu.memory_space<vmem>>, %arg15: memref<1x128xf32, #tpu.memory_space<vmem>>, %arg16: memref<64x64xbf16, #tpu.memory_space<vmem>>, %arg17: memref<1x64xf32, #tpu.memory_space<vmem>>, %arg18: memref<1x64xf32, #tpu.memory_space<vmem>>, %arg19: memref<1x64xf32, #tpu.memory_space<vmem>>, %arg20: memref<64x128xbf16, #tpu.memory_space<vmem>>, %arg21: memref<1x128xf32, #tpu.memory_space<vmem>>, %arg22: memref<128x64xbf16, #tpu.memory_space<vmem>>, %arg23: memref<1x64xf32, #tpu.memory_space<vmem>>, %arg24: memref<1x64xf32, #tpu.memory_space<vmem>>, %arg25: memref<1x64xf32, #tpu.memory_space<vmem>>, %arg26: memref<8x64xf32, #tpu.memory_space<vmem>>) attributes {dimension_semantics = [#tpu.dimension_semantics<parallel>], iteration_bounds = array<i64: 2>, scalar_prefetch = 0 : i64, scratch_operands = 0 : i64, tpu.core_type = #tpu.core_type<tc>, window_params = [{transform_indices = @transform_0, window_bounds = array<i64: 8, 64>}, {transform_indices = @transform_1, window_bounds = array<i64: 8, 64>}, {pipeline_mode = #tpu.pipeline_mode<synchronous>, transform_indices = @transform_2, window_bounds = array<i64: 8, 8>}, {pipeline_mode = #tpu.pipeline_mode<synchronous>, transform_indices = @transform_3, window_bounds = array<i64: 2, 8>}, {pipeline_mode = #tpu.pipeline_mode<synchronous>, transform_indices = @transform_4, window_bounds = array<i64: 2, 8>}, {pipeline_mode = #tpu.pipeline_mode<synchronous>, transform_indices = @transform_5, window_bounds = array<i64: 64, 192>}, {pipeline_mode = #tpu.pipeline_mode<synchronous>, transform_indices = @transform_6, window_bounds = array<i64: 1, 192>}, {pipeline_mode = #tpu.pipeline_mode<synchronous>, transform_indices = @transform_7, window_bounds = array<i64: 64, 64>}, {pipeline_mode = #tpu.pipeline_mode<synchronous>, transform_indices = @transform_8, window_bounds = array<i64: 1, 64>}, {pipeline_mode = #tpu.pipeline_mode<synchronous>, transform_indices = @transform_9, window_bounds = array<i64: 1, 64>}, {pipeline_mode = #tpu.pipeline_mode<synchronous>, transform_indices = @transform_10, window_bounds = array<i64: 1, 64>}, {pipeline_mode = #tpu.pipeline_mode<synchronous>, transform_indices = @transform_11, window_bounds = array<i64: 64, 64>}, {pipeline_mode = #tpu.pipeline_mode<synchronous>, transform_indices = @transform_12, window_bounds = array<i64: 1, 64>}, {pipeline_mode = #tpu.pipeline_mode<synchronous>, transform_indices = @transform_13, window_bounds = array<i64: 64, 128>}, {pipeline_mode = #tpu.pipeline_mode<synchronous>, transform_indices = @transform_14, window_bounds = array<i64: 1, 128>}, {pipeline_mode = #tpu.pipeline_mode<synchronous>, transform_indices = @transform_15, window_bounds = array<i64: 64, 64>}, {pipeline_mode = #tpu.pipeline_mode<synchronous>, transform_indices = @transform_16, window_bounds = array<i64: 1, 64>}, {pipeline_mode = #tpu.pipeline_mode<synchronous>, transform_indices = @transform_17, window_bounds = array<i64: 1, 64>}, {pipeline_mode = #tpu.pipeline_mode<synchronous>, transform_indices = @transform_18, window_bounds = array<i64: 1, 64>}, {pipeline_mode = #tpu.pipeline_mode<synchronous>, transform_indices = @transform_19, window_bounds = array<i64: 64, 128>}, {pipeline_mode = #tpu.pipeline_mode<synchronous>, transform_indices = @transform_20, window_bounds = array<i64: 1, 128>}, {pipeline_mode = #tpu.pipeline_mode<synchronous>, transform_indices = @transform_21, window_bounds = array<i64: 128, 64>}, {pipeline_mode = #tpu.pipeline_mode<synchronous>, transform_indices = @transform_22, window_bounds = array<i64: 1, 64>}, {pipeline_mode = #tpu.pipeline_mode<synchronous>, transform_indices = @transform_23, window_bounds = array<i64: 1, 64>}, {pipeline_mode = #tpu.pipeline_mode<synchronous>, transform_indices = @transform_24, window_bounds = array<i64: 1, 64>}, {transform_indices = @transform_25, window_bounds = array<i64: 8, 64>}]} {
    %c0 = arith.constant 0 : index
    %c0_0 = arith.constant 0 : index
    %0 = vector.load %arg1[%c0, %c0_0] : memref<8x64xf32, #tpu.memory_space<vmem>>, vector<8x64xf32>
    %c0_1 = arith.constant 0 : index
    %c0_2 = arith.constant 0 : index
    %1 = vector.load %arg2[%c0_1, %c0_2] : memref<8x64xf32, #tpu.memory_space<vmem>>, vector<8x64xf32>
    %c0_3 = arith.constant 0 : index
    %c0_4 = arith.constant 0 : index
    %2 = vector.load %arg3[%c0_3, %c0_4] : memref<8x8xf32, #tpu.memory_space<vmem>>, vector<8x8xf32>
    %3 = arith.index_cast %arg0 : i32 to index
    %c0_5 = arith.constant 0 : index
    %4 = vector.load %arg4[%3, %c0_5] : memref<2x8xf32, #tpu.memory_space<vmem>>, vector<1x8xf32>
    %5 = vector.broadcast %4 : vector<1x8xf32> to vector<8x8xf32>
    %6 = arith.addf %2, %5 : vector<8x8xf32>
    %7 = arith.truncf %0 : vector<8x64xf32> to vector<8x64xbf16>
    %c0_6 = arith.constant 0 : index
    %c0_7 = arith.constant 0 : index
    %8 = vector.load %arg6[%c0_6, %c0_7] : memref<64x192xbf16, #tpu.memory_space<vmem>>, vector<64x192xbf16>
    %cst = arith.constant dense<0.000000e+00> : vector<8x192xf32>
    %9 = tpu.matmul %7, %8, %cst {dimension_numbers = #tpu.dot_dimension_numbers<[1], [0], [0], [1], [0, 0, 1, 1], [], []>} : vector<8x64xbf16>, vector<64x192xbf16>, vector<8x192xf32> -> vector<8x192xf32>
    %c0_8 = arith.constant 0 : index
    %c0_9 = arith.constant 0 : index
    %10 = vector.load %arg7[%c0_8, %c0_9] : memref<1x192xf32, #tpu.memory_space<vmem>>, vector<1x192xf32>
    %11 = vector.broadcast %10 : vector<1x192xf32> to vector<8x192xf32>
    %12 = arith.addf %9, %11 : vector<8x192xf32>
    %13 = vector.extract_strided_slice %12 {offsets = [0, 0], sizes = [8, 64], strides = [1, 1]} : vector<8x192xf32> to vector<8x64xf32>
    %14 = vector.extract_strided_slice %12 {offsets = [0, 64], sizes = [8, 64], strides = [1, 1]} : vector<8x192xf32> to vector<8x64xf32>
    %15 = vector.extract_strided_slice %12 {offsets = [0, 128], sizes = [8, 64], strides = [1, 1]} : vector<8x192xf32> to vector<8x64xf32>
    %16 = vector.shape_cast %13 : vector<8x64xf32> to vector<8x8x8xf32>
    %17 = tpu.transpose %16, [1, 0, 2] : vector<8x8x8xf32> -> vector<8x8x8xf32>
    %18 = arith.truncf %17 : vector<8x8x8xf32> to vector<8x8x8xbf16>
    %19 = vector.shape_cast %14 : vector<8x64xf32> to vector<8x8x8xf32>
    %20 = tpu.transpose %19, [1, 0, 2] : vector<8x8x8xf32> -> vector<8x8x8xf32>
    %21 = arith.truncf %20 : vector<8x8x8xf32> to vector<8x8x8xbf16>
    %22 = vector.shape_cast %15 : vector<8x64xf32> to vector<8x8x8xf32>
    %23 = tpu.transpose %22, [1, 0, 2] : vector<8x8x8xf32> -> vector<8x8x8xf32>
    %24 = arith.truncf %23 : vector<8x8x8xf32> to vector<8x8x8xbf16>
    "tpu.trace_start"() <{level = 10 : i32, message = "hqd,hkd->hqk"}> : () -> ()
    %cst_10 = arith.constant dense<0.000000e+00> : vector<8x8x8xf32>
    %25 = tpu.matmul %18, %21, %cst_10 {dimension_numbers = #tpu.dot_dimension_numbers<[2], [2], [1], [1], [0, 0, 0, 1, 1, 1], [0], [0]>} : vector<8x8x8xbf16>, vector<8x8x8xbf16>, vector<8x8x8xf32> -> vector<8x8x8xf32>
    "tpu.trace_stop"() : () -> ()
    %cst_11 = arith.constant 0.353553385 : f32
    %26 = vector.broadcast %cst_11 : f32 to vector<8x8x8xf32>
    %27 = arith.mulf %25, %26 : vector<8x8x8xf32>
    %28 = vector.shape_cast %6 : vector<8x8xf32> to vector<1x8x8xf32>
    %29 = vector.broadcast %28 : vector<1x8x8xf32> to vector<8x8x8xf32>
    %30 = arith.addf %27, %29 : vector<8x8x8xf32>
    %cst_12 = arith.constant dense<0xFF800000> : vector<8x8xf32>
    %31 = vector.multi_reduction <maximumf>, %30, %cst_12 [2] : vector<8x8x8xf32> to vector<8x8xf32>
    %32 = vector.shape_cast %31 : vector<8x8xf32> to vector<8x8x1xf32>
    %33 = vector.broadcast %32 : vector<8x8x1xf32> to vector<8x8x8xf32>
    %34 = arith.subf %30, %33 : vector<8x8x8xf32>
    %35 = math.exp %34 : vector<8x8x8xf32>
    %cst_13 = arith.constant dense<0.000000e+00> : vector<8x8xf32>
    %36 = vector.multi_reduction <add>, %35, %cst_13 [2] : vector<8x8x8xf32> to vector<8x8xf32>
    %37 = vector.shape_cast %36 : vector<8x8xf32> to vector<8x8x1xf32>
    %38 = tpu.reciprocal %37 {approx = true} : vector<8x8x1xf32> -> vector<8x8x1xf32>
    %39 = vector.broadcast %38 : vector<8x8x1xf32> to vector<8x8x8xf32>
    %40 = arith.mulf %35, %39 : vector<8x8x8xf32>
    %41 = arith.truncf %40 : vector<8x8x8xf32> to vector<8x8x8xbf16>
    "tpu.trace_start"() <{level = 10 : i32, message = "hqk,hkd->hqd"}> : () -> ()
    %cst_14 = arith.constant dense<0.000000e+00> : vector<8x8x8xf32>
    %42 = tpu.matmul %41, %24, %cst_14 {dimension_numbers = #tpu.dot_dimension_numbers<[2], [1], [1], [2], [0, 0, 0, 1, 1, 2], [0], [0]>} : vector<8x8x8xbf16>, vector<8x8x8xbf16>, vector<8x8x8xf32> -> vector<8x8x8xf32>
    "tpu.trace_stop"() : () -> ()
    %43 = tpu.transpose %42, [1, 0, 2] : vector<8x8x8xf32> -> vector<8x8x8xf32>
    %44 = vector.shape_cast %43 : vector<8x8x8xf32> to vector<8x64xf32>
    %45 = arith.truncf %44 : vector<8x64xf32> to vector<8x64xbf16>
    %c0_15 = arith.constant 0 : index
    %c0_16 = arith.constant 0 : index
    %46 = vector.load %arg8[%c0_15, %c0_16] : memref<64x64xbf16, #tpu.memory_space<vmem>>, vector<64x64xbf16>
    %cst_17 = arith.constant dense<0.000000e+00> : vector<8x64xf32>
    %47 = tpu.matmul %45, %46, %cst_17 {dimension_numbers = #tpu.dot_dimension_numbers<[1], [0], [0], [1], [0, 0, 1, 1], [], []>} : vector<8x64xbf16>, vector<64x64xbf16>, vector<8x64xf32> -> vector<8x64xf32>
    %c0_18 = arith.constant 0 : index
    %c0_19 = arith.constant 0 : index
    %48 = vector.load %arg9[%c0_18, %c0_19] : memref<1x64xf32, #tpu.memory_space<vmem>>, vector<1x64xf32>
    %49 = vector.broadcast %48 : vector<1x64xf32> to vector<8x64xf32>
    %50 = arith.addf %47, %49 : vector<8x64xf32>
    %51 = arith.addf %0, %50 : vector<8x64xf32>
    %c0_20 = arith.constant 0 : index
    %c0_21 = arith.constant 0 : index
    %52 = vector.load %arg10[%c0_20, %c0_21] : memref<1x64xf32, #tpu.memory_space<vmem>>, vector<1x64xf32>
    %c0_22 = arith.constant 0 : index
    %c0_23 = arith.constant 0 : index
    %53 = vector.load %arg11[%c0_22, %c0_23] : memref<1x64xf32, #tpu.memory_space<vmem>>, vector<1x64xf32>
    %cst_24 = arith.constant dense<0.000000e+00> : vector<8xf32>
    %54 = vector.multi_reduction <add>, %51, %cst_24 [1] : vector<8x64xf32> to vector<8xf32>
    %55 = vector.shape_cast %54 : vector<8xf32> to vector<8x1xf32>
    %cst_25 = arith.constant 6.400000e+01 : f32
    %56 = vector.broadcast %cst_25 : f32 to vector<8x1xf32>
    %57 = arith.divf %55, %56 : vector<8x1xf32>
    %58 = vector.broadcast %57 : vector<8x1xf32> to vector<8x64xf32>
    %59 = arith.subf %51, %58 : vector<8x64xf32>
    %60 = arith.mulf %59, %59 : vector<8x64xf32>
    %cst_26 = arith.constant dense<0.000000e+00> : vector<8xf32>
    %61 = vector.multi_reduction <add>, %60, %cst_26 [1] : vector<8x64xf32> to vector<8xf32>
    %62 = vector.shape_cast %61 : vector<8xf32> to vector<8x1xf32>
    %cst_27 = arith.constant 6.400000e+01 : f32
    %63 = vector.broadcast %cst_27 : f32 to vector<8x1xf32>
    %64 = arith.divf %62, %63 : vector<8x1xf32>
    %65 = vector.broadcast %57 : vector<8x1xf32> to vector<8x64xf32>
    %66 = arith.subf %51, %65 : vector<8x64xf32>
    %cst_28 = arith.constant 9.99999974E-6 : f32
    %67 = vector.broadcast %cst_28 : f32 to vector<8x1xf32>
    %68 = arith.addf %64, %67 : vector<8x1xf32>
    %69 = math.rsqrt %68 : vector<8x1xf32>
    %70 = vector.broadcast %69 : vector<8x1xf32> to vector<8x64xf32>
    %71 = arith.mulf %66, %70 : vector<8x64xf32>
    %72 = vector.broadcast %52 : vector<1x64xf32> to vector<8x64xf32>
    %73 = arith.mulf %71, %72 : vector<8x64xf32>
    %74 = vector.broadcast %53 : vector<1x64xf32> to vector<8x64xf32>
    %75 = arith.addf %73, %74 : vector<8x64xf32>
    %76 = arith.index_cast %arg0 : i32 to index
    %c0_29 = arith.constant 0 : index
    %77 = vector.load %arg5[%76, %c0_29] : memref<2x8xf32, #tpu.memory_space<vmem>>, vector<1x8xf32>
    %78 = arith.truncf %75 : vector<8x64xf32> to vector<8x64xbf16>
    %c0_30 = arith.constant 0 : index
    %c0_31 = arith.constant 0 : index
    %79 = vector.load %arg12[%c0_30, %c0_31] : memref<64x64xbf16, #tpu.memory_space<vmem>>, vector<64x64xbf16>
    %cst_32 = arith.constant dense<0.000000e+00> : vector<8x64xf32>
    %80 = tpu.matmul %78, %79, %cst_32 {dimension_numbers = #tpu.dot_dimension_numbers<[1], [0], [0], [1], [0, 0, 1, 1], [], []>} : vector<8x64xbf16>, vector<64x64xbf16>, vector<8x64xf32> -> vector<8x64xf32>
    %c0_33 = arith.constant 0 : index
    %c0_34 = arith.constant 0 : index
    %81 = vector.load %arg13[%c0_33, %c0_34] : memref<1x64xf32, #tpu.memory_space<vmem>>, vector<1x64xf32>
    %82 = vector.broadcast %81 : vector<1x64xf32> to vector<8x64xf32>
    %83 = arith.addf %80, %82 : vector<8x64xf32>
    %84 = arith.truncf %1 : vector<8x64xf32> to vector<8x64xbf16>
    %c0_35 = arith.constant 0 : index
    %c0_36 = arith.constant 0 : index
    %85 = vector.load %arg14[%c0_35, %c0_36] : memref<64x128xbf16, #tpu.memory_space<vmem>>, vector<64x128xbf16>
    %cst_37 = arith.constant dense<0.000000e+00> : vector<8x128xf32>
    %86 = tpu.matmul %84, %85, %cst_37 {dimension_numbers = #tpu.dot_dimension_numbers<[1], [0], [0], [1], [0, 0, 1, 1], [], []>} : vector<8x64xbf16>, vector<64x128xbf16>, vector<8x128xf32> -> vector<8x128xf32>
    %c0_38 = arith.constant 0 : index
    %c0_39 = arith.constant 0 : index
    %87 = vector.load %arg15[%c0_38, %c0_39] : memref<1x128xf32, #tpu.memory_space<vmem>>, vector<1x128xf32>
    %88 = vector.broadcast %87 : vector<1x128xf32> to vector<8x128xf32>
    %89 = arith.addf %86, %88 : vector<8x128xf32>
    %90 = vector.extract_strided_slice %89 {offsets = [0, 0], sizes = [8, 64], strides = [1, 1]} : vector<8x128xf32> to vector<8x64xf32>
    %91 = vector.extract_strided_slice %89 {offsets = [0, 64], sizes = [8, 64], strides = [1, 1]} : vector<8x128xf32> to vector<8x64xf32>
    %92 = vector.shape_cast %83 : vector<8x64xf32> to vector<8x8x8xf32>
    %93 = tpu.transpose %92, [1, 0, 2] : vector<8x8x8xf32> -> vector<8x8x8xf32>
    %94 = arith.truncf %93 : vector<8x8x8xf32> to vector<8x8x8xbf16>
    %95 = vector.shape_cast %90 : vector<8x64xf32> to vector<8x8x8xf32>
    %96 = tpu.transpose %95, [1, 0, 2] : vector<8x8x8xf32> -> vector<8x8x8xf32>
    %97 = arith.truncf %96 : vector<8x8x8xf32> to vector<8x8x8xbf16>
    %98 = vector.shape_cast %91 : vector<8x64xf32> to vector<8x8x8xf32>
    %99 = tpu.transpose %98, [1, 0, 2] : vector<8x8x8xf32> -> vector<8x8x8xf32>
    %100 = arith.truncf %99 : vector<8x8x8xf32> to vector<8x8x8xbf16>
    "tpu.trace_start"() <{level = 10 : i32, message = "hqd,hkd->hqk"}> : () -> ()
    %cst_40 = arith.constant dense<0.000000e+00> : vector<8x8x8xf32>
    %101 = tpu.matmul %94, %97, %cst_40 {dimension_numbers = #tpu.dot_dimension_numbers<[2], [2], [1], [1], [0, 0, 0, 1, 1, 1], [0], [0]>} : vector<8x8x8xbf16>, vector<8x8x8xbf16>, vector<8x8x8xf32> -> vector<8x8x8xf32>
    "tpu.trace_stop"() : () -> ()
    %cst_41 = arith.constant 0.353553385 : f32
    %102 = vector.broadcast %cst_41 : f32 to vector<8x8x8xf32>
    %103 = arith.mulf %101, %102 : vector<8x8x8xf32>
    %104 = vector.shape_cast %77 : vector<1x8xf32> to vector<1x1x8xf32>
    %105 = vector.broadcast %104 : vector<1x1x8xf32> to vector<8x8x8xf32>
    %106 = arith.addf %103, %105 : vector<8x8x8xf32>
    %cst_42 = arith.constant dense<0xFF800000> : vector<8x8xf32>
    %107 = vector.multi_reduction <maximumf>, %106, %cst_42 [2] : vector<8x8x8xf32> to vector<8x8xf32>
    %108 = vector.shape_cast %107 : vector<8x8xf32> to vector<8x8x1xf32>
    %109 = vector.broadcast %108 : vector<8x8x1xf32> to vector<8x8x8xf32>
    %110 = arith.subf %106, %109 : vector<8x8x8xf32>
    %111 = math.exp %110 : vector<8x8x8xf32>
    %cst_43 = arith.constant dense<0.000000e+00> : vector<8x8xf32>
    %112 = vector.multi_reduction <add>, %111, %cst_43 [2] : vector<8x8x8xf32> to vector<8x8xf32>
    %113 = vector.shape_cast %112 : vector<8x8xf32> to vector<8x8x1xf32>
    %114 = tpu.reciprocal %113 {approx = true} : vector<8x8x1xf32> -> vector<8x8x1xf32>
    %115 = vector.broadcast %114 : vector<8x8x1xf32> to vector<8x8x8xf32>
    %116 = arith.mulf %111, %115 : vector<8x8x8xf32>
    %117 = arith.truncf %116 : vector<8x8x8xf32> to vector<8x8x8xbf16>
    "tpu.trace_start"() <{level = 10 : i32, message = "hqk,hkd->hqd"}> : () -> ()
    %cst_44 = arith.constant dense<0.000000e+00> : vector<8x8x8xf32>
    %118 = tpu.matmul %117, %100, %cst_44 {dimension_numbers = #tpu.dot_dimension_numbers<[2], [1], [1], [2], [0, 0, 0, 1, 1, 2], [0], [0]>} : vector<8x8x8xbf16>, vector<8x8x8xbf16>, vector<8x8x8xf32> -> vector<8x8x8xf32>
    "tpu.trace_stop"() : () -> ()
    %119 = tpu.transpose %118, [1, 0, 2] : vector<8x8x8xf32> -> vector<8x8x8xf32>
    %120 = vector.shape_cast %119 : vector<8x8x8xf32> to vector<8x64xf32>
    %121 = arith.truncf %120 : vector<8x64xf32> to vector<8x64xbf16>
    %c0_45 = arith.constant 0 : index
    %c0_46 = arith.constant 0 : index
    %122 = vector.load %arg16[%c0_45, %c0_46] : memref<64x64xbf16, #tpu.memory_space<vmem>>, vector<64x64xbf16>
    %cst_47 = arith.constant dense<0.000000e+00> : vector<8x64xf32>
    %123 = tpu.matmul %121, %122, %cst_47 {dimension_numbers = #tpu.dot_dimension_numbers<[1], [0], [0], [1], [0, 0, 1, 1], [], []>} : vector<8x64xbf16>, vector<64x64xbf16>, vector<8x64xf32> -> vector<8x64xf32>
    %c0_48 = arith.constant 0 : index
    %c0_49 = arith.constant 0 : index
    %124 = vector.load %arg17[%c0_48, %c0_49] : memref<1x64xf32, #tpu.memory_space<vmem>>, vector<1x64xf32>
    %125 = vector.broadcast %124 : vector<1x64xf32> to vector<8x64xf32>
    %126 = arith.addf %123, %125 : vector<8x64xf32>
    %127 = arith.addf %75, %126 : vector<8x64xf32>
    %c0_50 = arith.constant 0 : index
    %c0_51 = arith.constant 0 : index
    %128 = vector.load %arg18[%c0_50, %c0_51] : memref<1x64xf32, #tpu.memory_space<vmem>>, vector<1x64xf32>
    %c0_52 = arith.constant 0 : index
    %c0_53 = arith.constant 0 : index
    %129 = vector.load %arg19[%c0_52, %c0_53] : memref<1x64xf32, #tpu.memory_space<vmem>>, vector<1x64xf32>
    %cst_54 = arith.constant dense<0.000000e+00> : vector<8xf32>
    %130 = vector.multi_reduction <add>, %127, %cst_54 [1] : vector<8x64xf32> to vector<8xf32>
    %131 = vector.shape_cast %130 : vector<8xf32> to vector<8x1xf32>
    %cst_55 = arith.constant 6.400000e+01 : f32
    %132 = vector.broadcast %cst_55 : f32 to vector<8x1xf32>
    %133 = arith.divf %131, %132 : vector<8x1xf32>
    %134 = vector.broadcast %133 : vector<8x1xf32> to vector<8x64xf32>
    %135 = arith.subf %127, %134 : vector<8x64xf32>
    %136 = arith.mulf %135, %135 : vector<8x64xf32>
    %cst_56 = arith.constant dense<0.000000e+00> : vector<8xf32>
    %137 = vector.multi_reduction <add>, %136, %cst_56 [1] : vector<8x64xf32> to vector<8xf32>
    %138 = vector.shape_cast %137 : vector<8xf32> to vector<8x1xf32>
    %cst_57 = arith.constant 6.400000e+01 : f32
    %139 = vector.broadcast %cst_57 : f32 to vector<8x1xf32>
    %140 = arith.divf %138, %139 : vector<8x1xf32>
    %141 = vector.broadcast %133 : vector<8x1xf32> to vector<8x64xf32>
    %142 = arith.subf %127, %141 : vector<8x64xf32>
    %cst_58 = arith.constant 9.99999974E-6 : f32
    %143 = vector.broadcast %cst_58 : f32 to vector<8x1xf32>
    %144 = arith.addf %140, %143 : vector<8x1xf32>
    %145 = math.rsqrt %144 : vector<8x1xf32>
    %146 = vector.broadcast %145 : vector<8x1xf32> to vector<8x64xf32>
    %147 = arith.mulf %142, %146 : vector<8x64xf32>
    %148 = vector.broadcast %128 : vector<1x64xf32> to vector<8x64xf32>
    %149 = arith.mulf %147, %148 : vector<8x64xf32>
    %150 = vector.broadcast %129 : vector<1x64xf32> to vector<8x64xf32>
    %151 = arith.addf %149, %150 : vector<8x64xf32>
    %152 = arith.truncf %151 : vector<8x64xf32> to vector<8x64xbf16>
    %c0_59 = arith.constant 0 : index
    %c0_60 = arith.constant 0 : index
    %153 = vector.load %arg20[%c0_59, %c0_60] : memref<64x128xbf16, #tpu.memory_space<vmem>>, vector<64x128xbf16>
    %cst_61 = arith.constant dense<0.000000e+00> : vector<8x128xf32>
    %154 = tpu.matmul %152, %153, %cst_61 {dimension_numbers = #tpu.dot_dimension_numbers<[1], [0], [0], [1], [0, 0, 1, 1], [], []>} : vector<8x64xbf16>, vector<64x128xbf16>, vector<8x128xf32> -> vector<8x128xf32>
    %c0_62 = arith.constant 0 : index
    %c0_63 = arith.constant 0 : index
    %155 = vector.load %arg21[%c0_62, %c0_63] : memref<1x128xf32, #tpu.memory_space<vmem>>, vector<1x128xf32>
    %156 = vector.broadcast %155 : vector<1x128xf32> to vector<8x128xf32>
    %157 = arith.addf %154, %156 : vector<8x128xf32>
    %cst_64 = arith.constant 0.000000e+00 : f32
    %158 = vector.broadcast %cst_64 : f32 to vector<8x128xf32>
    %159 = arith.maximumf %157, %158 : vector<8x128xf32>
    %160 = arith.truncf %159 : vector<8x128xf32> to vector<8x128xbf16>
    %c0_65 = arith.constant 0 : index
    %c0_66 = arith.constant 0 : index
    %161 = vector.load %arg22[%c0_65, %c0_66] : memref<128x64xbf16, #tpu.memory_space<vmem>>, vector<128x64xbf16>
    %cst_67 = arith.constant dense<0.000000e+00> : vector<8x64xf32>
    %162 = tpu.matmul %160, %161, %cst_67 {dimension_numbers = #tpu.dot_dimension_numbers<[1], [0], [0], [1], [0, 0, 1, 1], [], []>} : vector<8x128xbf16>, vector<128x64xbf16>, vector<8x64xf32> -> vector<8x64xf32>
    %c0_68 = arith.constant 0 : index
    %c0_69 = arith.constant 0 : index
    %163 = vector.load %arg23[%c0_68, %c0_69] : memref<1x64xf32, #tpu.memory_space<vmem>>, vector<1x64xf32>
    %164 = vector.broadcast %163 : vector<1x64xf32> to vector<8x64xf32>
    %165 = arith.addf %162, %164 : vector<8x64xf32>
    %166 = arith.addf %151, %165 : vector<8x64xf32>
    %c0_70 = arith.constant 0 : index
    %c0_71 = arith.constant 0 : index
    %167 = vector.load %arg24[%c0_70, %c0_71] : memref<1x64xf32, #tpu.memory_space<vmem>>, vector<1x64xf32>
    %c0_72 = arith.constant 0 : index
    %c0_73 = arith.constant 0 : index
    %168 = vector.load %arg25[%c0_72, %c0_73] : memref<1x64xf32, #tpu.memory_space<vmem>>, vector<1x64xf32>
    %cst_74 = arith.constant dense<0.000000e+00> : vector<8xf32>
    %169 = vector.multi_reduction <add>, %166, %cst_74 [1] : vector<8x64xf32> to vector<8xf32>
    %170 = vector.shape_cast %169 : vector<8xf32> to vector<8x1xf32>
    %cst_75 = arith.constant 6.400000e+01 : f32
    %171 = vector.broadcast %cst_75 : f32 to vector<8x1xf32>
    %172 = arith.divf %170, %171 : vector<8x1xf32>
    %173 = vector.broadcast %172 : vector<8x1xf32> to vector<8x64xf32>
    %174 = arith.subf %166, %173 : vector<8x64xf32>
    %175 = arith.mulf %174, %174 : vector<8x64xf32>
    %cst_76 = arith.constant dense<0.000000e+00> : vector<8xf32>
    %176 = vector.multi_reduction <add>, %175, %cst_76 [1] : vector<8x64xf32> to vector<8xf32>
    %177 = vector.shape_cast %176 : vector<8xf32> to vector<8x1xf32>
    %cst_77 = arith.constant 6.400000e+01 : f32
    %178 = vector.broadcast %cst_77 : f32 to vector<8x1xf32>
    %179 = arith.divf %177, %178 : vector<8x1xf32>
    %180 = vector.broadcast %172 : vector<8x1xf32> to vector<8x64xf32>
    %181 = arith.subf %166, %180 : vector<8x64xf32>
    %cst_78 = arith.constant 9.99999974E-6 : f32
    %182 = vector.broadcast %cst_78 : f32 to vector<8x1xf32>
    %183 = arith.addf %179, %182 : vector<8x1xf32>
    %184 = math.rsqrt %183 : vector<8x1xf32>
    %185 = vector.broadcast %184 : vector<8x1xf32> to vector<8x64xf32>
    %186 = arith.mulf %181, %185 : vector<8x64xf32>
    %187 = vector.broadcast %167 : vector<1x64xf32> to vector<8x64xf32>
    %188 = arith.mulf %186, %187 : vector<8x64xf32>
    %189 = vector.broadcast %168 : vector<1x64xf32> to vector<8x64xf32>
    %190 = arith.addf %188, %189 : vector<8x64xf32>
    %c0_79 = arith.constant 0 : index
    %c0_80 = arith.constant 0 : index
    %191 = vector.load %arg26[%c0_79, %c0_80] : memref<8x64xf32, #tpu.memory_space<vmem>>, vector<8x64xf32>
    tpu.vector_store %arg26[%c0_79, %c0_80], %190 {strides = array<i32>} : memref<8x64xf32, #tpu.memory_space<vmem>>, vector<8x64xf32>,
    return
  }
  func.func @transform_0(%arg0: i32) -> (i32, i32) {
    %c0_i32 = arith.constant 0 : i32
    %c0_i32_0 = arith.constant 0 : i32
    return %arg0, %c0_i32 : i32, i32
  }
  func.func @transform_1(%arg0: i32) -> (i32, i32) {
    %c0_i32 = arith.constant 0 : i32
    %c0_i32_0 = arith.constant 0 : i32
    return %arg0, %c0_i32 : i32, i32
  }
  func.func @transform_2(%arg0: i32) -> (i32, i32) {
    %c0_i32 = arith.constant 0 : i32
    %c0_i32_0 = arith.constant 0 : i32
    %c0_i32_1 = arith.constant 0 : i32
    return %c0_i32, %c0_i32_0 : i32, i32
  }
  func.func @transform_3(%arg0: i32) -> (i32, i32) {
    %c0_i32 = arith.constant 0 : i32
    %c0_i32_0 = arith.constant 0 : i32
    %c0_i32_1 = arith.constant 0 : i32
    return %c0_i32, %c0_i32_0 : i32, i32
  }
  func.func @transform_4(%arg0: i32) -> (i32, i32) {
    %c0_i32 = arith.constant 0 : i32
    %c0_i32_0 = arith.constant 0 : i32
    %c0_i32_1 = arith.constant 0 : i32
    return %c0_i32, %c0_i32_0 : i32, i32
  }
  func.func @transform_5(%arg0: i32) -> (i32, i32) {
    %c0_i32 = arith.constant 0 : i32
    %c0_i32_0 = arith.constant 0 : i32
    %c0_i32_1 = arith.constant 0 : i32
    return %c0_i32, %c0_i32_0 : i32, i32
  }
  func.func @transform_6(%arg0: i32) -> (i32, i32) {
    %c0_i32 = arith.constant 0 : i32
    %c0_i32_0 = arith.constant 0 : i32
    %c0_i32_1 = arith.constant 0 : i32
    return %c0_i32, %c0_i32_0 : i32, i32
  }
  func.func @transform_7(%arg0: i32) -> (i32, i32) {
    %c0_i32 = arith.constant 0 : i32
    %c0_i32_0 = arith.constant 0 : i32
    %c0_i32_1 = arith.constant 0 : i32
    return %c0_i32, %c0_i32_0 : i32, i32
  }
  func.func @transform_8(%arg0: i32) -> (i32, i32) {
    %c0_i32 = arith.constant 0 : i32
    %c0_i32_0 = arith.constant 0 : i32
    %c0_i32_1 = arith.constant 0 : i32
    return %c0_i32, %c0_i32_0 : i32, i32
  }
  func.func @transform_9(%arg0: i32) -> (i32, i32) {
    %c0_i32 = arith.constant 0 : i32
    %c0_i32_0 = arith.constant 0 : i32
    %c0_i32_1 = arith.constant 0 : i32
    return %c0_i32, %c0_i32_0 : i32, i32
  }
  func.func @transform_10(%arg0: i32) -> (i32, i32) {
    %c0_i32 = arith.constant 0 : i32
    %c0_i32_0 = arith.constant 0 : i32
    %c0_i32_1 = arith.constant 0 : i32
    return %c0_i32, %c0_i32_0 : i32, i32
  }
  func.func @transform_11(%arg0: i32) -> (i32, i32) {
    %c0_i32 = arith.constant 0 : i32
    %c0_i32_0 = arith.constant 0 : i32
    %c0_i32_1 = arith.constant 0 : i32
    return %c0_i32, %c0_i32_0 : i32, i32
  }
  func.func @transform_12(%arg0: i32) -> (i32, i32) {
    %c0_i32 = arith.constant 0 : i32
    %c0_i32_0 = arith.constant 0 : i32
    %c0_i32_1 = arith.constant 0 : i32
    return %c0_i32, %c0_i32_0 : i32, i32
  }
  func.func @transform_13(%arg0: i32) -> (i32, i32) {
    %c0_i32 = arith.constant 0 : i32
    %c0_i32_0 = arith.constant 0 : i32
    %c0_i32_1 = arith.constant 0 : i32
    return %c0_i32, %c0_i32_0 : i32, i32
  }
  func.func @transform_14(%arg0: i32) -> (i32, i32) {
    %c0_i32 = arith.constant 0 : i32
    %c0_i32_0 = arith.constant 0 : i32
    %c0_i32_1 = arith.constant 0 : i32
    return %c0_i32, %c0_i32_0 : i32, i32
  }
  func.func @transform_15(%arg0: i32) -> (i32, i32) {
    %c0_i32 = arith.constant 0 : i32
    %c0_i32_0 = arith.constant 0 : i32
    %c0_i32_1 = arith.constant 0 : i32
    return %c0_i32, %c0_i32_0 : i32, i32
  }
  func.func @transform_16(%arg0: i32) -> (i32, i32) {
    %c0_i32 = arith.constant 0 : i32
    %c0_i32_0 = arith.constant 0 : i32
    %c0_i32_1 = arith.constant 0 : i32
    return %c0_i32, %c0_i32_0 : i32, i32
  }
  func.func @transform_17(%arg0: i32) -> (i32, i32) {
    %c0_i32 = arith.constant 0 : i32
    %c0_i32_0 = arith.constant 0 : i32
    %c0_i32_1 = arith.constant 0 : i32
    return %c0_i32, %c0_i32_0 : i32, i32
  }
  func.func @transform_18(%arg0: i32) -> (i32, i32) {
    %c0_i32 = arith.constant 0 : i32
    %c0_i32_0 = arith.constant 0 : i32
    %c0_i32_1 = arith.constant 0 : i32
    return %c0_i32, %c0_i32_0 : i32, i32
  }
  func.func @transform_19(%arg0: i32) -> (i32, i32) {
    %c0_i32 = arith.constant 0 : i32
    %c0_i32_0 = arith.constant 0 : i32
    %c0_i32_1 = arith.constant 0 : i32
    return %c0_i32, %c0_i32_0 : i32, i32
  }
  func.func @transform_20(%arg0: i32) -> (i32, i32) {
    %c0_i32 = arith.constant 0 : i32
    %c0_i32_0 = arith.constant 0 : i32
    %c0_i32_1 = arith.constant 0 : i32
    return %c0_i32, %c0_i32_0 : i32, i32
  }
  func.func @transform_21(%arg0: i32) -> (i32, i32) {
    %c0_i32 = arith.constant 0 : i32
    %c0_i32_0 = arith.constant 0 : i32
    %c0_i32_1 = arith.constant 0 : i32
    return %c0_i32, %c0_i32_0 : i32, i32
  }
  func.func @transform_22(%arg0: i32) -> (i32, i32) {
    %c0_i32 = arith.constant 0 : i32
    %c0_i32_0 = arith.constant 0 : i32
    %c0_i32_1 = arith.constant 0 : i32
    return %c0_i32, %c0_i32_0 : i32, i32
  }
  func.func @transform_23(%arg0: i32) -> (i32, i32) {
    %c0_i32 = arith.constant 0 : i32
    %c0_i32_0 = arith.constant 0 : i32
    %c0_i32_1 = arith.constant 0 : i32
    return %c0_i32, %c0_i32_0 : i32, i32
  }
  func.func @transform_24(%arg0: i32) -> (i32, i32) {
    %c0_i32 = arith.constant 0 : i32
    %c0_i32_0 = arith.constant 0 : i32
    %c0_i32_1 = arith.constant 0 : i32
    return %c0_i32, %c0_i32_0 : i32, i32
  }
  func.func @transform_25(%arg0: i32) -> (i32, i32) {
    %c0_i32 = arith.constant 0 : i32
    %c0_i32_0 = arith.constant 0 : i32
    return %arg0, %c0_i32 : i32, i32
  }
}

module attributes {stable_mosaic.version = 11 : i64} {
  func.func @_encoder_layer_kernel(%arg0: i32, %arg1: memref<8x64xf32, #tpu.memory_space<vmem>>, %arg2: memref<8x8xf32, #tpu.memory_space<vmem>>, %arg3: memref<2x8xf32, #tpu.memory_space<vmem>>, %arg4: memref<64x192xbf16, #tpu.memory_space<vmem>>, %arg5: memref<1x192xf32, #tpu.memory_space<vmem>>, %arg6: memref<64x64xbf16, #tpu.memory_space<vmem>>, %arg7: memref<1x64xf32, #tpu.memory_space<vmem>>, %arg8: memref<1x64xf32, #tpu.memory_space<vmem>>, %arg9: memref<1x64xf32, #tpu.memory_space<vmem>>, %arg10: memref<64x128xbf16, #tpu.memory_space<vmem>>, %arg11: memref<1x128xf32, #tpu.memory_space<vmem>>, %arg12: memref<128x64xbf16, #tpu.memory_space<vmem>>, %arg13: memref<1x64xf32, #tpu.memory_space<vmem>>, %arg14: memref<1x64xf32, #tpu.memory_space<vmem>>, %arg15: memref<1x64xf32, #tpu.memory_space<vmem>>, %arg16: memref<8x64xf32, #tpu.memory_space<vmem>>) attributes {dimension_semantics = [#tpu.dimension_semantics<parallel>], iteration_bounds = array<i64: 2>, scalar_prefetch = 0 : i64, scratch_operands = 0 : i64, tpu.core_type = #tpu.core_type<tc>, window_params = [{transform_indices = @transform_0, window_bounds = array<i64: 8, 64>}, {pipeline_mode = #tpu.pipeline_mode<synchronous>, transform_indices = @transform_1, window_bounds = array<i64: 8, 8>}, {pipeline_mode = #tpu.pipeline_mode<synchronous>, transform_indices = @transform_2, window_bounds = array<i64: 2, 8>}, {pipeline_mode = #tpu.pipeline_mode<synchronous>, transform_indices = @transform_3, window_bounds = array<i64: 64, 192>}, {pipeline_mode = #tpu.pipeline_mode<synchronous>, transform_indices = @transform_4, window_bounds = array<i64: 1, 192>}, {pipeline_mode = #tpu.pipeline_mode<synchronous>, transform_indices = @transform_5, window_bounds = array<i64: 64, 64>}, {pipeline_mode = #tpu.pipeline_mode<synchronous>, transform_indices = @transform_6, window_bounds = array<i64: 1, 64>}, {pipeline_mode = #tpu.pipeline_mode<synchronous>, transform_indices = @transform_7, window_bounds = array<i64: 1, 64>}, {pipeline_mode = #tpu.pipeline_mode<synchronous>, transform_indices = @transform_8, window_bounds = array<i64: 1, 64>}, {pipeline_mode = #tpu.pipeline_mode<synchronous>, transform_indices = @transform_9, window_bounds = array<i64: 64, 128>}, {pipeline_mode = #tpu.pipeline_mode<synchronous>, transform_indices = @transform_10, window_bounds = array<i64: 1, 128>}, {pipeline_mode = #tpu.pipeline_mode<synchronous>, transform_indices = @transform_11, window_bounds = array<i64: 128, 64>}, {pipeline_mode = #tpu.pipeline_mode<synchronous>, transform_indices = @transform_12, window_bounds = array<i64: 1, 64>}, {pipeline_mode = #tpu.pipeline_mode<synchronous>, transform_indices = @transform_13, window_bounds = array<i64: 1, 64>}, {pipeline_mode = #tpu.pipeline_mode<synchronous>, transform_indices = @transform_14, window_bounds = array<i64: 1, 64>}, {transform_indices = @transform_15, window_bounds = array<i64: 8, 64>}]} {
    %c0 = arith.constant 0 : index
    %c0_0 = arith.constant 0 : index
    %0 = vector.load %arg1[%c0, %c0_0] : memref<8x64xf32, #tpu.memory_space<vmem>>, vector<8x64xf32>
    %c0_1 = arith.constant 0 : index
    %c0_2 = arith.constant 0 : index
    %1 = vector.load %arg2[%c0_1, %c0_2] : memref<8x8xf32, #tpu.memory_space<vmem>>, vector<8x8xf32>
    %2 = arith.index_cast %arg0 : i32 to index
    %c0_3 = arith.constant 0 : index
    %3 = vector.load %arg3[%2, %c0_3] : memref<2x8xf32, #tpu.memory_space<vmem>>, vector<1x8xf32>
    %4 = vector.broadcast %3 : vector<1x8xf32> to vector<8x8xf32>
    %5 = arith.addf %1, %4 : vector<8x8xf32>
    %6 = arith.truncf %0 : vector<8x64xf32> to vector<8x64xbf16>
    %c0_4 = arith.constant 0 : index
    %c0_5 = arith.constant 0 : index
    %7 = vector.load %arg4[%c0_4, %c0_5] : memref<64x192xbf16, #tpu.memory_space<vmem>>, vector<64x192xbf16>
    %cst = arith.constant dense<0.000000e+00> : vector<8x192xf32>
    %8 = tpu.matmul %6, %7, %cst {dimension_numbers = #tpu.dot_dimension_numbers<[1], [0], [0], [1], [0, 0, 1, 1], [], []>} : vector<8x64xbf16>, vector<64x192xbf16>, vector<8x192xf32> -> vector<8x192xf32>
    %c0_6 = arith.constant 0 : index
    %c0_7 = arith.constant 0 : index
    %9 = vector.load %arg5[%c0_6, %c0_7] : memref<1x192xf32, #tpu.memory_space<vmem>>, vector<1x192xf32>
    %10 = vector.broadcast %9 : vector<1x192xf32> to vector<8x192xf32>
    %11 = arith.addf %8, %10 : vector<8x192xf32>
    %12 = vector.extract_strided_slice %11 {offsets = [0, 0], sizes = [8, 64], strides = [1, 1]} : vector<8x192xf32> to vector<8x64xf32>
    %13 = vector.extract_strided_slice %11 {offsets = [0, 64], sizes = [8, 64], strides = [1, 1]} : vector<8x192xf32> to vector<8x64xf32>
    %14 = vector.extract_strided_slice %11 {offsets = [0, 128], sizes = [8, 64], strides = [1, 1]} : vector<8x192xf32> to vector<8x64xf32>
    %15 = vector.shape_cast %12 : vector<8x64xf32> to vector<8x8x8xf32>
    %16 = tpu.transpose %15, [1, 0, 2] : vector<8x8x8xf32> -> vector<8x8x8xf32>
    %17 = arith.truncf %16 : vector<8x8x8xf32> to vector<8x8x8xbf16>
    %18 = vector.shape_cast %13 : vector<8x64xf32> to vector<8x8x8xf32>
    %19 = tpu.transpose %18, [1, 0, 2] : vector<8x8x8xf32> -> vector<8x8x8xf32>
    %20 = arith.truncf %19 : vector<8x8x8xf32> to vector<8x8x8xbf16>
    %21 = vector.shape_cast %14 : vector<8x64xf32> to vector<8x8x8xf32>
    %22 = tpu.transpose %21, [1, 0, 2] : vector<8x8x8xf32> -> vector<8x8x8xf32>
    %23 = arith.truncf %22 : vector<8x8x8xf32> to vector<8x8x8xbf16>
    "tpu.trace_start"() <{level = 10 : i32, message = "hqd,hkd->hqk"}> : () -> ()
    %cst_8 = arith.constant dense<0.000000e+00> : vector<8x8x8xf32>
    %24 = tpu.matmul %17, %20, %cst_8 {dimension_numbers = #tpu.dot_dimension_numbers<[2], [2], [1], [1], [0, 0, 0, 1, 1, 1], [0], [0]>} : vector<8x8x8xbf16>, vector<8x8x8xbf16>, vector<8x8x8xf32> -> vector<8x8x8xf32>
    "tpu.trace_stop"() : () -> ()
    %cst_9 = arith.constant 0.353553385 : f32
    %25 = vector.broadcast %cst_9 : f32 to vector<8x8x8xf32>
    %26 = arith.mulf %24, %25 : vector<8x8x8xf32>
    %27 = vector.shape_cast %5 : vector<8x8xf32> to vector<1x8x8xf32>
    %28 = vector.broadcast %27 : vector<1x8x8xf32> to vector<8x8x8xf32>
    %29 = arith.addf %26, %28 : vector<8x8x8xf32>
    %cst_10 = arith.constant dense<0xFF800000> : vector<8x8xf32>
    %30 = vector.multi_reduction <maximumf>, %29, %cst_10 [2] : vector<8x8x8xf32> to vector<8x8xf32>
    %31 = vector.shape_cast %30 : vector<8x8xf32> to vector<8x8x1xf32>
    %32 = vector.broadcast %31 : vector<8x8x1xf32> to vector<8x8x8xf32>
    %33 = arith.subf %29, %32 : vector<8x8x8xf32>
    %34 = math.exp %33 : vector<8x8x8xf32>
    %cst_11 = arith.constant dense<0.000000e+00> : vector<8x8xf32>
    %35 = vector.multi_reduction <add>, %34, %cst_11 [2] : vector<8x8x8xf32> to vector<8x8xf32>
    %36 = vector.shape_cast %35 : vector<8x8xf32> to vector<8x8x1xf32>
    %37 = tpu.reciprocal %36 {approx = true} : vector<8x8x1xf32> -> vector<8x8x1xf32>
    %38 = vector.broadcast %37 : vector<8x8x1xf32> to vector<8x8x8xf32>
    %39 = arith.mulf %34, %38 : vector<8x8x8xf32>
    %40 = arith.truncf %39 : vector<8x8x8xf32> to vector<8x8x8xbf16>
    "tpu.trace_start"() <{level = 10 : i32, message = "hqk,hkd->hqd"}> : () -> ()
    %cst_12 = arith.constant dense<0.000000e+00> : vector<8x8x8xf32>
    %41 = tpu.matmul %40, %23, %cst_12 {dimension_numbers = #tpu.dot_dimension_numbers<[2], [1], [1], [2], [0, 0, 0, 1, 1, 2], [0], [0]>} : vector<8x8x8xbf16>, vector<8x8x8xbf16>, vector<8x8x8xf32> -> vector<8x8x8xf32>
    "tpu.trace_stop"() : () -> ()
    %42 = tpu.transpose %41, [1, 0, 2] : vector<8x8x8xf32> -> vector<8x8x8xf32>
    %43 = vector.shape_cast %42 : vector<8x8x8xf32> to vector<8x64xf32>
    %44 = arith.truncf %43 : vector<8x64xf32> to vector<8x64xbf16>
    %c0_13 = arith.constant 0 : index
    %c0_14 = arith.constant 0 : index
    %45 = vector.load %arg6[%c0_13, %c0_14] : memref<64x64xbf16, #tpu.memory_space<vmem>>, vector<64x64xbf16>
    %cst_15 = arith.constant dense<0.000000e+00> : vector<8x64xf32>
    %46 = tpu.matmul %44, %45, %cst_15 {dimension_numbers = #tpu.dot_dimension_numbers<[1], [0], [0], [1], [0, 0, 1, 1], [], []>} : vector<8x64xbf16>, vector<64x64xbf16>, vector<8x64xf32> -> vector<8x64xf32>
    %c0_16 = arith.constant 0 : index
    %c0_17 = arith.constant 0 : index
    %47 = vector.load %arg7[%c0_16, %c0_17] : memref<1x64xf32, #tpu.memory_space<vmem>>, vector<1x64xf32>
    %48 = vector.broadcast %47 : vector<1x64xf32> to vector<8x64xf32>
    %49 = arith.addf %46, %48 : vector<8x64xf32>
    %50 = arith.addf %0, %49 : vector<8x64xf32>
    %c0_18 = arith.constant 0 : index
    %c0_19 = arith.constant 0 : index
    %51 = vector.load %arg8[%c0_18, %c0_19] : memref<1x64xf32, #tpu.memory_space<vmem>>, vector<1x64xf32>
    %c0_20 = arith.constant 0 : index
    %c0_21 = arith.constant 0 : index
    %52 = vector.load %arg9[%c0_20, %c0_21] : memref<1x64xf32, #tpu.memory_space<vmem>>, vector<1x64xf32>
    %cst_22 = arith.constant dense<0.000000e+00> : vector<8xf32>
    %53 = vector.multi_reduction <add>, %50, %cst_22 [1] : vector<8x64xf32> to vector<8xf32>
    %54 = vector.shape_cast %53 : vector<8xf32> to vector<8x1xf32>
    %cst_23 = arith.constant 6.400000e+01 : f32
    %55 = vector.broadcast %cst_23 : f32 to vector<8x1xf32>
    %56 = arith.divf %54, %55 : vector<8x1xf32>
    %57 = vector.broadcast %56 : vector<8x1xf32> to vector<8x64xf32>
    %58 = arith.subf %50, %57 : vector<8x64xf32>
    %59 = arith.mulf %58, %58 : vector<8x64xf32>
    %cst_24 = arith.constant dense<0.000000e+00> : vector<8xf32>
    %60 = vector.multi_reduction <add>, %59, %cst_24 [1] : vector<8x64xf32> to vector<8xf32>
    %61 = vector.shape_cast %60 : vector<8xf32> to vector<8x1xf32>
    %cst_25 = arith.constant 6.400000e+01 : f32
    %62 = vector.broadcast %cst_25 : f32 to vector<8x1xf32>
    %63 = arith.divf %61, %62 : vector<8x1xf32>
    %64 = vector.broadcast %56 : vector<8x1xf32> to vector<8x64xf32>
    %65 = arith.subf %50, %64 : vector<8x64xf32>
    %cst_26 = arith.constant 9.99999974E-6 : f32
    %66 = vector.broadcast %cst_26 : f32 to vector<8x1xf32>
    %67 = arith.addf %63, %66 : vector<8x1xf32>
    %68 = math.rsqrt %67 : vector<8x1xf32>
    %69 = vector.broadcast %68 : vector<8x1xf32> to vector<8x64xf32>
    %70 = arith.mulf %65, %69 : vector<8x64xf32>
    %71 = vector.broadcast %51 : vector<1x64xf32> to vector<8x64xf32>
    %72 = arith.mulf %70, %71 : vector<8x64xf32>
    %73 = vector.broadcast %52 : vector<1x64xf32> to vector<8x64xf32>
    %74 = arith.addf %72, %73 : vector<8x64xf32>
    %75 = arith.truncf %74 : vector<8x64xf32> to vector<8x64xbf16>
    %c0_27 = arith.constant 0 : index
    %c0_28 = arith.constant 0 : index
    %76 = vector.load %arg10[%c0_27, %c0_28] : memref<64x128xbf16, #tpu.memory_space<vmem>>, vector<64x128xbf16>
    %cst_29 = arith.constant dense<0.000000e+00> : vector<8x128xf32>
    %77 = tpu.matmul %75, %76, %cst_29 {dimension_numbers = #tpu.dot_dimension_numbers<[1], [0], [0], [1], [0, 0, 1, 1], [], []>} : vector<8x64xbf16>, vector<64x128xbf16>, vector<8x128xf32> -> vector<8x128xf32>
    %c0_30 = arith.constant 0 : index
    %c0_31 = arith.constant 0 : index
    %78 = vector.load %arg11[%c0_30, %c0_31] : memref<1x128xf32, #tpu.memory_space<vmem>>, vector<1x128xf32>
    %79 = vector.broadcast %78 : vector<1x128xf32> to vector<8x128xf32>
    %80 = arith.addf %77, %79 : vector<8x128xf32>
    %cst_32 = arith.constant 0.000000e+00 : f32
    %81 = vector.broadcast %cst_32 : f32 to vector<8x128xf32>
    %82 = arith.maximumf %80, %81 : vector<8x128xf32>
    %83 = arith.truncf %82 : vector<8x128xf32> to vector<8x128xbf16>
    %c0_33 = arith.constant 0 : index
    %c0_34 = arith.constant 0 : index
    %84 = vector.load %arg12[%c0_33, %c0_34] : memref<128x64xbf16, #tpu.memory_space<vmem>>, vector<128x64xbf16>
    %cst_35 = arith.constant dense<0.000000e+00> : vector<8x64xf32>
    %85 = tpu.matmul %83, %84, %cst_35 {dimension_numbers = #tpu.dot_dimension_numbers<[1], [0], [0], [1], [0, 0, 1, 1], [], []>} : vector<8x128xbf16>, vector<128x64xbf16>, vector<8x64xf32> -> vector<8x64xf32>
    %c0_36 = arith.constant 0 : index
    %c0_37 = arith.constant 0 : index
    %86 = vector.load %arg13[%c0_36, %c0_37] : memref<1x64xf32, #tpu.memory_space<vmem>>, vector<1x64xf32>
    %87 = vector.broadcast %86 : vector<1x64xf32> to vector<8x64xf32>
    %88 = arith.addf %85, %87 : vector<8x64xf32>
    %89 = arith.addf %74, %88 : vector<8x64xf32>
    %c0_38 = arith.constant 0 : index
    %c0_39 = arith.constant 0 : index
    %90 = vector.load %arg14[%c0_38, %c0_39] : memref<1x64xf32, #tpu.memory_space<vmem>>, vector<1x64xf32>
    %c0_40 = arith.constant 0 : index
    %c0_41 = arith.constant 0 : index
    %91 = vector.load %arg15[%c0_40, %c0_41] : memref<1x64xf32, #tpu.memory_space<vmem>>, vector<1x64xf32>
    %cst_42 = arith.constant dense<0.000000e+00> : vector<8xf32>
    %92 = vector.multi_reduction <add>, %89, %cst_42 [1] : vector<8x64xf32> to vector<8xf32>
    %93 = vector.shape_cast %92 : vector<8xf32> to vector<8x1xf32>
    %cst_43 = arith.constant 6.400000e+01 : f32
    %94 = vector.broadcast %cst_43 : f32 to vector<8x1xf32>
    %95 = arith.divf %93, %94 : vector<8x1xf32>
    %96 = vector.broadcast %95 : vector<8x1xf32> to vector<8x64xf32>
    %97 = arith.subf %89, %96 : vector<8x64xf32>
    %98 = arith.mulf %97, %97 : vector<8x64xf32>
    %cst_44 = arith.constant dense<0.000000e+00> : vector<8xf32>
    %99 = vector.multi_reduction <add>, %98, %cst_44 [1] : vector<8x64xf32> to vector<8xf32>
    %100 = vector.shape_cast %99 : vector<8xf32> to vector<8x1xf32>
    %cst_45 = arith.constant 6.400000e+01 : f32
    %101 = vector.broadcast %cst_45 : f32 to vector<8x1xf32>
    %102 = arith.divf %100, %101 : vector<8x1xf32>
    %103 = vector.broadcast %95 : vector<8x1xf32> to vector<8x64xf32>
    %104 = arith.subf %89, %103 : vector<8x64xf32>
    %cst_46 = arith.constant 9.99999974E-6 : f32
    %105 = vector.broadcast %cst_46 : f32 to vector<8x1xf32>
    %106 = arith.addf %102, %105 : vector<8x1xf32>
    %107 = math.rsqrt %106 : vector<8x1xf32>
    %108 = vector.broadcast %107 : vector<8x1xf32> to vector<8x64xf32>
    %109 = arith.mulf %104, %108 : vector<8x64xf32>
    %110 = vector.broadcast %90 : vector<1x64xf32> to vector<8x64xf32>
    %111 = arith.mulf %109, %110 : vector<8x64xf32>
    %112 = vector.broadcast %91 : vector<1x64xf32> to vector<8x64xf32>
    %113 = arith.addf %111, %112 : vector<8x64xf32>
    %c0_47 = arith.constant 0 : index
    %c0_48 = arith.constant 0 : index
    %114 = vector.load %arg16[%c0_47, %c0_48] : memref<8x64xf32, #tpu.memory_space<vmem>>, vector<8x64xf32>
    tpu.vector_store %arg16[%c0_47, %c0_48], %113 {strides = array<i32>} : memref<8x64xf32, #tpu.memory_space<vmem>>, vector<8x64xf32>,
    return
  }
  func.func @transform_0(%arg0: i32) -> (i32, i32) {
    %c0_i32 = arith.constant 0 : i32
    %c0_i32_0 = arith.constant 0 : i32
    return %arg0, %c0_i32 : i32, i32
  }
  func.func @transform_1(%arg0: i32) -> (i32, i32) {
    %c0_i32 = arith.constant 0 : i32
    %c0_i32_0 = arith.constant 0 : i32
    %c0_i32_1 = arith.constant 0 : i32
    return %c0_i32, %c0_i32_0 : i32, i32
  }
  func.func @transform_2(%arg0: i32) -> (i32, i32) {
    %c0_i32 = arith.constant 0 : i32
    %c0_i32_0 = arith.constant 0 : i32
    %c0_i32_1 = arith.constant 0 : i32
    return %c0_i32, %c0_i32_0 : i32, i32
  }
  func.func @transform_3(%arg0: i32) -> (i32, i32) {
    %c0_i32 = arith.constant 0 : i32
    %c0_i32_0 = arith.constant 0 : i32
    %c0_i32_1 = arith.constant 0 : i32
    return %c0_i32, %c0_i32_0 : i32, i32
  }
  func.func @transform_4(%arg0: i32) -> (i32, i32) {
    %c0_i32 = arith.constant 0 : i32
    %c0_i32_0 = arith.constant 0 : i32
    %c0_i32_1 = arith.constant 0 : i32
    return %c0_i32, %c0_i32_0 : i32, i32
  }
  func.func @transform_5(%arg0: i32) -> (i32, i32) {
    %c0_i32 = arith.constant 0 : i32
    %c0_i32_0 = arith.constant 0 : i32
    %c0_i32_1 = arith.constant 0 : i32
    return %c0_i32, %c0_i32_0 : i32, i32
  }
  func.func @transform_6(%arg0: i32) -> (i32, i32) {
    %c0_i32 = arith.constant 0 : i32
    %c0_i32_0 = arith.constant 0 : i32
    %c0_i32_1 = arith.constant 0 : i32
    return %c0_i32, %c0_i32_0 : i32, i32
  }
  func.func @transform_7(%arg0: i32) -> (i32, i32) {
    %c0_i32 = arith.constant 0 : i32
    %c0_i32_0 = arith.constant 0 : i32
    %c0_i32_1 = arith.constant 0 : i32
    return %c0_i32, %c0_i32_0 : i32, i32
  }
  func.func @transform_8(%arg0: i32) -> (i32, i32) {
    %c0_i32 = arith.constant 0 : i32
    %c0_i32_0 = arith.constant 0 : i32
    %c0_i32_1 = arith.constant 0 : i32
    return %c0_i32, %c0_i32_0 : i32, i32
  }
  func.func @transform_9(%arg0: i32) -> (i32, i32) {
    %c0_i32 = arith.constant 0 : i32
    %c0_i32_0 = arith.constant 0 : i32
    %c0_i32_1 = arith.constant 0 : i32
    return %c0_i32, %c0_i32_0 : i32, i32
  }
  func.func @transform_10(%arg0: i32) -> (i32, i32) {
    %c0_i32 = arith.constant 0 : i32
    %c0_i32_0 = arith.constant 0 : i32
    %c0_i32_1 = arith.constant 0 : i32
    return %c0_i32, %c0_i32_0 : i32, i32
  }
  func.func @transform_11(%arg0: i32) -> (i32, i32) {
    %c0_i32 = arith.constant 0 : i32
    %c0_i32_0 = arith.constant 0 : i32
    %c0_i32_1 = arith.constant 0 : i32
    return %c0_i32, %c0_i32_0 : i32, i32
  }
  func.func @transform_12(%arg0: i32) -> (i32, i32) {
    %c0_i32 = arith.constant 0 : i32
    %c0_i32_0 = arith.constant 0 : i32
    %c0_i32_1 = arith.constant 0 : i32
    return %c0_i32, %c0_i32_0 : i32, i32
  }
  func.func @transform_13(%arg0: i32) -> (i32, i32) {
    %c0_i32 = arith.constant 0 : i32
    %c0_i32_0 = arith.constant 0 : i32
    %c0_i32_1 = arith.constant 0 : i32
    return %c0_i32, %c0_i32_0 : i32, i32
  }
  func.func @transform_14(%arg0: i32) -> (i32, i32) {
    %c0_i32 = arith.constant 0 : i32
    %c0_i32_0 = arith.constant 0 : i32
    %c0_i32_1 = arith.constant 0 : i32
    return %c0_i32, %c0_i32_0 : i32, i32
  }
  func.func @transform_15(%arg0: i32) -> (i32, i32) {
    %c0_i32 = arith.constant 0 : i32
    %c0_i32_0 = arith.constant 0 : i32
    return %arg0, %c0_i32 : i32, i32
  }
}

module attributes {stable_mosaic.version = 11 : i64} {
  func.func @_decoder_layer_kernel(%arg0: i32, %arg1: memref<8x64xf32, #tpu.memory_space<vmem>>, %arg2: memref<8x64xf32, #tpu.memory_space<vmem>>, %arg3: memref<8x8xf32, #tpu.memory_space<vmem>>, %arg4: memref<2x8xf32, #tpu.memory_space<vmem>>, %arg5: memref<2x8xf32, #tpu.memory_space<vmem>>, %arg6: memref<64x192xbf16, #tpu.memory_space<vmem>>, %arg7: memref<1x192xf32, #tpu.memory_space<vmem>>, %arg8: memref<64x64xbf16, #tpu.memory_space<vmem>>, %arg9: memref<1x64xf32, #tpu.memory_space<vmem>>, %arg10: memref<1x64xf32, #tpu.memory_space<vmem>>, %arg11: memref<1x64xf32, #tpu.memory_space<vmem>>, %arg12: memref<64x64xbf16, #tpu.memory_space<vmem>>, %arg13: memref<1x64xf32, #tpu.memory_space<vmem>>, %arg14: memref<64x128xbf16, #tpu.memory_space<vmem>>, %arg15: memref<1x128xf32, #tpu.memory_space<vmem>>, %arg16: memref<64x64xbf16, #tpu.memory_space<vmem>>, %arg17: memref<1x64xf32, #tpu.memory_space<vmem>>, %arg18: memref<1x64xf32, #tpu.memory_space<vmem>>, %arg19: memref<1x64xf32, #tpu.memory_space<vmem>>, %arg20: memref<64x128xbf16, #tpu.memory_space<vmem>>, %arg21: memref<1x128xf32, #tpu.memory_space<vmem>>, %arg22: memref<128x64xbf16, #tpu.memory_space<vmem>>, %arg23: memref<1x64xf32, #tpu.memory_space<vmem>>, %arg24: memref<1x64xf32, #tpu.memory_space<vmem>>, %arg25: memref<1x64xf32, #tpu.memory_space<vmem>>, %arg26: memref<64x128xbf16, #tpu.memory_space<vmem>>, %arg27: memref<1x128xf32, #tpu.memory_space<vmem>>, %arg28: memref<8x128xf32, #tpu.memory_space<vmem>>) attributes {dimension_semantics = [#tpu.dimension_semantics<parallel>], iteration_bounds = array<i64: 2>, scalar_prefetch = 0 : i64, scratch_operands = 0 : i64, tpu.core_type = #tpu.core_type<tc>, window_params = [{transform_indices = @transform_0, window_bounds = array<i64: 8, 64>}, {transform_indices = @transform_1, window_bounds = array<i64: 8, 64>}, {pipeline_mode = #tpu.pipeline_mode<synchronous>, transform_indices = @transform_2, window_bounds = array<i64: 8, 8>}, {pipeline_mode = #tpu.pipeline_mode<synchronous>, transform_indices = @transform_3, window_bounds = array<i64: 2, 8>}, {pipeline_mode = #tpu.pipeline_mode<synchronous>, transform_indices = @transform_4, window_bounds = array<i64: 2, 8>}, {pipeline_mode = #tpu.pipeline_mode<synchronous>, transform_indices = @transform_5, window_bounds = array<i64: 64, 192>}, {pipeline_mode = #tpu.pipeline_mode<synchronous>, transform_indices = @transform_6, window_bounds = array<i64: 1, 192>}, {pipeline_mode = #tpu.pipeline_mode<synchronous>, transform_indices = @transform_7, window_bounds = array<i64: 64, 64>}, {pipeline_mode = #tpu.pipeline_mode<synchronous>, transform_indices = @transform_8, window_bounds = array<i64: 1, 64>}, {pipeline_mode = #tpu.pipeline_mode<synchronous>, transform_indices = @transform_9, window_bounds = array<i64: 1, 64>}, {pipeline_mode = #tpu.pipeline_mode<synchronous>, transform_indices = @transform_10, window_bounds = array<i64: 1, 64>}, {pipeline_mode = #tpu.pipeline_mode<synchronous>, transform_indices = @transform_11, window_bounds = array<i64: 64, 64>}, {pipeline_mode = #tpu.pipeline_mode<synchronous>, transform_indices = @transform_12, window_bounds = array<i64: 1, 64>}, {pipeline_mode = #tpu.pipeline_mode<synchronous>, transform_indices = @transform_13, window_bounds = array<i64: 64, 128>}, {pipeline_mode = #tpu.pipeline_mode<synchronous>, transform_indices = @transform_14, window_bounds = array<i64: 1, 128>}, {pipeline_mode = #tpu.pipeline_mode<synchronous>, transform_indices = @transform_15, window_bounds = array<i64: 64, 64>}, {pipeline_mode = #tpu.pipeline_mode<synchronous>, transform_indices = @transform_16, window_bounds = array<i64: 1, 64>}, {pipeline_mode = #tpu.pipeline_mode<synchronous>, transform_indices = @transform_17, window_bounds = array<i64: 1, 64>}, {pipeline_mode = #tpu.pipeline_mode<synchronous>, transform_indices = @transform_18, window_bounds = array<i64: 1, 64>}, {pipeline_mode = #tpu.pipeline_mode<synchronous>, transform_indices = @transform_19, window_bounds = array<i64: 64, 128>}, {pipeline_mode = #tpu.pipeline_mode<synchronous>, transform_indices = @transform_20, window_bounds = array<i64: 1, 128>}, {pipeline_mode = #tpu.pipeline_mode<synchronous>, transform_indices = @transform_21, window_bounds = array<i64: 128, 64>}, {pipeline_mode = #tpu.pipeline_mode<synchronous>, transform_indices = @transform_22, window_bounds = array<i64: 1, 64>}, {pipeline_mode = #tpu.pipeline_mode<synchronous>, transform_indices = @transform_23, window_bounds = array<i64: 1, 64>}, {pipeline_mode = #tpu.pipeline_mode<synchronous>, transform_indices = @transform_24, window_bounds = array<i64: 1, 64>}, {pipeline_mode = #tpu.pipeline_mode<synchronous>, transform_indices = @transform_25, window_bounds = array<i64: 64, 128>}, {pipeline_mode = #tpu.pipeline_mode<synchronous>, transform_indices = @transform_26, window_bounds = array<i64: 1, 128>}, {transform_indices = @transform_27, window_bounds = array<i64: 8, 128>}]} {
    %c0 = arith.constant 0 : index
    %c0_0 = arith.constant 0 : index
    %0 = vector.load %arg1[%c0, %c0_0] : memref<8x64xf32, #tpu.memory_space<vmem>>, vector<8x64xf32>
    %c0_1 = arith.constant 0 : index
    %c0_2 = arith.constant 0 : index
    %1 = vector.load %arg2[%c0_1, %c0_2] : memref<8x64xf32, #tpu.memory_space<vmem>>, vector<8x64xf32>
    %c0_3 = arith.constant 0 : index
    %c0_4 = arith.constant 0 : index
    %2 = vector.load %arg3[%c0_3, %c0_4] : memref<8x8xf32, #tpu.memory_space<vmem>>, vector<8x8xf32>
    %3 = arith.index_cast %arg0 : i32 to index
    %c0_5 = arith.constant 0 : index
    %4 = vector.load %arg4[%3, %c0_5] : memref<2x8xf32, #tpu.memory_space<vmem>>, vector<1x8xf32>
    %5 = vector.broadcast %4 : vector<1x8xf32> to vector<8x8xf32>
    %6 = arith.addf %2, %5 : vector<8x8xf32>
    %7 = arith.truncf %0 : vector<8x64xf32> to vector<8x64xbf16>
    %c0_6 = arith.constant 0 : index
    %c0_7 = arith.constant 0 : index
    %8 = vector.load %arg6[%c0_6, %c0_7] : memref<64x192xbf16, #tpu.memory_space<vmem>>, vector<64x192xbf16>
    %cst = arith.constant dense<0.000000e+00> : vector<8x192xf32>
    %9 = tpu.matmul %7, %8, %cst {dimension_numbers = #tpu.dot_dimension_numbers<[1], [0], [0], [1], [0, 0, 1, 1], [], []>} : vector<8x64xbf16>, vector<64x192xbf16>, vector<8x192xf32> -> vector<8x192xf32>
    %c0_8 = arith.constant 0 : index
    %c0_9 = arith.constant 0 : index
    %10 = vector.load %arg7[%c0_8, %c0_9] : memref<1x192xf32, #tpu.memory_space<vmem>>, vector<1x192xf32>
    %11 = vector.broadcast %10 : vector<1x192xf32> to vector<8x192xf32>
    %12 = arith.addf %9, %11 : vector<8x192xf32>
    %13 = vector.extract_strided_slice %12 {offsets = [0, 0], sizes = [8, 64], strides = [1, 1]} : vector<8x192xf32> to vector<8x64xf32>
    %14 = vector.extract_strided_slice %12 {offsets = [0, 64], sizes = [8, 64], strides = [1, 1]} : vector<8x192xf32> to vector<8x64xf32>
    %15 = vector.extract_strided_slice %12 {offsets = [0, 128], sizes = [8, 64], strides = [1, 1]} : vector<8x192xf32> to vector<8x64xf32>
    %16 = vector.shape_cast %13 : vector<8x64xf32> to vector<8x8x8xf32>
    %17 = tpu.transpose %16, [1, 0, 2] : vector<8x8x8xf32> -> vector<8x8x8xf32>
    %18 = arith.truncf %17 : vector<8x8x8xf32> to vector<8x8x8xbf16>
    %19 = vector.shape_cast %14 : vector<8x64xf32> to vector<8x8x8xf32>
    %20 = tpu.transpose %19, [1, 0, 2] : vector<8x8x8xf32> -> vector<8x8x8xf32>
    %21 = arith.truncf %20 : vector<8x8x8xf32> to vector<8x8x8xbf16>
    %22 = vector.shape_cast %15 : vector<8x64xf32> to vector<8x8x8xf32>
    %23 = tpu.transpose %22, [1, 0, 2] : vector<8x8x8xf32> -> vector<8x8x8xf32>
    %24 = arith.truncf %23 : vector<8x8x8xf32> to vector<8x8x8xbf16>
    "tpu.trace_start"() <{level = 10 : i32, message = "hqd,hkd->hqk"}> : () -> ()
    %cst_10 = arith.constant dense<0.000000e+00> : vector<8x8x8xf32>
    %25 = tpu.matmul %18, %21, %cst_10 {dimension_numbers = #tpu.dot_dimension_numbers<[2], [2], [1], [1], [0, 0, 0, 1, 1, 1], [0], [0]>} : vector<8x8x8xbf16>, vector<8x8x8xbf16>, vector<8x8x8xf32> -> vector<8x8x8xf32>
    "tpu.trace_stop"() : () -> ()
    %cst_11 = arith.constant 0.353553385 : f32
    %26 = vector.broadcast %cst_11 : f32 to vector<8x8x8xf32>
    %27 = arith.mulf %25, %26 : vector<8x8x8xf32>
    %28 = vector.shape_cast %6 : vector<8x8xf32> to vector<1x8x8xf32>
    %29 = vector.broadcast %28 : vector<1x8x8xf32> to vector<8x8x8xf32>
    %30 = arith.addf %27, %29 : vector<8x8x8xf32>
    %cst_12 = arith.constant dense<0xFF800000> : vector<8x8xf32>
    %31 = vector.multi_reduction <maximumf>, %30, %cst_12 [2] : vector<8x8x8xf32> to vector<8x8xf32>
    %32 = vector.shape_cast %31 : vector<8x8xf32> to vector<8x8x1xf32>
    %33 = vector.broadcast %32 : vector<8x8x1xf32> to vector<8x8x8xf32>
    %34 = arith.subf %30, %33 : vector<8x8x8xf32>
    %35 = math.exp %34 : vector<8x8x8xf32>
    %cst_13 = arith.constant dense<0.000000e+00> : vector<8x8xf32>
    %36 = vector.multi_reduction <add>, %35, %cst_13 [2] : vector<8x8x8xf32> to vector<8x8xf32>
    %37 = vector.shape_cast %36 : vector<8x8xf32> to vector<8x8x1xf32>
    %38 = tpu.reciprocal %37 {approx = true} : vector<8x8x1xf32> -> vector<8x8x1xf32>
    %39 = vector.broadcast %38 : vector<8x8x1xf32> to vector<8x8x8xf32>
    %40 = arith.mulf %35, %39 : vector<8x8x8xf32>
    %41 = arith.truncf %40 : vector<8x8x8xf32> to vector<8x8x8xbf16>
    "tpu.trace_start"() <{level = 10 : i32, message = "hqk,hkd->hqd"}> : () -> ()
    %cst_14 = arith.constant dense<0.000000e+00> : vector<8x8x8xf32>
    %42 = tpu.matmul %41, %24, %cst_14 {dimension_numbers = #tpu.dot_dimension_numbers<[2], [1], [1], [2], [0, 0, 0, 1, 1, 2], [0], [0]>} : vector<8x8x8xbf16>, vector<8x8x8xbf16>, vector<8x8x8xf32> -> vector<8x8x8xf32>
    "tpu.trace_stop"() : () -> ()
    %43 = tpu.transpose %42, [1, 0, 2] : vector<8x8x8xf32> -> vector<8x8x8xf32>
    %44 = vector.shape_cast %43 : vector<8x8x8xf32> to vector<8x64xf32>
    %45 = arith.truncf %44 : vector<8x64xf32> to vector<8x64xbf16>
    %c0_15 = arith.constant 0 : index
    %c0_16 = arith.constant 0 : index
    %46 = vector.load %arg8[%c0_15, %c0_16] : memref<64x64xbf16, #tpu.memory_space<vmem>>, vector<64x64xbf16>
    %cst_17 = arith.constant dense<0.000000e+00> : vector<8x64xf32>
    %47 = tpu.matmul %45, %46, %cst_17 {dimension_numbers = #tpu.dot_dimension_numbers<[1], [0], [0], [1], [0, 0, 1, 1], [], []>} : vector<8x64xbf16>, vector<64x64xbf16>, vector<8x64xf32> -> vector<8x64xf32>
    %c0_18 = arith.constant 0 : index
    %c0_19 = arith.constant 0 : index
    %48 = vector.load %arg9[%c0_18, %c0_19] : memref<1x64xf32, #tpu.memory_space<vmem>>, vector<1x64xf32>
    %49 = vector.broadcast %48 : vector<1x64xf32> to vector<8x64xf32>
    %50 = arith.addf %47, %49 : vector<8x64xf32>
    %51 = arith.addf %0, %50 : vector<8x64xf32>
    %c0_20 = arith.constant 0 : index
    %c0_21 = arith.constant 0 : index
    %52 = vector.load %arg10[%c0_20, %c0_21] : memref<1x64xf32, #tpu.memory_space<vmem>>, vector<1x64xf32>
    %c0_22 = arith.constant 0 : index
    %c0_23 = arith.constant 0 : index
    %53 = vector.load %arg11[%c0_22, %c0_23] : memref<1x64xf32, #tpu.memory_space<vmem>>, vector<1x64xf32>
    %cst_24 = arith.constant dense<0.000000e+00> : vector<8xf32>
    %54 = vector.multi_reduction <add>, %51, %cst_24 [1] : vector<8x64xf32> to vector<8xf32>
    %55 = vector.shape_cast %54 : vector<8xf32> to vector<8x1xf32>
    %cst_25 = arith.constant 6.400000e+01 : f32
    %56 = vector.broadcast %cst_25 : f32 to vector<8x1xf32>
    %57 = arith.divf %55, %56 : vector<8x1xf32>
    %58 = vector.broadcast %57 : vector<8x1xf32> to vector<8x64xf32>
    %59 = arith.subf %51, %58 : vector<8x64xf32>
    %60 = arith.mulf %59, %59 : vector<8x64xf32>
    %cst_26 = arith.constant dense<0.000000e+00> : vector<8xf32>
    %61 = vector.multi_reduction <add>, %60, %cst_26 [1] : vector<8x64xf32> to vector<8xf32>
    %62 = vector.shape_cast %61 : vector<8xf32> to vector<8x1xf32>
    %cst_27 = arith.constant 6.400000e+01 : f32
    %63 = vector.broadcast %cst_27 : f32 to vector<8x1xf32>
    %64 = arith.divf %62, %63 : vector<8x1xf32>
    %65 = vector.broadcast %57 : vector<8x1xf32> to vector<8x64xf32>
    %66 = arith.subf %51, %65 : vector<8x64xf32>
    %cst_28 = arith.constant 9.99999974E-6 : f32
    %67 = vector.broadcast %cst_28 : f32 to vector<8x1xf32>
    %68 = arith.addf %64, %67 : vector<8x1xf32>
    %69 = math.rsqrt %68 : vector<8x1xf32>
    %70 = vector.broadcast %69 : vector<8x1xf32> to vector<8x64xf32>
    %71 = arith.mulf %66, %70 : vector<8x64xf32>
    %72 = vector.broadcast %52 : vector<1x64xf32> to vector<8x64xf32>
    %73 = arith.mulf %71, %72 : vector<8x64xf32>
    %74 = vector.broadcast %53 : vector<1x64xf32> to vector<8x64xf32>
    %75 = arith.addf %73, %74 : vector<8x64xf32>
    %76 = arith.index_cast %arg0 : i32 to index
    %c0_29 = arith.constant 0 : index
    %77 = vector.load %arg5[%76, %c0_29] : memref<2x8xf32, #tpu.memory_space<vmem>>, vector<1x8xf32>
    %78 = arith.truncf %75 : vector<8x64xf32> to vector<8x64xbf16>
    %c0_30 = arith.constant 0 : index
    %c0_31 = arith.constant 0 : index
    %79 = vector.load %arg12[%c0_30, %c0_31] : memref<64x64xbf16, #tpu.memory_space<vmem>>, vector<64x64xbf16>
    %cst_32 = arith.constant dense<0.000000e+00> : vector<8x64xf32>
    %80 = tpu.matmul %78, %79, %cst_32 {dimension_numbers = #tpu.dot_dimension_numbers<[1], [0], [0], [1], [0, 0, 1, 1], [], []>} : vector<8x64xbf16>, vector<64x64xbf16>, vector<8x64xf32> -> vector<8x64xf32>
    %c0_33 = arith.constant 0 : index
    %c0_34 = arith.constant 0 : index
    %81 = vector.load %arg13[%c0_33, %c0_34] : memref<1x64xf32, #tpu.memory_space<vmem>>, vector<1x64xf32>
    %82 = vector.broadcast %81 : vector<1x64xf32> to vector<8x64xf32>
    %83 = arith.addf %80, %82 : vector<8x64xf32>
    %84 = arith.truncf %1 : vector<8x64xf32> to vector<8x64xbf16>
    %c0_35 = arith.constant 0 : index
    %c0_36 = arith.constant 0 : index
    %85 = vector.load %arg14[%c0_35, %c0_36] : memref<64x128xbf16, #tpu.memory_space<vmem>>, vector<64x128xbf16>
    %cst_37 = arith.constant dense<0.000000e+00> : vector<8x128xf32>
    %86 = tpu.matmul %84, %85, %cst_37 {dimension_numbers = #tpu.dot_dimension_numbers<[1], [0], [0], [1], [0, 0, 1, 1], [], []>} : vector<8x64xbf16>, vector<64x128xbf16>, vector<8x128xf32> -> vector<8x128xf32>
    %c0_38 = arith.constant 0 : index
    %c0_39 = arith.constant 0 : index
    %87 = vector.load %arg15[%c0_38, %c0_39] : memref<1x128xf32, #tpu.memory_space<vmem>>, vector<1x128xf32>
    %88 = vector.broadcast %87 : vector<1x128xf32> to vector<8x128xf32>
    %89 = arith.addf %86, %88 : vector<8x128xf32>
    %90 = vector.extract_strided_slice %89 {offsets = [0, 0], sizes = [8, 64], strides = [1, 1]} : vector<8x128xf32> to vector<8x64xf32>
    %91 = vector.extract_strided_slice %89 {offsets = [0, 64], sizes = [8, 64], strides = [1, 1]} : vector<8x128xf32> to vector<8x64xf32>
    %92 = vector.shape_cast %83 : vector<8x64xf32> to vector<8x8x8xf32>
    %93 = tpu.transpose %92, [1, 0, 2] : vector<8x8x8xf32> -> vector<8x8x8xf32>
    %94 = arith.truncf %93 : vector<8x8x8xf32> to vector<8x8x8xbf16>
    %95 = vector.shape_cast %90 : vector<8x64xf32> to vector<8x8x8xf32>
    %96 = tpu.transpose %95, [1, 0, 2] : vector<8x8x8xf32> -> vector<8x8x8xf32>
    %97 = arith.truncf %96 : vector<8x8x8xf32> to vector<8x8x8xbf16>
    %98 = vector.shape_cast %91 : vector<8x64xf32> to vector<8x8x8xf32>
    %99 = tpu.transpose %98, [1, 0, 2] : vector<8x8x8xf32> -> vector<8x8x8xf32>
    %100 = arith.truncf %99 : vector<8x8x8xf32> to vector<8x8x8xbf16>
    "tpu.trace_start"() <{level = 10 : i32, message = "hqd,hkd->hqk"}> : () -> ()
    %cst_40 = arith.constant dense<0.000000e+00> : vector<8x8x8xf32>
    %101 = tpu.matmul %94, %97, %cst_40 {dimension_numbers = #tpu.dot_dimension_numbers<[2], [2], [1], [1], [0, 0, 0, 1, 1, 1], [0], [0]>} : vector<8x8x8xbf16>, vector<8x8x8xbf16>, vector<8x8x8xf32> -> vector<8x8x8xf32>
    "tpu.trace_stop"() : () -> ()
    %cst_41 = arith.constant 0.353553385 : f32
    %102 = vector.broadcast %cst_41 : f32 to vector<8x8x8xf32>
    %103 = arith.mulf %101, %102 : vector<8x8x8xf32>
    %104 = vector.shape_cast %77 : vector<1x8xf32> to vector<1x1x8xf32>
    %105 = vector.broadcast %104 : vector<1x1x8xf32> to vector<8x8x8xf32>
    %106 = arith.addf %103, %105 : vector<8x8x8xf32>
    %cst_42 = arith.constant dense<0xFF800000> : vector<8x8xf32>
    %107 = vector.multi_reduction <maximumf>, %106, %cst_42 [2] : vector<8x8x8xf32> to vector<8x8xf32>
    %108 = vector.shape_cast %107 : vector<8x8xf32> to vector<8x8x1xf32>
    %109 = vector.broadcast %108 : vector<8x8x1xf32> to vector<8x8x8xf32>
    %110 = arith.subf %106, %109 : vector<8x8x8xf32>
    %111 = math.exp %110 : vector<8x8x8xf32>
    %cst_43 = arith.constant dense<0.000000e+00> : vector<8x8xf32>
    %112 = vector.multi_reduction <add>, %111, %cst_43 [2] : vector<8x8x8xf32> to vector<8x8xf32>
    %113 = vector.shape_cast %112 : vector<8x8xf32> to vector<8x8x1xf32>
    %114 = tpu.reciprocal %113 {approx = true} : vector<8x8x1xf32> -> vector<8x8x1xf32>
    %115 = vector.broadcast %114 : vector<8x8x1xf32> to vector<8x8x8xf32>
    %116 = arith.mulf %111, %115 : vector<8x8x8xf32>
    %117 = arith.truncf %116 : vector<8x8x8xf32> to vector<8x8x8xbf16>
    "tpu.trace_start"() <{level = 10 : i32, message = "hqk,hkd->hqd"}> : () -> ()
    %cst_44 = arith.constant dense<0.000000e+00> : vector<8x8x8xf32>
    %118 = tpu.matmul %117, %100, %cst_44 {dimension_numbers = #tpu.dot_dimension_numbers<[2], [1], [1], [2], [0, 0, 0, 1, 1, 2], [0], [0]>} : vector<8x8x8xbf16>, vector<8x8x8xbf16>, vector<8x8x8xf32> -> vector<8x8x8xf32>
    "tpu.trace_stop"() : () -> ()
    %119 = tpu.transpose %118, [1, 0, 2] : vector<8x8x8xf32> -> vector<8x8x8xf32>
    %120 = vector.shape_cast %119 : vector<8x8x8xf32> to vector<8x64xf32>
    %121 = arith.truncf %120 : vector<8x64xf32> to vector<8x64xbf16>
    %c0_45 = arith.constant 0 : index
    %c0_46 = arith.constant 0 : index
    %122 = vector.load %arg16[%c0_45, %c0_46] : memref<64x64xbf16, #tpu.memory_space<vmem>>, vector<64x64xbf16>
    %cst_47 = arith.constant dense<0.000000e+00> : vector<8x64xf32>
    %123 = tpu.matmul %121, %122, %cst_47 {dimension_numbers = #tpu.dot_dimension_numbers<[1], [0], [0], [1], [0, 0, 1, 1], [], []>} : vector<8x64xbf16>, vector<64x64xbf16>, vector<8x64xf32> -> vector<8x64xf32>
    %c0_48 = arith.constant 0 : index
    %c0_49 = arith.constant 0 : index
    %124 = vector.load %arg17[%c0_48, %c0_49] : memref<1x64xf32, #tpu.memory_space<vmem>>, vector<1x64xf32>
    %125 = vector.broadcast %124 : vector<1x64xf32> to vector<8x64xf32>
    %126 = arith.addf %123, %125 : vector<8x64xf32>
    %127 = arith.addf %75, %126 : vector<8x64xf32>
    %c0_50 = arith.constant 0 : index
    %c0_51 = arith.constant 0 : index
    %128 = vector.load %arg18[%c0_50, %c0_51] : memref<1x64xf32, #tpu.memory_space<vmem>>, vector<1x64xf32>
    %c0_52 = arith.constant 0 : index
    %c0_53 = arith.constant 0 : index
    %129 = vector.load %arg19[%c0_52, %c0_53] : memref<1x64xf32, #tpu.memory_space<vmem>>, vector<1x64xf32>
    %cst_54 = arith.constant dense<0.000000e+00> : vector<8xf32>
    %130 = vector.multi_reduction <add>, %127, %cst_54 [1] : vector<8x64xf32> to vector<8xf32>
    %131 = vector.shape_cast %130 : vector<8xf32> to vector<8x1xf32>
    %cst_55 = arith.constant 6.400000e+01 : f32
    %132 = vector.broadcast %cst_55 : f32 to vector<8x1xf32>
    %133 = arith.divf %131, %132 : vector<8x1xf32>
    %134 = vector.broadcast %133 : vector<8x1xf32> to vector<8x64xf32>
    %135 = arith.subf %127, %134 : vector<8x64xf32>
    %136 = arith.mulf %135, %135 : vector<8x64xf32>
    %cst_56 = arith.constant dense<0.000000e+00> : vector<8xf32>
    %137 = vector.multi_reduction <add>, %136, %cst_56 [1] : vector<8x64xf32> to vector<8xf32>
    %138 = vector.shape_cast %137 : vector<8xf32> to vector<8x1xf32>
    %cst_57 = arith.constant 6.400000e+01 : f32
    %139 = vector.broadcast %cst_57 : f32 to vector<8x1xf32>
    %140 = arith.divf %138, %139 : vector<8x1xf32>
    %141 = vector.broadcast %133 : vector<8x1xf32> to vector<8x64xf32>
    %142 = arith.subf %127, %141 : vector<8x64xf32>
    %cst_58 = arith.constant 9.99999974E-6 : f32
    %143 = vector.broadcast %cst_58 : f32 to vector<8x1xf32>
    %144 = arith.addf %140, %143 : vector<8x1xf32>
    %145 = math.rsqrt %144 : vector<8x1xf32>
    %146 = vector.broadcast %145 : vector<8x1xf32> to vector<8x64xf32>
    %147 = arith.mulf %142, %146 : vector<8x64xf32>
    %148 = vector.broadcast %128 : vector<1x64xf32> to vector<8x64xf32>
    %149 = arith.mulf %147, %148 : vector<8x64xf32>
    %150 = vector.broadcast %129 : vector<1x64xf32> to vector<8x64xf32>
    %151 = arith.addf %149, %150 : vector<8x64xf32>
    %152 = arith.truncf %151 : vector<8x64xf32> to vector<8x64xbf16>
    %c0_59 = arith.constant 0 : index
    %c0_60 = arith.constant 0 : index
    %153 = vector.load %arg20[%c0_59, %c0_60] : memref<64x128xbf16, #tpu.memory_space<vmem>>, vector<64x128xbf16>
    %cst_61 = arith.constant dense<0.000000e+00> : vector<8x128xf32>
    %154 = tpu.matmul %152, %153, %cst_61 {dimension_numbers = #tpu.dot_dimension_numbers<[1], [0], [0], [1], [0, 0, 1, 1], [], []>} : vector<8x64xbf16>, vector<64x128xbf16>, vector<8x128xf32> -> vector<8x128xf32>
    %c0_62 = arith.constant 0 : index
    %c0_63 = arith.constant 0 : index
    %155 = vector.load %arg21[%c0_62, %c0_63] : memref<1x128xf32, #tpu.memory_space<vmem>>, vector<1x128xf32>
    %156 = vector.broadcast %155 : vector<1x128xf32> to vector<8x128xf32>
    %157 = arith.addf %154, %156 : vector<8x128xf32>
    %cst_64 = arith.constant 0.000000e+00 : f32
    %158 = vector.broadcast %cst_64 : f32 to vector<8x128xf32>
    %159 = arith.maximumf %157, %158 : vector<8x128xf32>
    %160 = arith.truncf %159 : vector<8x128xf32> to vector<8x128xbf16>
    %c0_65 = arith.constant 0 : index
    %c0_66 = arith.constant 0 : index
    %161 = vector.load %arg22[%c0_65, %c0_66] : memref<128x64xbf16, #tpu.memory_space<vmem>>, vector<128x64xbf16>
    %cst_67 = arith.constant dense<0.000000e+00> : vector<8x64xf32>
    %162 = tpu.matmul %160, %161, %cst_67 {dimension_numbers = #tpu.dot_dimension_numbers<[1], [0], [0], [1], [0, 0, 1, 1], [], []>} : vector<8x128xbf16>, vector<128x64xbf16>, vector<8x64xf32> -> vector<8x64xf32>
    %c0_68 = arith.constant 0 : index
    %c0_69 = arith.constant 0 : index
    %163 = vector.load %arg23[%c0_68, %c0_69] : memref<1x64xf32, #tpu.memory_space<vmem>>, vector<1x64xf32>
    %164 = vector.broadcast %163 : vector<1x64xf32> to vector<8x64xf32>
    %165 = arith.addf %162, %164 : vector<8x64xf32>
    %166 = arith.addf %151, %165 : vector<8x64xf32>
    %c0_70 = arith.constant 0 : index
    %c0_71 = arith.constant 0 : index
    %167 = vector.load %arg24[%c0_70, %c0_71] : memref<1x64xf32, #tpu.memory_space<vmem>>, vector<1x64xf32>
    %c0_72 = arith.constant 0 : index
    %c0_73 = arith.constant 0 : index
    %168 = vector.load %arg25[%c0_72, %c0_73] : memref<1x64xf32, #tpu.memory_space<vmem>>, vector<1x64xf32>
    %cst_74 = arith.constant dense<0.000000e+00> : vector<8xf32>
    %169 = vector.multi_reduction <add>, %166, %cst_74 [1] : vector<8x64xf32> to vector<8xf32>
    %170 = vector.shape_cast %169 : vector<8xf32> to vector<8x1xf32>
    %cst_75 = arith.constant 6.400000e+01 : f32
    %171 = vector.broadcast %cst_75 : f32 to vector<8x1xf32>
    %172 = arith.divf %170, %171 : vector<8x1xf32>
    %173 = vector.broadcast %172 : vector<8x1xf32> to vector<8x64xf32>
    %174 = arith.subf %166, %173 : vector<8x64xf32>
    %175 = arith.mulf %174, %174 : vector<8x64xf32>
    %cst_76 = arith.constant dense<0.000000e+00> : vector<8xf32>
    %176 = vector.multi_reduction <add>, %175, %cst_76 [1] : vector<8x64xf32> to vector<8xf32>
    %177 = vector.shape_cast %176 : vector<8xf32> to vector<8x1xf32>
    %cst_77 = arith.constant 6.400000e+01 : f32
    %178 = vector.broadcast %cst_77 : f32 to vector<8x1xf32>
    %179 = arith.divf %177, %178 : vector<8x1xf32>
    %180 = vector.broadcast %172 : vector<8x1xf32> to vector<8x64xf32>
    %181 = arith.subf %166, %180 : vector<8x64xf32>
    %cst_78 = arith.constant 9.99999974E-6 : f32
    %182 = vector.broadcast %cst_78 : f32 to vector<8x1xf32>
    %183 = arith.addf %179, %182 : vector<8x1xf32>
    %184 = math.rsqrt %183 : vector<8x1xf32>
    %185 = vector.broadcast %184 : vector<8x1xf32> to vector<8x64xf32>
    %186 = arith.mulf %181, %185 : vector<8x64xf32>
    %187 = vector.broadcast %167 : vector<1x64xf32> to vector<8x64xf32>
    %188 = arith.mulf %186, %187 : vector<8x64xf32>
    %189 = vector.broadcast %168 : vector<1x64xf32> to vector<8x64xf32>
    %190 = arith.addf %188, %189 : vector<8x64xf32>
    %191 = arith.truncf %190 : vector<8x64xf32> to vector<8x64xbf16>
    %c0_79 = arith.constant 0 : index
    %c0_80 = arith.constant 0 : index
    %192 = vector.load %arg26[%c0_79, %c0_80] : memref<64x128xbf16, #tpu.memory_space<vmem>>, vector<64x128xbf16>
    %cst_81 = arith.constant dense<0.000000e+00> : vector<8x128xf32>
    %193 = tpu.matmul %191, %192, %cst_81 {dimension_numbers = #tpu.dot_dimension_numbers<[1], [0], [0], [1], [0, 0, 1, 1], [], []>} : vector<8x64xbf16>, vector<64x128xbf16>, vector<8x128xf32> -> vector<8x128xf32>
    %c0_82 = arith.constant 0 : index
    %c0_83 = arith.constant 0 : index
    %194 = vector.load %arg27[%c0_82, %c0_83] : memref<1x128xf32, #tpu.memory_space<vmem>>, vector<1x128xf32>
    %195 = vector.broadcast %194 : vector<1x128xf32> to vector<8x128xf32>
    %196 = arith.addf %193, %195 : vector<8x128xf32>
    %c0_84 = arith.constant 0 : index
    %c0_85 = arith.constant 0 : index
    %197 = vector.load %arg28[%c0_84, %c0_85] : memref<8x128xf32, #tpu.memory_space<vmem>>, vector<8x128xf32>
    tpu.vector_store %arg28[%c0_84, %c0_85], %196 {strides = array<i32>} : memref<8x128xf32, #tpu.memory_space<vmem>>, vector<8x128xf32>,
    return
  }
  func.func @transform_0(%arg0: i32) -> (i32, i32) {
    %c0_i32 = arith.constant 0 : i32
    %c0_i32_0 = arith.constant 0 : i32
    return %arg0, %c0_i32 : i32, i32
  }
  func.func @transform_1(%arg0: i32) -> (i32, i32) {
    %c0_i32 = arith.constant 0 : i32
    %c0_i32_0 = arith.constant 0 : i32
    return %arg0, %c0_i32 : i32, i32
  }
  func.func @transform_2(%arg0: i32) -> (i32, i32) {
    %c0_i32 = arith.constant 0 : i32
    %c0_i32_0 = arith.constant 0 : i32
    %c0_i32_1 = arith.constant 0 : i32
    return %c0_i32, %c0_i32_0 : i32, i32
  }
  func.func @transform_3(%arg0: i32) -> (i32, i32) {
    %c0_i32 = arith.constant 0 : i32
    %c0_i32_0 = arith.constant 0 : i32
    %c0_i32_1 = arith.constant 0 : i32
    return %c0_i32, %c0_i32_0 : i32, i32
  }
  func.func @transform_4(%arg0: i32) -> (i32, i32) {
    %c0_i32 = arith.constant 0 : i32
    %c0_i32_0 = arith.constant 0 : i32
    %c0_i32_1 = arith.constant 0 : i32
    return %c0_i32, %c0_i32_0 : i32, i32
  }
  func.func @transform_5(%arg0: i32) -> (i32, i32) {
    %c0_i32 = arith.constant 0 : i32
    %c0_i32_0 = arith.constant 0 : i32
    %c0_i32_1 = arith.constant 0 : i32
    return %c0_i32, %c0_i32_0 : i32, i32
  }
  func.func @transform_6(%arg0: i32) -> (i32, i32) {
    %c0_i32 = arith.constant 0 : i32
    %c0_i32_0 = arith.constant 0 : i32
    %c0_i32_1 = arith.constant 0 : i32
    return %c0_i32, %c0_i32_0 : i32, i32
  }
  func.func @transform_7(%arg0: i32) -> (i32, i32) {
    %c0_i32 = arith.constant 0 : i32
    %c0_i32_0 = arith.constant 0 : i32
    %c0_i32_1 = arith.constant 0 : i32
    return %c0_i32, %c0_i32_0 : i32, i32
  }
  func.func @transform_8(%arg0: i32) -> (i32, i32) {
    %c0_i32 = arith.constant 0 : i32
    %c0_i32_0 = arith.constant 0 : i32
    %c0_i32_1 = arith.constant 0 : i32
    return %c0_i32, %c0_i32_0 : i32, i32
  }
  func.func @transform_9(%arg0: i32) -> (i32, i32) {
    %c0_i32 = arith.constant 0 : i32
    %c0_i32_0 = arith.constant 0 : i32
    %c0_i32_1 = arith.constant 0 : i32
    return %c0_i32, %c0_i32_0 : i32, i32
  }
  func.func @transform_10(%arg0: i32) -> (i32, i32) {
    %c0_i32 = arith.constant 0 : i32
    %c0_i32_0 = arith.constant 0 : i32
    %c0_i32_1 = arith.constant 0 : i32
    return %c0_i32, %c0_i32_0 : i32, i32
  }
  func.func @transform_11(%arg0: i32) -> (i32, i32) {
    %c0_i32 = arith.constant 0 : i32
    %c0_i32_0 = arith.constant 0 : i32
    %c0_i32_1 = arith.constant 0 : i32
    return %c0_i32, %c0_i32_0 : i32, i32
  }
  func.func @transform_12(%arg0: i32) -> (i32, i32) {
    %c0_i32 = arith.constant 0 : i32
    %c0_i32_0 = arith.constant 0 : i32
    %c0_i32_1 = arith.constant 0 : i32
    return %c0_i32, %c0_i32_0 : i32, i32
  }
  func.func @transform_13(%arg0: i32) -> (i32, i32) {
    %c0_i32 = arith.constant 0 : i32
    %c0_i32_0 = arith.constant 0 : i32
    %c0_i32_1 = arith.constant 0 : i32
    return %c0_i32, %c0_i32_0 : i32, i32
  }
  func.func @transform_14(%arg0: i32) -> (i32, i32) {
    %c0_i32 = arith.constant 0 : i32
    %c0_i32_0 = arith.constant 0 : i32
    %c0_i32_1 = arith.constant 0 : i32
    return %c0_i32, %c0_i32_0 : i32, i32
  }
  func.func @transform_15(%arg0: i32) -> (i32, i32) {
    %c0_i32 = arith.constant 0 : i32
    %c0_i32_0 = arith.constant 0 : i32
    %c0_i32_1 = arith.constant 0 : i32
    return %c0_i32, %c0_i32_0 : i32, i32
  }
  func.func @transform_16(%arg0: i32) -> (i32, i32) {
    %c0_i32 = arith.constant 0 : i32
    %c0_i32_0 = arith.constant 0 : i32
    %c0_i32_1 = arith.constant 0 : i32
    return %c0_i32, %c0_i32_0 : i32, i32
  }
  func.func @transform_17(%arg0: i32) -> (i32, i32) {
    %c0_i32 = arith.constant 0 : i32
    %c0_i32_0 = arith.constant 0 : i32
    %c0_i32_1 = arith.constant 0 : i32
    return %c0_i32, %c0_i32_0 : i32, i32
  }
  func.func @transform_18(%arg0: i32) -> (i32, i32) {
    %c0_i32 = arith.constant 0 : i32
    %c0_i32_0 = arith.constant 0 : i32
    %c0_i32_1 = arith.constant 0 : i32
    return %c0_i32, %c0_i32_0 : i32, i32
  }
  func.func @transform_19(%arg0: i32) -> (i32, i32) {
    %c0_i32 = arith.constant 0 : i32
    %c0_i32_0 = arith.constant 0 : i32
    %c0_i32_1 = arith.constant 0 : i32
    return %c0_i32, %c0_i32_0 : i32, i32
  }
  func.func @transform_20(%arg0: i32) -> (i32, i32) {
    %c0_i32 = arith.constant 0 : i32
    %c0_i32_0 = arith.constant 0 : i32
    %c0_i32_1 = arith.constant 0 : i32
    return %c0_i32, %c0_i32_0 : i32, i32
  }
  func.func @transform_21(%arg0: i32) -> (i32, i32) {
    %c0_i32 = arith.constant 0 : i32
    %c0_i32_0 = arith.constant 0 : i32
    %c0_i32_1 = arith.constant 0 : i32
    return %c0_i32, %c0_i32_0 : i32, i32
  }
  func.func @transform_22(%arg0: i32) -> (i32, i32) {
    %c0_i32 = arith.constant 0 : i32
    %c0_i32_0 = arith.constant 0 : i32
    %c0_i32_1 = arith.constant 0 : i32
    return %c0_i32, %c0_i32_0 : i32, i32
  }
  func.func @transform_23(%arg0: i32) -> (i32, i32) {
    %c0_i32 = arith.constant 0 : i32
    %c0_i32_0 = arith.constant 0 : i32
    %c0_i32_1 = arith.constant 0 : i32
    return %c0_i32, %c0_i32_0 : i32, i32
  }
  func.func @transform_24(%arg0: i32) -> (i32, i32) {
    %c0_i32 = arith.constant 0 : i32
    %c0_i32_0 = arith.constant 0 : i32
    %c0_i32_1 = arith.constant 0 : i32
    return %c0_i32, %c0_i32_0 : i32, i32
  }
  func.func @transform_25(%arg0: i32) -> (i32, i32) {
    %c0_i32 = arith.constant 0 : i32
    %c0_i32_0 = arith.constant 0 : i32
    %c0_i32_1 = arith.constant 0 : i32
    return %c0_i32, %c0_i32_0 : i32, i32
  }
  func.func @transform_26(%arg0: i32) -> (i32, i32) {
    %c0_i32 = arith.constant 0 : i32
    %c0_i32_0 = arith.constant 0 : i32
    %c0_i32_1 = arith.constant 0 : i32
    return %c0_i32, %c0_i32_0 : i32, i32
  }
  func.func @transform_27(%arg0: i32) -> (i32, i32) {
    %c0_i32 = arith.constant 0 : i32
    %c0_i32_0 = arith.constant 0 : i32
    return %arg0, %c0_i32 : i32, i32
  }
}

</mosaic_0001>

<bundles_post_ra>
// kernel: transformer_forward.4
= control target key start
LH: loop header
LB: loop body
LE: loop exit
PB: predicated region body
PF: predicated region fallthrough
CT: control target
= control target key end

     0   :  { %s4218_s0 = inlined_call_operand.vmem [shape: f32[16,64], index: 0, kind: input, shape index: {}]   ;;  %s4219_s1 = inlined_call_operand.hbm [shape: f32[8,8], index: 1, kind: input, shape index: {}]   ;;  %s4220_s2 = inlined_call_operand.vmem [shape: f32[2,8], index: 2, kind: input, shape index: {}]   ;;  %s4221_s3 = inlined_call_operand.hbm [shape: bf16[64,192], index: 3, kind: input, shape index: {}]   ;;  %s4222_s4 = inlined_call_operand.hbm [shape: f32[1,192], index: 4, kind: input, shape index: {}]   ;;  %s4223_s5 = inlined_call_operand.hbm [shape: bf16[64,64], index: 5, kind: input, shape index: {}]   ;;  %s4224_s6 = inlined_call_operand.hbm [shape: f32[1,64], index: 6, kind: input, shape index: {}]   ;;  %s4225_s7 = inlined_call_operand.hbm [shape: f32[1,64], index: 7, kind: input, shape index: {}]   ;;  %s4226_s8 = inlined_call_operand.hbm [shape: f32[1,64], index: 8, kind: input, shape index: {}]   ;;  %s4227_s9 = inlined_call_operand.hbm [shape: bf16[64,128], index: 9, kind: input, shape index: {}]   ;;  %s4228_s10 = inlined_call_operand.hbm [shape: f32[1,128], index: 10, kind: input, shape index: {}]   ;;  %s4229_s11 = inlined_call_operand.vmem [shape: bf16[128,64], index: 11, kind: input, shape index: {}]   ;;  %s4230_s12 = inlined_call_operand.hbm [shape: f32[1,64], index: 12, kind: input, shape index: {}]   ;;  %s4231_s13 = inlined_call_operand.hbm [shape: f32[1,64], index: 13, kind: input, shape index: {}]   ;;  %s4232_s14 = inlined_call_operand.hbm [shape: f32[1,64], index: 14, kind: input, shape index: {}]   ;;  %s4233_s15 = inlined_call_operand.vmem [shape: f32[16,64], index: 15, kind: output, shape index: {}]  }
   0x1   :  { %4236 = sst [smem:[#allocation29_spill]] %s4221_s3 }
   0x2   :  { %4237 = sst [smem:[#allocation30_spill]] %s4223_s5 }
   0x3   :  { %4238 = sst [smem:[#allocation31_spill]] %s4229_s11 }
   0x4   :  { %4239 = sst [smem:[#allocation32_spill]] %s4233_s15 }
   0x5   :  { %20 = vsyncpa [#allocation3], 0 }
   0x6   :  { %21 = vsyncpa [#allocation5], 0 }
   0x7   :  { %22 = vsyncpa [#allocation8], 0 }
   0x8   :  { %23 = vsyncpa [#allocation11], 0 }
   0x9   :  { %24 = vsyncpa [#allocation14], 0 }
   0xa   :  { %25 = vsyncpa [#allocation17], 0 }
   0xb   :  { %26 = vsyncpa [#allocation20], 0  ;;  %s3546_s18 = smov 0  }
   0xc LB: > { %4240 = sst [smem:[#allocation28_spill]] %s3430_s18  ;;  %s3555_s22 = sadd.s32 4294967295, %s3430_s18   ;;  %s3430_s18 = sphi %s3546_s18, %s32_s18  }
   0xd   : > { %s4241_s3 = sld [smem:[#allocation29_spill]]  ;;  %p2647_p0 = scmp.ge.s32.totalorder %s3430_s18, 1 }
   0xe   : > { %p383_p1 = scmp.lt.s32.totalorder %s3430_s18, 3  ;;  %p2903_p2 = scmp.eq.s32.totalorder %s3555_s22, 0 }
   0xf   : > { %s3432_s24 = smov [#allocation4]   ;;  %s4243_s5 = sld [smem:[#allocation30_spill]] }
  0x10   : > { %p3560_p3 = pnand %p2647_p0, %p383_p1  ;;  %s411_s25 = sshll.u32 %s3432_s24, 4  ;;  %s412_s25 = int_to_ptr.vmem [resolvable:$true] %s411_s25 }
  0x11   : > { %s3433_s30 = smov [#allocation7]   ;;  %s3434_s17 = smov 128  }
  0x12   : > { %p2866_p4 = pneg %p3560_p3  ;;  %s437_s16 = sshll.u32 %s3433_s30, 4  ;;  %s438_s16 = int_to_ptr.vmem [resolvable:$true] %s437_s16 }
  0x13   : > { %s409_s21 = sshll.u32 %s4241_s3, 4  ;;  %s3435_s19 = smov 8   ;;  %s410_s21 = int_to_ptr.hbm [resolvable:$true] %s409_s21 }
  0x14   : > { %p3571_p5 = pnand %p2903_p2, %p2866_p4  ;;  %s462_s26 = sshll.u32 %s4225_s7, 4  ;;  %s463_s26 = int_to_ptr.hbm [resolvable:$true] %s462_s26 }
  0x15   : > { %s435_s28 = sshll.u32 %s4243_s5, 4  ;;  %s3436_s27 = smov 64   ;;  %s436_s28 = int_to_ptr.hbm [resolvable:$true] %s435_s28 }
  0x16   : > { %2872 = dma.hbm_to_vmem [thread:$0]  (!%p3571_p5), %s410_s21, 1024, %s412_s25, [#allocation5], %s3434_s17, %s3434_s17, %s3435_s19  }
  0x17   : > { %s3437_s3 = smov 4   ;;  %s3438_s5 = smov [#allocation10]  }
  0x18   : > { %2878 = dma.hbm_to_vmem [thread:$0]  (!%p3571_p5), %s436_s28, 512, %s438_s16, [#allocation8], %s3436_s27, %s3436_s27, %s3437_s3  }
  0x19   : > { %s464_s18 = sshll.u32 %s3438_s5, 4  ;;  %s485_s30 = sshll.u32 %s4227_s9, 4  ;;  %s465_s18 = int_to_ptr.vmem [resolvable:$true] %s464_s18  ;;  %s486_s30 = int_to_ptr.hbm [resolvable:$true] %s485_s30 }
  0x1a   : > { %2884 = dma.hbm_to_vmem [thread:$0]  (!%p3571_p5), %s463_s26, 16, %s465_s18, [#allocation11]  }
  0x1b   : > { %s515_s17 = sshll.u32 %s4230_s12, 4  ;;  %s3439_s19 = smov [#allocation13]   ;;  %s516_s17 = int_to_ptr.hbm [resolvable:$true] %s515_s17 }
  0x1c   : > { %s487_s20 = sshll.u32 %s3439_s19, 4  ;;  %s3440_s5 = smov [#allocation16]   ;;  %s488_s20 = int_to_ptr.vmem [resolvable:$true] %s487_s20 }
  0x1d   : > { %2890 = dma.hbm_to_vmem [thread:$0]  (!%p3571_p5), %s486_s30, 512, %s488_s20, [#allocation14], %s3436_s27, %s3436_s27, %s3437_s3  }
  0x1e   : > { %s517_s28 = sshll.u32 %s3440_s5, 4  ;;  %s395_s16 = sshll.u32 %s4219_s1, 4  ;;  %s518_s28 = int_to_ptr.vmem [resolvable:$true] %s517_s28  ;;  %s396_s16 = int_to_ptr.hbm [resolvable:$true] %s395_s16 }
  0x1f   : > { %2896 = dma.hbm_to_vmem [thread:$0]  (!%p3571_p5), %s516_s17, 16, %s518_s28, [#allocation17]  }
  0x20   : > { %s424_s26 = sshll.u32 %s4222_s4, 4  ;;  %s3441_s21 = smov [#allocation2]   ;;  %s425_s26 = int_to_ptr.hbm [resolvable:$true] %s424_s26 }
  0x21   : > { %s397_s25 = sshll.u32 %s3441_s21, 4  ;;  %s3442_s3 = smov [#allocation6]   ;;  %s398_s25 = int_to_ptr.vmem [resolvable:$true] %s397_s25 }
  0x22   : > { %2869 = dma.hbm_to_vmem [thread:$0]  (!%p3571_p5), %s396_s16, 128, %s398_s25, [#allocation3]  }
  0x23   : > { %s426_s27 = sshll.u32 %s3442_s3, 4  ;;  %s450_s20 = sshll.u32 %s4224_s6, 4  ;;  %s427_s27 = int_to_ptr.vmem [resolvable:$true] %s426_s27  ;;  %s451_s20 = int_to_ptr.hbm [resolvable:$true] %s450_s20 }
  0x24   : > { %2875 = dma.hbm_to_vmem [thread:$0]  (!%p3571_p5), %s425_s26, 32, %s427_s27, [#allocation5]  }
  0x25   : > { %s474_s28 = sshll.u32 %s4226_s8, 4  ;;  %s3443_s11 = smov [#allocation9]   ;;  %s475_s28 = int_to_ptr.hbm [resolvable:$true] %s474_s28 }
  0x26   : > { %s452_s15 = sshll.u32 %s3443_s11, 4  ;;  %s3444_s16 = smov [#allocation12]   ;;  %s453_s15 = int_to_ptr.vmem [resolvable:$true] %s452_s15 }
  0x27   : > { %2881 = dma.hbm_to_vmem [thread:$0]  (!%p3571_p5), %s451_s20, 16, %s453_s15, [#allocation8]  }
  0x28   : > { %s476_s18 = sshll.u32 %s3444_s16, 4  ;;  %s500_s25 = sshll.u32 %s4228_s10, 4  ;;  %s477_s18 = int_to_ptr.vmem [resolvable:$true] %s476_s18  ;;  %s501_s25 = int_to_ptr.hbm [resolvable:$true] %s500_s25 }
  0x29   : > { %2887 = dma.hbm_to_vmem [thread:$0]  (!%p3571_p5), %s475_s28, 16, %s477_s18, [#allocation11]  }
  0x2a   : > { %s527_s27 = sshll.u32 %s4231_s13, 4  ;;  %s3445_s30 = smov [#allocation15]   ;;  %s528_s27 = int_to_ptr.hbm [resolvable:$true] %s527_s27 }
  0x2b   : > { %s502_s19 = sshll.u32 %s3445_s30, 4  ;;  %s3446_s20 = smov [#allocation18]   ;;  %s503_s19 = int_to_ptr.vmem [resolvable:$true] %s502_s19 }
  0x2c   : > { %2893 = dma.hbm_to_vmem [thread:$0]  (!%p3571_p5), %s501_s25, 16, %s503_s19, [#allocation14]  }
  0x2d   : > { %s529_s17 = sshll.u32 %s3446_s20, 4  ;;  %s539_s15 = sshll.u32 %s4232_s14, 4  ;;  %s530_s17 = int_to_ptr.vmem [resolvable:$true] %s529_s17  ;;  %s540_s15 = int_to_ptr.hbm [resolvable:$true] %s539_s15 }
  0x2e   : > { %2899 = dma.hbm_to_vmem [thread:$0]  (!%p3571_p5), %s528_s27, 16, %s530_s17, [#allocation17]  }
  0x2f   : > { %s3447_s28 = smov [#allocation19]   ;;  %561 = sbr.rel (%p3560_p3) target bundleno = 2158 (0x86e), region = 80 }
  0x30   : > { %s541_s16 = sshll.u32 %s3447_s28, 4  ;;  %s542_s16 = int_to_ptr.vmem [resolvable:$true] %s541_s16 }
  0x31   : > { %2902 = dma.hbm_to_vmem [thread:$0]  (!%p3571_p5), %s540_s15, 16, %s542_s16, [#allocation20]  }
  0x34   : > { %3401 = dma.done.wait (%p2903_p2), [#allocation3], 128  }
  0x35   : > { %3403 = vsyncadd (%p2903_p2), [#allocation3], 4294967168 }
  0x36   : > { %3405 = dma.done.wait (%p2903_p2), [#allocation5], 1056  }
  0x37   : > { %3407 = vsyncadd (%p2903_p2), [#allocation5], 4294966240 }
  0x38   : > { %3409 = dma.done.wait (%p2903_p2), [#allocation8], 528  }
  0x39   : > { %3411 = vsyncadd (%p2903_p2), [#allocation8], 4294966768 }
  0x3a   : > { %3413 = dma.done.wait (%p2903_p2), [#allocation11], 32  }
  0x3b   : > { %3415 = vsyncadd (%p2903_p2), [#allocation11], 4294967264 }
  0x3c   : > { %3417 = dma.done.wait (%p2903_p2), [#allocation14], 528  }
  0x3d   : > { %3419 = vsyncadd (%p2903_p2), [#allocation14], 4294966768 }
  0x3e   : > { %3421 = dma.done.wait (%p2903_p2), [#allocation17], 32  }
  0x3f   : > { %3423 = vsyncadd (%p2903_p2), [#allocation17], 4294967264 }
  0x40   : > { %3425 = dma.done.wait (%p2903_p2), [#allocation20], 16  }
  0x41   : > { %3427 = vsyncadd (%p2903_p2), [#allocation20], 4294967280  ;;  %p663_p6 = scmp.lt.s32.totalorder %s3555_s22, 1  ;;  %v2702_v0 = vld [vmem:[#allocation4 + $0x30] sm:$0xf]  ;;  %vm733_vm0 = vcmask 523264   ;;  %s674_s15 = scalar_lea.vmem %s4220_s2, %s3555_s22 }
  0x42   : > { %v2801_v1 = vld [vmem:[#allocation4 + $0x34] sm:$0xf0]  ;;  %v2694_v2 = vld [vmem:[#allocation4 + $0x20] sm:$0xf]  ;;  %v2799_v4 = vld [vmem:[#allocation4 + $0x24] sm:$0xf0] }
  0x43   : > { %s3661_s23 = scalar_select %p663_p6, %s3555_s22, 1  ;;  %v2703_v3 = vor.u32 %v2801_v1, %v2702_v0  ;;  %v2695_v5 = vor.u32 %v2799_v4, %v2694_v2  ;;  %v2686_v6 = vld [vmem:[#allocation4 + $0x10] sm:$0xf]  ;;  %v2797_v7 = vld [vmem:[#allocation4 + $0x14] sm:$0xf0]  ;;  %vm786_vm1 = vcmask 1047556  }
  0x44   : > { %v2687_v8 = vor.u32 %v2797_v7, %v2686_v6  ;;  %v2678_v9 = vld [vmem:[#allocation4] sm:$0xf]  ;;  %v2795_v10 = vld [vmem:[#allocation4 + $0x4] sm:$0xf0]  ;;  %s3448_s25 = smov 88   ;;  %s3449_s26 = smov 96  }
  0x45   : > { %s2674_s29 = sshll.u32 %s3661_s23, 3  ;;  %741 = vmatpush.bf16.msra.mxu0 %v2703_v3  ;;  %v2679_v11 = vor.u32 %v2795_v10, %v2678_v9  ;;  %v3676_v14 = vld [vmem:[#allocation6] sm:$0x3]  ;;  %s3450_s3 = smov 120   ;;  %v3455_v23 = vmov 1983009808  }
  0x46   : > { %s3669_s21 = scalar_lea.vmem %s4218_s0, %s2674_s29  ;;  %v689_v15 = vperm.slane %v3676_v14, 0  ;;  %s3451_s27 = smov 80   ;;  %v791_v24 = vunpack.c.l.s4 %v3455_v23  ;;  %v3457_v34 = vmov 1934713408   ;;  %vm1528_vm2 = vcmask 64512  }
  0x47   : > { %v672_v12 = vld [vmem:[%s3669_s21] sm:$0xff]  ;;  %s3452_s30 = smov 104   ;;  %s3453_s19 = smov 112   ;;  %v839_v35 = vunpack.c.l.s4 %v3457_v34  ;;  %vm1796_vm3 = vcmask 1043456   ;;  %vm2199_vm4 = vcmask 130048   ;;  %vm2201_vm5 = vcmask 195584  }
  0x48   : > { %v3672_v13 = vpack.c.bf16 %v672_v12, %v672_v12  ;;  %s3454_s20 = smov 72   ;;  %s3456_s17 = smov 64   ;;  %v3687_v27 = vunpack.c.0.s8 %v791_v24  ;;  %vm2203_vm6 = vcmask 261120   ;;  %vm2205_vm7 = vcmask 326656  }
  0x49   : > { %742 = vmatpush.bf16.msra.mxu0 %v2695_v5  ;;  %v3701_v52 = vunpack.c.0.s8 %v839_v35  ;;  %s3458_s22 = smov 16   ;;  %s3459_s28 = smov 8   ;;  %vm2207_vm8 = vcmask 392192   ;;  %vm2209_vm9 = vcmask 457728  }
  0x4a   : > { %s3460_s16 = smov 24   ;;  %s3461_s18 = smov 48  }
  0x4b   : > { %s3462_s24 = smov 32  }
  0x4d   : > { %743 = vmatpush.bf16.msra.mxu0 %v2687_v8 }
  0x51   : > { %744 = vmatpush.bf16.msra.mxu0 %v2679_v11 }
  0x54   : > { %2708 = vmatmul.msk.bf16.vlgmr.msra.gmra.mxu0 %vm733_vm0, %v3672_v13 }
  0xd1   : > { %v746_v16 = vpop.f32.mrf.mxu0 }
  0xd2   : > { %v747_v17 = vadd.f32 %v746_v16, %v689_v15 }
  0xd4   : > { %776 = vrot.lane.b32.xlu2 %v747_v17, %s3448_s25  ;;  %773 = vrot.lane.b32.xlu1 %v747_v17, %s3449_s26  ;;  %v788_v30 = vrot.slane %v747_v17, 4 }
  0xd5   : > { %764 = vrot.lane.b32.xlu0 %v747_v17, %s3450_s3 }
  0xd9   : > { %v748_v18 = vpop.f32.mrf.mxu0 }
  0xdc   : > { %779 = vrot.lane.b32.xlu2 %v747_v17, %s3451_s27  ;;  %770 = vrot.lane.b32.xlu1 %v747_v17, %s3452_s30 }
  0xdd   : > { %767 = vrot.lane.b32.xlu0 %v747_v17, %s3453_s19 }
  0xe5   : > { %782 = vrot.lane.b32.xlu0 %v747_v17, %s3454_s20 }
 0x12e   : > { %v777_v19 = vpop.permute.xlu2 %776 }
 0x12f   : > { %v824_v57 = vrot.slane %v777_v19, 4 }
 0x136   : > { %v780_v26 = vpop.permute.xlu2 %779 }
 0x137   : > { %v810_v41 = vrot.slane %v780_v26, 4 }
 0x146   : > { %v774_v20 = vpop.permute.xlu1 %773 }
 0x147   : > { %v765_v21 = vpop.permute.xlu0 %764  ;;  %v812_v28 = vrot.slane %v774_v20, 4  ;;  %v811_v48 = vsel %vm786_vm1, %v810_v41, %v774_v20 }
 0x148   : > { %v2969_v22 = vpack.i.bf16 %v765_v21, %v747_v17  ;;  %v800_v25 = vrot.slane %v765_v21, 4  ;;  %v817_v58 = vperm.slane %v811_v48, %v3687_v27 }
 0x149   : > { %v813_v44 = vsel %vm786_vm1, %v780_v26, %v812_v28 }
 0x14a   : > { %2970 = vrot.lane.b32.xlu1 %v2969_v22, %s3456_s17  ;;  %v821_v54 = vperm.slane %v813_v44, %v3687_v27  ;;  %v860_v5 = vrot.slane %v817_v58, 4 }
 0x14c   : > { %v872_v1 = vrot.slane %v821_v54, 4 }
 0x14e   : > { %v771_v29 = vpop.permute.xlu1 %770 }
 0x14f   : > { %v798_v31 = vrot.slane %v771_v29, 4  ;;  %v2979_v32 = vpack.i.bf16 %v777_v19, %v771_v29  ;;  %v801_v33 = vsel %vm786_vm1, %v771_v29, %v800_v25  ;;  %v768_v36 = vpop.permute.xlu0 %767 }
 0x150   : > { %v809_v37 = vperm.slane %v801_v33, %v3687_v27  ;;  %v785_v38 = vrot.slane %v768_v36, 4  ;;  %v2974_v39 = vpack.i.bf16 %v774_v20, %v768_v36  ;;  %v789_v40 = vsel %vm786_vm1, %v768_v36, %v788_v30 }
 0x151   : > { %v799_v42 = vsel %vm786_vm1, %v798_v31, %v765_v21  ;;  %v797_v43 = vperm.slane %v789_v40, %v3687_v27  ;;  %2980 = vrot.lane.b32.xlu0 %v2979_v32, %s3456_s17 }
 0x152   : > { %v805_v45 = vperm.slane %v799_v42, %v3687_v27  ;;  %v846_v46 = vrot.slane %v809_v37, 4  ;;  %v787_v47 = vsel %vm786_vm1, %v785_v38, %v747_v17  ;;  %2975 = vrot.lane.b32.xlu2 %v2974_v39, %s3456_s17 }
 0x153   : > { %v793_v49 = vperm.slane %v787_v47, %v3687_v27  ;;  %v848_v50 = vrot.slane %v797_v43, 4 }
 0x154   : > { %v834_v51 = vrot.slane %v805_v45, 4  ;;  %v847_v53 = vsel %vm786_vm1, %v846_v46, %v797_v43 }
 0x155   : > { %v836_v55 = vrot.slane %v793_v49, 4  ;;  %v849_v56 = vsel %vm786_vm1, %v809_v37, %v848_v50  ;;  %v853_v7 = vperm.slane %v847_v53, %v3701_v52 }
 0x156   : > { %v835_v59 = vsel %vm786_vm1, %v834_v51, %v793_v49  ;;  %v857_v62 = vperm.slane %v849_v56, %v3701_v52 }
 0x157   : > { %v837_v60 = vsel %vm786_vm1, %v805_v45, %v836_v55  ;;  %v783_v61 = vpop.permute.xlu0 %782  ;;  %v841_v11 = vperm.slane %v835_v59, %v3701_v52  ;;  %v892_v24 = vrot.slane %v853_v7, 4 }
 0x158   : > { %v822_v63 = vrot.slane %v783_v61, 4  ;;  %v825_v0 = vsel %vm786_vm1, %v783_v61, %v824_v57  ;;  %v845_v2 = vperm.slane %v837_v60, %v3701_v52  ;;  %v2984_v4 = vpack.i.bf16 %v783_v61, %v780_v26 }
 0x159   : > { %v833_v3 = vperm.slane %v825_v0, %v3687_v27  ;;  %v896_v12 = vrot.slane %v857_v62, 4  ;;  %v884_v32 = vrot.slane %v841_v11, 4 }
 0x15a   : > { %v823_v6 = vsel %vm786_vm1, %v822_v63, %v777_v19  ;;  %2985 = vrot.lane.b32.xlu1 %v2984_v4, %s3456_s17  ;;  %v888_v16 = vrot.slane %v845_v2, 4 }
 0x15b   : > { %v829_v8 = vperm.slane %v823_v6, %v3687_v27  ;;  %v870_v9 = vrot.slane %v833_v3, 4  ;;  %v873_v10 = vsel %vm786_vm1, %v833_v3, %v872_v1 }
 0x15c   : > { %v881_v15 = vperm.slane %v873_v10, %v3701_v52 }
 0x15d   : > { %v858_v17 = vrot.slane %v829_v8, 4  ;;  %v861_v18 = vsel %vm786_vm1, %v829_v8, %v860_v5  ;;  %v871_v19 = vsel %vm786_vm1, %v870_v9, %v821_v54 }
 0x15e   : > { %v869_v20 = vperm.slane %v861_v18, %v3701_v52  ;;  %v877_v21 = vperm.slane %v871_v19, %v3701_v52  ;;  %v894_v22 = vrot.slane %v881_v15, 4  ;;  %v897_v23 = vsel %vm786_vm1, %v881_v15, %v896_v12 }
 0x15f   : > { %v859_v25 = vsel %vm786_vm1, %v858_v17, %v817_v58  ;;  %v934_v26 = vrot.slane %v897_v23, 4 }
 0x160   : > { %v865_v28 = vperm.slane %v859_v25, %v3701_v52  ;;  %v886_v29 = vrot.slane %v869_v20, 4  ;;  %v889_v30 = vsel %vm786_vm1, %v869_v20, %v888_v16  ;;  %v890_v31 = vrot.slane %v877_v21, 4 }
 0x161   : > { %v910_v33 = vrot.slane %v889_v30, 4  ;;  %v893_v34 = vsel %vm786_vm1, %v877_v21, %v892_v24  ;;  %v895_v35 = vsel %vm786_vm1, %v894_v22, %v857_v62 }
 0x162   : > { %v882_v36 = vrot.slane %v865_v28, 4  ;;  %v891_v37 = vsel %vm786_vm1, %v890_v31, %v853_v7  ;;  %v922_v38 = vrot.slane %v895_v35, 4  ;;  %v935_v39 = vsel %vm786_vm1, %v934_v26, %v893_v34 }
 0x163   : > { %v924_v40 = vrot.slane %v891_v37, 4  ;;  %v936_v41 = vrot.slane %v893_v34, 4  ;;  %v885_v42 = vsel %vm786_vm1, %v865_v28, %v884_v32  ;;  %v887_v43 = vsel %vm786_vm1, %v886_v29, %v845_v2 }
 0x164   : > { %v883_v44 = vsel %vm786_vm1, %v882_v36, %v841_v11  ;;  %v898_v45 = vrot.slane %v887_v43, 4  ;;  %v911_v46 = vsel %vm786_vm1, %v910_v33, %v885_v42  ;;  %v912_v47 = vrot.slane %v885_v42, 4 }
 0x165   : > { %v925_v48 = vsel %vm786_vm1, %v895_v35, %v924_v40  ;;  %v937_v49 = vsel %vm786_vm1, %v897_v23, %v936_v41  ;;  %v900_v50 = vrot.slane %v883_v44, 4  ;;  %v917_v51 = vperm.slane %v911_v46, %v3687_v27  ;;  %v2798_v46 = vld [vmem:[#allocation4 + $0x24] sm:$0xf] }
 0x166   : > { %v945_v53 = vperm.slane %v937_v49, %v3687_v27  ;;  %v899_v54 = vsel %vm786_vm1, %v898_v45, %v883_v44  ;;  %v923_v55 = vsel %vm786_vm1, %v922_v38, %v891_v37  ;;  %v941_v56 = vperm.slane %v935_v39, %v3687_v27  ;;  %v2704_v44 = vld [vmem:[#allocation4 + $0x38] sm:$0xf0]  ;;  %v2796_v49 = vld [vmem:[#allocation4 + $0x14] sm:$0xf] }
 0x167   : > { %v905_v57 = vperm.slane %v899_v54, %v3687_v27  ;;  %v929_v58 = vperm.slane %v923_v55, %v3687_v27  ;;  %v946_v59 = vrot.slane %v917_v51, 4  ;;  %v901_v60 = vsel %vm786_vm1, %v887_v43, %v900_v50  ;;  %v2800_v43 = vld [vmem:[#allocation4 + $0x34] sm:$0xf]  ;;  %v2688_v50 = vld [vmem:[#allocation4 + $0x18] sm:$0xf0] }
 0x168   : > { %v970_v61 = vrot.slane %v941_v56, 4  ;;  %v909_v62 = vperm.slane %v901_v60, %v3687_v27  ;;  %v913_v63 = vsel %vm786_vm1, %v889_v30, %v912_v47  ;;  %v933_v0 = vperm.slane %v925_v48, %v3687_v27  ;;  %v2696_v47 = vld [vmem:[#allocation4 + $0x28] sm:$0xf0] }
 0x169   : > { %v947_v1 = vsel %vm786_vm1, %v946_v59, %v905_v57  ;;  %v921_v2 = vperm.slane %v913_v63, %v3687_v27  ;;  %v982_v3 = vrot.slane %v945_v53, 4  ;;  %v948_v4 = vrot.slane %v905_v57, 4  ;;  %v2680_v54 = vld [vmem:[#allocation4 + $0x8] sm:$0xf0] }
 0x16a   : > { %v953_v5 = vperm.slane %v947_v1, %v3701_v52  ;;  %v971_v6 = vsel %vm786_vm1, %v970_v61, %v929_v58  ;;  %v972_v7 = vrot.slane %v929_v58, 4  ;;  %v960_v8 = vrot.slane %v909_v62, 4 }
 0x16b   : > { %v977_v9 = vperm.slane %v971_v6, %v3701_v52  ;;  %v958_v10 = vrot.slane %v921_v2, 4  ;;  %v983_v11 = vsel %vm786_vm1, %v982_v3, %v933_v0  ;;  %v949_v12 = vsel %vm786_vm1, %v917_v51, %v948_v4 }
 0x16c   : > { %v996_v15 = vrot.slane %v953_v5, 4  ;;  %v989_v16 = vperm.slane %v983_v11, %v3701_v52  ;;  %v957_v17 = vperm.slane %v949_v12, %v3701_v52  ;;  %v973_v18 = vsel %vm786_vm1, %v941_v56, %v972_v7 }
 0x16d   : > { %v994_v19 = vrot.slane %v977_v9, 4  ;;  %v959_v20 = vsel %vm786_vm1, %v958_v10, %v909_v62  ;;  %v981_v21 = vperm.slane %v973_v18, %v3701_v52  ;;  %v961_v22 = vsel %vm786_vm1, %v921_v2, %v960_v8 }
 0x16e   : > { %v965_v23 = vperm.slane %v959_v20, %v3701_v52  ;;  %v1002_v24 = vrot.slane %v989_v16, 4  ;;  %v1000_v25 = vrot.slane %v957_v17, 4  ;;  %v3764_v26 = vsel %vm786_vm1, %v977_v9, %v996_v15 }
 0x16f   : > { %v3767_v28 = vsel %vm786_vm1, %v994_v19, %v953_v5  ;;  %v998_v29 = vrot.slane %v981_v21, 4  ;;  %v969_v30 = vperm.slane %v961_v22, %v3701_v52  ;;  %v984_v33 = vrot.slane %v933_v0, 4 }
 0x170   : > { %v3771_v31 = vsel %vm786_vm1, %v1002_v24, %v965_v23  ;;  %v1004_v32 = vrot.slane %v965_v23, 4  ;;  %v3777_v36 = vsel %vm786_vm1, %v981_v21, %v1000_v25  ;;  %v2707_v45 = vor.u32 %v2800_v43, %v2704_v44 }
 0x171   : > { %v3774_v34 = vsel %vm786_vm1, %v998_v29, %v957_v17  ;;  %v1008_v35 = vrot.slane %v969_v30, 4  ;;  %v985_v38 = vsel %vm786_vm1, %v945_v53, %v984_v33  ;;  %v2699_v48 = vor.u32 %v2798_v46, %v2696_v47  ;;  %v2794_v53 = vld [vmem:[#allocation4 + $0x4] sm:$0xf] }
 0x172   : > { %v3780_v37 = vsel %vm786_vm1, %v989_v16, %v1004_v32  ;;  %v993_v39 = vperm.slane %v985_v38, %v3701_v52  ;;  %754 = vmatpush.bf16.msra.mxu1 %v2707_v45  ;;  %v2691_v51 = vor.u32 %v2796_v49, %v2688_v50  ;;  %v2683_v55 = vor.u32 %v2794_v53, %v2680_v54 }
 0x174   : > { %v1006_v40 = vrot.slane %v993_v39, 4  ;;  %v3785_v41 = vsel %vm786_vm1, %v993_v39, %v1008_v35 }
 0x176   : > { %v3788_v42 = vsel %vm786_vm1, %v1006_v40, %v969_v30  ;;  %755 = vmatpush.bf16.msra.mxu1 %v2699_v48 }
 0x17a   : > { %756 = vmatpush.bf16.msra.mxu1 %v2691_v51 }
 0x17e   : > { %757 = vmatpush.bf16.msra.mxu1 %v2683_v55 }
 0x181   : > { %2709 = vmatmul.msk.bf16.vlgmr.msra.gmra.mxu1 %vm733_vm0, %v3672_v13 }
 0x1ac   : > { %v2976_v57 = vpop.permute.xlu2 %2975 }
 0x1ad   : > { %v2977_v59 = vunpack.i.l.bf16 %v2976_v57  ;;  %v2978_v11 = vunpack.i.h.bf16 %v2976_v57 }
 0x1af   : > { %v1042_v63 = vrot.slane %v2977_v59, 4  ;;  %v1068_v22 = vrot.slane %v2978_v11, 4 }
 0x1bc   : > { %v2971_v56 = vpop.permute.xlu1 %2970 }
 0x1bd   : > { %v2972_v58 = vunpack.i.l.bf16 %v2971_v56  ;;  %v2973_v60 = vunpack.i.h.bf16 %v2971_v56 }
 0x1bf   : > { %v1044_v61 = vrot.slane %v2972_v58, 4  ;;  %v1056_v0 = vrot.slane %v2973_v60, 4  ;;  %v1043_v3 = vsel %vm786_vm1, %v1042_v63, %v2972_v58 }
 0x1c0   : > { %v1049_v8 = vperm.slane %v1043_v3, %v3687_v27 }
 0x1c1   : > { %v1045_v2 = vsel %vm786_vm1, %v2977_v59, %v1044_v61 }
 0x1c2   : > { %v1053_v13 = vperm.slane %v1045_v2, %v3687_v27  ;;  %v1092_v17 = vrot.slane %v1049_v8, 4 }
 0x1c3   : > { %v2981_v62 = vpop.permute.xlu0 %2980 }
 0x1c4   : > { %v2982_v1 = vunpack.i.l.bf16 %v2981_v62  ;;  %v2983_v10 = vunpack.i.h.bf16 %v2981_v62  ;;  %v1104_v15 = vrot.slane %v1053_v13, 4 }
 0x1c6   : > { %v1054_v4 = vrot.slane %v2982_v1, 4  ;;  %v1057_v5 = vsel %vm786_vm1, %v2982_v1, %v1056_v0  ;;  %v1080_v19 = vrot.slane %v2983_v10, 4 }
 0x1c7   : > { %v1065_v6 = vperm.slane %v1057_v5, %v3687_v27 }
 0x1c8   : > { %v1055_v7 = vsel %vm786_vm1, %v1054_v4, %v2973_v60 }
 0x1c9   : > { %v1061_v9 = vperm.slane %v1055_v7, %v3687_v27  ;;  %v1102_v12 = vrot.slane %v1065_v6, 4  ;;  %v1105_v20 = vsel %vm786_vm1, %v1065_v6, %v1104_v15 }
 0x1ca   : > { %v1113_v33 = vperm.slane %v1105_v20, %v3701_v52 }
 0x1cb   : > { %v1090_v16 = vrot.slane %v1061_v9, 4  ;;  %v1093_v23 = vsel %vm786_vm1, %v1061_v9, %v1092_v17  ;;  %v1103_v24 = vsel %vm786_vm1, %v1102_v12, %v1053_v13 }
 0x1cc   : > { %v2986_v18 = vpop.permute.xlu1 %2985  ;;  %v1101_v40 = vperm.slane %v1093_v23, %v3701_v52  ;;  %v1109_v43 = vperm.slane %v1103_v24, %v3701_v52  ;;  %v1152_v53 = vrot.slane %v1113_v33, 4 }
 0x1cd   : > { %v2988_v21 = vunpack.i.h.bf16 %v2986_v18  ;;  %v2987_v25 = vunpack.i.l.bf16 %v2986_v18  ;;  %v1091_v29 = vsel %vm786_vm1, %v1090_v16, %v1049_v8 }
 0x1ce   : > { %v1097_v46 = vperm.slane %v1091_v29, %v3701_v52  ;;  %v1148_v56 = vrot.slane %v1109_v43, 4  ;;  %v1144_v61 = vrot.slane %v1101_v40, 4 }
 0x1cf   : > { %v1078_v30 = vrot.slane %v2988_v21, 4  ;;  %v1081_v32 = vsel %vm786_vm1, %v2988_v21, %v1080_v19  ;;  %v1066_v35 = vrot.slane %v2987_v25, 4  ;;  %v1069_v38 = vsel %vm786_vm1, %v2987_v25, %v1068_v22 }
 0x1d0   : > { %v1089_v39 = vperm.slane %v1081_v32, %v3687_v27  ;;  %v1077_v44 = vperm.slane %v1069_v38, %v3687_v27  ;;  %v1140_v60 = vrot.slane %v1097_v46, 4 }
 0x1d1   : > { %v1079_v45 = vsel %vm786_vm1, %v1078_v30, %v2983_v10  ;;  %v1067_v47 = vsel %vm786_vm1, %v1066_v35, %v2978_v11 }
 0x1d2   : > { %v1085_v48 = vperm.slane %v1079_v45, %v3687_v27  ;;  %v1126_v49 = vrot.slane %v1089_v39, 4  ;;  %v1073_v50 = vperm.slane %v1067_v47, %v3687_v27  ;;  %v1128_v51 = vrot.slane %v1077_v44, 4 }
 0x1d4   : > { %v1114_v54 = vrot.slane %v1085_v48, 4  ;;  %v1127_v55 = vsel %vm786_vm1, %v1126_v49, %v1077_v44  ;;  %v1116_v57 = vrot.slane %v1073_v50, 4  ;;  %v1129_v58 = vsel %vm786_vm1, %v1089_v39, %v1128_v51 }
 0x1d5   : > { %v1133_v59 = vperm.slane %v1127_v55, %v3701_v52  ;;  %v1137_v63 = vperm.slane %v1129_v58, %v3701_v52 }
 0x1d6   : > { %v1115_v62 = vsel %vm786_vm1, %v1114_v54, %v1073_v50  ;;  %v1117_v0 = vsel %vm786_vm1, %v1085_v48, %v1116_v57 }
 0x1d7   : > { %v1121_v1 = vperm.slane %v1115_v62, %v3701_v52  ;;  %v1146_v2 = vrot.slane %v1133_v59, 4  ;;  %v1149_v3 = vsel %vm786_vm1, %v1133_v59, %v1148_v56  ;;  %v1125_v4 = vperm.slane %v1117_v0, %v3701_v52 }
 0x1d8   : > { %v1150_v5 = vrot.slane %v1137_v63, 4  ;;  %v1153_v6 = vsel %vm786_vm1, %v1137_v63, %v1152_v53  ;;  %v1192_v13 = vrot.slane %v1149_v3, 4 }
 0x1d9   : > { %v1138_v7 = vrot.slane %v1121_v1, 4  ;;  %v1190_v8 = vrot.slane %v1153_v6, 4  ;;  %v1141_v9 = vsel %vm786_vm1, %v1121_v1, %v1140_v60  ;;  %v1147_v10 = vsel %vm786_vm1, %v1146_v2, %v1109_v43 }
 0x1da   : > { %v1142_v11 = vrot.slane %v1125_v4, 4  ;;  %v1145_v12 = vsel %vm786_vm1, %v1125_v4, %v1144_v61  ;;  %v1151_v15 = vsel %vm786_vm1, %v1150_v5, %v1113_v33  ;;  %v1168_v16 = vrot.slane %v1141_v9, 4 }
 0x1db   : > { %v1139_v17 = vsel %vm786_vm1, %v1138_v7, %v1097_v46  ;;  %v1166_v18 = vrot.slane %v1145_v12, 4  ;;  %v1178_v19 = vrot.slane %v1151_v15, 4  ;;  %v1180_v20 = vrot.slane %v1147_v10, 4 }
 0x1dc   : > { %v1143_v21 = vsel %vm786_vm1, %v1142_v11, %v1101_v40  ;;  %v1156_v22 = vrot.slane %v1139_v17, 4  ;;  %v1191_v23 = vsel %vm786_vm1, %v1190_v8, %v1149_v3  ;;  %v1169_v24 = vsel %vm786_vm1, %v1145_v12, %v1168_v16 }
 0x1dd   : > { %v1154_v25 = vrot.slane %v1143_v21, 4  ;;  %v1167_v29 = vsel %vm786_vm1, %v1166_v18, %v1141_v9  ;;  %v1179_v30 = vsel %vm786_vm1, %v1178_v19, %v1147_v10  ;;  %v1197_v32 = vperm.slane %v1191_v23, %v3687_v27 }
 0x1de   : > { %v1173_v33 = vperm.slane %v1167_v29, %v3687_v27  ;;  %v1185_v35 = vperm.slane %v1179_v30, %v3687_v27  ;;  %v1157_v38 = vsel %vm786_vm1, %v1143_v21, %v1156_v22  ;;  %v1177_v39 = vperm.slane %v1169_v24, %v3687_v27 }
 0x1df   : > { %v1155_v40 = vsel %vm786_vm1, %v1154_v25, %v1139_v17  ;;  %v1226_v43 = vrot.slane %v1197_v32, 4  ;;  %v1165_v44 = vperm.slane %v1157_v38, %v3687_v27  ;;  %v1181_v45 = vsel %vm786_vm1, %v1151_v15, %v1180_v20 }
 0x1e0   : > { %v1161_v46 = vperm.slane %v1155_v40, %v3687_v27  ;;  %v1202_v47 = vrot.slane %v1173_v33, 4  ;;  %v1189_v48 = vperm.slane %v1181_v45, %v3687_v27  ;;  %v1193_v49 = vsel %vm786_vm1, %v1153_v6, %v1192_v13 }
 0x1e1   : > { %v1227_v50 = vsel %vm786_vm1, %v1226_v43, %v1185_v35  ;;  %v1201_v51 = vperm.slane %v1193_v49, %v3687_v27  ;;  %v1214_v53 = vrot.slane %v1177_v39, 4  ;;  %v1228_v54 = vrot.slane %v1185_v35, 4 }
 0x1e2   : > { %v1203_v55 = vsel %vm786_vm1, %v1202_v47, %v1161_v46  ;;  %v1233_v56 = vperm.slane %v1227_v50, %v3701_v52  ;;  %v1204_v57 = vrot.slane %v1161_v46, 4  ;;  %v1216_v58 = vrot.slane %v1165_v44, 4 }
 0x1e3   : > { %v1209_v59 = vperm.slane %v1203_v55, %v3701_v52  ;;  %v1215_v60 = vsel %vm786_vm1, %v1214_v53, %v1165_v44  ;;  %v1238_v61 = vrot.slane %v1201_v51, 4  ;;  %v1229_v62 = vsel %vm786_vm1, %v1197_v32, %v1228_v54 }
 0x1e4   : > { %v1250_v63 = vrot.slane %v1233_v56, 4  ;;  %v1221_v0 = vperm.slane %v1215_v60, %v3701_v52  ;;  %v1205_v1 = vsel %vm786_vm1, %v1173_v33, %v1204_v57  ;;  %v1237_v2 = vperm.slane %v1229_v62, %v3701_v52 }
 0x1e5   : > { %v1239_v3 = vsel %vm786_vm1, %v1238_v61, %v1189_v48  ;;  %v1252_v4 = vrot.slane %v1209_v59, 4  ;;  %v1213_v5 = vperm.slane %v1205_v1, %v3701_v52  ;;  %v1217_v12 = vsel %vm786_vm1, %v1177_v39, %v1216_v58 }
 0x1e6   : > { %v1251_v6 = vsel %vm786_vm1, %v1250_v63, %v1209_v59  ;;  %v1245_v13 = vperm.slane %v1239_v3, %v3701_v52  ;;  %v1254_v7 = vrot.slane %v1237_v2, 4  ;;  %v1260_v8 = vrot.slane %v1221_v0, 4 }
 0x1e7   : > { %v1266_v9 = vpack.c.bf16 %v1251_v6, %v1251_v6  ;;  %v1253_v10 = vsel %vm786_vm1, %v1233_v56, %v1252_v4  ;;  %v1256_v11 = vrot.slane %v1213_v5, 4  ;;  %v1240_v22 = vrot.slane %v1189_v48, 4 }
 0x1e8   : > { %v1258_v15 = vrot.slane %v1245_v13, 4  ;;  %v1267_v16 = vpack.c.bf16 %v1253_v10, %v1253_v10  ;;  %v1255_v17 = vsel %vm786_vm1, %v1254_v7, %v1213_v5  ;;  %v1261_v18 = vsel %vm786_vm1, %v1245_v13, %v1260_v8 }
 0x1e9   : > { %v1533_v19 = vsel %vm1528_vm2, %v1266_v9, 0  ;;  %v1268_v20 = vpack.c.bf16 %v1255_v17, %v1255_v17  ;;  %v1271_v21 = vpack.c.bf16 %v1261_v18, %v1261_v18  ;;  %v1257_v25 = vsel %vm786_vm1, %v1237_v2, %v1256_v11 }
 0x1ea   : > { %1542 = vmatpush.bf16.xpose.msra.mxu3 %v1533_v19  ;;  %v1259_v23 = vsel %vm786_vm1, %v1258_v15, %v1221_v0  ;;  %v1552_v24 = vsel %vm1528_vm2, %v1267_v16, 0  ;;  %v1241_v33 = vsel %vm786_vm1, %v1201_v51, %v1240_v22  ;;  %v1225_v35 = vperm.slane %v1217_v12, %v3701_v52 }
 0x1eb   : > { %v1270_v29 = vpack.c.bf16 %v1259_v23, %v1259_v23  ;;  %v1571_v30 = vsel %vm1528_vm2, %v1268_v20, 0  ;;  %v1628_v32 = vsel %vm1528_vm2, %v1271_v21, 0  ;;  %v1249_v38 = vperm.slane %v1241_v33, %v3701_v52 }
 0x1ec   : > { %1580 = vmatpush.bf16.xpose.msra.mxu2 %v1571_v30  ;;  %1637 = vmatpush.bf16.xpose.msrb.mxu1 %v1628_v32  ;;  %v1269_v40 = vpack.c.bf16 %v1257_v25, %v1257_v25  ;;  %v1010_v44 = vpack.c.bf16 %v3767_v28, %v3767_v28  ;;  %v1012_v48 = vpack.c.bf16 %v3774_v34, %v3774_v34  ;;  %v1264_v28 = vrot.slane %v1225_v35, 4 }
 0x1ed   : > { %v1609_v39 = vsel %vm1528_vm2, %v1270_v29, 0  ;;  %v1262_v43 = vrot.slane %v1249_v38, 4  ;;  %v1015_v49 = vpack.c.bf16 %v3780_v37, %v3780_v37  ;;  %v1014_v51 = vpack.c.bf16 %v3771_v31, %v3771_v31 }
 0x1ee   : > { %1618 = vmatpush.bf16.xpose.msrb.mxu0 %v1609_v39  ;;  %v1590_v47 = vsel %vm1528_vm2, %v1269_v40, 0  ;;  %v1265_v34 = vsel %vm786_vm1, %v1249_v38, %v1264_v28  ;;  %v1011_v53 = vpack.c.bf16 %v3764_v26, %v3764_v26  ;;  %v1016_v54 = vpack.c.bf16 %v3788_v42, %v3788_v42  ;;  %v673_v42 = vld [vmem:[#allocation2] sm:$0xff] }
 0x1ef   : > { %v1263_v45 = vsel %vm786_vm1, %v1262_v43, %v1225_v35  ;;  %v1273_v37 = vpack.c.bf16 %v1265_v34, %v1265_v34  ;;  %v1013_v55 = vpack.c.bf16 %v3777_v36, %v3777_v36  ;;  %v1017_v56 = vpack.c.bf16 %v3785_v41, %v3785_v41  ;;  %v2989_v41 = vld [vmem:[%s674_s15] ss:$0 sm:$0xff] }
 0x1f0   : > { %v1272_v46 = vpack.c.bf16 %v1263_v45, %v1263_v45  ;;  %v690_v26 = vperm.slane %v3676_v14, 1  ;;  %v677_v60 = vadd.f32 %v2989_v41, %v673_v42 }
 0x1f1   : > { %2710 = vmatmul.msk.bf16.vlgmr.msra.gmra.mxu3 %vm1528_vm2, %v1010_v44  ;;  %v1666_v31 = vsel %vm1528_vm2, %v1273_v37, 0 }
 0x1f2   : > { %1561 = vmatpush.bf16.xpose.msrb.mxu3 %v1552_v24  ;;  %v1647_v50 = vsel %vm1528_vm2, %v1272_v46, 0 }
 0x1f3   : > { %2712 = vmatmul.msk.bf16.vlgmr.msra.gmra.mxu2 %vm1528_vm2, %v1012_v48  ;;  %2715 = vmatmul.msk.bf16.vlgmr.msrb.gmra.mxu1 %vm1528_vm2, %v1015_v49 }
 0x1f4   : > { %1656 = vmatpush.bf16.xpose.msrb.mxu2 %v1647_v50 }
 0x1f5   : > { %2714 = vmatmul.msk.bf16.vlgmr.msrb.gmra.mxu0 %vm1528_vm2, %v1014_v51 }
 0x1fa   : > { %1599 = vmatpush.bf16.xpose.msra.mxu3 %v1590_v47 }
 0x1fe   : > { %v759_v57 = vpop.f32.mrf.mxu1 }
 0x1ff   : > { %v3909_v58 = vadd.f32 %v759_v57, %v690_v26 }
 0x201   : > { %2711 = vmatmul.msk.bf16.vlgmr.msrb.gmra.mxu3 %vm1528_vm2, %v1011_v53  ;;  %1287 = vrot.lane.b32.xlu1 %v3909_v58, %s3448_s25  ;;  %s3463_s25 = smov 40  }
 0x202   : > { %1675 = vmatpush.bf16.xpose.msrb.mxu3 %v1666_v31  ;;  %1284 = vrot.lane.b32.xlu0 %v3909_v58, %s3449_s26  ;;  %s3464_s26 = smov 56  }
 0x203   : > { %2716 = vmatmul.msk.bf16.vlgmr.msrb.gmra.mxu2 %vm1528_vm2, %v1016_v54  ;;  %1290 = vrot.lane.b32.xlu2 %v3909_v58, %s3451_s27  ;;  %s4245_s27 = sld [smem:[#allocation31_spill]] }
 0x206   : > { %v761_v36 = vpop.f32.mrf.mxu1 }
 0x20a   : > { %1275 = vrot.lane.b32.xlu0 %v3909_v58, %s3450_s3 }
 0x211   : > { %2713 = vmatmul.msk.bf16.vlgmr.msra.gmra.mxu3 %vm1528_vm2, %v1013_v55 }
 0x221   : > { %2717 = vmatmul.msk.bf16.vlgmr.msrb.gmra.mxu3 %vm1528_vm2, %v1017_v56 }
 0x25d   : > { %v3939_v45 = vpop.permute.xlu2 %1290 }
 0x270   : > { %v1639_v59 = vpop.f32.mrf.mxu1 }
 0x271   : > { %v1686_v14 = vmul.f32 0.35355338, %v1639_v59 }
 0x272   : > { %v1620_v61 = vpop.f32.mrf.mxu0 }
 0x273   : > { %v1685_v62 = vmul.f32 0.35355338, %v1620_v61  ;;  %v3919_v63 = vadd.f32 %v1686_v14, %v677_v60  ;;  %v3941_v46 = vpop.permute.xlu1 %1287 }
 0x274   : > { %v1544_v0 = vpop.f32.mrf.mxu3  ;;  %v3945_v31 = vpop.permute.xlu0 %1284 }
 0x275   : > { %v3921_v1 = vadd.f32 %v1685_v62, %v677_v60  ;;  %v1712_v2 = vsel %vm1528_vm2, %v3919_v63, -inf  ;;  %v1681_v5 = vmul.f32 0.35355338, %v1544_v0 }
 0x276   : > { %1713 = vmax.xlane.f32.xlu2 %v1712_v2  ;;  %v1582_v3 = vpop.f32.mrf.mxu2 }
 0x277   : > { %v1709_v4 = vsel %vm1528_vm2, %v3921_v1, -inf  ;;  %v1683_v6 = vmul.f32 0.35355338, %v1582_v3  ;;  %v1689_v9 = vadd.f32 %v1681_v5, %v677_v60 }
 0x278   : > { %1710 = vmax.xlane.f32.xlu1 %v1709_v4  ;;  %v1641_v13 = vpop.f32.mrf.mxu1 }
 0x279   : > { %v1691_v7 = vadd.f32 %v1683_v6, %v677_v60  ;;  %v1697_v15 = vsel %vm1528_vm2, %v1689_v9, -inf }
 0x27a   : > { %v1622_v8 = vpop.f32.mrf.mxu0 }
 0x27b   : > { %v1703_v11 = vsel %vm1528_vm2, %v1691_v7, -inf }
 0x27c   : > { %v1546_v10 = vpop.f32.mrf.mxu3  ;;  %v1276_v59 = vpop.permute.xlu0 %1275 }
 0x27e   : > { %1704 = vmax.xlane.f32.xlu2 %v1703_v11  ;;  %v1584_v12 = vpop.f32.mrf.mxu2 }
 0x280   : > { %1698 = vmax.xlane.f32.xlu1 %v1697_v15 }
 0x284   : > { %v1563_v16 = vpop.f32.mrf.mxu3 }
 0x285   : > { %v1682_v17 = vmul.f32 0.35355338, %v1563_v16 }
 0x286   : > { %v1658_v18 = vpop.f32.mrf.mxu2 }
 0x287   : > { %v1690_v19 = vadd.f32 %v1682_v17, %v677_v60  ;;  %v1687_v20 = vmul.f32 0.35355338, %v1658_v18 }
 0x289   : > { %v1700_v21 = vsel %vm1528_vm2, %v1690_v19, -inf  ;;  %v1695_v23 = vadd.f32 %v1687_v20, %v677_v60  ;;  %v1298_v20 = vrot.slane %v3909_v58, 4 }
 0x28a   : > { %1701 = vmax.xlane.f32.xlu2 %v1700_v21 }
 0x28b   : > { %v1715_v25 = vsel %vm1528_vm2, %v1695_v23, -inf }
 0x28c   : > { %v1565_v22 = vpop.f32.mrf.mxu3 }
 0x28e   : > { %v1660_v24 = vpop.f32.mrf.mxu2 }
 0x292   : > { %1716 = vmax.xlane.f32.xlu2 %v1715_v25 }
 0x294   : > { %v1601_v29 = vpop.f32.mrf.mxu3 }
 0x295   : > { %v1684_v30 = vmul.f32 0.35355338, %v1601_v29  ;;  %v1322_v29 = vrot.slane %v3945_v31, 4 }
 0x297   : > { %v1692_v32 = vadd.f32 %v1684_v30, %v677_v60 }
 0x299   : > { %1278 = vrot.lane.b32.xlu1 %v3909_v58, %s3453_s19  ;;  %v1706_v33 = vsel %vm1528_vm2, %v1692_v32, -inf }
 0x29a   : > { %1707 = vmax.xlane.f32.xlu0 %v1706_v33 }
 0x29c   : > { %v1603_v35 = vpop.f32.mrf.mxu3 }
 0x2a4   : > { %v1677_v38 = vpop.f32.mrf.mxu3 }
 0x2a5   : > { %v1688_v39 = vmul.f32 0.35355338, %v1677_v38 }
 0x2a7   : > { %v1696_v40 = vadd.f32 %v1688_v39, %v677_v60 }
 0x2a9   : > { %v1718_v43 = vsel %vm1528_vm2, %v1696_v40, -inf }
 0x2aa   : > { %1281 = vrot.lane.b32.xlu2 %v3909_v58, %s3452_s30  ;;  %1719 = vmax.xlane.f32.xlu0 %v1718_v43  ;;  %v1323_v43 = vsel %vm786_vm1, %v3939_v45, %v1322_v29  ;;  %s4246_s30 = sld [smem:[#allocation32_spill]] }
 0x2ac   : > { %v1679_v44 = vpop.f32.mrf.mxu3 }
 0x2b0   : > { %s670_s19 = scalar_lea.vmem %s4246_s30, %s2674_s29 }
 0x2be   : > { %1293 = vrot.lane.b32.xlu0 %v3909_v58, %s3454_s20 }
 0x2e9   : > { %v1714_v47 = vpop.xlane.xlu2 %1713 }
 0x2ea   : > { %v1726_v13 = vsub.f32 %v3919_v63, %v1714_v47  ;;  %v1310_v63 = vrot.slane %v1276_v59, 4 }
 0x2eb   : > { %v1711_v48 = vpop.xlane.xlu1 %1710 }
 0x2ec   : > { %v1725_v36 = vsub.f32 %v3921_v1, %v1711_v48  ;;  %v1739_v8 = vmul.f32 1.442695, %v1726_v13 }
 0x2ee   : > { %v1737_v42 = vmul.f32 1.442695, %v1725_v36 }
 0x2f1   : > { %v1705_v49 = vpop.xlane.xlu2 %1704 }
 0x2f2   : > { %v1723_v50 = vsub.f32 %v1691_v7, %v1705_v49 }
 0x2f3   : > { %v1699_v51 = vpop.xlane.xlu1 %1698 }
 0x2f4   : > { %v1721_v28 = vsub.f32 %v1689_v9, %v1699_v51  ;;  %v1733_v34 = vmul.f32 1.442695, %v1723_v50  ;;  %v1331_v51 = vperm.slane %v1323_v43, %v3687_v27 }
 0x2f6   : > { %v1729_v37 = vmul.f32 1.442695, %v1721_v28  ;;  %2997 = vpow2.f32 %v1733_v34 }
 0x2f8   : > { %2999 = vpow2.f32 %v1729_v37  ;;  %v1334_v37 = vrot.slane %v3941_v46, 4 }
 0x2fc   : > { %v3943_v53 = vpop.eup %2997 }
 0x2fd   : > { %v1702_v54 = vpop.xlane.xlu2 %1701  ;;  %v1751_v55 = vsel %vm1528_vm2, %v3943_v53, 0.0 }
 0x2fe   : > { %v3949_v56 = vpop.eup %2999  ;;  %v1722_v26 = vsub.f32 %v1690_v19, %v1702_v54  ;;  %1752 = vadd.xlane.f32.xlu1 %v1751_v55 }
 0x2ff   : > { %v1745_v57 = vsel %vm1528_vm2, %v3949_v56, 0.0 }
 0x300   : > { %1746 = vadd.xlane.f32.xlu2 %v1745_v57  ;;  %v1731_v41 = vmul.f32 1.442695, %v1722_v26 }
 0x302   : > { %3001 = vpow2.f32 %v1731_v41  ;;  %v1382_v41 = vrot.slane %v1331_v51, 4 }
 0x303   : > { %3003 = vpow2.f32 %v1737_v42 }
 0x305   : > { %v1717_v61 = vpop.xlane.xlu2 %1716 }
 0x306   : > { %v1727_v3 = vsub.f32 %v1695_v23, %v1717_v61 }
 0x308   : > { %v3954_v14 = vpop.eup %3001  ;;  %v1741_v5 = vmul.f32 1.442695, %v1727_v3 }
 0x309   : > { %v1748_v60 = vsel %vm1528_vm2, %v3954_v14, 0.0  ;;  %v3958_v0 = vpop.eup %3003 }
 0x30a   : > { %1749 = vadd.xlane.f32.xlu1 %v1748_v60  ;;  %v1757_v1 = vsel %vm1528_vm2, %v3958_v0, 0.0 }
 0x30b   : > { %v1279_v12 = vpop.permute.xlu1 %1278 }
 0x30c   : > { %v1296_v18 = vrot.slane %v1279_v12, 4  ;;  %v1299_v21 = vsel %vm786_vm1, %v1279_v12, %v1298_v20 }
 0x30d   : > { %v1708_v62 = vpop.xlane.xlu0 %1707  ;;  %v1282_v15 = vpop.permute.xlu2 %1281  ;;  %v1307_v33 = vperm.slane %v1299_v21, %v3687_v27 }
 0x30e   : > { %v1724_v2 = vsub.f32 %v1692_v32, %v1708_v62  ;;  %v1308_v19 = vrot.slane %v1282_v15, 4  ;;  %v1311_v22 = vsel %vm786_vm1, %v1282_v15, %v1310_v63  ;;  %v1297_v24 = vsel %vm786_vm1, %v1296_v18, %v3909_v58 }
 0x30f   : > { %v1320_v32 = vrot.slane %v3939_v45, 4  ;;  %v1319_v35 = vperm.slane %v1311_v22, %v3687_v27  ;;  %v1303_v38 = vperm.slane %v1297_v24, %v3687_v27  ;;  %v1358_v47 = vrot.slane %v1307_v33, 4 }
 0x310   : > { %v1735_v4 = vmul.f32 1.442695, %v1724_v2  ;;  %v1309_v25 = vsel %vm786_vm1, %v1308_v19, %v1276_v59 }
 0x311   : > { %v1315_v39 = vperm.slane %v1309_v25, %v3687_v27  ;;  %v1321_v44 = vsel %vm786_vm1, %v1320_v32, %v3945_v31  ;;  %v1356_v48 = vrot.slane %v1319_v35, 4  ;;  %v1346_v49 = vrot.slane %v1303_v38, 4 }
 0x312   : > { %3005 = vpow2.f32 %v1735_v4  ;;  %1758 = vadd.xlane.f32.xlu1 %v1757_v1  ;;  %v1359_v28 = vsel %vm786_vm1, %v1319_v35, %v1358_v47  ;;  %v1327_v34 = vperm.slane %v1321_v44, %v3687_v27 }
 0x313   : > { %3007 = vpow2.f32 %v1741_v5  ;;  %v1344_v50 = vrot.slane %v1315_v39, 4  ;;  %v1347_v54 = vsel %vm786_vm1, %v1315_v39, %v1346_v49  ;;  %v1357_v55 = vsel %vm786_vm1, %v1356_v48, %v1307_v33 }
 0x314   : > { %3009 = vpow2.f32 %v1739_v8  ;;  %v1367_v31 = vperm.slane %v1359_v28, %v3701_v52  ;;  %v1355_v42 = vperm.slane %v1347_v54, %v3701_v52  ;;  %v1370_v60 = vrot.slane %v1327_v34, 4 }
 0x315   : > { %v1345_v26 = vsel %vm786_vm1, %v1344_v50, %v1303_v38  ;;  %v1363_v61 = vperm.slane %v1357_v55, %v3701_v52 }
 0x316   : > { %v1351_v2 = vperm.slane %v1345_v26, %v3701_v52  ;;  %v1406_v5 = vrot.slane %v1367_v31, 4 }
 0x317   : > { %v1402_v18 = vrot.slane %v1363_v61, 4 }
 0x318   : > { %v3962_v6 = vpop.eup %3005 }
 0x319   : > { %v1754_v7 = vsel %vm1528_vm2, %v3962_v6, 0.0  ;;  %v3967_v10 = vpop.eup %3007 }
 0x31a   : > { %1755 = vadd.xlane.f32.xlu0 %v1754_v7  ;;  %v1763_v17 = vsel %vm1528_vm2, %v3967_v10, 0.0  ;;  %v3974_v23 = vpop.eup %3009  ;;  %v1398_v7 = vrot.slane %v1355_v42, 4 }
 0x31d   : > { %v1720_v9 = vpop.xlane.xlu0 %1719 }
 0x31e   : > { %v1728_v11 = vsub.f32 %v1696_v40, %v1720_v9  ;;  %v1760_v40 = vsel %vm1528_vm2, %v3974_v23, 0.0 }
 0x320   : > { %v1743_v16 = vmul.f32 1.442695, %v1728_v11 }
 0x322   : > { %3011 = vpow2.f32 %v1743_v16  ;;  %1764 = vadd.xlane.f32.xlu0 %v1763_v17  ;;  %v1394_v17 = vrot.slane %v1351_v2, 4 }
 0x328   : > { %v3980_v30 = vpop.eup %3011 }
 0x329   : > { %v1766_v58 = vsel %vm1528_vm2, %v3980_v30, 0.0 }
 0x32a   : > { %1761 = vadd.xlane.f32.xlu0 %v1760_v40  ;;  %1767 = vadd.xlane.f32.xlu2 %v1766_v58 }
 0x330   : > { %v1294_v45 = vpop.permute.xlu0 %1293 }
 0x331   : > { %v1332_v57 = vrot.slane %v1294_v45, 4  ;;  %v1335_v36 = vsel %vm786_vm1, %v1294_v45, %v1334_v37 }
 0x332   : > { %v1343_v59 = vperm.slane %v1335_v36, %v3687_v27 }
 0x333   : > { %v1333_v62 = vsel %vm786_vm1, %v1332_v57, %v3941_v46 }
 0x334   : > { %v1339_v3 = vperm.slane %v1333_v62, %v3687_v27  ;;  %v1380_v4 = vrot.slane %v1343_v59, 4  ;;  %v1383_v1 = vsel %vm786_vm1, %v1343_v59, %v1382_v41 }
 0x335   : > { %v1391_v13 = vperm.slane %v1383_v1, %v3701_v52 }
 0x336   : > { %v1368_v8 = vrot.slane %v1339_v3, 4  ;;  %v1371_v9 = vsel %vm786_vm1, %v1339_v3, %v1370_v60  ;;  %v1381_v11 = vsel %vm786_vm1, %v1380_v4, %v1331_v51 }
 0x337   : > { %v1379_v12 = vperm.slane %v1371_v9, %v3701_v52  ;;  %v1387_v46 = vperm.slane %v1381_v11, %v3701_v52  ;;  %v1404_v15 = vrot.slane %v1391_v13, 4  ;;  %v1407_v16 = vsel %vm786_vm1, %v1391_v13, %v1406_v5 }
 0x338   : > { %v1369_v19 = vsel %vm786_vm1, %v1368_v8, %v1327_v34  ;;  %v1444_v63 = vrot.slane %v1407_v16, 4 }
 0x339   : > { %v1375_v20 = vperm.slane %v1369_v19, %v3701_v52  ;;  %v1396_v21 = vrot.slane %v1379_v12, 4  ;;  %v1399_v22 = vsel %vm786_vm1, %v1379_v12, %v1398_v7  ;;  %v1400_v24 = vrot.slane %v1387_v46, 4 }
 0x33a   : > { %v1403_v25 = vsel %vm786_vm1, %v1387_v46, %v1402_v18  ;;  %v1405_v29 = vsel %vm786_vm1, %v1404_v15, %v1367_v31  ;;  %v1420_v32 = vrot.slane %v1399_v22, 4 }
 0x33b   : > { %v1392_v33 = vrot.slane %v1375_v20, 4  ;;  %v1395_v35 = vsel %vm786_vm1, %v1375_v20, %v1394_v17  ;;  %v1397_v38 = vsel %vm786_vm1, %v1396_v21, %v1355_v42  ;;  %v1401_v39 = vsel %vm786_vm1, %v1400_v24, %v1363_v61 }
 0x33c   : > { %v1408_v40 = vrot.slane %v1397_v38, 4  ;;  %v1422_v58 = vrot.slane %v1395_v35, 4  ;;  %v1432_v43 = vrot.slane %v1405_v29, 4  ;;  %v1434_v44 = vrot.slane %v1401_v39, 4 }
 0x33d   : > { %v1445_v47 = vsel %vm786_vm1, %v1444_v63, %v1403_v25  ;;  %v1446_v48 = vrot.slane %v1403_v25, 4  ;;  %v1393_v49 = vsel %vm786_vm1, %v1392_v33, %v1351_v2  ;;  %v1421_v50 = vsel %vm786_vm1, %v1420_v32, %v1395_v35 }
 0x33e   : > { %v1435_v51 = vsel %vm786_vm1, %v1405_v29, %v1434_v44  ;;  %v1451_v28 = vperm.slane %v1445_v47, %v3687_v27  ;;  %v1409_v34 = vsel %vm786_vm1, %v1408_v40, %v1393_v49  ;;  %v1410_v37 = vrot.slane %v1393_v49, 4 }
 0x33f   : > { %v1447_v54 = vsel %vm786_vm1, %v1407_v16, %v1446_v48  ;;  %v1415_v55 = vperm.slane %v1409_v34, %v3687_v27  ;;  %v1427_v45 = vperm.slane %v1421_v50, %v3687_v27  ;;  %v1433_v26 = vsel %vm786_vm1, %v1432_v43, %v1401_v39 }
 0x340   : > { %v1455_v31 = vperm.slane %v1447_v54, %v3687_v27  ;;  %v1439_v57 = vperm.slane %v1433_v26, %v3687_v27  ;;  %v1480_v36 = vrot.slane %v1451_v28, 4  ;;  %v1411_v41 = vsel %vm786_vm1, %v1397_v38, %v1410_v37 }
 0x341   : > { %v1456_v42 = vrot.slane %v1427_v45, 4  ;;  %v1458_v59 = vrot.slane %v1415_v55, 4  ;;  %v1419_v60 = vperm.slane %v1411_v41, %v3687_v27  ;;  %v1423_v61 = vsel %vm786_vm1, %v1399_v22, %v1422_v58 }
 0x342   : > { %v1481_v62 = vsel %vm786_vm1, %v1480_v36, %v1439_v57  ;;  %v1482_v2 = vrot.slane %v1439_v57, 4  ;;  %v1431_v3 = vperm.slane %v1423_v61, %v3687_v27  ;;  %v1443_v4 = vperm.slane %v1435_v51, %v3687_v27 }
 0x343   : > { %v1457_v1 = vsel %vm786_vm1, %v1456_v42, %v1415_v55  ;;  %v1487_v5 = vperm.slane %v1481_v62, %v3701_v52  ;;  %v1459_v13 = vsel %vm786_vm1, %v1427_v45, %v1458_v59  ;;  %v1492_v7 = vrot.slane %v1455_v31, 4 }
 0x344   : > { %v1463_v8 = vperm.slane %v1457_v1, %v3701_v52  ;;  %v1467_v9 = vperm.slane %v1459_v13, %v3701_v52  ;;  %v1483_v11 = vsel %vm786_vm1, %v1451_v28, %v1482_v2  ;;  %v1468_v12 = vrot.slane %v1431_v3, 4 }
 0x345   : > { %v1504_v46 = vrot.slane %v1487_v5, 4  ;;  %v1491_v15 = vperm.slane %v1483_v11, %v3701_v52  ;;  %v1493_v16 = vsel %vm786_vm1, %v1492_v7, %v1443_v4  ;;  %v1470_v17 = vrot.slane %v1419_v60, 4 }
 0x346   : > { %v1506_v18 = vrot.slane %v1463_v8, 4  ;;  %v1469_v19 = vsel %vm786_vm1, %v1468_v12, %v1419_v60  ;;  %v1499_v63 = vperm.slane %v1493_v16, %v3701_v52  ;;  %v1510_v20 = vrot.slane %v1467_v9, 4 }
 0x347   : > { %v1505_v21 = vsel %vm786_vm1, %v1504_v46, %v1463_v8  ;;  %v1508_v22 = vrot.slane %v1491_v15, 4  ;;  %v1475_v24 = vperm.slane %v1469_v19, %v3701_v52  ;;  %v1471_v25 = vsel %vm786_vm1, %v1431_v3, %v1470_v17 }
 0x348   : > { %v1520_v29 = vpack.c.bf16 %v1505_v21, %v1505_v21  ;;  %v1507_v32 = vsel %vm786_vm1, %v1487_v5, %v1506_v18  ;;  %v1512_v33 = vrot.slane %v1499_v63, 4  ;;  %v1511_v35 = vsel %vm786_vm1, %v1491_v15, %v1510_v20 }
 0x349   : > { %v1521_v38 = vpack.c.bf16 %v1507_v32, %v1507_v32  ;;  %v1509_v39 = vsel %vm786_vm1, %v1508_v22, %v1467_v9  ;;  %v1523_v40 = vpack.c.bf16 %v1511_v35, %v1511_v35  ;;  %v1514_v58 = vrot.slane %v1475_v24, 4 }
 0x34a   : > { %v1798_v43 = vsel %vm1796_vm3, %v1520_v29, 0  ;;  %v1522_v44 = vpack.c.bf16 %v1509_v39, %v1509_v39  ;;  %v1513_v47 = vsel %vm786_vm1, %v1512_v33, %v1475_v24  ;;  %v1479_v48 = vperm.slane %v1471_v25, %v3701_v52 }
 0x34b   : > { %1807 = vmatpush.bf16.msra.mxu0 %v1798_v43  ;;  %v1817_v49 = vsel %vm1796_vm3, %v1521_v38, 0  ;;  %v1524_v50 = vpack.c.bf16 %v1513_v47, %v1513_v47  ;;  %v1855_v51 = vsel %vm1796_vm3, %v1523_v40, 0  ;;  %v1515_v28 = vsel %vm786_vm1, %v1499_v63, %v1514_v58 }
 0x34c   : > { %1826 = vmatpush.bf16.msra.mxu1 %v1817_v49  ;;  %v1836_v34 = vsel %vm1796_vm3, %v1522_v44, 0  ;;  %1864 = vmatpush.bf16.msra.mxu3 %v1855_v51  ;;  %v1525_v37 = vpack.c.bf16 %v1515_v28, %v1515_v28  ;;  %v1494_v54 = vrot.slane %v1443_v4, 4  ;;  %v1518_v45 = vrot.slane %v1479_v48, 4 }
 0x34d   : > { %1845 = vmatpush.bf16.msra.mxu2 %v1836_v34  ;;  %v1874_v55 = vsel %vm1796_vm3, %v1524_v50, 0 }
 0x34e   : > { %v1893_v26 = vsel %vm1796_vm3, %v1525_v37, 0  ;;  %v1495_v57 = vsel %vm786_vm1, %v1455_v31, %v1494_v54 }
 0x34f   : > { %1883 = vmatpush.bf16.msrb.mxu0 %v1874_v55  ;;  %v1503_v36 = vperm.slane %v1495_v57, %v3701_v52 }
 0x350   : > { %1902 = vmatpush.bf16.msrb.mxu1 %v1893_v26 }
 0x351   : > { %v1516_v41 = vrot.slane %v1503_v36, 4  ;;  %v1519_v42 = vsel %vm786_vm1, %v1503_v36, %v1518_v45 }
 0x352   : > { %v1527_v59 = vpack.c.bf16 %v1519_v42, %v1519_v42 }
 0x353   : > { %v1517_v60 = vsel %vm786_vm1, %v1516_v41, %v1479_v48 }
 0x354   : > { %v1526_v61 = vpack.c.bf16 %v1517_v60, %v1517_v60  ;;  %v1931_v62 = vsel %vm1796_vm3, %v1527_v59, 0 }
 0x355   : > { %1940 = vmatpush.bf16.msrb.mxu3 %v1931_v62 }
 0x356   : > { %v1912_v2 = vsel %vm1796_vm3, %v1526_v61, 0 }
 0x357   : > { %1921 = vmatpush.bf16.msrb.mxu2 %v1912_v2 }
 0x371   : > { %v1753_v3 = vpop.xlane.xlu1 %1752 }
 0x372   : > { %3013 = vrcp.f32 %v1753_v3 }
 0x373   : > { %v1747_v4 = vpop.xlane.xlu2 %1746 }
 0x374   : > { %3015 = vrcp.f32 %v1747_v4 }
 0x378   : > { %v3014_v31 = vpop.eup %3013 }
 0x379   : > { %v1779_v1 = vmul.f32 %v3014_v31, %v3943_v53 }
 0x37a   : > { %v3016_v5 = vpop.eup %3015 }
 0x37b   : > { %v1777_v13 = vmul.f32 %v3016_v5, %v3949_v56  ;;  %v1787_v7 = vpack.c.bf16 %v1779_v1, %v1779_v1 }
 0x37d   : > { %v1785_v8 = vpack.c.bf16 %v1777_v13, %v1777_v13  ;;  %v1750_v9 = vpop.xlane.xlu1 %1749  ;;  %2720 = vmatmul.msk.bf16.vlgmr.msra.gmra.mxu2 %vm1528_vm2, %v1787_v7 }
 0x37e   : > { %3017 = vrcp.f32 %v1750_v9 }
 0x37f   : > { %2718 = vmatmul.msk.bf16.vlgmr.msra.gmra.mxu0 %vm1528_vm2, %v1785_v8 }
 0x384   : > { %v3018_v11 = vpop.eup %3017 }
 0x385   : > { %v1778_v12 = vmul.f32 %v3018_v11, %v3954_v14  ;;  %v1759_v46 = vpop.xlane.xlu1 %1758 }
 0x386   : > { %3019 = vrcp.f32 %v1759_v46 }
 0x387   : > { %v1786_v15 = vpack.c.bf16 %v1778_v12, %v1778_v12 }
 0x389   : > { %2719 = vmatmul.msk.bf16.vlgmr.msra.gmra.mxu1 %vm1528_vm2, %v1786_v15 }
 0x38c   : > { %v3020_v53 = vpop.eup %3019 }
 0x38d   : > { %v1781_v16 = vmul.f32 %v3020_v53, %v3958_v0  ;;  %v1756_v56 = vpop.xlane.xlu0 %1755 }
 0x38e   : > { %3021 = vrcp.f32 %v1756_v56 }
 0x38f   : > { %v1789_v17 = vpack.c.bf16 %v1781_v16, %v1781_v16 }
 0x391   : > { %2722 = vmatmul.msk.bf16.vlgmr.msrb.gmra.mxu0 %vm1528_vm2, %v1789_v17 }
 0x394   : > { %v3022_v18 = vpop.eup %3021 }
 0x395   : > { %v1780_v19 = vmul.f32 %v3022_v18, %v3962_v6  ;;  %v1765_v63 = vpop.xlane.xlu0 %1764 }
 0x396   : > { %3023 = vrcp.f32 %v1765_v63 }
 0x397   : > { %v1788_v20 = vpack.c.bf16 %v1780_v19, %v1780_v19 }
 0x399   : > { %2721 = vmatmul.msk.bf16.vlgmr.msra.gmra.mxu3 %vm1528_vm2, %v1788_v20 }
 0x39c   : > { %v3024_v14 = vpop.eup %3023 }
 0x39d   : > { %v1783_v21 = vmul.f32 %v3024_v14, %v3967_v10  ;;  %v1768_v22 = vpop.xlane.xlu2 %1767  ;;  %v1762_v24 = vpop.xlane.xlu0 %1761 }
 0x39e   : > { %3025 = vrcp.f32 %v1768_v22 }
 0x39f   : > { %v1791_v0 = vpack.c.bf16 %v1783_v21, %v1783_v21  ;;  %3027 = vrcp.f32 %v1762_v24 }
 0x3a1   : > { %2724 = vmatmul.msk.bf16.vlgmr.msrb.gmra.mxu2 %vm1528_vm2, %v1791_v0 }
 0x3a4   : > { %v3026_v25 = vpop.eup %3025 }
 0x3a5   : > { %v3028_v29 = vpop.eup %3027  ;;  %v1784_v32 = vmul.f32 %v3026_v25, %v3980_v30 }
 0x3a6   : > { %v1782_v6 = vmul.f32 %v3028_v29, %v3974_v23 }
 0x3a7   : > { %v1792_v33 = vpack.c.bf16 %v1784_v32, %v1784_v32 }
 0x3a8   : > { %v1790_v35 = vpack.c.bf16 %v1782_v6, %v1782_v6 }
 0x3a9   : > { %2725 = vmatmul.msk.bf16.vlgmr.msrb.gmra.mxu3 %vm1528_vm2, %v1792_v33 }
 0x3aa   : > { %2723 = vmatmul.msk.bf16.vlgmr.msrb.gmra.mxu1 %vm1528_vm2, %v1790_v35 }
 0x3fc   : > { %v1809_v10 = vpop.f32.mrf.mxu0 }
 0x3fd   : > { %v1948_v30 = vrot.slane %v1809_v10, 4 }
 0x400   : > { %v1847_v38 = vpop.f32.mrf.mxu2 }
 0x401   : > { %v1946_v50 = vrot.slane %v1847_v38, 4  ;;  %v1949_v23 = vsel %vm786_vm1, %v1847_v38, %v1948_v30 }
 0x402   : > { %v1957_v54 = vperm.slane %v1949_v23, %v3687_v27 }
 0x403   : > { %v1947_v37 = vsel %vm786_vm1, %v1946_v50, %v1809_v10 }
 0x404   : > { %v1811_v39 = vpop.f32.mrf.mxu0  ;;  %v1953_v36 = vperm.slane %v1947_v37, %v3687_v27  ;;  %v2008_v61 = vrot.slane %v1957_v54, 4 }
 0x406   : > { %v1828_v40 = vpop.f32.mrf.mxu1  ;;  %v1996_v3 = vrot.slane %v1953_v36, 4 }
 0x407   : > { %v1960_v51 = vrot.slane %v1828_v40, 4 }
 0x408   : > { %v1849_v58 = vpop.f32.mrf.mxu2 }
 0x40e   : > { %v1830_v43 = vpop.f32.mrf.mxu1  ;;  %v1885_v44 = vpop.f32.mrf.mxu0 }
 0x40f   : > { %v1972_v41 = vrot.slane %v1885_v44, 4 }
 0x416   : > { %v1887_v47 = vpop.f32.mrf.mxu0 }
 0x41c   : > { %v1866_v48 = vpop.f32.mrf.mxu3 }
 0x41d   : > { %v1958_v49 = vrot.slane %v1866_v48, 4  ;;  %v1961_v34 = vsel %vm786_vm1, %v1866_v48, %v1960_v51 }
 0x41e   : > { %v1969_v45 = vperm.slane %v1961_v34, %v3687_v27 }
 0x41f   : > { %v1959_v28 = vsel %vm786_vm1, %v1958_v49, %v1828_v40 }
 0x420   : > { %v1965_v55 = vperm.slane %v1959_v28, %v3687_v27  ;;  %v2006_v2 = vrot.slane %v1969_v45, 4  ;;  %v2009_v31 = vsel %vm786_vm1, %v1969_v45, %v2008_v61 }
 0x421   : > { %v2017_v46 = vperm.slane %v2009_v31, %v3701_v52 }
 0x422   : > { %v1994_v62 = vrot.slane %v1965_v55, 4  ;;  %v1997_v5 = vsel %vm786_vm1, %v1965_v55, %v1996_v3  ;;  %v2007_v8 = vsel %vm786_vm1, %v2006_v2, %v1957_v54 }
 0x423   : > { %v2005_v16 = vperm.slane %v1997_v5, %v3701_v52  ;;  %v2013_v19 = vperm.slane %v2007_v8, %v3701_v52  ;;  %v2056_v0 = vrot.slane %v2017_v46, 4 }
 0x424   : > { %v1868_v26 = vpop.f32.mrf.mxu3  ;;  %v1923_v57 = vpop.f32.mrf.mxu2  ;;  %v1995_v7 = vsel %vm786_vm1, %v1994_v62, %v1953_v36 }
 0x425   : > { %v1970_v42 = vrot.slane %v1923_v57, 4  ;;  %v1973_v59 = vsel %vm786_vm1, %v1923_v57, %v1972_v41  ;;  %v2001_v18 = vperm.slane %v1995_v7, %v3701_v52  ;;  %v2048_v29 = vrot.slane %v2005_v16, 4 }
 0x426   : > { %v1981_v1 = vperm.slane %v1973_v59, %v3687_v27  ;;  %v2052_v58 = vrot.slane %v2013_v19, 4 }
 0x427   : > { %v1904_v60 = vpop.f32.mrf.mxu1  ;;  %v1971_v4 = vsel %vm786_vm1, %v1970_v42, %v1885_v44  ;;  %v2044_v40 = vrot.slane %v2001_v18, 4 }
 0x428   : > { %v1984_v13 = vrot.slane %v1904_v60, 4  ;;  %v1977_v9 = vperm.slane %v1971_v4, %v3687_v27  ;;  %v2032_v56 = vrot.slane %v1981_v1, 4 }
 0x42a   : > { %v2020_v14 = vrot.slane %v1977_v9, 4 }
 0x42c   : > { %v1925_v11 = vpop.f32.mrf.mxu2  ;;  %v1942_v12 = vpop.f32.mrf.mxu3 }
 0x42d   : > { %v1982_v15 = vrot.slane %v1942_v12, 4  ;;  %v1985_v53 = vsel %vm786_vm1, %v1942_v12, %v1984_v13 }
 0x42e   : > { %v1993_v17 = vperm.slane %v1985_v53, %v3687_v27 }
 0x42f   : > { %v1983_v63 = vsel %vm786_vm1, %v1982_v15, %v1904_v60  ;;  %v1906_v20 = vpop.f32.mrf.mxu1 }
 0x430   : > { %v1989_v21 = vperm.slane %v1983_v63, %v3687_v27  ;;  %v2030_v22 = vrot.slane %v1993_v17, 4  ;;  %v2033_v24 = vsel %vm786_vm1, %v1993_v17, %v2032_v56 }
 0x431   : > { %v2041_v25 = vperm.slane %v2033_v24, %v3701_v52 }
 0x432   : > { %v2018_v32 = vrot.slane %v1989_v21, 4  ;;  %v2021_v6 = vsel %vm786_vm1, %v1989_v21, %v2020_v14  ;;  %v2031_v33 = vsel %vm786_vm1, %v2030_v22, %v1981_v1 }
 0x433   : > { %v2029_v35 = vperm.slane %v2021_v6, %v3701_v52  ;;  %v2037_v10 = vperm.slane %v2031_v33, %v3701_v52  ;;  %v2054_v38 = vrot.slane %v2041_v25, 4  ;;  %v2057_v39 = vsel %vm786_vm1, %v2041_v25, %v2056_v0 }
 0x434   : > { %v2019_v43 = vsel %vm786_vm1, %v2018_v32, %v1977_v9  ;;  %v1944_v44 = vpop.f32.mrf.mxu3  ;;  %v2094_v23 = vrot.slane %v2057_v39, 4 }
 0x435   : > { %v2025_v47 = vperm.slane %v2019_v43, %v3701_v52  ;;  %v2046_v48 = vrot.slane %v2029_v35, 4  ;;  %v2049_v49 = vsel %vm786_vm1, %v2029_v35, %v2048_v29  ;;  %v2050_v50 = vrot.slane %v2037_v10, 4 }
 0x436   : > { %v2053_v30 = vsel %vm786_vm1, %v2037_v10, %v2052_v58  ;;  %v2055_v51 = vsel %vm786_vm1, %v2054_v38, %v2017_v46  ;;  %v2070_v28 = vrot.slane %v2049_v49, 4 }
 0x437   : > { %v2042_v34 = vrot.slane %v2025_v47, 4  ;;  %v2047_v37 = vsel %vm786_vm1, %v2046_v48, %v2005_v16  ;;  %v2051_v54 = vsel %vm786_vm1, %v2050_v50, %v2013_v19  ;;  %v2082_v55 = vrot.slane %v2055_v51, 4 }
 0x438   : > { %v2084_v45 = vrot.slane %v2051_v54, 4  ;;  %v2096_v26 = vrot.slane %v2053_v30, 4  ;;  %v2045_v57 = vsel %vm786_vm1, %v2025_v47, %v2044_v40  ;;  %v2058_v36 = vrot.slane %v2047_v37, 4 }
 0x439   : > { %v2043_v41 = vsel %vm786_vm1, %v2042_v34, %v2001_v18  ;;  %v2071_v42 = vsel %vm786_vm1, %v2070_v28, %v2045_v57  ;;  %v2072_v59 = vrot.slane %v2045_v57, 4  ;;  %v2083_v60 = vsel %vm786_vm1, %v2082_v55, %v2051_v54  ;;  %v2802_v57 = vld [vmem:[#allocation7] sm:$0xff] }
 0x43a   : > { %v2059_v61 = vsel %vm786_vm1, %v2058_v36, %v2043_v41  ;;  %v2060_v62 = vrot.slane %v2043_v41, 4  ;;  %v2077_v2 = vperm.slane %v2071_v42, %v3687_v27  ;;  %v2089_v3 = vperm.slane %v2083_v60, %v3687_v27 }
 0x43b   : > { %v2065_v4 = vperm.slane %v2059_v61, %v3687_v27  ;;  %v2095_v31 = vsel %vm786_vm1, %v2094_v23, %v2053_v30  ;;  %v2073_v1 = vsel %vm786_vm1, %v2049_v49, %v2072_v59  ;;  %v2085_v5 = vsel %vm786_vm1, %v2055_v51, %v2084_v45  ;;  %v2804_v45 = vld [vmem:[#allocation7 + $0x10] sm:$0xff] }
 0x43c   : > { %v2101_v13 = vperm.slane %v2095_v31, %v3687_v27  ;;  %v2132_v7 = vrot.slane %v2089_v3, 4  ;;  %v2106_v8 = vrot.slane %v2077_v2, 4  ;;  %v2061_v9 = vsel %vm786_vm1, %v2047_v37, %v2060_v62 }
 0x43d   : > { %v2108_v11 = vrot.slane %v2065_v4, 4  ;;  %v2069_v12 = vperm.slane %v2061_v9, %v3687_v27  ;;  %v2081_v46 = vperm.slane %v2073_v1, %v3687_v27  ;;  %v2093_v15 = vperm.slane %v2085_v5, %v3687_v27 }
 0x43e   : > { %v2133_v53 = vsel %vm786_vm1, %v2101_v13, %v2132_v7  ;;  %v2107_v16 = vsel %vm786_vm1, %v2106_v8, %v2065_v4  ;;  %v2130_v56 = vrot.slane %v2101_v13, 4  ;;  %v2097_v17 = vsel %vm786_vm1, %v2057_v39, %v2096_v26  ;;  %v2803_v26 = vld [vmem:[#allocation7 + $0x8] sm:$0xff]  ;;  %v2990_v8 = vld [vmem:[#allocation9] ss:$0 sm:$0xff] }
 0x43f   : > { %v2109_v18 = vsel %vm786_vm1, %v2077_v2, %v2108_v11  ;;  %v2141_v19 = vperm.slane %v2133_v53, %v3701_v52  ;;  %v2113_v63 = vperm.slane %v2107_v16, %v3701_v52  ;;  %v2105_v20 = vperm.slane %v2097_v17, %v3687_v27 }
 0x440   : > { %v2117_v14 = vperm.slane %v2109_v18, %v3701_v52  ;;  %v2131_v21 = vsel %vm786_vm1, %v2130_v56, %v2089_v3  ;;  %v2120_v22 = vrot.slane %v2069_v12, 4  ;;  %v2144_v24 = vrot.slane %v2093_v15, 4 }
 0x441   : > { %v2158_v0 = vrot.slane %v2141_v19, 4  ;;  %v2137_v25 = vperm.slane %v2131_v21, %v3701_v52  ;;  %v2156_v29 = vrot.slane %v2113_v63, 4  ;;  %v2118_v32 = vrot.slane %v2081_v46, 4 }
 0x442   : > { %v2160_v6 = vrot.slane %v2117_v14, 4  ;;  %v2145_v33 = vsel %vm786_vm1, %v2105_v20, %v2144_v24  ;;  %v2142_v35 = vrot.slane %v2105_v20, 4  ;;  %v2121_v39 = vsel %vm786_vm1, %v2081_v46, %v2120_v22 }
 0x443   : > { %v2159_v10 = vsel %vm786_vm1, %v2158_v0, %v2117_v14  ;;  %v2154_v38 = vrot.slane %v2137_v25, 4  ;;  %v2157_v27 = vsel %vm786_vm1, %v2137_v25, %v2156_v29  ;;  %v2153_v58 = vperm.slane %v2145_v33, %v3701_v52  ;;  %v2809_v25 = vld [vmem:[#allocation13 + $0x18] sm:$0xff]  ;;  %v2808_v29 = vld [vmem:[#allocation13 + $0x10] sm:$0xff] }
 0x444   : > { %2175 = vrot.lane.b32.xlu1 %v2159_v10, %s3458_s22  ;;  %2171 = vrot.lane.b32.xlu2 %v2157_v27, %s3459_s28  ;;  %v2161_v40 = vsel %vm786_vm1, %v2141_v19, %v2160_v6  ;;  %v2119_v43 = vsel %vm786_vm1, %v2118_v32, %v2069_v12  ;;  %v2143_v47 = vsel %vm786_vm1, %v2142_v35, %v2093_v15  ;;  %v3035_v12 = vld [vmem:[%s3669_s21] sm:$0xff]  ;;  %v3465_v16 = vmov 64.0   ;;  %v2807_v32 = vld [vmem:[#allocation13 + $0x8] sm:$0xff]  ;;  %v2816_v10 = vld [vmem:[%s4245_s27 + $0x30] sm:$0xff] }
 0x445   : > { %2179 = vrot.lane.b32.xlu0 %v2161_v40, %s3460_s16  ;;  %v2125_v44 = vperm.slane %v2119_v43, %v3701_v52  ;;  %v2155_v48 = vsel %vm786_vm1, %v2154_v38, %v2113_v63  ;;  %v2149_v49 = vperm.slane %v2143_v47, %v3701_v52  ;;  %v2129_v50 = vperm.slane %v2121_v39, %v3701_v52  ;;  %v2805_v52 = vld [vmem:[#allocation7 + $0x18] sm:$0xff]  ;;  %v2817_v6 = vld [vmem:[%s4245_s27 + $0x38] sm:$0xff]  ;;  %v2806_v27 = vld [vmem:[#allocation13] sm:$0xff] }
 0x446   : > { %v2166_v30 = vrot.slane %v2153_v58, 4  ;;  %2255 = vmatpush.bf16.msra.mxu0 %v2805_v52  ;;  %3029 = vrcp.f32 %v3465_v16  ;;  %2348 = vmatpush.bf16.msra.mxu1 %v2809_v25  ;;  %v2815_v39 = vld [vmem:[%s4245_s27 + $0x28] sm:$0xff]  ;;  %v2814_v40 = vld [vmem:[%s4245_s27 + $0x20] sm:$0xff] }
 0x447   : > { %v2162_v51 = vrot.slane %v2149_v49, 4  ;;  %v2164_v23 = vrot.slane %v2125_v44, 4  ;;  %v2168_v54 = vrot.slane %v2129_v50, 4  ;;  %2427 = vmatpush.bf16.msra.mxu2 %v2817_v6  ;;  %v2811_v52 = vld [vmem:[%s4245_s27 + $0x8] sm:$0xff] }
 0x448   : > { %v2167_v28 = vsel %vm786_vm1, %v2166_v30, %v2129_v50 }
 0x449   : > { %v2163_v34 = vsel %vm786_vm1, %v2162_v51, %v2125_v44  ;;  %v2165_v37 = vsel %vm786_vm1, %v2149_v49, %v2164_v23  ;;  %v2169_v55 = vsel %vm786_vm1, %v2153_v58, %v2168_v54  ;;  %v2813_v44 = vld [vmem:[%s4245_s27 + $0x18] sm:$0xff]  ;;  %v2812_v49 = vld [vmem:[%s4245_s27 + $0x10] sm:$0xff]  ;;  %v2991_v51 = vld [vmem:[#allocation10] ss:$0 sm:$0xff] }
 0x44a   : > { %2256 = vmatpush.bf16.msra.mxu0 %v2804_v45  ;;  %2349 = vmatpush.bf16.msra.mxu1 %v2808_v29  ;;  %v2810_v45 = vld [vmem:[%s4245_s27] sm:$0xff] }
 0x44b   : > { %2428 = vmatpush.bf16.msra.mxu2 %v2816_v10 }
 0x44c   : > { %2191 = vrot.lane.b32.xlu1 %v2167_v28, %s3461_s18  ;;  %2183 = vrot.lane.b32.xlu2 %v2163_v34, %s3462_s24  ;;  %v3030_v56 = vpop.eup %3029  ;;  %v2992_v28 = vld [vmem:[#allocation12] ss:$0 sm:$0xff] }
 0x44d   : > { %2187 = vrot.lane.b32.xlu0 %v2165_v37, %s3463_s25  ;;  %v2271_v17 = vmul.f32 64.0, %v3030_v56  ;;  %vm2275_vm10 = vweird.f32 %v3030_v56 }
 0x44e   : > { %2257 = vmatpush.bf16.msra.mxu0 %v2803_v26  ;;  %2350 = vmatpush.bf16.msra.mxu1 %v2807_v32  ;;  %v2993_v26 = vld [vmem:[#allocation15] ss:$0 sm:$0xff] }
 0x44f   : > { %v2272_v18 = vsub.f32 1.0, %v2271_v17  ;;  %2429 = vmatpush.bf16.msra.mxu2 %v2815_v39  ;;  %v2995_v17 = vld [vmem:[#allocation18] ss:$0 sm:$0xff] }
 0x451   : > { %v2273_v19 = vmul.f32 %v3030_v56, %v2272_v18 }
 0x452   : > { %2258 = vmatpush.bf16.msra.mxu0 %v2802_v57  ;;  %2351 = vmatpush.bf16.msra.mxu1 %v2806_v27 }
 0x453   : > { %v2274_v63 = vadd.f32 %v3030_v56, %v2273_v19  ;;  %2430 = vmatpush.bf16.msra.mxu2 %v2814_v40  ;;  %v2996_v19 = vld [vmem:[#allocation19] ss:$0 sm:$0xff] }
 0x454   : > { %2195 = vrot.lane.b32.xlu2 %v2169_v55, %s3464_s26 }
 0x455   : > { %v4175_v20 = vsel %vm2275_vm10, %v3030_v56, %v2274_v63 }
 0x457   : > { %2431 = vmatpush.bf16.msra.mxu2 %v2813_v44 }
 0x45b   : > { %2432 = vmatpush.bf16.msra.mxu2 %v2812_v49 }
 0x45f   : > { %2433 = vmatpush.bf16.msra.mxu2 %v2811_v52 }
 0x463   : > { %2434 = vmatpush.bf16.msra.mxu2 %v2810_v45 }
 0x49e   : > { %v2172_v36 = vpop.permute.xlu2 %2171 }
 0x49f   : > { %v2198_v60 = vsel %vm1528_vm2, %v2155_v48, %v2172_v36 }
 0x4a6   : > { %v2184_v42 = vpop.permute.xlu2 %2183 }
 0x4ae   : > { %v2196_v1 = vpop.permute.xlu2 %2195 }
 0x4b6   : > { %v2176_v41 = vpop.permute.xlu1 %2175 }
 0x4b7   : > { %v2180_v59 = vpop.permute.xlu0 %2179  ;;  %v2200_v61 = vsel %vm2199_vm4, %v2198_v60, %v2176_v41  ;;  %v2994_v60 = vld [vmem:[#allocation16] ss:$0 sm:$0xff] }
 0x4b8   : > { %v2202_v62 = vsel %vm2201_vm5, %v2200_v61, %v2180_v59 }
 0x4b9   : > { %v2204_v3 = vsel %vm2203_vm6, %v2202_v62, %v2184_v42 }
 0x4be   : > { %v2192_v4 = vpop.permute.xlu1 %2191 }
 0x4bf   : > { %v2188_v2 = vpop.permute.xlu0 %2187 }
 0x4c0   : > { %v2206_v31 = vsel %vm2205_vm7, %v2204_v3, %v2188_v2 }
 0x4c1   : > { %v2208_v5 = vsel %vm2207_vm8, %v2206_v31, %v2192_v4 }
 0x4c2   : > { %v2210_v13 = vsel %vm2209_vm9, %v2208_v5, %v2196_v1 }
 0x4c3   : > { %v2211_v7 = vpack.c.bf16 %v2210_v13, %v2210_v13 }
 0x4c5   : > { %2742 = vmatmul.msk.bf16.vlgmr.msra.gmra.mxu0 %vm733_vm0, %v2211_v7 }
 0x542   : > { %v2260_v9 = vpop.f32.mrf.mxu0 }
 0x543   : > { %v2261_v11 = vadd.f32 %v2990_v8, %v2260_v9 }
 0x545   : > { %v2264_v46 = vadd.f32 %v3035_v12, %v2261_v11 }
 0x547   : > { %v2267_v15 = vsel %vm733_vm0, %v2264_v46, 0.0 }
 0x548   : > { %2268 = vadd.xlane.f32.xlu0 %v2267_v15 }
 0x54a   : > { %v2262_v53 = vpop.f32.mrf.mxu0 }
 0x5bb   : > { %v2269_v14 = vpop.xlane.xlu0 %2268 }
 0x5bc   : > { %v2277_v21 = vmul.f32 %v4175_v20, %v2269_v14 }
 0x5be   : > { %v2278_v22 = vsub.f32 %v2264_v46, %v2277_v21 }
 0x5c0   : > { %v2279_v24 = vmul.f32 %v2278_v22, %v2278_v22 }
 0x5c2   : > { %v2280_v0 = vsel %vm733_vm0, %v2279_v24, 0.0 }
 0x5c3   : > { %2281 = vadd.xlane.f32.xlu1 %v2280_v0 }
 0x636   : > { %v2282_v33 = vpop.xlane.xlu1 %2281 }
 0x637   : > { %v2283_v35 = vmul.f32 %v2282_v33, %v4175_v20 }
 0x639   : > { %v2284_v38 = vadd.f32 1e-05, %v2283_v35 }
 0x63b   : > { %3031 = vrsqrt.f32 %v2284_v38  ;;  %vm2291_vm12 = vweird.f32 %v2284_v38 }
 0x641   : > { %v3032_v58 = vpop.eup %3031 }
 0x642   : > { %v2286_v43 = vmul.f32 %v3032_v58, %v2284_v38  ;;  %vm2292_vm11 = vweird.f32 %v3032_v58 }
 0x643   : > { %vm2293_vm13 = vmor %vm2291_vm12, %vm2292_vm11 }
 0x644   : > { %v2287_v47 = vmul.f32 %v3032_v58, %v2286_v43 }
 0x646   : > { %v2288_v48 = vmul.f32 0.5, %v2287_v47 }
 0x648   : > { %v2289_v50 = vsub.f32 1.5, %v2288_v48 }
 0x64a   : > { %v2290_v30 = vmul.f32 %v3032_v58, %v2289_v50 }
 0x64c   : > { %v2294_v23 = vsel %vm2293_vm13, %v3032_v58, %v2290_v30 }
 0x64d   : > { %v2295_v34 = vmul.f32 %v2294_v23, %v2278_v22 }
 0x64f   : > { %v2299_v37 = vmul.f32 %v2991_v51, %v2295_v34 }
 0x651   : > { %v2303_v54 = vadd.f32 %v2992_v28, %v2299_v37 }
 0x653   : > { %v2304_v55 = vpack.c.bf16 %v2303_v54, %v2303_v54 }
 0x655   : > { %2759 = vmatmul.msk.bf16.vlgmr.msra.gmra.mxu1 %vm733_vm0, %v2304_v55 }
 0x6d2   : > { %v2353_v57 = vpop.f32.mrf.mxu1 }
 0x6d3   : > { %v2354_v36 = vadd.f32 %v2993_v26, %v2353_v57 }
 0x6d5   : > { %v2357_v41 = vmax.f32 %v2354_v36, 0.0 }
 0x6d7   : > { %v2358_v42 = vpack.c.bf16 %v2357_v41, %v2357_v41 }
 0x6d9   : > { %2435 = vmatmul.bf16.vlgmr.msra.gmra.mxu2 %v2358_v42 }
 0x6da   : > { %v2355_v59 = vpop.f32.mrf.mxu1 }
 0x75c   : > { %v2436_v61 = vpop.f32.mrf.mxu2 }
 0x75d   : > { %v2437_v62 = vadd.f32 %v2994_v60, %v2436_v61 }
 0x75f   : > { %v2440_v2 = vadd.f32 %v2437_v62, %v2303_v54 }
 0x761   : > { %v2443_v3 = vsel %vm733_vm0, %v2440_v2, 0.0 }
 0x762   : > { %2444 = vadd.xlane.f32.xlu2 %v2443_v3 }
 0x764   : > { %v2438_v4 = vpop.f32.mrf.mxu2 }
 0x7d5   : > { %v2445_v31 = vpop.xlane.xlu2 %2444 }
 0x7d6   : > { %v2446_v1 = vmul.f32 %v2445_v31, %v4175_v20 }
 0x7d8   : > { %v2447_v5 = vsub.f32 %v2440_v2, %v2446_v1 }
 0x7da   : > { %v2448_v13 = vmul.f32 %v2447_v5, %v2447_v5 }
 0x7dc   : > { %v2449_v7 = vsel %vm733_vm0, %v2448_v13, 0.0 }
 0x7dd   : > { %2450 = vadd.xlane.f32.xlu0 %v2449_v7 }
 0x850   : > { %v2451_v8 = vpop.xlane.xlu0 %2450 }
 0x851   : > { %v2452_v9 = vmul.f32 %v2451_v8, %v4175_v20 }
 0x853   : > { %v2453_v11 = vadd.f32 1e-05, %v2452_v9 }
 0x855   : > { %3033 = vrsqrt.f32 %v2453_v11  ;;  %vm2460_vm15 = vweird.f32 %v2453_v11 }
 0x85b   : > { %v3034_v12 = vpop.eup %3033 }
 0x85c   : > { %v2455_v46 = vmul.f32 %v3034_v12, %v2453_v11  ;;  %vm2461_vm14 = vweird.f32 %v3034_v12 }
 0x85d   : > { %vm2462_vm1 = vmor %vm2460_vm15, %vm2461_vm14 }
 0x85e   : > { %v2456_v15 = vmul.f32 %v3034_v12, %v2455_v46 }
 0x860   : > { %v2457_v53 = vmul.f32 0.5, %v2456_v15 }
 0x862   : > { %v2458_v16 = vsub.f32 1.5, %v2457_v53 }
 0x864   : > { %v2459_v56 = vmul.f32 %v3034_v12, %v2458_v16 }
 0x866   : > { %v2463_v18 = vsel %vm2462_vm1, %v3034_v12, %v2459_v56 }
 0x867   : > { %v2464_v63 = vmul.f32 %v2463_v18, %v2447_v5 }
 0x869   : > { %v2468_v14 = vmul.f32 %v2995_v17, %v2464_v63 }
 0x86b   : > { %v2472_v20 = vadd.f32 %v2996_v19, %v2468_v14 }
 0x86d   : > { %2473 = vst.msk [vmem:[%s670_s19] sm:$0xff] %vm733_vm0, %v2472_v20 }
 0x86e PF: > { %s4247_s20 = sld [smem:[#allocation28_spill]] }
 0x874   : > { %s32_s18 = sadd.s32 1, %s4247_s20  }
 0x875   : > { %p29_p7 = scmp.ge.s32.totalorder %s32_s18, 4  }
 0x877   :  { %31 = sbr.rel (!%p29_p7) target bundleno = 12 (0xc), region = 160 }
 0x87c   :  { %2493 = vsyncpa [#allocation3], 1 }
 0x87d   :  { %2495 = vsyncpa [#allocation3 + $0x1], 1 }
 0x87e   :  { %2496 = vsyncpa [#allocation5], 1 }
 0x87f   :  { %2497 = vsyncpa [#allocation8], 1 }
 0x880   :  { %2498 = vsyncpa [#allocation11], 1 }
 0x881   :  { %2499 = vsyncpa [#allocation14], 1 }
 0x882   :  { %2500 = vsyncpa [#allocation17], 1 }
 0x883   :  { %2501 = vsyncpa [#allocation20], 1 }

// kernel: transformer_forward.6
= control target key start
LH: loop header
LB: loop body
LE: loop exit
PB: predicated region body
PF: predicated region fallthrough
CT: control target
= control target key end

     0   :  { %s7604_s0 = inlined_call_operand.vmem [shape: f32[16,64], index: 0, kind: input, shape index: {}]   ;;  %s7605_s1 = inlined_call_operand.vmem [shape: f32[16,64], index: 1, kind: input, shape index: {}]   ;;  %s7606_s2 = inlined_call_operand.hbm [shape: f32[8,8], index: 2, kind: input, shape index: {}]   ;;  %s7607_s3 = inlined_call_operand.vmem [shape: f32[2,8], index: 3, kind: input, shape index: {}]   ;;  %s7608_s4 = inlined_call_operand.vmem [shape: f32[2,8], index: 4, kind: input, shape index: {}]   ;;  %s7609_s5 = inlined_call_operand.hbm [shape: bf16[64,192], index: 5, kind: input, shape index: {}]   ;;  %s7610_s6 = inlined_call_operand.hbm [shape: f32[1,192], index: 6, kind: input, shape index: {}]   ;;  %s7611_s7 = inlined_call_operand.hbm [shape: bf16[64,64], index: 7, kind: input, shape index: {}]   ;;  %s7612_s8 = inlined_call_operand.hbm [shape: f32[1,64], index: 8, kind: input, shape index: {}]   ;;  %s7613_s9 = inlined_call_operand.hbm [shape: f32[1,64], index: 9, kind: input, shape index: {}]   ;;  %s7614_s10 = inlined_call_operand.hbm [shape: f32[1,64], index: 10, kind: input, shape index: {}]   ;;  %s7615_s11 = inlined_call_operand.hbm [shape: bf16[64,64], index: 11, kind: input, shape index: {}]   ;;  %s7616_s12 = inlined_call_operand.hbm [shape: f32[1,64], index: 12, kind: input, shape index: {}]   ;;  %s7617_s13 = inlined_call_operand.hbm [shape: bf16[64,128], index: 13, kind: input, shape index: {}]   ;;  %s7618_s14 = inlined_call_operand.hbm [shape: f32[1,128], index: 14, kind: input, shape index: {}]   ;;  %s7619_s15 = inlined_call_operand.hbm [shape: bf16[64,64], index: 15, kind: input, shape index: {}]   ;;  %s7620_s16 = inlined_call_operand.hbm [shape: f32[1,64], index: 16, kind: input, shape index: {}]   ;;  %s7621_s17 = inlined_call_operand.hbm [shape: f32[1,64], index: 17, kind: input, shape index: {}]   ;;  %s7622_s18 = inlined_call_operand.hbm [shape: f32[1,64], index: 18, kind: input, shape index: {}]   ;;  %s7623_s19 = inlined_call_operand.hbm [shape: bf16[64,128], index: 19, kind: input, shape index: {}]   ;;  %s7624_s20 = inlined_call_operand.hbm [shape: f32[1,128], index: 20, kind: input, shape index: {}]   ;;  %s7625_s21 = inlined_call_operand.vmem [shape: bf16[128,64], index: 21, kind: input, shape index: {}]   ;;  %s7626_s22 = inlined_call_operand.hbm [shape: f32[1,64], index: 22, kind: input, shape index: {}]   ;;  %s7627_s23 = inlined_call_operand.hbm [shape: f32[1,64], index: 23, kind: input, shape index: {}]   ;;  %s7628_s24 = inlined_call_operand.hbm [shape: f32[1,64], index: 24, kind: input, shape index: {}]   ;;  %s7629_s25 = inlined_call_operand.vmem [shape: f32[16,64], index: 25, kind: output, shape index: {}]  }
   0x1   :  { %7638 = sst [smem:[#allocation47_spill]] %s7604_s0 }
   0x2   :  { %7639 = sst [smem:[#allocation48_spill]] %s7605_s1 }
   0x3   :  { %7640 = sst [smem:[#allocation49_spill]] %s7606_s2 }
   0x4   :  { %7641 = sst [smem:[#allocation50_spill]] %s7607_s3 }
   0x5   :  { %7642 = sst [smem:[#allocation51_spill]] %s7608_s4 }
   0x6   :  { %7643 = sst [smem:[#allocation52_spill]] %s7609_s5 }
   0x7   :  { %7644 = sst [smem:[#allocation53_spill]] %s7610_s6 }
   0x8   :  { %7645 = sst [smem:[#allocation54_spill]] %s7611_s7 }
   0x9   :  { %7646 = sst [smem:[#allocation55_spill]] %s7612_s8 }
   0xa   :  { %7647 = sst [smem:[#allocation56_spill]] %s7613_s9 }
   0xb   :  { %7648 = sst [smem:[#allocation57_spill]] %s7615_s11 }
   0xc   :  { %7649 = sst [smem:[#allocation58_spill]] %s7625_s21 }
   0xd   :  { %7650 = sst [smem:[#allocation59_spill]] %s7629_s25 }
   0xe   :  { %30 = vsyncpa [#allocation3], 0 }
   0xf   :  { %31 = vsyncpa [#allocation5], 0 }
  0x10   :  { %32 = vsyncpa [#allocation8], 0 }
  0x11   :  { %33 = vsyncpa [#allocation11], 0 }
  0x12   :  { %34 = vsyncpa [#allocation14], 0 }
  0x13   :  { %35 = vsyncpa [#allocation17], 0 }
  0x14   :  { %36 = vsyncpa [#allocation20], 0 }
  0x15   :  { %37 = vsyncpa [#allocation23], 0 }
  0x16   :  { %38 = vsyncpa [#allocation26], 0 }
  0x17   :  { %39 = vsyncpa [#allocation29], 0 }
  0x18   :  { %40 = vsyncpa [#allocation32], 0  ;;  %s6249_s29 = smov 0  }
  0x19 LB: > { %7651 = sst [smem:[#allocation44_spill]] %s6075_s29  ;;  %s6258_s3 = sadd.s32 4294967295, %s6075_s29   ;;  %s6075_s29 = sphi %s6249_s29, %s46_s29  }
  0x1a   : > { %s7652_s30 = sld [smem:[#allocation52_spill]]  ;;  %p4780_p0 = scmp.ge.s32.totalorder %s6075_s29, 1 }
  0x1b   : > { %7653 = sst [smem:[#allocation45_spill]] %s6258_s3  ;;  %p612_p1 = scmp.lt.s32.totalorder %s6075_s29, 3 }
  0x1c   : > { %p5188_p2 = scmp.eq.s32.totalorder %s6258_s3, 0  ;;  %s6077_s1 = smov [#allocation4]  }
  0x1d   : > { %p6263_p3 = pnand %p4780_p0, %p612_p1  ;;  %s643_s8 = sshll.u32 %s6077_s1, 4  ;;  %s644_s8 = int_to_ptr.vmem [resolvable:$true] %s643_s8 }
  0x1e   : > { %s7656_s28 = sld [smem:[#allocation54_spill]]  ;;  %s6078_s0 = smov [#allocation7]  }
  0x1f   : > { %s7654_s26 = scalar_select %p6263_p3, 1, 0 }
  0x20   : > { %s641_s7 = sshll.u32 %s7652_s30, 4  ;;  %p5127_p4 = pneg %p6263_p3  ;;  %s642_s7 = int_to_ptr.hbm [resolvable:$true] %s641_s7 }
  0x21   : > { %7655 = sst [smem:[#allocation46_spill]] %s7654_s26  ;;  %s669_s2 = sshll.u32 %s6078_s0, 4  ;;  %s670_s2 = int_to_ptr.vmem [resolvable:$true] %s669_s2 }
  0x22   : > { %p6274_p5 = pnand %p5188_p2, %p5127_p4  ;;  %s6079_s6 = smov 128  }
  0x23   : > { %s6080_s30 = smov 8   ;;  %s7658_s27 = sld [smem:[#allocation56_spill]] }
  0x24   : > { %s667_s9 = sshll.u32 %s7656_s28, 4  ;;  %s6081_s28 = smov 64   ;;  %s668_s9 = int_to_ptr.hbm [resolvable:$true] %s667_s9 }
  0x25   : > { %5133 = dma.hbm_to_vmem [thread:$0]  (!%p6274_p5), %s642_s7, 1024, %s644_s8, [#allocation5], %s6079_s6, %s6079_s6, %s6080_s30  }
  0x26   : > { %s6082_s25 = smov 4   ;;  %s6083_s21 = smov [#allocation10]  }
  0x27   : > { %5139 = dma.hbm_to_vmem [thread:$0]  (!%p6274_p5), %s668_s9, 512, %s670_s2, [#allocation8], %s6081_s28, %s6081_s28, %s6082_s25  }
  0x28   : > { %s696_s0 = sshll.u32 %s6083_s21, 4  ;;  %s7659_s11 = sld [smem:[#allocation57_spill]]  ;;  %s697_s0 = int_to_ptr.vmem [resolvable:$true] %s696_s0 }
  0x29   : > { %s694_s4 = sshll.u32 %s7658_s27, 4  ;;  %s743_s6 = sshll.u32 %s7617_s13, 4  ;;  %s695_s4 = int_to_ptr.hbm [resolvable:$true] %s694_s4  ;;  %s744_s6 = int_to_ptr.hbm [resolvable:$true] %s743_s6 }
  0x2a   : > { %5145 = dma.hbm_to_vmem [thread:$0]  (!%p6274_p5), %s695_s4, 16, %s697_s0, [#allocation11]  }
  0x2b   : > { %s6084_s30 = smov [#allocation13]   ;;  %s6085_s21 = smov [#allocation16]  }
  0x2c   : > { %s719_s1 = sshll.u32 %s6084_s30, 4  ;;  %s745_s3 = sshll.u32 %s6085_s21, 4  ;;  %s720_s1 = int_to_ptr.vmem [resolvable:$true] %s719_s1  ;;  %s746_s3 = int_to_ptr.vmem [resolvable:$true] %s745_s3 }
  0x2d   : > { %s769_s2 = sshll.u32 %s7619_s15, 4  ;;  %s796_s0 = sshll.u32 %s7621_s17, 4  ;;  %s770_s2 = int_to_ptr.hbm [resolvable:$true] %s769_s2  ;;  %s797_s0 = int_to_ptr.hbm [resolvable:$true] %s796_s0 }
  0x2e   : > { %s717_s7 = sshll.u32 %s7659_s11, 4  ;;  %s6086_s29 = smov [#allocation19]   ;;  %s718_s7 = int_to_ptr.hbm [resolvable:$true] %s717_s7 }
  0x2f   : > { %5151 = dma.hbm_to_vmem [thread:$0]  (!%p6274_p5), %s718_s7, 512, %s720_s1, [#allocation14], %s6081_s28, %s6081_s28, %s6082_s25  }
  0x30   : > { %5157 = dma.hbm_to_vmem [thread:$0]  (!%p6274_p5), %s744_s6, 512, %s746_s3, [#allocation17], %s6081_s28, %s6081_s28, %s6082_s25  }
  0x31   : > { %s771_s7 = sshll.u32 %s6086_s29, 4  ;;  %s6087_s8 = smov [#allocation22]   ;;  %s772_s7 = int_to_ptr.vmem [resolvable:$true] %s771_s7 }
  0x32   : > { %5163 = dma.hbm_to_vmem [thread:$0]  (!%p6274_p5), %s770_s2, 512, %s772_s7, [#allocation20], %s6081_s28, %s6081_s28, %s6082_s25  }
  0x33   : > { %s798_s30 = sshll.u32 %s6087_s8, 4  ;;  %s819_s6 = sshll.u32 %s7623_s19, 4  ;;  %s799_s30 = int_to_ptr.vmem [resolvable:$true] %s798_s30  ;;  %s820_s6 = int_to_ptr.hbm [resolvable:$true] %s819_s6 }
  0x34   : > { %5169 = dma.hbm_to_vmem [thread:$0]  (!%p6274_p5), %s797_s0, 16, %s799_s30, [#allocation23]  }
  0x35   : > { %s849_s9 = sshll.u32 %s7626_s22, 4  ;;  %s6088_s27 = smov [#allocation25]   ;;  %s850_s9 = int_to_ptr.hbm [resolvable:$true] %s849_s9 }
  0x36   : > { %s821_s4 = sshll.u32 %s6088_s27, 4  ;;  %s6089_s2 = smov [#allocation28]   ;;  %s822_s4 = int_to_ptr.vmem [resolvable:$true] %s821_s4 }
  0x37   : > { %5175 = dma.hbm_to_vmem [thread:$0]  (!%p6274_p5), %s820_s6, 512, %s822_s4, [#allocation26], %s6081_s28, %s6081_s28, %s6082_s25  }
  0x38   : > { %s851_s29 = sshll.u32 %s6089_s2, 4  ;;  %s7660_s1 = sld [smem:[#allocation49_spill]]  ;;  %s852_s29 = int_to_ptr.vmem [resolvable:$true] %s851_s29 }
  0x39   : > { %5181 = dma.hbm_to_vmem [thread:$0]  (!%p6274_p5), %s850_s9, 16, %s852_s29, [#allocation29]  }
  0x3a   : > { %s7661_s3 = sld [smem:[#allocation53_spill]]  ;;  %s6090_s27 = smov [#allocation2]  }
  0x3b   : > { %s626_s11 = sshll.u32 %s6090_s27, 4  ;;  %s6091_s25 = smov [#allocation6]   ;;  %s627_s11 = int_to_ptr.vmem [resolvable:$true] %s626_s11 }
  0x3c   : > { %s658_s28 = sshll.u32 %s6091_s25, 4  ;;  %s7662_s2 = sld [smem:[#allocation55_spill]]  ;;  %s659_s28 = int_to_ptr.vmem [resolvable:$true] %s658_s28 }
  0x3d   : > { %s706_s8 = sshll.u32 %s7614_s10, 4  ;;  %s732_s27 = sshll.u32 %s7616_s12, 4  ;;  %s707_s8 = int_to_ptr.hbm [resolvable:$true] %s706_s8  ;;  %s733_s27 = int_to_ptr.hbm [resolvable:$true] %s732_s27 }
  0x3e   : > { %s624_s0 = sshll.u32 %s7660_s1, 4  ;;  %s6092_s1 = smov [#allocation9]   ;;  %s625_s0 = int_to_ptr.hbm [resolvable:$true] %s624_s0 }
  0x3f   : > { %5130 = dma.hbm_to_vmem [thread:$0]  (!%p6274_p5), %s625_s0, 128, %s627_s11, [#allocation3]  }
  0x40   : > { %s656_s26 = sshll.u32 %s7661_s3, 4  ;;  %s684_s30 = sshll.u32 %s6092_s1, 4  ;;  %s657_s26 = int_to_ptr.hbm [resolvable:$true] %s656_s26  ;;  %s685_s30 = int_to_ptr.vmem [resolvable:$true] %s684_s30 }
  0x41   : > { %5136 = dma.hbm_to_vmem [thread:$0]  (!%p6274_p5), %s657_s26, 32, %s659_s28, [#allocation5]  }
  0x42   : > { %s682_s7 = sshll.u32 %s7662_s2, 4  ;;  %s6093_s11 = smov [#allocation12]   ;;  %s683_s7 = int_to_ptr.hbm [resolvable:$true] %s682_s7 }
  0x43   : > { %5142 = dma.hbm_to_vmem [thread:$0]  (!%p6274_p5), %s683_s7, 16, %s685_s30, [#allocation8]  }
  0x44   : > { %s708_s0 = sshll.u32 %s6093_s11, 4  ;;  %s758_s28 = sshll.u32 %s7618_s14, 4  ;;  %s709_s0 = int_to_ptr.vmem [resolvable:$true] %s708_s0  ;;  %s759_s28 = int_to_ptr.hbm [resolvable:$true] %s758_s28 }
  0x45   : > { %5148 = dma.hbm_to_vmem [thread:$0]  (!%p6274_p5), %s707_s8, 16, %s709_s0, [#allocation11]  }
  0x46   : > { %s6094_s6 = smov [#allocation15]   ;;  %s6095_s2 = smov [#allocation18]  }
  0x47   : > { %s734_s4 = sshll.u32 %s6094_s6, 4  ;;  %s760_s7 = sshll.u32 %s6095_s2, 4  ;;  %s735_s4 = int_to_ptr.vmem [resolvable:$true] %s734_s4  ;;  %s761_s7 = int_to_ptr.vmem [resolvable:$true] %s760_s7 }
  0x48   : > { %5154 = dma.hbm_to_vmem [thread:$0]  (!%p6274_p5), %s733_s27, 16, %s735_s4, [#allocation14]  }
  0x49   : > { %s784_s1 = sshll.u32 %s7620_s16, 4  ;;  %s808_s11 = sshll.u32 %s7622_s18, 4  ;;  %s785_s1 = int_to_ptr.hbm [resolvable:$true] %s784_s1  ;;  %s809_s11 = int_to_ptr.hbm [resolvable:$true] %s808_s11 }
  0x4a   : > { %5160 = dma.hbm_to_vmem [thread:$0]  (!%p6274_p5), %s759_s28, 16, %s761_s7, [#allocation17]  }
  0x4b   : > { %s6096_s0 = smov [#allocation21]   ;;  %s6097_s3 = smov [#allocation24]  }
  0x4c   : > { %s786_s21 = sshll.u32 %s6096_s0, 4  ;;  %s810_s27 = sshll.u32 %s6097_s3, 4  ;;  %s787_s21 = int_to_ptr.vmem [resolvable:$true] %s786_s21  ;;  %s811_s27 = int_to_ptr.vmem [resolvable:$true] %s810_s27 }
  0x4d   : > { %5166 = dma.hbm_to_vmem [thread:$0]  (!%p6274_p5), %s785_s1, 16, %s787_s21, [#allocation20]  }
  0x4e   : > { %s834_s6 = sshll.u32 %s7624_s20, 4  ;;  %s861_s2 = sshll.u32 %s7627_s23, 4  ;;  %s835_s6 = int_to_ptr.hbm [resolvable:$true] %s834_s6  ;;  %s862_s2 = int_to_ptr.hbm [resolvable:$true] %s861_s2 }
  0x4f   : > { %5172 = dma.hbm_to_vmem [thread:$0]  (!%p6274_p5), %s809_s11, 16, %s811_s27, [#allocation23]  }
  0x50   : > { %s6098_s7 = smov [#allocation27]   ;;  %s6099_s29 = smov [#allocation30]  }
  0x51   : > { %s836_s9 = sshll.u32 %s6098_s7, 4  ;;  %s863_s1 = sshll.u32 %s6099_s29, 4  ;;  %s837_s9 = int_to_ptr.vmem [resolvable:$true] %s836_s9  ;;  %s864_s1 = int_to_ptr.vmem [resolvable:$true] %s863_s1 }
  0x52   : > { %5178 = dma.hbm_to_vmem [thread:$0]  (!%p6274_p5), %s835_s6, 16, %s837_s9, [#allocation26]  }
  0x53   : > { %s873_s0 = sshll.u32 %s7628_s24, 4  ;;  %s6100_s11 = smov [#allocation31]   ;;  %s874_s0 = int_to_ptr.hbm [resolvable:$true] %s873_s0 }
  0x54   : > { %5184 = dma.hbm_to_vmem [thread:$0]  (!%p6274_p5), %s862_s2, 16, %s864_s1, [#allocation29]  }
  0x55   : > { %s875_s21 = sshll.u32 %s6100_s11, 4  ;;  %902 = sbr.rel (%p6263_p3) target bundleno = 3611 (0xe1b), region = 120  ;;  %s876_s21 = int_to_ptr.vmem [resolvable:$true] %s875_s21 }
  0x56   : > { %5187 = dma.hbm_to_vmem [thread:$0]  (!%p6274_p5), %s874_s0, 16, %s876_s21, [#allocation32]  }
  0x57   : > { %s7664_s27 = sld [smem:[#allocation45_spill]] (!%p6263_p3) }
  0x5a   : > { %6030 = dma.done.wait (%p5188_p2), [#allocation3], 128  }
  0x5b   : > { %6032 = vsyncadd (%p5188_p2), [#allocation3], 4294967168 }
  0x5c   : > { %6034 = dma.done.wait (%p5188_p2), [#allocation5], 1056  }
  0x5d   : > { %6036 = vsyncadd (%p5188_p2), [#allocation5], 4294966240 }
  0x5e   : > { %6038 = dma.done.wait (%p5188_p2), [#allocation8], 528  }
  0x5f   : > { %6040 = vsyncadd (%p5188_p2), [#allocation8], 4294966768 }
  0x60   : > { %6042 = dma.done.wait (%p5188_p2), [#allocation11], 32  }
  0x61   : > { %6044 = vsyncadd (%p5188_p2), [#allocation11], 4294967264 }
  0x62   : > { %6046 = dma.done.wait (%p5188_p2), [#allocation14], 528  }
  0x63   : > { %6048 = vsyncadd (%p5188_p2), [#allocation14], 4294966768 }
  0x64   : > { %6050 = dma.done.wait (%p5188_p2), [#allocation17], 528  }
  0x65   : > { %6052 = vsyncadd (%p5188_p2), [#allocation17], 4294966768 }
  0x66   : > { %6054 = dma.done.wait (%p5188_p2), [#allocation20], 528  }
  0x67   : > { %6056 = vsyncadd (%p5188_p2), [#allocation20], 4294966768 }
  0x68   : > { %6058 = dma.done.wait (%p5188_p2), [#allocation23], 32  }
  0x69   : > { %6060 = vsyncadd (%p5188_p2), [#allocation23], 4294967264 }
  0x6a   : > { %6062 = dma.done.wait (%p5188_p2), [#allocation26], 528  }
  0x6b   : > { %6064 = vsyncadd (%p5188_p2), [#allocation26], 4294966768 }
  0x6c   : > { %6066 = dma.done.wait (%p5188_p2), [#allocation29], 32  }
  0x6d   : > { %6068 = vsyncadd (%p5188_p2), [#allocation29], 4294967264 }
  0x6e   : > { %6070 = dma.done.wait (%p5188_p2), [#allocation32], 16  }
  0x6f   : > { %6072 = vsyncadd (%p5188_p2), [#allocation32], 4294967280  ;;  %p1068_p6 = scmp.lt.s32.totalorder %s7664_s27, 1  ;;  %v4852_v0 = vld [vmem:[#allocation4 + $0x30] sm:$0xf]  ;;  %s7665_s28 = sld [smem:[#allocation47_spill]] }
  0x70   : > { %v5018_v1 = vld [vmem:[#allocation4 + $0x34] sm:$0xf0]  ;;  %v4844_v2 = vld [vmem:[#allocation4 + $0x20] sm:$0xf]  ;;  %v5016_v4 = vld [vmem:[#allocation4 + $0x24] sm:$0xf0] }
  0x71   : > { %s1069_s5 = scalar_select %p1068_p6, %s7664_s27, 1  ;;  %v4853_v3 = vor.u32 %v5018_v1, %v4852_v0  ;;  %v4845_v5 = vor.u32 %v5016_v4, %v4844_v2  ;;  %v4836_v6 = vld [vmem:[#allocation4 + $0x10] sm:$0xf]  ;;  %v5014_v7 = vld [vmem:[#allocation4 + $0x14] sm:$0xf0]  ;;  %vm1143_vm0 = vcmask 523264  }
  0x72   : > { %v4837_v8 = vor.u32 %v5014_v7, %v4836_v6  ;;  %v4828_v9 = vld [vmem:[#allocation4] sm:$0xf]  ;;  %v5012_v10 = vld [vmem:[#allocation4 + $0x4] sm:$0xf0]  ;;  %s6101_s2 = smov 88   ;;  %s6102_s7 = smov 96  }
  0x73   : > { %1151 = vmatpush.bf16.msra.mxu0 %v4853_v3  ;;  %s6435_s26 = sshll.u32 %s1069_s5, 3  ;;  %v4829_v11 = vor.u32 %v5012_v10, %v4828_v9  ;;  %v6448_v14 = vld [vmem:[#allocation6] sm:$0x3]  ;;  %s6103_s9 = smov 120   ;;  %v6108_v23 = vmov 1983009808  }
  0x74   : > { %v1099_v15 = vperm.slane %v6448_v14, 0  ;;  %s6104_s29 = smov 80   ;;  %s6105_s1 = smov 104   ;;  %v1201_v24 = vunpack.c.l.s4 %v6108_v23  ;;  %vm1196_vm1 = vcmask 1047556   ;;  %v6110_v34 = vmov 1934713408  }
  0x75   : > { %s6441_s4 = scalar_lea.vmem %s7665_s28, %s6435_s26  ;;  %s6106_s8 = smov 112   ;;  %v1249_v35 = vunpack.c.l.s4 %v6110_v34  ;;  %vm1938_vm2 = vcmask 64512   ;;  %vm2206_vm3 = vcmask 1043456   ;;  %vm2609_vm4 = vcmask 130048  }
  0x76   : > { %v1081_v12 = vld [vmem:[%s6441_s4] sm:$0xff]  ;;  %s6107_s30 = smov 72   ;;  %s6109_s0 = smov 64   ;;  %v6459_v27 = vunpack.c.0.s8 %v1201_v24  ;;  %vm2611_vm5 = vcmask 195584   ;;  %vm2613_vm6 = vcmask 261120   ;;  %vm2615_vm7 = vcmask 326656  }
  0x77   : > { %1152 = vmatpush.bf16.msra.mxu0 %v4845_v5  ;;  %v6444_v13 = vpack.c.bf16 %v1081_v12, %v1081_v12  ;;  %v6473_v52 = vunpack.c.0.s8 %v1249_v35  ;;  %s7666_s3 = sld [smem:[#allocation50_spill]]  ;;  %s6111_s25 = smov 32   ;;  %vm2617_vm8 = vcmask 392192   ;;  %vm2619_vm9 = vcmask 457728  }
  0x78   : > { %s6112_s6 = smov 24   ;;  %s6113_s28 = smov 16  }
  0x79   : > { %s6114_s11 = smov 8   ;;  %s7637_s21 = smov 40  }
  0x7b   : > { %1153 = vmatpush.bf16.msra.mxu0 %v4837_v8 }
  0x7d   : > { %s1084_s5 = scalar_lea.vmem %s7666_s3, %s7664_s27  ;;  %s7636_s3 = smov 48  }
  0x7f   : > { %1154 = vmatpush.bf16.msra.mxu0 %v4829_v11 }
  0x82   : > { %4858 = vmatmul.msk.bf16.vlgmr.msra.gmra.mxu0 %vm1143_vm0, %v6444_v13 }
  0xff   : > { %v1156_v16 = vpop.f32.mrf.mxu0 }
 0x100   : > { %v1157_v17 = vadd.f32 %v1156_v16, %v1099_v15 }
 0x102   : > { %1186 = vrot.lane.b32.xlu2 %v1157_v17, %s6101_s2  ;;  %1183 = vrot.lane.b32.xlu1 %v1157_v17, %s6102_s7  ;;  %v1198_v30 = vrot.slane %v1157_v17, 4 }
 0x103   : > { %1174 = vrot.lane.b32.xlu0 %v1157_v17, %s6103_s9 }
 0x107   : > { %v1158_v18 = vpop.f32.mrf.mxu0 }
 0x10a   : > { %1189 = vrot.lane.b32.xlu2 %v1157_v17, %s6104_s29  ;;  %1180 = vrot.lane.b32.xlu1 %v1157_v17, %s6105_s1 }
 0x10b   : > { %1177 = vrot.lane.b32.xlu0 %v1157_v17, %s6106_s8 }
 0x113   : > { %1192 = vrot.lane.b32.xlu0 %v1157_v17, %s6107_s30 }
 0x15c   : > { %v1187_v19 = vpop.permute.xlu2 %1186 }
 0x15d   : > { %v1234_v57 = vrot.slane %v1187_v19, 4 }
 0x164   : > { %v1190_v26 = vpop.permute.xlu2 %1189 }
 0x165   : > { %v1220_v41 = vrot.slane %v1190_v26, 4 }
 0x174   : > { %v1184_v20 = vpop.permute.xlu1 %1183 }
 0x175   : > { %v1175_v21 = vpop.permute.xlu0 %1174  ;;  %v1222_v28 = vrot.slane %v1184_v20, 4  ;;  %v1221_v48 = vsel %vm1196_vm1, %v1220_v41, %v1184_v20 }
 0x176   : > { %v5278_v22 = vpack.i.bf16 %v1175_v21, %v1157_v17  ;;  %v1210_v25 = vrot.slane %v1175_v21, 4  ;;  %v1227_v58 = vperm.slane %v1221_v48, %v6459_v27 }
 0x177   : > { %v1223_v44 = vsel %vm1196_vm1, %v1190_v26, %v1222_v28 }
 0x178   : > { %5279 = vrot.lane.b32.xlu1 %v5278_v22, %s6109_s0  ;;  %v1231_v54 = vperm.slane %v1223_v44, %v6459_v27  ;;  %v1270_v5 = vrot.slane %v1227_v58, 4 }
 0x17a   : > { %v1282_v1 = vrot.slane %v1231_v54, 4 }
 0x17c   : > { %v1181_v29 = vpop.permute.xlu1 %1180 }
 0x17d   : > { %v1208_v31 = vrot.slane %v1181_v29, 4  ;;  %v5288_v32 = vpack.i.bf16 %v1187_v19, %v1181_v29  ;;  %v1211_v33 = vsel %vm1196_vm1, %v1181_v29, %v1210_v25  ;;  %v1178_v36 = vpop.permute.xlu0 %1177 }
 0x17e   : > { %v1219_v37 = vperm.slane %v1211_v33, %v6459_v27  ;;  %v1195_v38 = vrot.slane %v1178_v36, 4  ;;  %v5283_v39 = vpack.i.bf16 %v1184_v20, %v1178_v36  ;;  %v1199_v40 = vsel %vm1196_vm1, %v1178_v36, %v1198_v30 }
 0x17f   : > { %v1209_v42 = vsel %vm1196_vm1, %v1208_v31, %v1175_v21  ;;  %v1207_v43 = vperm.slane %v1199_v40, %v6459_v27  ;;  %5289 = vrot.lane.b32.xlu0 %v5288_v32, %s6109_s0 }
 0x180   : > { %v1215_v45 = vperm.slane %v1209_v42, %v6459_v27  ;;  %v1256_v46 = vrot.slane %v1219_v37, 4  ;;  %v1197_v47 = vsel %vm1196_vm1, %v1195_v38, %v1157_v17  ;;  %5284 = vrot.lane.b32.xlu2 %v5283_v39, %s6109_s0 }
 0x181   : > { %v1203_v49 = vperm.slane %v1197_v47, %v6459_v27  ;;  %v1258_v50 = vrot.slane %v1207_v43, 4 }
 0x182   : > { %v1244_v51 = vrot.slane %v1215_v45, 4  ;;  %v1257_v53 = vsel %vm1196_vm1, %v1256_v46, %v1207_v43 }
 0x183   : > { %v1246_v55 = vrot.slane %v1203_v49, 4  ;;  %v1259_v56 = vsel %vm1196_vm1, %v1219_v37, %v1258_v50  ;;  %v1263_v7 = vperm.slane %v1257_v53, %v6473_v52 }
 0x184   : > { %v1245_v59 = vsel %vm1196_vm1, %v1244_v51, %v1203_v49  ;;  %v1267_v62 = vperm.slane %v1259_v56, %v6473_v52 }
 0x185   : > { %v1247_v60 = vsel %vm1196_vm1, %v1215_v45, %v1246_v55  ;;  %v1193_v61 = vpop.permute.xlu0 %1192  ;;  %v1251_v11 = vperm.slane %v1245_v59, %v6473_v52  ;;  %v1302_v24 = vrot.slane %v1263_v7, 4 }
 0x186   : > { %v1232_v63 = vrot.slane %v1193_v61, 4  ;;  %v1235_v0 = vsel %vm1196_vm1, %v1193_v61, %v1234_v57  ;;  %v1255_v2 = vperm.slane %v1247_v60, %v6473_v52  ;;  %v5293_v4 = vpack.i.bf16 %v1193_v61, %v1190_v26 }
 0x187   : > { %v1243_v3 = vperm.slane %v1235_v0, %v6459_v27  ;;  %v1306_v12 = vrot.slane %v1267_v62, 4  ;;  %v1294_v32 = vrot.slane %v1251_v11, 4 }
 0x188   : > { %v1233_v6 = vsel %vm1196_vm1, %v1232_v63, %v1187_v19  ;;  %5294 = vrot.lane.b32.xlu1 %v5293_v4, %s6109_s0  ;;  %v1298_v16 = vrot.slane %v1255_v2, 4 }
 0x189   : > { %v1239_v8 = vperm.slane %v1233_v6, %v6459_v27  ;;  %v1280_v9 = vrot.slane %v1243_v3, 4  ;;  %v1283_v10 = vsel %vm1196_vm1, %v1243_v3, %v1282_v1 }
 0x18a   : > { %v1291_v15 = vperm.slane %v1283_v10, %v6473_v52 }
 0x18b   : > { %v1268_v17 = vrot.slane %v1239_v8, 4  ;;  %v1271_v18 = vsel %vm1196_vm1, %v1239_v8, %v1270_v5  ;;  %v1281_v19 = vsel %vm1196_vm1, %v1280_v9, %v1231_v54 }
 0x18c   : > { %v1279_v20 = vperm.slane %v1271_v18, %v6473_v52  ;;  %v1287_v21 = vperm.slane %v1281_v19, %v6473_v52  ;;  %v1304_v22 = vrot.slane %v1291_v15, 4  ;;  %v1307_v23 = vsel %vm1196_vm1, %v1291_v15, %v1306_v12 }
 0x18d   : > { %v1269_v25 = vsel %vm1196_vm1, %v1268_v17, %v1227_v58  ;;  %v1344_v26 = vrot.slane %v1307_v23, 4 }
 0x18e   : > { %v1275_v28 = vperm.slane %v1269_v25, %v6473_v52  ;;  %v1296_v29 = vrot.slane %v1279_v20, 4  ;;  %v1299_v30 = vsel %vm1196_vm1, %v1279_v20, %v1298_v16  ;;  %v1300_v31 = vrot.slane %v1287_v21, 4 }
 0x18f   : > { %v1320_v33 = vrot.slane %v1299_v30, 4  ;;  %v1303_v34 = vsel %vm1196_vm1, %v1287_v21, %v1302_v24  ;;  %v1305_v35 = vsel %vm1196_vm1, %v1304_v22, %v1267_v62 }
 0x190   : > { %v1292_v36 = vrot.slane %v1275_v28, 4  ;;  %v1301_v37 = vsel %vm1196_vm1, %v1300_v31, %v1263_v7  ;;  %v1332_v38 = vrot.slane %v1305_v35, 4  ;;  %v1345_v39 = vsel %vm1196_vm1, %v1344_v26, %v1303_v34 }
 0x191   : > { %v1334_v40 = vrot.slane %v1301_v37, 4  ;;  %v1346_v41 = vrot.slane %v1303_v34, 4  ;;  %v1295_v42 = vsel %vm1196_vm1, %v1275_v28, %v1294_v32  ;;  %v1297_v43 = vsel %vm1196_vm1, %v1296_v29, %v1255_v2 }
 0x192   : > { %v1293_v44 = vsel %vm1196_vm1, %v1292_v36, %v1251_v11  ;;  %v1308_v45 = vrot.slane %v1297_v43, 4  ;;  %v1321_v46 = vsel %vm1196_vm1, %v1320_v33, %v1295_v42  ;;  %v1322_v47 = vrot.slane %v1295_v42, 4 }
 0x193   : > { %v1335_v48 = vsel %vm1196_vm1, %v1305_v35, %v1334_v40  ;;  %v1347_v49 = vsel %vm1196_vm1, %v1307_v23, %v1346_v41  ;;  %v1310_v50 = vrot.slane %v1293_v44, 4  ;;  %v1327_v51 = vperm.slane %v1321_v46, %v6459_v27  ;;  %v5015_v46 = vld [vmem:[#allocation4 + $0x24] sm:$0xf] }
 0x194   : > { %v1355_v53 = vperm.slane %v1347_v49, %v6459_v27  ;;  %v1309_v54 = vsel %vm1196_vm1, %v1308_v45, %v1293_v44  ;;  %v1333_v55 = vsel %vm1196_vm1, %v1332_v38, %v1301_v37  ;;  %v1351_v56 = vperm.slane %v1345_v39, %v6459_v27  ;;  %v4854_v44 = vld [vmem:[#allocation4 + $0x38] sm:$0xf0]  ;;  %v5013_v49 = vld [vmem:[#allocation4 + $0x14] sm:$0xf] }
 0x195   : > { %v1315_v57 = vperm.slane %v1309_v54, %v6459_v27  ;;  %v1339_v58 = vperm.slane %v1333_v55, %v6459_v27  ;;  %v1356_v59 = vrot.slane %v1327_v51, 4  ;;  %v1311_v60 = vsel %vm1196_vm1, %v1297_v43, %v1310_v50  ;;  %v5017_v43 = vld [vmem:[#allocation4 + $0x34] sm:$0xf]  ;;  %v4838_v50 = vld [vmem:[#allocation4 + $0x18] sm:$0xf0] }
 0x196   : > { %v1380_v61 = vrot.slane %v1351_v56, 4  ;;  %v1319_v62 = vperm.slane %v1311_v60, %v6459_v27  ;;  %v1323_v63 = vsel %vm1196_vm1, %v1299_v30, %v1322_v47  ;;  %v1343_v0 = vperm.slane %v1335_v48, %v6459_v27  ;;  %v4846_v47 = vld [vmem:[#allocation4 + $0x28] sm:$0xf0] }
 0x197   : > { %v1357_v1 = vsel %vm1196_vm1, %v1356_v59, %v1315_v57  ;;  %v1358_v2 = vrot.slane %v1315_v57, 4  ;;  %v1382_v3 = vrot.slane %v1339_v58, 4  ;;  %v1331_v4 = vperm.slane %v1323_v63, %v6459_v27  ;;  %v4830_v54 = vld [vmem:[#allocation4 + $0x8] sm:$0xf0] }
 0x198   : > { %v1363_v5 = vperm.slane %v1357_v1, %v6473_v52  ;;  %v1381_v6 = vsel %vm1196_vm1, %v1380_v61, %v1339_v58  ;;  %v1370_v7 = vrot.slane %v1319_v62, 4  ;;  %v1392_v8 = vrot.slane %v1355_v53, 4 }
 0x199   : > { %v1387_v9 = vperm.slane %v1381_v6, %v6473_v52  ;;  %v1368_v10 = vrot.slane %v1331_v4, 4  ;;  %v1394_v11 = vrot.slane %v1343_v0, 4  ;;  %v1359_v12 = vsel %vm1196_vm1, %v1327_v51, %v1358_v2 }
 0x19a   : > { %v1393_v15 = vsel %vm1196_vm1, %v1392_v8, %v1343_v0  ;;  %v1406_v16 = vrot.slane %v1363_v5, 4  ;;  %v1367_v17 = vperm.slane %v1359_v12, %v6473_v52  ;;  %v1383_v18 = vsel %vm1196_vm1, %v1351_v56, %v1382_v3 }
 0x19b   : > { %v1404_v19 = vrot.slane %v1387_v9, 4  ;;  %v1369_v20 = vsel %vm1196_vm1, %v1368_v10, %v1319_v62  ;;  %v1399_v21 = vperm.slane %v1393_v15, %v6473_v52  ;;  %v1391_v22 = vperm.slane %v1383_v18, %v6473_v52 }
 0x19c   : > { %v1375_v23 = vperm.slane %v1369_v20, %v6473_v52  ;;  %v6535_v24 = vsel %vm1196_vm1, %v1387_v9, %v1406_v16  ;;  %v1410_v25 = vrot.slane %v1367_v17, 4  ;;  %v1371_v26 = vsel %vm1196_vm1, %v1331_v4, %v1370_v7 }
 0x19d   : > { %v6539_v28 = vsel %vm1196_vm1, %v1404_v19, %v1363_v5  ;;  %v1412_v29 = vrot.slane %v1399_v21, 4  ;;  %v1408_v30 = vrot.slane %v1391_v22, 4  ;;  %v1379_v33 = vperm.slane %v1371_v26, %v6473_v52 }
 0x19e   : > { %v1414_v31 = vrot.slane %v1375_v23, 4  ;;  %v6542_v32 = vsel %vm1196_vm1, %v1391_v22, %v1410_v25  ;;  %v1395_v36 = vsel %vm1196_vm1, %v1355_v53, %v1394_v11  ;;  %v4857_v45 = vor.u32 %v5017_v43, %v4854_v44  ;;  %v5011_v53 = vld [vmem:[#allocation4 + $0x4] sm:$0xf] }
 0x19f   : > { %v6546_v34 = vsel %vm1196_vm1, %v1412_v29, %v1375_v23  ;;  %v6549_v35 = vsel %vm1196_vm1, %v1408_v30, %v1367_v17  ;;  %v1403_v38 = vperm.slane %v1395_v36, %v6473_v52  ;;  %v1418_v39 = vrot.slane %v1379_v33, 4 }
 0x1a0   : > { %v6553_v37 = vsel %vm1196_vm1, %v1399_v21, %v1414_v31  ;;  %1164 = vmatpush.bf16.msra.mxu1 %v4857_v45  ;;  %v4849_v48 = vor.u32 %v5015_v46, %v4846_v47  ;;  %v4841_v51 = vor.u32 %v5013_v49, %v4838_v50  ;;  %v4833_v55 = vor.u32 %v5011_v53, %v4830_v54 }
 0x1a1   : > { %v1416_v40 = vrot.slane %v1403_v38, 4  ;;  %v6557_v41 = vsel %vm1196_vm1, %v1403_v38, %v1418_v39 }
 0x1a3   : > { %v6560_v42 = vsel %vm1196_vm1, %v1416_v40, %v1379_v33 }
 0x1a4   : > { %1165 = vmatpush.bf16.msra.mxu1 %v4849_v48 }
 0x1a8   : > { %1166 = vmatpush.bf16.msra.mxu1 %v4841_v51 }
 0x1ac   : > { %1167 = vmatpush.bf16.msra.mxu1 %v4833_v55 }
 0x1af   : > { %4859 = vmatmul.msk.bf16.vlgmr.msra.gmra.mxu1 %vm1143_vm0, %v6444_v13 }
 0x1da   : > { %v5285_v57 = vpop.permute.xlu2 %5284 }
 0x1db   : > { %v5286_v59 = vunpack.i.l.bf16 %v5285_v57  ;;  %v5287_v11 = vunpack.i.h.bf16 %v5285_v57 }
 0x1dd   : > { %v1452_v63 = vrot.slane %v5286_v59, 4  ;;  %v1478_v22 = vrot.slane %v5287_v11, 4 }
 0x1ea   : > { %v5280_v56 = vpop.permute.xlu1 %5279 }
 0x1eb   : > { %v5281_v58 = vunpack.i.l.bf16 %v5280_v56  ;;  %v5282_v60 = vunpack.i.h.bf16 %v5280_v56 }
 0x1ed   : > { %v1454_v61 = vrot.slane %v5281_v58, 4  ;;  %v1466_v0 = vrot.slane %v5282_v60, 4  ;;  %v1453_v3 = vsel %vm1196_vm1, %v1452_v63, %v5281_v58 }
 0x1ee   : > { %v1459_v8 = vperm.slane %v1453_v3, %v6459_v27 }
 0x1ef   : > { %v1455_v2 = vsel %vm1196_vm1, %v5286_v59, %v1454_v61 }
 0x1f0   : > { %v1463_v13 = vperm.slane %v1455_v2, %v6459_v27  ;;  %v1502_v17 = vrot.slane %v1459_v8, 4 }
 0x1f1   : > { %v5290_v62 = vpop.permute.xlu0 %5289 }
 0x1f2   : > { %v5291_v1 = vunpack.i.l.bf16 %v5290_v62  ;;  %v5292_v10 = vunpack.i.h.bf16 %v5290_v62  ;;  %v1514_v15 = vrot.slane %v1463_v13, 4 }
 0x1f4   : > { %v1464_v4 = vrot.slane %v5291_v1, 4  ;;  %v1467_v5 = vsel %vm1196_vm1, %v5291_v1, %v1466_v0  ;;  %v1490_v19 = vrot.slane %v5292_v10, 4 }
 0x1f5   : > { %v1475_v6 = vperm.slane %v1467_v5, %v6459_v27 }
 0x1f6   : > { %v1465_v7 = vsel %vm1196_vm1, %v1464_v4, %v5282_v60 }
 0x1f7   : > { %v1471_v9 = vperm.slane %v1465_v7, %v6459_v27  ;;  %v1512_v12 = vrot.slane %v1475_v6, 4  ;;  %v1515_v20 = vsel %vm1196_vm1, %v1475_v6, %v1514_v15 }
 0x1f8   : > { %v1523_v33 = vperm.slane %v1515_v20, %v6473_v52 }
 0x1f9   : > { %v1500_v16 = vrot.slane %v1471_v9, 4  ;;  %v1503_v23 = vsel %vm1196_vm1, %v1471_v9, %v1502_v17  ;;  %v1513_v25 = vsel %vm1196_vm1, %v1512_v12, %v1463_v13 }
 0x1fa   : > { %v5295_v18 = vpop.permute.xlu1 %5294  ;;  %v1511_v40 = vperm.slane %v1503_v23, %v6473_v52  ;;  %v1519_v43 = vperm.slane %v1513_v25, %v6473_v52  ;;  %v1562_v53 = vrot.slane %v1523_v33, 4 }
 0x1fb   : > { %v5297_v21 = vunpack.i.h.bf16 %v5295_v18  ;;  %v5296_v26 = vunpack.i.l.bf16 %v5295_v18  ;;  %v1501_v29 = vsel %vm1196_vm1, %v1500_v16, %v1459_v8 }
 0x1fc   : > { %v1507_v46 = vperm.slane %v1501_v29, %v6473_v52  ;;  %v1558_v56 = vrot.slane %v1519_v43, 4  ;;  %v1554_v61 = vrot.slane %v1511_v40, 4 }
 0x1fd   : > { %v1488_v30 = vrot.slane %v5297_v21, 4  ;;  %v1491_v31 = vsel %vm1196_vm1, %v5297_v21, %v1490_v19  ;;  %v1476_v36 = vrot.slane %v5296_v26, 4  ;;  %v1479_v38 = vsel %vm1196_vm1, %v5296_v26, %v1478_v22 }
 0x1fe   : > { %v1499_v39 = vperm.slane %v1491_v31, %v6459_v27  ;;  %v1487_v44 = vperm.slane %v1479_v38, %v6459_v27  ;;  %v1550_v60 = vrot.slane %v1507_v46, 4 }
 0x1ff   : > { %v1489_v45 = vsel %vm1196_vm1, %v1488_v30, %v5292_v10  ;;  %v1477_v47 = vsel %vm1196_vm1, %v1476_v36, %v5287_v11 }
 0x200   : > { %v1495_v48 = vperm.slane %v1489_v45, %v6459_v27  ;;  %v1536_v49 = vrot.slane %v1499_v39, 4  ;;  %v1483_v50 = vperm.slane %v1477_v47, %v6459_v27  ;;  %v1538_v51 = vrot.slane %v1487_v44, 4 }
 0x202   : > { %v1524_v54 = vrot.slane %v1495_v48, 4  ;;  %v1537_v55 = vsel %vm1196_vm1, %v1536_v49, %v1487_v44  ;;  %v1526_v57 = vrot.slane %v1483_v50, 4  ;;  %v1539_v58 = vsel %vm1196_vm1, %v1499_v39, %v1538_v51 }
 0x203   : > { %v1543_v59 = vperm.slane %v1537_v55, %v6473_v52  ;;  %v1547_v63 = vperm.slane %v1539_v58, %v6473_v52 }
 0x204   : > { %v1525_v62 = vsel %vm1196_vm1, %v1524_v54, %v1483_v50  ;;  %v1527_v0 = vsel %vm1196_vm1, %v1495_v48, %v1526_v57 }
 0x205   : > { %v1531_v1 = vperm.slane %v1525_v62, %v6473_v52  ;;  %v1556_v2 = vrot.slane %v1543_v59, 4  ;;  %v1559_v3 = vsel %vm1196_vm1, %v1543_v59, %v1558_v56  ;;  %v1535_v4 = vperm.slane %v1527_v0, %v6473_v52 }
 0x206   : > { %v1560_v5 = vrot.slane %v1547_v63, 4  ;;  %v1563_v6 = vsel %vm1196_vm1, %v1547_v63, %v1562_v53  ;;  %v1602_v13 = vrot.slane %v1559_v3, 4 }
 0x207   : > { %v1548_v7 = vrot.slane %v1531_v1, 4  ;;  %v1600_v8 = vrot.slane %v1563_v6, 4  ;;  %v1551_v9 = vsel %vm1196_vm1, %v1531_v1, %v1550_v60  ;;  %v1557_v10 = vsel %vm1196_vm1, %v1556_v2, %v1519_v43 }
 0x208   : > { %v1552_v11 = vrot.slane %v1535_v4, 4  ;;  %v1555_v12 = vsel %vm1196_vm1, %v1535_v4, %v1554_v61  ;;  %v1561_v15 = vsel %vm1196_vm1, %v1560_v5, %v1523_v33  ;;  %v1578_v16 = vrot.slane %v1551_v9, 4 }
 0x209   : > { %v1549_v17 = vsel %vm1196_vm1, %v1548_v7, %v1507_v46  ;;  %v1576_v18 = vrot.slane %v1555_v12, 4  ;;  %v1588_v19 = vrot.slane %v1561_v15, 4  ;;  %v1590_v20 = vrot.slane %v1557_v10, 4 }
 0x20a   : > { %v1553_v21 = vsel %vm1196_vm1, %v1552_v11, %v1511_v40  ;;  %v1566_v22 = vrot.slane %v1549_v17, 4  ;;  %v1601_v23 = vsel %vm1196_vm1, %v1600_v8, %v1559_v3  ;;  %v1579_v25 = vsel %vm1196_vm1, %v1555_v12, %v1578_v16 }
 0x20b   : > { %v1564_v26 = vrot.slane %v1553_v21, 4  ;;  %v1577_v29 = vsel %vm1196_vm1, %v1576_v18, %v1551_v9  ;;  %v1589_v30 = vsel %vm1196_vm1, %v1588_v19, %v1557_v10  ;;  %v1607_v31 = vperm.slane %v1601_v23, %v6459_v27 }
 0x20c   : > { %v1583_v33 = vperm.slane %v1577_v29, %v6459_v27  ;;  %v1595_v36 = vperm.slane %v1589_v30, %v6459_v27  ;;  %v1567_v38 = vsel %vm1196_vm1, %v1553_v21, %v1566_v22  ;;  %v1587_v39 = vperm.slane %v1579_v25, %v6459_v27 }
 0x20d   : > { %v1565_v40 = vsel %vm1196_vm1, %v1564_v26, %v1549_v17  ;;  %v1636_v43 = vrot.slane %v1607_v31, 4  ;;  %v1575_v44 = vperm.slane %v1567_v38, %v6459_v27  ;;  %v1591_v45 = vsel %vm1196_vm1, %v1561_v15, %v1590_v20 }
 0x20e   : > { %v1571_v46 = vperm.slane %v1565_v40, %v6459_v27  ;;  %v1612_v47 = vrot.slane %v1583_v33, 4  ;;  %v1599_v48 = vperm.slane %v1591_v45, %v6459_v27  ;;  %v1603_v49 = vsel %vm1196_vm1, %v1563_v6, %v1602_v13 }
 0x20f   : > { %v1637_v50 = vsel %vm1196_vm1, %v1636_v43, %v1595_v36  ;;  %v1611_v51 = vperm.slane %v1603_v49, %v6459_v27  ;;  %v1624_v53 = vrot.slane %v1587_v39, 4  ;;  %v1626_v54 = vrot.slane %v1575_v44, 4 }
 0x210   : > { %v1613_v55 = vsel %vm1196_vm1, %v1612_v47, %v1571_v46  ;;  %v1643_v56 = vperm.slane %v1637_v50, %v6473_v52  ;;  %v1614_v57 = vrot.slane %v1571_v46, 4  ;;  %v1638_v58 = vrot.slane %v1595_v36, 4 }
 0x211   : > { %v1619_v59 = vperm.slane %v1613_v55, %v6473_v52  ;;  %v1625_v60 = vsel %vm1196_vm1, %v1624_v53, %v1575_v44  ;;  %v1648_v61 = vrot.slane %v1611_v51, 4  ;;  %v1627_v62 = vsel %vm1196_vm1, %v1587_v39, %v1626_v54 }
 0x212   : > { %v1660_v63 = vrot.slane %v1643_v56, 4  ;;  %v1631_v0 = vperm.slane %v1625_v60, %v6473_v52  ;;  %v1615_v1 = vsel %vm1196_vm1, %v1583_v33, %v1614_v57  ;;  %v1639_v2 = vsel %vm1196_vm1, %v1607_v31, %v1638_v58 }
 0x213   : > { %v1649_v3 = vsel %vm1196_vm1, %v1648_v61, %v1599_v48  ;;  %v1662_v4 = vrot.slane %v1619_v59, 4  ;;  %v1623_v5 = vperm.slane %v1615_v1, %v6473_v52  ;;  %v1647_v6 = vperm.slane %v1639_v2, %v6473_v52 }
 0x214   : > { %v1661_v13 = vsel %vm1196_vm1, %v1660_v63, %v1619_v59  ;;  %v1655_v7 = vperm.slane %v1649_v3, %v6473_v52  ;;  %v1670_v8 = vrot.slane %v1631_v0, 4  ;;  %v1635_v9 = vperm.slane %v1627_v62, %v6473_v52 }
 0x215   : > { %v1676_v10 = vpack.c.bf16 %v1661_v13, %v1661_v13  ;;  %v1663_v11 = vsel %vm1196_vm1, %v1643_v56, %v1662_v4  ;;  %v1664_v12 = vrot.slane %v1647_v6, 4  ;;  %v1666_v15 = vrot.slane %v1623_v5, 4 }
 0x216   : > { %v1668_v16 = vrot.slane %v1655_v7, 4  ;;  %v1677_v17 = vpack.c.bf16 %v1663_v11, %v1663_v11  ;;  %v1650_v18 = vrot.slane %v1599_v48, 4  ;;  %v1671_v22 = vsel %vm1196_vm1, %v1655_v7, %v1670_v8 }
 0x217   : > { %v1943_v19 = vsel %vm1938_vm2, %v1676_v10, 0  ;;  %v1665_v20 = vsel %vm1196_vm1, %v1664_v12, %v1623_v5  ;;  %v1667_v21 = vsel %vm1196_vm1, %v1647_v6, %v1666_v15  ;;  %v1674_v33 = vrot.slane %v1635_v9, 4 }
 0x218   : > { %1952 = vmatpush.bf16.xpose.msra.mxu2 %v1943_v19  ;;  %v1669_v23 = vsel %vm1196_vm1, %v1668_v16, %v1631_v0  ;;  %v1962_v25 = vsel %vm1938_vm2, %v1677_v17, 0  ;;  %v1678_v26 = vpack.c.bf16 %v1665_v20, %v1665_v20  ;;  %v1679_v29 = vpack.c.bf16 %v1667_v21, %v1667_v21 }
 0x219   : > { %v1680_v30 = vpack.c.bf16 %v1669_v23, %v1669_v23  ;;  %1971 = vmatpush.bf16.xpose.msra.mxu3 %v1962_v25  ;;  %v1651_v31 = vsel %vm1196_vm1, %v1611_v51, %v1650_v18  ;;  %v1681_v43 = vpack.c.bf16 %v1671_v22, %v1671_v22  ;;  %v1420_v45 = vpack.c.bf16 %v6539_v28, %v6539_v28 }
 0x21a   : > { %v1981_v36 = vsel %vm1938_vm2, %v1678_v26, 0  ;;  %v2000_v38 = vsel %vm1938_vm2, %v1679_v29, 0  ;;  %v1659_v39 = vperm.slane %v1651_v31, %v6473_v52  ;;  %v1421_v47 = vpack.c.bf16 %v6535_v24, %v6535_v24 }
 0x21b   : > { %v2019_v40 = vsel %vm1938_vm2, %v1680_v30, 0  ;;  %v2038_v48 = vsel %vm1938_vm2, %v1681_v43, 0  ;;  %v1424_v50 = vpack.c.bf16 %v6546_v34, %v6546_v34  ;;  %v1422_v53 = vpack.c.bf16 %v6549_v35, %v6549_v35 }
 0x21c   : > { %2028 = vmatpush.bf16.xpose.msrb.mxu0 %v2019_v40  ;;  %v1675_v44 = vsel %vm1196_vm1, %v1659_v39, %v1674_v33  ;;  %v1672_v24 = vrot.slane %v1659_v39, 4  ;;  %v1423_v54 = vpack.c.bf16 %v6542_v32, %v6542_v32  ;;  %v1425_v55 = vpack.c.bf16 %v6553_v37, %v6553_v37 }
 0x21d   : > { %v1683_v46 = vpack.c.bf16 %v1675_v44, %v1675_v44  ;;  %v1427_v56 = vpack.c.bf16 %v6557_v41, %v6557_v41  ;;  %v1426_v32 = vpack.c.bf16 %v6560_v42, %v6560_v42  ;;  %v1100_v35 = vperm.slane %v6448_v14, 1  ;;  %v5338_v41 = vld [vmem:[%s1084_s5] ss:$0 sm:$0xff]  ;;  %s7635_s5 = smov 56  }
 0x21e   : > { %v1673_v28 = vsel %vm1196_vm1, %v1672_v24, %v1635_v9  ;;  %v1083_v42 = vld [vmem:[#allocation2] sm:$0xff] }
 0x21f   : > { %4860 = vmatmul.msk.bf16.vlgmr.msra.gmra.mxu2 %vm1938_vm2, %v1420_v45  ;;  %v2076_v49 = vsel %vm1938_vm2, %v1683_v46, 0  ;;  %v1682_v51 = vpack.c.bf16 %v1673_v28, %v1673_v28  ;;  %v1087_v59 = vadd.f32 %v5338_v41, %v1083_v42 }
 0x220   : > { %1990 = vmatpush.bf16.xpose.msrb.mxu2 %v1981_v36  ;;  %4861 = vmatmul.msk.bf16.vlgmr.msra.gmra.mxu3 %vm1938_vm2, %v1421_v47 }
 0x221   : > { %2009 = vmatpush.bf16.xpose.msrb.mxu3 %v2000_v38  ;;  %v2057_v34 = vsel %vm1938_vm2, %v1682_v51, 0 }
 0x223   : > { %4864 = vmatmul.msk.bf16.vlgmr.msrb.gmra.mxu0 %vm1938_vm2, %v1424_v50 }
 0x228   : > { %2047 = vmatpush.bf16.xpose.msra.mxu2 %v2038_v48 }
 0x229   : > { %2085 = vmatpush.bf16.xpose.msra.mxu3 %v2076_v49 }
 0x22c   : > { %v1169_v57 = vpop.f32.mrf.mxu1 }
 0x22d   : > { %v6681_v58 = vadd.f32 %v1169_v57, %v1100_v35 }
 0x22f   : > { %4862 = vmatmul.msk.bf16.vlgmr.msrb.gmra.mxu2 %vm1938_vm2, %v1422_v53  ;;  %1697 = vrot.lane.b32.xlu1 %v6681_v58, %s6101_s2 }
 0x230   : > { %2066 = vmatpush.bf16.xpose.msrb.mxu2 %v2057_v34  ;;  %4863 = vmatmul.msk.bf16.vlgmr.msrb.gmra.mxu3 %vm1938_vm2, %v1423_v54 }
 0x231   : > { %1694 = vrot.lane.b32.xlu0 %v6681_v58, %s6102_s7  ;;  %1700 = vrot.lane.b32.xlu2 %v6681_v58, %s6104_s29 }
 0x234   : > { %v1171_v37 = vpop.f32.mrf.mxu1 }
 0x239   : > { %1685 = vrot.lane.b32.xlu0 %v6681_v58, %s6103_s9 }
 0x23f   : > { %4865 = vmatmul.msk.bf16.vlgmr.msra.gmra.mxu2 %vm1938_vm2, %v1425_v55 }
 0x240   : > { %4867 = vmatmul.msk.bf16.vlgmr.msra.gmra.mxu3 %vm1938_vm2, %v1427_v56 }
 0x24f   : > { %4866 = vmatmul.msk.bf16.vlgmr.msrb.gmra.mxu2 %vm1938_vm2, %v1426_v32 }
 0x28b   : > { %v1701_v47 = vpop.permute.xlu2 %1700 }
 0x2a0   : > { %v2030_v14 = vpop.f32.mrf.mxu0 }
 0x2a1   : > { %v2095_v60 = vmul.f32 0.35355338, %v2030_v14  ;;  %v6717_v45 = vpop.permute.xlu1 %1697 }
 0x2a2   : > { %v1954_v61 = vpop.f32.mrf.mxu2 }
 0x2a3   : > { %v6691_v62 = vadd.f32 %v2095_v60, %v1087_v59  ;;  %v1973_v63 = vpop.f32.mrf.mxu3  ;;  %v2091_v2 = vmul.f32 0.35355338, %v1954_v61  ;;  %v1695_v48 = vpop.permute.xlu0 %1694 }
 0x2a4   : > { %v2092_v0 = vmul.f32 0.35355338, %v1973_v63 }
 0x2a5   : > { %v2119_v1 = vsel %vm1938_vm2, %v6691_v62, -inf  ;;  %v2099_v6 = vadd.f32 %v2091_v2, %v1087_v59 }
 0x2a6   : > { %2120 = vmax.xlane.f32.xlu1 %v2119_v1  ;;  %v6695_v3 = vadd.f32 %v2092_v0, %v1087_v59 }
 0x2a7   : > { %v2107_v8 = vsel %vm1938_vm2, %v2099_v6, -inf }
 0x2a8   : > { %v2032_v4 = vpop.f32.mrf.mxu0  ;;  %v2110_v5 = vsel %vm1938_vm2, %v6695_v3, -inf }
 0x2a9   : > { %2111 = vmax.xlane.f32.xlu2 %v2110_v5 }
 0x2aa   : > { %v1956_v13 = vpop.f32.mrf.mxu2 }
 0x2ab   : > { %v1975_v7 = vpop.f32.mrf.mxu3  ;;  %v6719_v28 = vpop.permute.xlu0 %1685 }
 0x2ae   : > { %2108 = vmax.xlane.f32.xlu1 %v2107_v8  ;;  %v1730_v8 = vrot.slane %v1701_v47, 4 }
 0x2b2   : > { %v1992_v9 = vpop.f32.mrf.mxu2 }
 0x2b3   : > { %v2093_v10 = vmul.f32 0.35355338, %v1992_v9  ;;  %v2011_v11 = vpop.f32.mrf.mxu3 }
 0x2b4   : > { %v2094_v12 = vmul.f32 0.35355338, %v2011_v11 }
 0x2b5   : > { %v2101_v15 = vadd.f32 %v2093_v10, %v1087_v59 }
 0x2b6   : > { %v2102_v16 = vadd.f32 %v2094_v12, %v1087_v59 }
 0x2b7   : > { %v2113_v17 = vsel %vm1938_vm2, %v2101_v15, -inf }
 0x2b8   : > { %2114 = vmax.xlane.f32.xlu2 %v2113_v17  ;;  %v2116_v18 = vsel %vm1938_vm2, %v2102_v16, -inf  ;;  %v1731_v17 = vsel %vm1196_vm1, %v1730_v8, %v1695_v48 }
 0x2b9   : > { %2117 = vmax.xlane.f32.xlu0 %v2116_v18 }
 0x2ba   : > { %v1994_v19 = vpop.f32.mrf.mxu2 }
 0x2bb   : > { %v2013_v20 = vpop.f32.mrf.mxu3 }
 0x2c2   : > { %v2049_v21 = vpop.f32.mrf.mxu2 }
 0x2c3   : > { %v2096_v22 = vmul.f32 0.35355338, %v2049_v21  ;;  %v2087_v23 = vpop.f32.mrf.mxu3 }
 0x2c4   : > { %v2098_v25 = vmul.f32 0.35355338, %v2087_v23  ;;  %v1737_v23 = vperm.slane %v1731_v17, %v6459_v27 }
 0x2c5   : > { %v6702_v26 = vadd.f32 %v2096_v22, %v1087_v59 }
 0x2c6   : > { %v2106_v29 = vadd.f32 %v2098_v25, %v1087_v59  ;;  %v1744_v25 = vrot.slane %v6717_v45, 4 }
 0x2c7   : > { %1688 = vrot.lane.b32.xlu1 %v6681_v58, %s6106_s8  ;;  %v2122_v30 = vsel %vm1938_vm2, %v6702_v26, -inf }
 0x2c8   : > { %2123 = vmax.xlane.f32.xlu2 %v2122_v30  ;;  %v2128_v31 = vsel %vm1938_vm2, %v2106_v29, -inf }
 0x2c9   : > { %2129 = vmax.xlane.f32.xlu0 %v2128_v31 }
 0x2ca   : > { %v2051_v33 = vpop.f32.mrf.mxu2 }
 0x2cb   : > { %v2089_v36 = vpop.f32.mrf.mxu3 }
 0x2d2   : > { %v2068_v38 = vpop.f32.mrf.mxu2 }
 0x2d3   : > { %v2097_v39 = vmul.f32 0.35355338, %v2068_v38 }
 0x2d5   : > { %v6709_v40 = vadd.f32 %v2097_v39, %v1087_v59 }
 0x2d7   : > { %v2125_v43 = vsel %vm1938_vm2, %v6709_v40, -inf }
 0x2d8   : > { %2126 = vmax.xlane.f32.xlu2 %v2125_v43  ;;  %v1780_v43 = vrot.slane %v1737_v23, 4 }
 0x2da   : > { %v2070_v44 = vpop.f32.mrf.mxu2 }
 0x2dd   : > { %1703 = vrot.lane.b32.xlu0 %v6681_v58, %s6107_s30 }
 0x2f0   : > { %1691 = vrot.lane.b32.xlu2 %v6681_v58, %s6105_s1 }
 0x319   : > { %v2121_v46 = vpop.xlane.xlu1 %2120 }
 0x31a   : > { %v2135_v59 = vsub.f32 %v6691_v62, %v2121_v46 }
 0x31c   : > { %v2112_v24 = vpop.xlane.xlu2 %2111  ;;  %v2147_v63 = vmul.f32 1.442695, %v2135_v59 }
 0x31d   : > { %v2132_v35 = vsub.f32 %v6695_v3, %v2112_v24 }
 0x31f   : > { %v2141_v41 = vmul.f32 1.442695, %v2132_v35 }
 0x321   : > { %v2109_v49 = vpop.xlane.xlu1 %2108 }
 0x322   : > { %v2131_v50 = vsub.f32 %v2099_v6, %v2109_v49  ;;  %v1732_v6 = vrot.slane %v1695_v48, 4 }
 0x324   : > { %v2139_v51 = vmul.f32 1.442695, %v2131_v50  ;;  %v1733_v12 = vsel %vm1196_vm1, %v1701_v47, %v1732_v6 }
 0x325   : > { %v1741_v21 = vperm.slane %v1733_v12, %v6459_v27 }
 0x326   : > { %5352 = vpow2.f32 %v2139_v51 }
 0x327   : > { %v1792_v39 = vrot.slane %v1741_v21, 4 }
 0x32b   : > { %v2115_v53 = vpop.xlane.xlu2 %2114 }
 0x32c   : > { %v6721_v54 = vpop.eup %5352  ;;  %v2133_v34 = vsub.f32 %v2101_v15, %v2115_v53  ;;  %v2118_v55 = vpop.xlane.xlu0 %2117  ;;  %v1708_v15 = vrot.slane %v6681_v58, 4 }
 0x32d   : > { %v2155_v56 = vsel %vm1938_vm2, %v6721_v54, 0.0  ;;  %v2134_v32 = vsub.f32 %v2102_v16, %v2118_v55 }
 0x32e   : > { %2156 = vadd.xlane.f32.xlu2 %v2155_v56  ;;  %v2143_v57 = vmul.f32 1.442695, %v2133_v34 }
 0x32f   : > { %v2145_v37 = vmul.f32 1.442695, %v2134_v32 }
 0x330   : > { %5354 = vpow2.f32 %v2143_v57 }
 0x331   : > { %5356 = vpow2.f32 %v2145_v37 }
 0x332   : > { %5358 = vpow2.f32 %v2141_v41 }
 0x333   : > { %5360 = vpow2.f32 %v2147_v63 }
 0x336   : > { %v6726_v42 = vpop.eup %5354 }
 0x337   : > { %v6729_v14 = vpop.eup %5356  ;;  %v2161_v60 = vsel %vm1938_vm2, %v6726_v42, 0.0 }
 0x338   : > { %2162 = vadd.xlane.f32.xlu1 %v2161_v60  ;;  %v2164_v61 = vsel %vm1938_vm2, %v6729_v14, 0.0  ;;  %v6735_v0 = vpop.eup %5358 }
 0x339   : > { %2165 = vadd.xlane.f32.xlu0 %v2164_v61  ;;  %v2158_v62 = vsel %vm1938_vm2, %v6735_v0, 0.0  ;;  %v6739_v5 = vpop.eup %5360  ;;  %v1689_v13 = vpop.permute.xlu1 %1688 }
 0x33a   : > { %v2167_v9 = vsel %vm1938_vm2, %v6739_v5, 0.0  ;;  %v1706_v11 = vrot.slane %v1689_v13, 4  ;;  %v1709_v19 = vsel %vm1196_vm1, %v1689_v13, %v1708_v15 }
 0x33b   : > { %v2124_v4 = vpop.xlane.xlu2 %2123 }
 0x33c   : > { %v2130_v1 = vpop.xlane.xlu0 %2129  ;;  %v2136_v16 = vsub.f32 %v6702_v26, %v2124_v4  ;;  %v1707_v22 = vsel %vm1196_vm1, %v1706_v11, %v6681_v58  ;;  %v1717_v26 = vperm.slane %v1709_v19, %v6459_v27  ;;  %v1720_v58 = vrot.slane %v6719_v28, 4 }
 0x33d   : > { %v2138_v2 = vsub.f32 %v2106_v29, %v2130_v1  ;;  %v1713_v33 = vperm.slane %v1707_v22, %v6459_v27 }
 0x33e   : > { %v2149_v29 = vmul.f32 1.442695, %v2136_v16  ;;  %v1768_v46 = vrot.slane %v1717_v26, 4 }
 0x33f   : > { %v2153_v3 = vmul.f32 1.442695, %v2138_v2  ;;  %v1756_v24 = vrot.slane %v1713_v33, 4 }
 0x340   : > { %2159 = vadd.xlane.f32.xlu1 %v2158_v62 }
 0x341   : > { %5362 = vpow2.f32 %v2153_v3 }
 0x347   : > { %v6741_v7 = vpop.eup %5362 }
 0x348   : > { %2168 = vadd.xlane.f32.xlu1 %v2167_v9  ;;  %v2176_v10 = vsel %vm1938_vm2, %v6741_v7, 0.0 }
 0x349   : > { %2177 = vadd.xlane.f32.xlu2 %v2176_v10 }
 0x34b   : > { %v2127_v18 = vpop.xlane.xlu2 %2126 }
 0x34c   : > { %v2137_v20 = vsub.f32 %v6709_v40, %v2127_v18 }
 0x34e   : > { %v2151_v30 = vmul.f32 1.442695, %v2137_v20 }
 0x34f   : > { %v1704_v31 = vpop.permute.xlu0 %1703 }
 0x350   : > { %5364 = vpow2.f32 %v2151_v30  ;;  %v1742_v36 = vrot.slane %v1704_v31, 4  ;;  %v1745_v38 = vsel %vm1196_vm1, %v1704_v31, %v1744_v25 }
 0x351   : > { %v1753_v40 = vperm.slane %v1745_v38, %v6459_v27  ;;  %5366 = vpow2.f32 %v2149_v29 }
 0x352   : > { %v1743_v44 = vsel %vm1196_vm1, %v1742_v36, %v6717_v45 }
 0x353   : > { %v1749_v47 = vperm.slane %v1743_v44, %v6459_v27  ;;  %v1790_v48 = vrot.slane %v1753_v40, 4  ;;  %v1793_v49 = vsel %vm1196_vm1, %v1753_v40, %v1792_v39  ;;  %v1692_v50 = vpop.permute.xlu2 %1691 }
 0x354   : > { %v1801_v51 = vperm.slane %v1793_v49, %v6473_v52  ;;  %v1718_v53 = vrot.slane %v1692_v50, 4  ;;  %v1721_v34 = vsel %vm1196_vm1, %v1692_v50, %v1720_v58 }
 0x355   : > { %v1778_v55 = vrot.slane %v1749_v47, 4  ;;  %v1781_v56 = vsel %vm1196_vm1, %v1749_v47, %v1780_v43  ;;  %v1791_v32 = vsel %vm1196_vm1, %v1790_v48, %v1741_v21  ;;  %v1729_v45 = vperm.slane %v1721_v34, %v6459_v27 }
 0x356   : > { %v6772_v35 = vpop.eup %5364  ;;  %v1789_v57 = vperm.slane %v1781_v56, %v6473_v52  ;;  %v1797_v37 = vperm.slane %v1791_v32, %v6473_v52  ;;  %v1814_v41 = vrot.slane %v1801_v51, 4  ;;  %v1719_v59 = vsel %vm1196_vm1, %v1718_v53, %v6719_v28 }
 0x357   : > { %v1779_v60 = vsel %vm1196_vm1, %v1778_v55, %v1737_v23  ;;  %v1725_v61 = vperm.slane %v1719_v59, %v6459_v27  ;;  %v1766_v63 = vrot.slane %v1729_v45, 4  ;;  %v1769_v1 = vsel %vm1196_vm1, %v1729_v45, %v1768_v46  ;;  %v6781_v2 = vpop.eup %5366 }
 0x358   : > { %v1785_v3 = vperm.slane %v1779_v60, %v6473_v52  ;;  %v1806_v62 = vrot.slane %v1789_v57, 4  ;;  %v1810_v4 = vrot.slane %v1797_v37, 4  ;;  %v1777_v6 = vperm.slane %v1769_v1, %v6473_v52 }
 0x359   : > { %v1754_v13 = vrot.slane %v1725_v61, 4  ;;  %v1757_v8 = vsel %vm1196_vm1, %v1725_v61, %v1756_v24  ;;  %v1767_v28 = vsel %vm1196_vm1, %v1766_v63, %v1717_v26  ;;  %v2173_v9 = vsel %vm1938_vm2, %v6772_v35, 0.0 }
 0x35a   : > { %v1802_v10 = vrot.slane %v1785_v3, 4  ;;  %v1765_v11 = vperm.slane %v1757_v8, %v6473_v52  ;;  %v1773_v12 = vperm.slane %v1767_v28, %v6473_v52  ;;  %v1815_v15 = vsel %vm1196_vm1, %v1814_v41, %v1777_v6  ;;  %2174 = vadd.xlane.f32.xlu0 %v2173_v9 }
 0x35b   : > { %v1755_v16 = vsel %vm1196_vm1, %v1754_v13, %v1713_v33  ;;  %v1816_v17 = vrot.slane %v1777_v6, 4  ;;  %v1842_v18 = vrot.slane %v1815_v15, 4  ;;  %v2170_v19 = vsel %vm1938_vm2, %v6781_v2, 0.0 }
 0x35c   : > { %v1761_v20 = vperm.slane %v1755_v16, %v6473_v52  ;;  %v1807_v21 = vsel %vm1196_vm1, %v1806_v62, %v1765_v11  ;;  %v1808_v22 = vrot.slane %v1765_v11, 4  ;;  %v1811_v23 = vsel %vm1196_vm1, %v1810_v4, %v1773_v12 }
 0x35d   : > { %v1812_v25 = vrot.slane %v1773_v12, 4  ;;  %v1817_v29 = vsel %vm1196_vm1, %v1801_v51, %v1816_v17  ;;  %v1818_v30 = vrot.slane %v1807_v21, 4  ;;  %v1843_v26 = vsel %vm1196_vm1, %v1842_v18, %v1811_v23 }
 0x35e   : > { %v1803_v31 = vsel %vm1196_vm1, %v1802_v10, %v1761_v20  ;;  %v1804_v33 = vrot.slane %v1761_v20, 4  ;;  %v1809_v36 = vsel %vm1196_vm1, %v1789_v57, %v1808_v22  ;;  %v1844_v38 = vrot.slane %v1811_v23, 4 }
 0x35f   : > { %v1813_v39 = vsel %vm1196_vm1, %v1797_v37, %v1812_v25  ;;  %v1820_v40 = vrot.slane %v1803_v31, 4  ;;  %v1830_v43 = vrot.slane %v1809_v36, 4  ;;  %v1849_v58 = vperm.slane %v1843_v26, %v6459_v27 }
 0x360   : > { %v1845_v44 = vsel %vm1196_vm1, %v1815_v15, %v1844_v38  ;;  %v1854_v46 = vrot.slane %v1817_v29, 4  ;;  %v1856_v47 = vrot.slane %v1813_v39, 4  ;;  %v1805_v48 = vsel %vm1196_vm1, %v1785_v3, %v1804_v33 }
 0x361   : > { %v1853_v49 = vperm.slane %v1845_v44, %v6459_v27  ;;  %v1819_v50 = vsel %vm1196_vm1, %v1818_v30, %v1803_v31  ;;  %v1831_v24 = vsel %vm1196_vm1, %v1830_v43, %v1805_v48  ;;  %v1832_v51 = vrot.slane %v1805_v48, 4 }
 0x362   : > { %v1857_v53 = vsel %vm1196_vm1, %v1817_v29, %v1856_v47  ;;  %2171 = vadd.xlane.f32.xlu0 %v2170_v19  ;;  %v1825_v34 = vperm.slane %v1819_v50, %v6459_v27  ;;  %v1837_v55 = vperm.slane %v1831_v24, %v6459_v27  ;;  %v1855_v56 = vsel %vm1196_vm1, %v1854_v46, %v1813_v39 }
 0x363   : > { %v1861_v32 = vperm.slane %v1855_v56, %v6459_v27  ;;  %v1892_v45 = vrot.slane %v1849_v58, 4  ;;  %v1821_v57 = vsel %vm1196_vm1, %v1807_v21, %v1820_v40  ;;  %v1833_v37 = vsel %vm1196_vm1, %v1809_v36, %v1832_v51 }
 0x364   : > { %v1868_v41 = vrot.slane %v1825_v34, 4  ;;  %v1866_v59 = vrot.slane %v1837_v55, 4  ;;  %v1829_v60 = vperm.slane %v1821_v57, %v6459_v27  ;;  %v1841_v61 = vperm.slane %v1833_v37, %v6459_v27 }
 0x365   : > { %v1893_v63 = vsel %vm1196_vm1, %v1861_v32, %v1892_v45  ;;  %v1890_v1 = vrot.slane %v1861_v32, 4  ;;  %v1865_v3 = vperm.slane %v1857_v53, %v6459_v27  ;;  %v1904_v62 = vrot.slane %v1853_v49, 4 }
 0x366   : > { %v1869_v4 = vsel %vm1196_vm1, %v1837_v55, %v1868_v41  ;;  %v1901_v6 = vperm.slane %v1893_v63, %v6473_v52  ;;  %v1867_v13 = vsel %vm1196_vm1, %v1866_v59, %v1825_v34  ;;  %v1880_v8 = vrot.slane %v1829_v60, 4 }
 0x367   : > { %v1877_v28 = vperm.slane %v1869_v4, %v6473_v52  ;;  %v1873_v9 = vperm.slane %v1867_v13, %v6473_v52  ;;  %v1891_v10 = vsel %vm1196_vm1, %v1890_v1, %v1849_v58  ;;  %v1905_v11 = vsel %vm1196_vm1, %v1865_v3, %v1904_v62 }
 0x368   : > { %v1918_v12 = vrot.slane %v1901_v6, 4  ;;  %v1897_v15 = vperm.slane %v1891_v10, %v6473_v52  ;;  %v1881_v16 = vsel %vm1196_vm1, %v1841_v61, %v1880_v8  ;;  %v1913_v17 = vperm.slane %v1905_v11, %v6473_v52 }
 0x369   : > { %v1920_v18 = vrot.slane %v1877_v28, 4  ;;  %v1889_v19 = vperm.slane %v1881_v16, %v6473_v52  ;;  %v1916_v20 = vrot.slane %v1873_v9, 4  ;;  %v1878_v21 = vrot.slane %v1841_v61, 4 }
 0x36a   : > { %v1919_v22 = vsel %vm1196_vm1, %v1918_v12, %v1877_v28  ;;  %v1914_v23 = vrot.slane %v1897_v15, 4  ;;  %v1926_v25 = vrot.slane %v1913_v17, 4  ;;  %v1902_v29 = vrot.slane %v1865_v3, 4 }
 0x36b   : > { %v1932_v30 = vpack.c.bf16 %v1919_v22, %v1919_v22  ;;  %v1921_v26 = vsel %vm1196_vm1, %v1901_v6, %v1920_v18  ;;  %v1917_v31 = vsel %vm1196_vm1, %v1897_v15, %v1916_v20  ;;  %v1879_v33 = vsel %vm1196_vm1, %v1878_v21, %v1829_v60 }
 0x36c   : > { %v1915_v36 = vsel %vm1196_vm1, %v1914_v23, %v1873_v9  ;;  %v1933_v38 = vpack.c.bf16 %v1921_v26, %v1921_v26  ;;  %v1927_v39 = vsel %vm1196_vm1, %v1926_v25, %v1889_v19  ;;  %v1931_v40 = vpack.c.bf16 %v1917_v31, %v1917_v31 }
 0x36d   : > { %v2246_v43 = vsel %vm2206_vm3, %v1932_v30, 0  ;;  %v1930_v58 = vpack.c.bf16 %v1915_v36, %v1915_v36  ;;  %v1936_v44 = vpack.c.bf16 %v1927_v39, %v1927_v39  ;;  %v1885_v46 = vperm.slane %v1879_v33, %v6473_v52 }
 0x36e   : > { %2255 = vmatpush.bf16.msra.mxu2 %v2246_v43  ;;  %v2265_v47 = vsel %vm2206_vm3, %v1933_v38, 0  ;;  %v2227_v48 = vsel %vm2206_vm3, %v1931_v40, 0  ;;  %v1903_v50 = vsel %vm1196_vm1, %v1902_v29, %v1853_v49  ;;  %v1928_v24 = vrot.slane %v1889_v19, 4 }
 0x36f   : > { %v2208_v51 = vsel %vm2206_vm3, %v1930_v58, 0  ;;  %2274 = vmatpush.bf16.msrb.mxu3 %v2265_v47  ;;  %v2322_v53 = vsel %vm2206_vm3, %v1936_v44, 0  ;;  %2236 = vmatpush.bf16.msrb.mxu1 %v2227_v48  ;;  %v1909_v34 = vperm.slane %v1903_v50, %v6473_v52  ;;  %v1924_v55 = vrot.slane %v1885_v46, 4 }
 0x370   : > { %2217 = vmatpush.bf16.msra.mxu0 %v2208_v51  ;;  %v1929_v56 = vsel %vm1196_vm1, %v1913_v17, %v1928_v24 }
 0x371   : > { %v1922_v32 = vrot.slane %v1909_v34, 4  ;;  %v1937_v45 = vpack.c.bf16 %v1929_v56, %v1929_v56  ;;  %v1925_v57 = vsel %vm1196_vm1, %v1909_v34, %v1924_v55 }
 0x372   : > { %2331 = vmatpush.bf16.msrb.mxu2 %v2322_v53  ;;  %v1935_v37 = vpack.c.bf16 %v1925_v57, %v1925_v57 }
 0x373   : > { %v1923_v49 = vsel %vm1196_vm1, %v1922_v32, %v1885_v46  ;;  %v2341_v41 = vsel %vm2206_vm3, %v1937_v45, 0 }
 0x374   : > { %v1934_v59 = vpack.c.bf16 %v1923_v49, %v1923_v49  ;;  %2350 = vmatpush.bf16.msra.mxu3 %v2341_v41  ;;  %v2303_v60 = vsel %vm2206_vm3, %v1935_v37, 0 }
 0x375   : > { %2312 = vmatpush.bf16.msra.mxu1 %v2303_v60 }
 0x376   : > { %v2284_v61 = vsel %vm2206_vm3, %v1934_v59, 0 }
 0x377   : > { %2293 = vmatpush.bf16.msrb.mxu0 %v2284_v61 }
 0x3a1   : > { %v2157_v63 = vpop.xlane.xlu2 %2156 }
 0x3a2   : > { %5368 = vrcp.f32 %v2157_v63 }
 0x3a8   : > { %v5369_v1 = vpop.eup %5368 }
 0x3a9   : > { %v2187_v3 = vmul.f32 %v5369_v1, %v6721_v54 }
 0x3ab   : > { %v2195_v62 = vpack.c.bf16 %v2187_v3, %v2187_v3  ;;  %v2163_v4 = vpop.xlane.xlu1 %2162 }
 0x3ac   : > { %5370 = vrcp.f32 %v2163_v4  ;;  %v2166_v6 = vpop.xlane.xlu0 %2165 }
 0x3ad   : > { %4868 = vmatmul.msk.bf16.vlgmr.msra.gmra.mxu0 %vm1938_vm2, %v2195_v62  ;;  %5372 = vrcp.f32 %v2166_v6 }
 0x3b2   : > { %v5371_v13 = vpop.eup %5370 }
 0x3b3   : > { %v5373_v8 = vpop.eup %5372  ;;  %v2189_v28 = vmul.f32 %v5371_v13, %v6726_v42  ;;  %v2160_v9 = vpop.xlane.xlu1 %2159 }
 0x3b4   : > { %v2190_v10 = vmul.f32 %v5373_v8, %v6729_v14  ;;  %5374 = vrcp.f32 %v2160_v9 }
 0x3b5   : > { %v2197_v11 = vpack.c.bf16 %v2189_v28, %v2189_v28 }
 0x3b6   : > { %v2198_v12 = vpack.c.bf16 %v2190_v10, %v2190_v10 }
 0x3b7   : > { %4870 = vmatmul.msk.bf16.vlgmr.msra.gmra.mxu2 %vm1938_vm2, %v2197_v11 }
 0x3b8   : > { %4871 = vmatmul.msk.bf16.vlgmr.msrb.gmra.mxu3 %vm1938_vm2, %v2198_v12 }
 0x3ba   : > { %v5375_v54 = vpop.eup %5374 }
 0x3bb   : > { %v2188_v15 = vmul.f32 %v5375_v54, %v6735_v0  ;;  %v2169_v16 = vpop.xlane.xlu1 %2168 }
 0x3bc   : > { %5376 = vrcp.f32 %v2169_v16  ;;  %v2178_v17 = vpop.xlane.xlu2 %2177 }
 0x3bd   : > { %5378 = vrcp.f32 %v2178_v17  ;;  %v2196_v18 = vpack.c.bf16 %v2188_v15, %v2188_v15 }
 0x3bf   : > { %4869 = vmatmul.msk.bf16.vlgmr.msrb.gmra.mxu1 %vm1938_vm2, %v2196_v18 }
 0x3c2   : > { %v5377_v42 = vpop.eup %5376 }
 0x3c3   : > { %v5379_v19 = vpop.eup %5378  ;;  %v2191_v14 = vmul.f32 %v5377_v42, %v6739_v5 }
 0x3c4   : > { %v2194_v20 = vmul.f32 %v5379_v19, %v6741_v7 }
 0x3c5   : > { %v2199_v21 = vpack.c.bf16 %v2191_v14, %v2191_v14 }
 0x3c6   : > { %v2202_v22 = vpack.c.bf16 %v2194_v20, %v2194_v20 }
 0x3c7   : > { %4872 = vmatmul.msk.bf16.vlgmr.msrb.gmra.mxu0 %vm1938_vm2, %v2199_v21 }
 0x3c8   : > { %4875 = vmatmul.msk.bf16.vlgmr.msra.gmra.mxu3 %vm1938_vm2, %v2202_v22 }
 0x3cd   : > { %v2175_v0 = vpop.xlane.xlu0 %2174 }
 0x3ce   : > { %5380 = vrcp.f32 %v2175_v0 }
 0x3d4   : > { %v5381_v23 = vpop.eup %5380 }
 0x3d5   : > { %v2193_v25 = vmul.f32 %v5381_v23, %v6772_v35  ;;  %v2172_v29 = vpop.xlane.xlu0 %2171 }
 0x3d6   : > { %5382 = vrcp.f32 %v2172_v29 }
 0x3d7   : > { %v2201_v30 = vpack.c.bf16 %v2193_v25, %v2193_v25 }
 0x3d9   : > { %4874 = vmatmul.msk.bf16.vlgmr.msrb.gmra.mxu2 %vm1938_vm2, %v2201_v30 }
 0x3dc   : > { %v5383_v26 = vpop.eup %5382 }
 0x3dd   : > { %v2192_v5 = vmul.f32 %v5383_v26, %v6781_v2 }
 0x3df   : > { %v2200_v7 = vpack.c.bf16 %v2192_v5, %v2192_v5 }
 0x3e1   : > { %4873 = vmatmul.msk.bf16.vlgmr.msra.gmra.mxu1 %vm1938_vm2, %v2200_v7 }
 0x42a   : > { %v2219_v31 = vpop.f32.mrf.mxu0 }
 0x42b   : > { %v2358_v2 = vrot.slane %v2219_v31, 4 }
 0x432   : > { %v2221_v33 = vpop.f32.mrf.mxu0 }
 0x43a   : > { %v2257_v36 = vpop.f32.mrf.mxu2 }
 0x43b   : > { %v2276_v38 = vpop.f32.mrf.mxu3  ;;  %v2356_v47 = vrot.slane %v2257_v36, 4  ;;  %v2359_v55 = vsel %vm1196_vm1, %v2257_v36, %v2358_v2 }
 0x43c   : > { %v2238_v39 = vpop.f32.mrf.mxu1  ;;  %v2368_v50 = vrot.slane %v2276_v38, 4  ;;  %v2367_v57 = vperm.slane %v2359_v55, %v6459_v27 }
 0x43d   : > { %v2370_v48 = vrot.slane %v2238_v39, 4  ;;  %v2357_v24 = vsel %vm1196_vm1, %v2356_v47, %v2219_v31 }
 0x43e   : > { %v2369_v51 = vsel %vm1196_vm1, %v2368_v50, %v2238_v39  ;;  %v2363_v56 = vperm.slane %v2357_v24, %v6459_v27  ;;  %v2418_v60 = vrot.slane %v2367_v57, 4 }
 0x43f   : > { %v2371_v53 = vsel %vm1196_vm1, %v2276_v38, %v2370_v48  ;;  %v2375_v32 = vperm.slane %v2369_v51, %v6459_v27 }
 0x440   : > { %v2379_v45 = vperm.slane %v2371_v53, %v6459_v27  ;;  %v2406_v37 = vrot.slane %v2363_v56, 4 }
 0x441   : > { %v2404_v49 = vrot.slane %v2375_v32, 4 }
 0x442   : > { %v2259_v40 = vpop.f32.mrf.mxu2  ;;  %v2416_v41 = vrot.slane %v2379_v45, 4  ;;  %v2407_v63 = vsel %vm1196_vm1, %v2375_v32, %v2406_v37  ;;  %v2419_v13 = vsel %vm1196_vm1, %v2379_v45, %v2418_v60 }
 0x443   : > { %v2278_v43 = vpop.f32.mrf.mxu3  ;;  %v2405_v4 = vsel %vm1196_vm1, %v2404_v49, %v2363_v56  ;;  %v2415_v12 = vperm.slane %v2407_v63, %v6473_v52  ;;  %v2427_v18 = vperm.slane %v2419_v13, %v6473_v52 }
 0x444   : > { %v2240_v58 = vpop.f32.mrf.mxu1  ;;  %v2295_v35 = vpop.f32.mrf.mxu0  ;;  %v2417_v6 = vsel %vm1196_vm1, %v2416_v41, %v2367_v57  ;;  %v2411_v16 = vperm.slane %v2405_v4, %v6473_v52 }
 0x445   : > { %v2382_v59 = vrot.slane %v2295_v35, 4  ;;  %v2423_v17 = vperm.slane %v2417_v6, %v6473_v52  ;;  %v2458_v31 = vrot.slane %v2415_v12, 4  ;;  %v2466_v36 = vrot.slane %v2427_v18, 4 }
 0x446   : > { %v2454_v30 = vrot.slane %v2411_v16, 4 }
 0x447   : > { %v2462_v33 = vrot.slane %v2423_v17, 4 }
 0x44b   : > { %v2352_v44 = vpop.f32.mrf.mxu3 }
 0x44c   : > { %v2297_v46 = vpop.f32.mrf.mxu0  ;;  %v2392_v1 = vrot.slane %v2352_v44, 4 }
 0x453   : > { %v2354_v34 = vpop.f32.mrf.mxu3 }
 0x45c   : > { %v2333_v61 = vpop.f32.mrf.mxu2 }
 0x45d   : > { %v2380_v3 = vrot.slane %v2333_v61, 4  ;;  %v2383_v62 = vsel %vm1196_vm1, %v2333_v61, %v2382_v59 }
 0x45e   : > { %v2391_v8 = vperm.slane %v2383_v62, %v6459_v27  ;;  %v2314_v28 = vpop.f32.mrf.mxu1 }
 0x45f   : > { %v2381_v9 = vsel %vm1196_vm1, %v2380_v3, %v2295_v35  ;;  %v2393_v10 = vsel %vm1196_vm1, %v2392_v1, %v2314_v28  ;;  %v2394_v11 = vrot.slane %v2314_v28, 4 }
 0x460   : > { %v2387_v54 = vperm.slane %v2381_v9, %v6459_v27  ;;  %v2399_v15 = vperm.slane %v2393_v10, %v6459_v27  ;;  %v2442_v14 = vrot.slane %v2391_v8, 4 }
 0x461   : > { %v2395_v42 = vsel %vm1196_vm1, %v2352_v44, %v2394_v11 }
 0x462   : > { %v2430_v19 = vrot.slane %v2387_v54, 4  ;;  %v2403_v20 = vperm.slane %v2395_v42, %v6459_v27  ;;  %v2428_v21 = vrot.slane %v2399_v15, 4 }
 0x464   : > { %v2429_v22 = vsel %vm1196_vm1, %v2428_v21, %v2387_v54  ;;  %v2431_v0 = vsel %vm1196_vm1, %v2399_v15, %v2430_v19  ;;  %v2440_v23 = vrot.slane %v2403_v20, 4  ;;  %v2443_v25 = vsel %vm1196_vm1, %v2403_v20, %v2442_v14  ;;  %v2335_v29 = vpop.f32.mrf.mxu2 }
 0x465   : > { %v2435_v26 = vperm.slane %v2429_v22, %v6473_v52  ;;  %v2439_v5 = vperm.slane %v2431_v0, %v6473_v52  ;;  %v2451_v7 = vperm.slane %v2443_v25, %v6473_v52 }
 0x466   : > { %v2441_v38 = vsel %vm1196_vm1, %v2440_v23, %v2391_v8  ;;  %v2316_v39 = vpop.f32.mrf.mxu1 }
 0x467   : > { %v2447_v40 = vperm.slane %v2441_v38, %v6473_v52  ;;  %v2452_v43 = vrot.slane %v2435_v26, 4  ;;  %v2455_v58 = vsel %vm1196_vm1, %v2435_v26, %v2454_v30  ;;  %v2456_v35 = vrot.slane %v2439_v5, 4 }
 0x468   : > { %v2459_v44 = vsel %vm1196_vm1, %v2439_v5, %v2458_v31  ;;  %v2464_v46 = vrot.slane %v2451_v7, 4  ;;  %v2467_v47 = vsel %vm1196_vm1, %v2451_v7, %v2466_v36  ;;  %v2482_v48 = vrot.slane %v2455_v58, 4 }
 0x469   : > { %v2453_v50 = vsel %vm1196_vm1, %v2452_v43, %v2411_v16  ;;  %v2457_v24 = vsel %vm1196_vm1, %v2456_v35, %v2415_v12  ;;  %v2460_v2 = vrot.slane %v2447_v40, 4  ;;  %v2463_v51 = vsel %vm1196_vm1, %v2447_v40, %v2462_v33 }
 0x46a   : > { %v2468_v53 = vrot.slane %v2457_v24, 4  ;;  %v2480_v34 = vrot.slane %v2459_v44, 4  ;;  %v2506_v55 = vrot.slane %v2463_v51, 4  ;;  %v2465_v56 = vsel %vm1196_vm1, %v2464_v46, %v2427_v18 }
 0x46b   : > { %v2461_v32 = vsel %vm1196_vm1, %v2460_v2, %v2423_v17  ;;  %v2470_v45 = vrot.slane %v2453_v50, 4  ;;  %v2483_v57 = vsel %vm1196_vm1, %v2459_v44, %v2482_v48  ;;  %v2492_v37 = vrot.slane %v2465_v56, 4 }
 0x46c   : > { %v2491_v49 = vperm.slane %v2483_v57, %v6459_v27  ;;  %v2494_v41 = vrot.slane %v2461_v32, 4  ;;  %v2507_v59 = vsel %vm1196_vm1, %v2467_v47, %v2506_v55  ;;  %v2469_v60 = vsel %vm1196_vm1, %v2468_v53, %v2453_v50  ;;  %v5019_v57 = vld [vmem:[#allocation7] sm:$0xff] }
 0x46d   : > { %v2471_v61 = vsel %vm1196_vm1, %v2457_v24, %v2470_v45  ;;  %v2515_v63 = vperm.slane %v2507_v59, %v6459_v27  ;;  %v2475_v1 = vperm.slane %v2469_v60, %v6459_v27  ;;  %v2481_v3 = vsel %vm1196_vm1, %v2480_v34, %v2455_v58  ;;  %v5020_v45 = vld [vmem:[#allocation7 + $0x8] sm:$0xff] }
 0x46e   : > { %v2479_v62 = vperm.slane %v2471_v61, %v6459_v27  ;;  %v2495_v4 = vsel %vm1196_vm1, %v2465_v56, %v2494_v41  ;;  %v2528_v6 = vrot.slane %v2491_v49, 4  ;;  %v2493_v28 = vsel %vm1196_vm1, %v2492_v37, %v2461_v32  ;;  %v5022_v56 = vld [vmem:[#allocation7 + $0x18] sm:$0xff]  ;;  %v5021_v32 = vld [vmem:[#allocation7 + $0x10] sm:$0xff] }
 0x46f   : > { %v2503_v13 = vperm.slane %v2495_v4, %v6459_v27  ;;  %v2552_v8 = vrot.slane %v2515_v63, 4  ;;  %v2504_v9 = vrot.slane %v2467_v47, 4  ;;  %v2487_v10 = vperm.slane %v2481_v3, %v6459_v27  ;;  %2665 = vmatpush.bf16.msra.mxu0 %v5022_v56 }
 0x470   : > { %v2499_v11 = vperm.slane %v2493_v28, %v6459_v27  ;;  %v2518_v12 = vrot.slane %v2475_v1, 4  ;;  %v2529_v54 = vsel %vm1196_vm1, %v2528_v6, %v2479_v62  ;;  %v2530_v33 = vrot.slane %v2479_v62, 4 }
 0x471   : > { %v2553_v15 = vsel %vm1196_vm1, %v2552_v8, %v2503_v13  ;;  %v2505_v16 = vsel %vm1196_vm1, %v2504_v9, %v2463_v51  ;;  %v2554_v17 = vrot.slane %v2503_v13, 4  ;;  %v2535_v21 = vperm.slane %v2529_v54, %v6473_v52  ;;  %v5339_v9 = vld [vmem:[#allocation9] ss:$0 sm:$0xff] }
 0x472   : > { %v2559_v18 = vperm.slane %v2553_v15, %v6473_v52  ;;  %v2511_v42 = vperm.slane %v2505_v16, %v6459_v27  ;;  %v2519_v19 = vsel %vm1196_vm1, %v2487_v10, %v2518_v12  ;;  %v2542_v14 = vrot.slane %v2499_v11, 4  ;;  %v5424_v12 = vld [vmem:[%s6441_s4] sm:$0xff] }
 0x473   : > { %v2527_v20 = vperm.slane %v2519_v19, %v6473_v52  ;;  %v2516_v29 = vrot.slane %v2487_v10, 4  ;;  %v2555_v26 = vsel %vm1196_vm1, %v2515_v63, %v2554_v17  ;;  %v2574_v44 = vrot.slane %v2535_v21, 4  ;;  %2666 = vmatpush.bf16.msra.mxu0 %v5021_v32 }
 0x474   : > { %v2572_v22 = vrot.slane %v2559_v18, 4  ;;  %v2543_v0 = vsel %vm1196_vm1, %v2511_v42, %v2542_v14  ;;  %v2540_v5 = vrot.slane %v2511_v42, 4  ;;  %v2563_v43 = vperm.slane %v2555_v26, %v6473_v52  ;;  %v5029_v42 = vld [vmem:[#allocation16 + $0x10] sm:$0xff] }
 0x475   : > { %v2551_v23 = vperm.slane %v2543_v0, %v6473_v52  ;;  %v2570_v25 = vrot.slane %v2527_v20, 4  ;;  %v2517_v36 = vsel %vm1196_vm1, %v2516_v29, %v2475_v1  ;;  %v2531_v46 = vsel %vm1196_vm1, %v2491_v49, %v2530_v33 }
 0x476   : > { %v2573_v30 = vsel %vm1196_vm1, %v2572_v22, %v2535_v21  ;;  %v2523_v38 = vperm.slane %v2517_v36, %v6473_v52  ;;  %v2541_v39 = vsel %vm1196_vm1, %v2540_v5, %v2499_v11  ;;  %v2576_v48 = vrot.slane %v2563_v43, 4  ;;  %v5028_v5 = vld [vmem:[#allocation16 + $0x8] sm:$0xff]  ;;  %v5026_v36 = vld [vmem:[#allocation13 + $0x18] sm:$0xff] }
 0x477   : > { %2593 = vrot.lane.b32.xlu2 %v2573_v30, %s6111_s25  ;;  %v2571_v7 = vsel %vm1196_vm1, %v2551_v23, %v2570_v25  ;;  %v2568_v31 = vrot.slane %v2551_v23, 4  ;;  %v2547_v58 = vperm.slane %v2541_v39, %v6473_v52  ;;  %v2539_v24 = vperm.slane %v2531_v46, %v6473_v52  ;;  %2667 = vmatpush.bf16.msra.mxu0 %v5020_v45  ;;  %v5024_v39 = vld [vmem:[#allocation13 + $0x8] sm:$0xff]  ;;  %v5342_v45 = vld [vmem:[#allocation18] ss:$0 sm:$0xff] }
 0x478   : > { %2589 = vrot.lane.b32.xlu0 %v2571_v7, %s6112_s6  ;;  %v2566_v35 = vrot.slane %v2523_v38, 4  ;;  %v2575_v51 = vsel %vm1196_vm1, %v2559_v18, %v2574_v44  ;;  %v6118_v17 = vmov 64.0   ;;  %v5030_v18 = vld [vmem:[#allocation16 + $0x18] sm:$0xff]  ;;  %2760 = vmatpush.bf16.msrb.mxu1 %v5026_v36 }
 0x479   : > { %v2569_v40 = vsel %vm1196_vm1, %v2568_v31, %v2527_v20  ;;  %v2564_v47 = vrot.slane %v2547_v58, 4  ;;  %v2577_v53 = vsel %vm1196_vm1, %v2576_v48, %v2539_v24  ;;  %v2578_v34 = vrot.slane %v2539_v24, 4  ;;  %2813 = vmatpush.bf16.msra.mxu2 %v5030_v18  ;;  %v5027_v31 = vld [vmem:[#allocation16] sm:$0xff] }
 0x47a   : > { %2585 = vrot.lane.b32.xlu1 %v2569_v40, %s6113_s28  ;;  %v2567_v2 = vsel %vm1196_vm1, %v2547_v58, %v2566_v35  ;;  %5384 = vrcp.f32 %v6118_v17  ;;  %v5023_v40 = vld [vmem:[#allocation13] sm:$0xff] }
 0x47b   : > { %v2565_v50 = vsel %vm1196_vm1, %v2564_v47, %v2523_v38  ;;  %v2579_v55 = vsel %vm1196_vm1, %v2563_v43, %v2578_v34  ;;  %2668 = vmatpush.bf16.msra.mxu0 %v5019_v57  ;;  %v5025_v38 = vld [vmem:[#allocation13 + $0x10] sm:$0xff] }
 0x47c   : > { %2761 = vmatpush.bf16.msrb.mxu1 %v5025_v38 }
 0x47d   : > { %2814 = vmatpush.bf16.msra.mxu2 %v5029_v42 }
 0x47f   : > { %2581 = vrot.lane.b32.xlu2 %v2567_v2, %s6114_s11  ;;  %v5340_v2 = vld [vmem:[#allocation10] ss:$0 sm:$0xff] }
 0x480   : > { %2597 = vrot.lane.b32.xlu0 %v2575_v51, %s7637_s21  ;;  %v5385_v19 = vpop.eup %5384  ;;  %2762 = vmatpush.bf16.msrb.mxu1 %v5024_v39 }
 0x481   : > { %v2681_v14 = vmul.f32 64.0, %v5385_v19  ;;  %vm2685_vm10 = vweird.f32 %v5385_v19  ;;  %2815 = vmatpush.bf16.msra.mxu2 %v5028_v5 }
 0x482   : > { %2601 = vrot.lane.b32.xlu1 %v2577_v53, %s7636_s3  ;;  %s7667_s3 = sld [smem:[#allocation48_spill]]  ;;  %v5341_v53 = vld [vmem:[#allocation12] ss:$0 sm:$0xff] }
 0x483   : > { %v2682_v20 = vsub.f32 1.0, %v2681_v14 }
 0x484   : > { %2763 = vmatpush.bf16.msrb.mxu1 %v5023_v40 }
 0x485   : > { %v2683_v21 = vmul.f32 %v5385_v19, %v2682_v20  ;;  %2816 = vmatpush.bf16.msra.mxu2 %v5027_v31 }
 0x487   : > { %2605 = vrot.lane.b32.xlu2 %v2579_v55, %s7635_s5  ;;  %v2684_v22 = vadd.f32 %v5385_v19, %v2683_v21 }
 0x488   : > { %s1075_s21 = scalar_lea.vmem %s7667_s3, %s6435_s26 }
 0x489   : > { %v6964_v0 = vsel %vm2685_vm10, %v5385_v19, %v2684_v22  ;;  %v1082_v7 = vld [vmem:[%s1075_s21] sm:$0xff] }
 0x48a   : > { %v2769_v33 = vpack.c.bf16 %v1082_v7, %v1082_v7 }
 0x48c   : > { %4926 = vmatmul.msk.bf16.vlgmr.msra.gmra.mxu2 %vm1143_vm0, %v2769_v33 }
 0x4d1   : > { %v2594_v37 = vpop.permute.xlu2 %2593 }
 0x4d9   : > { %v2582_v49 = vpop.permute.xlu2 %2581 }
 0x4da   : > { %v2608_v59 = vsel %vm1938_vm2, %v2565_v50, %v2582_v49 }
 0x4e1   : > { %v2606_v6 = vpop.permute.xlu2 %2605 }
 0x4ea   : > { %v2590_v41 = vpop.permute.xlu0 %2589 }
 0x4ec   : > { %v2586_v60 = vpop.permute.xlu1 %2585 }
 0x4ed   : > { %v2610_v61 = vsel %vm2609_vm4, %v2608_v59, %v2586_v60 }
 0x4ee   : > { %v2612_v63 = vsel %vm2611_vm5, %v2610_v61, %v2590_v41  ;;  %v5343_v41 = vld [vmem:[#allocation15] ss:$0 sm:$0xff] }
 0x4ef   : > { %v2614_v3 = vsel %vm2613_vm6, %v2612_v63, %v2594_v37 }
 0x4f2   : > { %v2598_v1 = vpop.permute.xlu0 %2597 }
 0x4f3   : > { %v2616_v62 = vsel %vm2615_vm7, %v2614_v3, %v2598_v1 }
 0x4f4   : > { %v2602_v4 = vpop.permute.xlu1 %2601 }
 0x4f5   : > { %v2618_v13 = vsel %vm2617_vm8, %v2616_v62, %v2602_v4 }
 0x4f6   : > { %v2620_v8 = vsel %vm2619_vm9, %v2618_v13, %v2606_v6 }
 0x4f7   : > { %v2621_v28 = vpack.c.bf16 %v2620_v8, %v2620_v8 }
 0x4f9   : > { %4892 = vmatmul.msk.bf16.vlgmr.msra.gmra.mxu0 %vm1143_vm0, %v2621_v28 }
 0x50f   : > { %v2818_v57 = vpop.f32.mrf.mxu2 }
 0x510   : > { %v6979_v37 = vadd.f32 %v5342_v45, %v2818_v57 }
 0x512   : > { %3083 = vrot.lane.b32.xlu2 %v6979_v37, %s6105_s1  ;;  %v3100_v8 = vrot.slane %v6979_v37, 4 }
 0x517   : > { %v2820_v49 = vpop.f32.mrf.mxu2 }
 0x56c   : > { %v6995_v1 = vpop.permute.xlu2 %3083 }
 0x56d   : > { %v3110_v28 = vrot.slane %v6995_v1, 4 }
 0x576   : > { %v2670_v10 = vpop.f32.mrf.mxu0 }
 0x577   : > { %v2671_v11 = vadd.f32 %v5339_v9, %v2670_v10 }
 0x579   : > { %v2674_v54 = vadd.f32 %v5424_v12, %v2671_v11 }
 0x57b   : > { %v2677_v15 = vsel %vm1143_vm0, %v2674_v54, 0.0 }
 0x57c   : > { %2678 = vadd.xlane.f32.xlu0 %v2677_v15 }
 0x57e   : > { %v2672_v16 = vpop.f32.mrf.mxu0 }
 0x590   : > { %3089 = vrot.lane.b32.xlu0 %v6979_v37, %s6101_s2 }
 0x5ef   : > { %v2679_v23 = vpop.xlane.xlu0 %2678 }
 0x5f0   : > { %v2687_v25 = vmul.f32 %v6964_v0, %v2679_v23 }
 0x5f2   : > { %v2688_v29 = vsub.f32 %v2674_v54, %v2687_v25 }
 0x5f4   : > { %v2689_v30 = vmul.f32 %v2688_v29, %v2688_v29 }
 0x5f6   : > { %v2690_v26 = vsel %vm1143_vm0, %v2689_v30, 0.0 }
 0x5f7   : > { %2691 = vadd.xlane.f32.xlu1 %v2690_v26 }
 0x602   : > { %v7014_v15 = vpop.permute.xlu0 %3089 }
 0x603   : > { %v3136_v14 = vrot.slane %v7014_v15, 4 }
 0x610   : > { %3095 = vrot.lane.b32.xlu1 %v6979_v37, %s6107_s30 }
 0x66a   : > { %v2692_v43 = vpop.xlane.xlu1 %2691 }
 0x66b   : > { %v2693_v58 = vmul.f32 %v2692_v43, %v6964_v0 }
 0x66d   : > { %v2694_v35 = vadd.f32 1e-05, %v2693_v58 }
 0x66f   : > { %5386 = vrsqrt.f32 %v2694_v35  ;;  %vm2701_vm12 = vweird.f32 %v2694_v35 }
 0x675   : > { %v5387_v44 = vpop.eup %5386 }
 0x676   : > { %v2696_v46 = vmul.f32 %v5387_v44, %v2694_v35  ;;  %vm2702_vm11 = vweird.f32 %v5387_v44 }
 0x677   : > { %vm2703_vm13 = vmor %vm2701_vm12, %vm2702_vm11 }
 0x678   : > { %v2697_v47 = vmul.f32 %v5387_v44, %v2696_v46 }
 0x67a   : > { %v2698_v48 = vmul.f32 0.5, %v2697_v47 }
 0x67c   : > { %v2699_v50 = vsub.f32 1.5, %v2698_v48 }
 0x67e   : > { %v2700_v24 = vmul.f32 %v5387_v44, %v2699_v50 }
 0x680   : > { %v2704_v51 = vsel %vm2703_vm13, %v5387_v44, %v2700_v24 }
 0x681   : > { %v2705_v34 = vmul.f32 %v2704_v51, %v2688_v29 }
 0x682   : > { %v7010_v11 = vpop.permute.xlu1 %3095 }
 0x683   : > { %v2709_v55 = vmul.f32 %v5340_v2, %v2705_v34  ;;  %v3134_v42 = vrot.slane %v7010_v11, 4  ;;  %v3137_v7 = vsel %vm1196_vm1, %v7010_v11, %v3136_v14 }
 0x684   : > { %v3145_v50 = vperm.slane %v3137_v7, %v6459_v27 }
 0x685   : > { %v6974_v56 = vadd.f32 %v5341_v53, %v2709_v55  ;;  %v3135_v26 = vsel %vm1196_vm1, %v3134_v42, %v7014_v15 }
 0x686   : > { %v3141_v40 = vperm.slane %v3135_v26, %v6459_v27 }
 0x687   : > { %v2716_v32 = vpack.c.bf16 %v6974_v56, %v6974_v56 }
 0x688   : > { %v3170_v57 = vrot.slane %v3141_v40, 4 }
 0x689   : > { %4909 = vmatmul.msk.bf16.vlgmr.msrb.gmra.mxu1 %vm1143_vm0, %v2716_v32 }
 0x706   : > { %v2765_v59 = vpop.f32.mrf.mxu1 }
 0x707   : > { %v2766_v60 = vadd.f32 %v5343_v41, %v2765_v59 }
 0x709   : > { %2841 = vrot.lane.b32.xlu0 %v2766_v60, %s6107_s30  ;;  %v5298_v61 = vpack.i.bf16 %v2766_v60, %v6979_v37  ;;  %v2846_v29 = vrot.slane %v2766_v60, 4 }
 0x70b   : > { %5299 = vrot.lane.b32.xlu2 %v5298_v61, %s6103_s9  ;;  %s7668_s9 = sld [smem:[#allocation51_spill]] }
 0x70e   : > { %v2767_v63 = vpop.f32.mrf.mxu1 }
 0x713   : > { %5304 = vrot.lane.b32.xlu2 %v5298_v61, %s6106_s8  ;;  %s7671_s8 = smov 56  }
 0x71b   : > { %5309 = vrot.lane.b32.xlu2 %v5298_v61, %s6102_s7 }
 0x723   : > { %5314 = vrot.lane.b32.xlu2 %v5298_v61, %s6104_s29  ;;  %s2714_s29 = scalar_lea.vmem %s7668_s9, %s7664_s27  ;;  %s7669_s27 = smov 40  }
 0x72b   : > { %2829 = vrot.lane.b32.xlu2 %v2766_v60, %s6105_s1  ;;  %s7670_s1 = smov 48  }
 0x733   : > { %2835 = vrot.lane.b32.xlu2 %v2766_v60, %s6101_s2 }
 0x765   : > { %v6997_v3 = vpop.permute.xlu2 %5299 }
 0x766   : > { %v7000_v62 = vunpack.i.l.bf16 %v6997_v3  ;;  %v5302_v46 = vunpack.i.h.bf16 %v6997_v3  ;;  %v3182_v3 = vrot.slane %v3145_v50, 4 }
 0x768   : > { %v3112_v13 = vrot.slane %v7000_v62, 4  ;;  %v3111_v12 = vsel %vm1196_vm1, %v3110_v28, %v7000_v62  ;;  %v2858_v61 = vrot.slane %v5302_v46, 4 }
 0x769   : > { %v3117_v19 = vperm.slane %v3111_v12, %v6459_v27 }
 0x76a   : > { %v3113_v16 = vsel %vm1196_vm1, %v6995_v1, %v3112_v13 }
 0x76b   : > { %v3121_v21 = vperm.slane %v3113_v16, %v6459_v27  ;;  %v3146_v5 = vrot.slane %v3117_v19, 4 }
 0x76d   : > { %v5305_v4 = vpop.permute.xlu2 %5304  ;;  %v3158_v33 = vrot.slane %v3121_v21, 4 }
 0x76e   : > { %v7002_v6 = vunpack.i.l.bf16 %v5305_v4  ;;  %v5307_v54 = vunpack.i.h.bf16 %v5305_v4 }
 0x770   : > { %v3098_v9 = vrot.slane %v7002_v6, 4  ;;  %v3101_v10 = vsel %vm1196_vm1, %v7002_v6, %v3100_v8  ;;  %v2844_v22 = vrot.slane %v5307_v54, 4  ;;  %v2847_v38 = vsel %vm1196_vm1, %v5307_v54, %v2846_v29 }
 0x771   : > { %v3109_v18 = vperm.slane %v3101_v10, %v6459_v27  ;;  %v7045_v48 = vperm.slane %v2847_v38, %v6459_v27 }
 0x772   : > { %v3099_v17 = vsel %vm1196_vm1, %v3098_v9, %v6979_v37  ;;  %v2845_v36 = vsel %vm1196_vm1, %v2844_v22, %v2766_v60 }
 0x773   : > { %v3105_v23 = vperm.slane %v3099_v17, %v6459_v27  ;;  %v3160_v30 = vrot.slane %v3109_v18, 4  ;;  %v3159_v58 = vsel %vm1196_vm1, %v3158_v33, %v3109_v18  ;;  %v7042_v47 = vperm.slane %v2845_v36, %v6459_v27 }
 0x774   : > { %v3165_v32 = vperm.slane %v3159_v58, %v6473_v52  ;;  %v2906_v8 = vrot.slane %v7045_v48, 4 }
 0x775   : > { %v5310_v20 = vpop.permute.xlu2 %5309  ;;  %v3148_v39 = vrot.slane %v3105_v23, 4  ;;  %v3147_v43 = vsel %vm1196_vm1, %v3146_v5, %v3105_v23  ;;  %v3161_v35 = vsel %vm1196_vm1, %v3121_v21, %v3160_v30  ;;  %v2894_v13 = vrot.slane %v7042_v47, 4 }
 0x776   : > { %v7026_v25 = vunpack.i.l.bf16 %v5310_v20  ;;  %v5312_v44 = vunpack.i.h.bf16 %v5310_v20  ;;  %v7053_v55 = vperm.slane %v3147_v43, %v6473_v52  ;;  %v3169_v45 = vperm.slane %v3161_v35, %v6473_v52 }
 0x777   : > { %v3149_v2 = vsel %vm1196_vm1, %v3117_v19, %v3148_v39  ;;  %v3204_v10 = vrot.slane %v3165_v32, 4 }
 0x778   : > { %v5323_v31 = vpack.i.bf16 %v7026_v25, %v7002_v6  ;;  %v3124_v51 = vrot.slane %v7026_v25, 4  ;;  %v2870_v49 = vrot.slane %v5312_v44, 4  ;;  %v3157_v63 = vperm.slane %v3149_v2, %v6473_v52 }
 0x779   : > { %v3196_v17 = vrot.slane %v7053_v55, 4  ;;  %v3208_v18 = vrot.slane %v3169_v45, 4 }
 0x77a   : > { %v3200_v14 = vrot.slane %v3157_v63, 4 }
 0x77b   : > { %v2842_v20 = vpop.permute.xlu0 %2841 }
 0x77c   : > { %v2880_v43 = vrot.slane %v2842_v20, 4 }
 0x77d   : > { %v5315_v24 = vpop.permute.xlu2 %5314 }
 0x77e   : > { %v5317_v53 = vunpack.i.h.bf16 %v5315_v24  ;;  %v7050_v34 = vunpack.i.l.bf16 %v5315_v24 }
 0x780   : > { %v2868_v41 = vrot.slane %v5317_v53, 4  ;;  %v3122_v59 = vrot.slane %v7050_v34, 4  ;;  %v3125_v60 = vsel %vm1196_vm1, %v7050_v34, %v3124_v51  ;;  %v2871_v28 = vsel %vm1196_vm1, %v5317_v53, %v2870_v49 }
 0x781   : > { %v3133_v4 = vperm.slane %v3125_v60, %v6459_v27  ;;  %v7073_v21 = vperm.slane %v2871_v28, %v6459_v27 }
 0x782   : > { %v3123_v9 = vsel %vm1196_vm1, %v3122_v59, %v7026_v25  ;;  %v2869_v12 = vsel %vm1196_vm1, %v2868_v41, %v5312_v44 }
 0x783   : > { %v3129_v54 = vperm.slane %v3123_v9, %v6459_v27  ;;  %v3183_v16 = vsel %vm1196_vm1, %v3182_v3, %v3133_v4  ;;  %v3184_v42 = vrot.slane %v3133_v4, 4  ;;  %v2875_v30 = vperm.slane %v2869_v12, %v6459_v27 }
 0x784   : > { %v3189_v19 = vperm.slane %v3183_v16, %v6473_v52  ;;  %v2930_v24 = vrot.slane %v7073_v21, 4 }
 0x785   : > { %v3171_v22 = vsel %vm1196_vm1, %v3170_v57, %v3129_v54  ;;  %v3172_v23 = vrot.slane %v3129_v54, 4  ;;  %v2830_v29 = vpop.permute.xlu2 %2829  ;;  %v3185_v5 = vsel %vm1196_vm1, %v3145_v50, %v3184_v42  ;;  %v2918_v51 = vrot.slane %v2875_v30, 4 }
 0x786   : > { %v3177_v26 = vperm.slane %v3171_v22, %v6473_v52  ;;  %v3202_v7 = vrot.slane %v3189_v19, 4  ;;  %v3193_v36 = vperm.slane %v3185_v5, %v6473_v52  ;;  %v7082_v38 = vsel %vm1196_vm1, %v3189_v19, %v3204_v10 }
 0x787   : > { %v3173_v33 = vsel %vm1196_vm1, %v3141_v40, %v3172_v23  ;;  %v2856_v39 = vrot.slane %v2830_v29, 4  ;;  %v2859_v44 = vsel %vm1196_vm1, %v2830_v29, %v2858_v61  ;;  %v3248_v57 = vrot.slane %v7082_v38, 4 }
 0x788   : > { %v3181_v58 = vperm.slane %v3173_v33, %v6473_v52  ;;  %v7086_v35 = vsel %vm1196_vm1, %v3202_v7, %v3165_v32  ;;  %v3206_v50 = vrot.slane %v3193_v36, 4  ;;  %v7091_v2 = vsel %vm1196_vm1, %v3193_v36, %v3208_v18 }
 0x789   : > { %v2857_v40 = vsel %vm1196_vm1, %v2856_v39, %v5302_v46  ;;  %v3194_v41 = vrot.slane %v3177_v26, 4  ;;  %v3236_v59 = vrot.slane %v7086_v35, 4  ;;  %v2867_v60 = vperm.slane %v2859_v44, %v6459_v27 }
 0x78a   : > { %v3198_v53 = vrot.slane %v3181_v58, 4  ;;  %v2863_v49 = vperm.slane %v2857_v40, %v6459_v27  ;;  %v7097_v32 = vsel %vm1196_vm1, %v3181_v58, %v3200_v14  ;;  %v7102_v61 = vsel %vm1196_vm1, %v3206_v50, %v3169_v45 }
 0x78b   : > { %v3246_v3 = vrot.slane %v7091_v2, 4  ;;  %v2904_v9 = vrot.slane %v2867_v60, 4  ;;  %v2907_v10 = vsel %vm1196_vm1, %v2867_v60, %v2906_v8  ;;  %v7121_v8 = vsel %vm1196_vm1, %v3194_v41, %v7053_v55 }
 0x78c   : > { %v2892_v46 = vrot.slane %v2863_v49, 4  ;;  %v2895_v4 = vsel %vm1196_vm1, %v2863_v49, %v2894_v13  ;;  %v7109_v54 = vsel %vm1196_vm1, %v3198_v53, %v3157_v63  ;;  %v2915_v45 = vperm.slane %v2907_v10, %v6473_v52 }
 0x78d   : > { %v2903_v28 = vperm.slane %v2895_v4, %v6473_v52  ;;  %v2836_v12 = vpop.permute.xlu2 %2835  ;;  %v2905_v13 = vsel %vm1196_vm1, %v2904_v9, %v7045_v48  ;;  %v3234_v63 = vrot.slane %v7102_v61, 4  ;;  %v7127_v23 = vsel %vm1196_vm1, %v3177_v26, %v3196_v17 }
 0x78e   : > { %v2893_v16 = vsel %vm1196_vm1, %v2892_v46, %v7042_v47  ;;  %v2881_v18 = vsel %vm1196_vm1, %v2880_v43, %v2836_v12  ;;  %v2882_v42 = vrot.slane %v2836_v12, 4  ;;  %v2911_v47 = vperm.slane %v2905_v13, %v6473_v52 }
 0x78f   : > { %v2899_v19 = vperm.slane %v2893_v16, %v6473_v52  ;;  %v2887_v14 = vperm.slane %v2881_v18, %v6459_v27  ;;  %v3210_v7 = vrot.slane %v7109_v54, 4  ;;  %v3247_v55 = vsel %vm1196_vm1, %v3246_v3, %v7082_v38 }
 0x790   : > { %v2883_v22 = vsel %vm1196_vm1, %v2842_v20, %v2882_v42  ;;  %v2946_v33 = vrot.slane %v2903_v28, 4  ;;  %v2954_v36 = vrot.slane %v2915_v45, 4  ;;  %v3222_v10 = vrot.slane %v7097_v32, 4 }
 0x791   : > { %v2891_v29 = vperm.slane %v2883_v22, %v6459_v27  ;;  %v2916_v5 = vrot.slane %v2887_v14, 4  ;;  %v2919_v48 = vsel %vm1196_vm1, %v2887_v14, %v2918_v51  ;;  %v2942_v43 = vrot.slane %v2899_v19, 4 }
 0x792   : > { %v2927_v39 = vperm.slane %v2919_v48, %v6473_v52  ;;  %v2950_v51 = vrot.slane %v2911_v47, 4  ;;  %v3211_v41 = vsel %vm1196_vm1, %v3210_v7, %v7121_v8 }
 0x793   : > { %v2917_v20 = vsel %vm1196_vm1, %v2916_v5, %v2875_v30  ;;  %v2928_v58 = vrot.slane %v2891_v29, 4  ;;  %v2931_v17 = vsel %vm1196_vm1, %v2891_v29, %v2930_v24 }
 0x794   : > { %v2923_v26 = vperm.slane %v2917_v20, %v6473_v52  ;;  %v2939_v44 = vperm.slane %v2931_v17, %v6473_v52  ;;  %v2944_v50 = vrot.slane %v2927_v39, 4  ;;  %v2947_v40 = vsel %vm1196_vm1, %v2927_v39, %v2946_v33 }
 0x795   : > { %v2929_v53 = vsel %vm1196_vm1, %v2928_v58, %v7073_v21  ;;  %v2968_v49 = vrot.slane %v2947_v40, 4  ;;  %v3217_v33 = vperm.slane %v3211_v41, %v6459_v27 }
 0x796   : > { %v2935_v30 = vperm.slane %v2929_v53, %v6473_v52  ;;  %v2940_v60 = vrot.slane %v2923_v26, 4  ;;  %v2943_v24 = vsel %vm1196_vm1, %v2923_v26, %v2942_v43  ;;  %v2945_v3 = vsel %vm1196_vm1, %v2944_v50, %v2903_v28 }
 0x797   : > { %v2952_v46 = vrot.slane %v2939_v44, 4  ;;  %v2956_v4 = vrot.slane %v2945_v3, 4  ;;  %v2969_v9 = vsel %vm1196_vm1, %v2968_v49, %v2943_v24  ;;  %v2955_v16 = vsel %vm1196_vm1, %v2939_v44, %v2954_v36 }
 0x798   : > { %v2941_v12 = vsel %vm1196_vm1, %v2940_v60, %v2899_v19  ;;  %v2948_v21 = vrot.slane %v2935_v30, 4  ;;  %v2970_v18 = vrot.slane %v2943_v24, 4  ;;  %v2951_v42 = vsel %vm1196_vm1, %v2935_v30, %v2950_v51 }
 0x799   : > { %v7153_v13 = vsel %vm1196_vm1, %v2952_v46, %v2915_v45  ;;  %v2957_v14 = vsel %vm1196_vm1, %v2956_v4, %v2941_v12  ;;  %v2958_v28 = vrot.slane %v2941_v12, 4  ;;  %v7164_v5 = vperm.slane %v2969_v9, %v6459_v27 }
 0x79a   : > { %v7157_v22 = vsel %vm1196_vm1, %v2948_v21, %v2911_v47  ;;  %v7160_v29 = vperm.slane %v2957_v14, %v6459_v27  ;;  %v2971_v19 = vsel %vm1196_vm1, %v2947_v40, %v2970_v18  ;;  %v2992_v7 = vrot.slane %v2955_v16, 4 }
 0x79b   : > { %v2959_v48 = vsel %vm1196_vm1, %v2945_v3, %v2958_v28  ;;  %v3212_v45 = vrot.slane %v7121_v8, 4  ;;  %v7170_v36 = vperm.slane %v2971_v19, %v6459_v27  ;;  %v2980_v47 = vrot.slane %v7153_v13, 4 }
 0x79c   : > { %v2994_v39 = vrot.slane %v2951_v42, 4  ;;  %v3224_v43 = vrot.slane %v7127_v23, 4  ;;  %v7175_v20 = vperm.slane %v2959_v48, %v6459_v27  ;;  %v2982_v58 = vrot.slane %v7157_v22, 4 }
 0x79d   : > { %v2993_v17 = vsel %vm1196_vm1, %v2992_v7, %v2951_v42  ;;  %v3223_v8 = vsel %vm1196_vm1, %v3222_v10, %v7127_v23  ;;  %v3004_v44 = vrot.slane %v7164_v5, 4  ;;  %v3006_v50 = vrot.slane %v7160_v29, 4 }
 0x79e   : > { %v7182_v26 = vsel %vm1196_vm1, %v2955_v16, %v2994_v39  ;;  %v3229_v40 = vperm.slane %v3223_v8, %v6459_v27  ;;  %v7188_v51 = vperm.slane %v2993_v17, %v6459_v27  ;;  %v3235_v53 = vsel %vm1196_vm1, %v3234_v63, %v7086_v35 }
 0x79f   : > { %v3253_v49 = vperm.slane %v3247_v55, %v6459_v27  ;;  %v3213_v23 = vsel %vm1196_vm1, %v7109_v54, %v3212_v45  ;;  %v3241_v41 = vperm.slane %v3235_v53, %v6459_v27  ;;  %v3225_v24 = vsel %vm1196_vm1, %v7097_v32, %v3224_v43 }
 0x7a0   : > { %v3258_v30 = vrot.slane %v3229_v40, 4  ;;  %v3221_v60 = vperm.slane %v3213_v23, %v6459_v27  ;;  %v3233_v46 = vperm.slane %v3225_v24, %v6459_v27  ;;  %v3237_v63 = vsel %vm1196_vm1, %v7102_v61, %v3236_v59 }
 0x7a1   : > { %v3282_v3 = vrot.slane %v3253_v49, 4  ;;  %v3249_v54 = vsel %vm1196_vm1, %v7091_v2, %v3248_v57  ;;  %v3245_v4 = vperm.slane %v3237_v63, %v6459_v27  ;;  %v3260_v32 = vrot.slane %v3217_v33, 4 }
 0x7a2   : > { %v3259_v55 = vsel %vm1196_vm1, %v3258_v30, %v3217_v33  ;;  %v3257_v9 = vperm.slane %v3249_v54, %v6459_v27  ;;  %v3270_v35 = vrot.slane %v3233_v46, 4  ;;  %v3284_v21 = vrot.slane %v3241_v41, 4 }
 0x7a3   : > { %v3265_v10 = vperm.slane %v3259_v55, %v6473_v52  ;;  %v3283_v12 = vsel %vm1196_vm1, %v3282_v3, %v3241_v41  ;;  %v3261_v38 = vsel %vm1196_vm1, %v3229_v40, %v3260_v32  ;;  %v3272_v16 = vrot.slane %v3221_v60, 4 }
 0x7a4   : > { %v3289_v59 = vperm.slane %v3283_v12, %v6473_v52  ;;  %v3294_v61 = vrot.slane %v3257_v9, 4  ;;  %v3271_v2 = vsel %vm1196_vm1, %v3270_v35, %v3221_v60  ;;  %v3269_v18 = vperm.slane %v3261_v38, %v6473_v52 }
 0x7a5   : > { %v3308_v57 = vrot.slane %v3265_v10, 4  ;;  %v3285_v42 = vsel %vm1196_vm1, %v3253_v49, %v3284_v21  ;;  %v3277_v28 = vperm.slane %v3271_v2, %v6473_v52  ;;  %v3273_v33 = vsel %vm1196_vm1, %v3233_v46, %v3272_v16 }
 0x7a6   : > { %v3306_v14 = vrot.slane %v3289_v59, 4  ;;  %v3295_v19 = vsel %vm1196_vm1, %v3294_v61, %v3245_v4  ;;  %v3293_v48 = vperm.slane %v3285_v42, %v6473_v52  ;;  %v3296_v39 = vrot.slane %v3245_v4, 4 }
 0x7a7   : > { %v3301_v7 = vperm.slane %v3295_v19, %v6473_v52  ;;  %v3309_v45 = vsel %vm1196_vm1, %v3289_v59, %v3308_v57  ;;  %v3316_v40 = vrot.slane %v3277_v28, 4  ;;  %v3281_v23 = vperm.slane %v3273_v33, %v6473_v52 }
 0x7a8   : > { %v3307_v43 = vsel %vm1196_vm1, %v3306_v14, %v3265_v10  ;;  %v3323_v17 = vpack.c.bf16 %v3309_v45, %v3309_v45  ;;  %v3310_v8 = vrot.slane %v3293_v48, 4  ;;  %v3297_v41 = vsel %vm1196_vm1, %v3257_v9, %v3296_v39 }
 0x7a9   : > { %v3322_v53 = vpack.c.bf16 %v3307_v43, %v3307_v43  ;;  %v3314_v49 = vrot.slane %v3301_v7, 4  ;;  %v3317_v24 = vsel %vm1196_vm1, %v3301_v7, %v3316_v40  ;;  %v3305_v3 = vperm.slane %v3297_v41, %v6473_v52 }
 0x7aa   : > { %v3609_v30 = vsel %vm1938_vm2, %v3323_v17, 0  ;;  %v3311_v60 = vsel %vm1196_vm1, %v3310_v8, %v3269_v18  ;;  %v3327_v55 = vpack.c.bf16 %v3317_v24, %v3317_v24  ;;  %v3312_v10 = vrot.slane %v3269_v18, 4 }
 0x7ab   : > { %v3590_v46 = vsel %vm1938_vm2, %v3322_v53, 0  ;;  %v3315_v63 = vsel %vm1196_vm1, %v3314_v49, %v3277_v28  ;;  %3618 = vmatpush.bf16.xpose.msrb.mxu0 %v3609_v30  ;;  %v3324_v54 = vpack.c.bf16 %v3311_v60, %v3311_v60  ;;  %v3318_v32 = vrot.slane %v3305_v3, 4 }
 0x7ac   : > { %3599 = vmatpush.bf16.xpose.msrb.mxu3 %v3590_v46  ;;  %v3326_v4 = vpack.c.bf16 %v3315_v63, %v3315_v63  ;;  %v3320_v9 = vrot.slane %v3281_v23, 4  ;;  %v3685_v35 = vsel %vm1938_vm2, %v3327_v55, 0  ;;  %v2981_v21 = vsel %vm1196_vm1, %v2980_v47, %v7157_v22 }
 0x7ad   : > { %v3628_v12 = vsel %vm1938_vm2, %v3324_v54, 0  ;;  %v3005_v59 = vsel %vm1196_vm1, %v3004_v44, %v7160_v29  ;;  %v3319_v38 = vsel %vm1196_vm1, %v3318_v32, %v3281_v23  ;;  %v3313_v16 = vsel %vm1196_vm1, %v3293_v48, %v3312_v10 }
 0x7ae   : > { %v3666_v61 = vsel %vm1938_vm2, %v3326_v4, 0  ;;  %3637 = vmatpush.bf16.xpose.msra.mxu1 %v3628_v12  ;;  %v3321_v2 = vsel %vm1196_vm1, %v3305_v3, %v3320_v9  ;;  %v3328_v57 = vpack.c.bf16 %v3319_v38, %v3319_v38  ;;  %v3325_v18 = vpack.c.bf16 %v3313_v16, %v3313_v16 }
 0x7af   : > { %v3329_v42 = vpack.c.bf16 %v3321_v2, %v3321_v2  ;;  %v2987_v47 = vperm.slane %v2981_v21, %v6459_v27  ;;  %v2983_v44 = vsel %vm1196_vm1, %v7153_v13, %v2982_v58  ;;  %v3011_v14 = vperm.slane %v3005_v59, %v6473_v52 }
 0x7b0   : > { %v3028_v28 = vrot.slane %v7188_v51, 4  ;;  %v3007_v19 = vsel %vm1196_vm1, %v7164_v5, %v3006_v50  ;;  %v3003_v48 = vperm.slane %v7182_v26, %v6459_v27  ;;  %v3704_v7 = vsel %vm1938_vm2, %v3328_v57, 0 }
 0x7b1   : > { %v3647_v45 = vsel %vm1938_vm2, %v3325_v18, 0  ;;  %v3015_v22 = vperm.slane %v3007_v19, %v6473_v52  ;;  %v3723_v13 = vsel %vm1938_vm2, %v3329_v42, 0  ;;  %v3054_v33 = vrot.slane %v3011_v14, 4 }
 0x7b2   : > { %3656 = vmatpush.bf16.xpose.msrb.mxu2 %v3647_v45  ;;  %v3029_v58 = vsel %vm1196_vm1, %v3028_v28, %v2987_v47  ;;  %v3030_v29 = vrot.slane %v2987_v47, 4  ;;  %v3016_v26 = vrot.slane %v7170_v36, 4  ;;  %v2991_v43 = vperm.slane %v2983_v44, %v6459_v27  ;;  %v5344_v44 = vld [vmem:[%s2714_s29] ss:$0 sm:$0xff] }
 0x7b3   : > { %3694 = vmatpush.bf16.xpose.msra.mxu0 %v3685_v35  ;;  %v3035_v5 = vperm.slane %v3029_v58, %v6473_v52  ;;  %v3058_v50 = vrot.slane %v3015_v22, 4  ;;  %v3018_v53 = vrot.slane %v7175_v20, 4  ;;  %v3040_v23 = vrot.slane %v3003_v48, 4 }
 0x7b4   : > { %3675 = vmatpush.bf16.xpose.msra.mxu3 %v3666_v61  ;;  %v3031_v39 = vsel %vm1196_vm1, %v7188_v51, %v3030_v29  ;;  %v3017_v3 = vsel %vm1196_vm1, %v3016_v26, %v7175_v20  ;;  %v3042_v46 = vrot.slane %v2991_v43, 4 }
 0x7b5   : > { %v3055_v17 = vsel %vm1196_vm1, %v3035_v5, %v3054_v33  ;;  %v3052_v8 = vrot.slane %v3035_v5, 4  ;;  %v3039_v40 = vperm.slane %v3031_v39, %v6473_v52  ;;  %v3041_v55 = vsel %vm1196_vm1, %v3040_v23, %v2991_v43 }
 0x7b6   : > { %3713 = vmatpush.bf16.xpose.msrb.mxu1 %v3704_v7  ;;  %v3069_v49 = vpack.c.bf16 %v3055_v17, %v3055_v17  ;;  %v3019_v4 = vsel %vm1196_vm1, %v7170_v36, %v3018_v53  ;;  %v3023_v32 = vperm.slane %v3017_v3, %v6473_v52  ;;  %v3043_v20 = vsel %vm1196_vm1, %v3003_v48, %v3042_v46 }
 0x7b7   : > { %v3053_v41 = vsel %vm1196_vm1, %v3052_v8, %v3011_v14  ;;  %v3059_v30 = vsel %vm1196_vm1, %v3039_v40, %v3058_v50  ;;  %v3056_v60 = vrot.slane %v3039_v40, 4  ;;  %v3047_v10 = vperm.slane %v3041_v55, %v6473_v52 }
 0x7b8   : > { %4928 = vmatmul.msk.bf16.vlgmr.msrb.gmra.mxu0 %vm1938_vm2, %v3069_v49  ;;  %v3068_v51 = vpack.c.bf16 %v3053_v41, %v3053_v41  ;;  %v3071_v24 = vpack.c.bf16 %v3059_v30, %v3059_v30  ;;  %v3027_v9 = vperm.slane %v3019_v4, %v6473_v52  ;;  %v3062_v12 = vrot.slane %v3023_v32, 4 }
 0x7b9   : > { %v3057_v63 = vsel %vm1196_vm1, %v3056_v60, %v3015_v22  ;;  %v3051_v35 = vperm.slane %v3043_v20, %v6473_v52  ;;  %v3060_v21 = vrot.slane %v3047_v10, 4 }
 0x7ba   : > { %3732 = vmatpush.bf16.xpose.msra.mxu2 %v3723_v13  ;;  %4927 = vmatmul.msk.bf16.vlgmr.msrb.gmra.mxu3 %vm1938_vm2, %v3068_v51  ;;  %v3070_v54 = vpack.c.bf16 %v3057_v63, %v3057_v63  ;;  %v3066_v59 = vrot.slane %v3027_v9, 4  ;;  %v3063_v36 = vsel %vm1196_vm1, %v3047_v10, %v3062_v12 }
 0x7bb   : > { %4930 = vmatmul.msk.bf16.vlgmr.msrb.gmra.mxu2 %vm1938_vm2, %v3071_v24  ;;  %v3064_v61 = vrot.slane %v3051_v35, 4  ;;  %v3061_v38 = vsel %vm1196_vm1, %v3060_v21, %v3023_v32  ;;  %v3073_v2 = vpack.c.bf16 %v3063_v36, %v3063_v36  ;;  %v5318_v36 = vpack.i.bf16 %v7000_v62, %v6979_v37 }
 0x7bc   : > { %4929 = vmatmul.msk.bf16.vlgmr.msra.gmra.mxu1 %vm1938_vm2, %v3070_v54  ;;  %v3067_v16 = vsel %vm1196_vm1, %v3051_v35, %v3066_v59  ;;  %v3072_v18 = vpack.c.bf16 %v3061_v38, %v3061_v38  ;;  %v5333_v59 = vpack.i.bf16 %v7010_v11, %v7014_v15 }
 0x7bd   : > { %v3065_v57 = vsel %vm1196_vm1, %v3064_v61, %v3027_v9  ;;  %v3075_v42 = vpack.c.bf16 %v3067_v16, %v3067_v16  ;;  %v5328_v61 = vpack.i.bf16 %v6995_v1, %v7050_v34 }
 0x7be   : > { %v3074_v47 = vpack.c.bf16 %v3065_v57, %v3065_v57 }
 0x7c8   : > { %4932 = vmatmul.msk.bf16.vlgmr.msra.gmra.mxu0 %vm1938_vm2, %v3073_v2 }
 0x7ca   : > { %4931 = vmatmul.msk.bf16.vlgmr.msra.gmra.mxu3 %vm1938_vm2, %v3072_v18 }
 0x7cb   : > { %4934 = vmatmul.msk.bf16.vlgmr.msra.gmra.mxu2 %vm1938_vm2, %v3075_v42 }
 0x7cc   : > { %4933 = vmatmul.msk.bf16.vlgmr.msrb.gmra.mxu1 %vm1938_vm2, %v3074_v47 }
 0x835   : > { %v3620_v14 = vpop.f32.mrf.mxu0 }
 0x836   : > { %v3739_v28 = vmul.f32 0.35355338, %v3620_v14 }
 0x838   : > { %v7302_v19 = vadd.f32 %v5344_v44, %v3739_v28 }
 0x839   : > { %v3639_v48 = vpop.f32.mrf.mxu1 }
 0x83a   : > { %v3740_v7 = vmul.f32 0.35355338, %v3639_v48  ;;  %v3758_v45 = vsel %vm1938_vm2, %v7302_v19, -inf }
 0x83b   : > { %3759 = vmax.xlane.f32.xlu2 %v3758_v45 }
 0x83c   : > { %v3749_v22 = vadd.f32 %v5344_v44, %v3740_v7 }
 0x83d   : > { %v3601_v13 = vpop.f32.mrf.mxu3  ;;  %v3622_v58 = vpop.f32.mrf.mxu0 }
 0x83e   : > { %v3738_v33 = vmul.f32 0.35355338, %v3601_v13  ;;  %v3658_v29 = vpop.f32.mrf.mxu2  ;;  %v3761_v5 = vsel %vm1938_vm2, %v3749_v22, -inf }
 0x83f   : > { %v3741_v50 = vmul.f32 0.35355338, %v3658_v29  ;;  %3762 = vmax.xlane.f32.xlu0 %v3761_v5 }
 0x840   : > { %v3747_v26 = vadd.f32 %v5344_v44, %v3738_v33 }
 0x841   : > { %v3641_v39 = vpop.f32.mrf.mxu1  ;;  %v3750_v43 = vadd.f32 %v5344_v44, %v3741_v50 }
 0x842   : > { %v3755_v17 = vsel %vm1938_vm2, %v3747_v26, -inf }
 0x843   : > { %v3764_v8 = vsel %vm1938_vm2, %v3750_v43, -inf  ;;  %3756 = vmax.xlane.f32.xlu2 %v3755_v17 }
 0x844   : > { %3765 = vmax.xlane.f32.xlu1 %v3764_v8 }
 0x845   : > { %v3603_v40 = vpop.f32.mrf.mxu3  ;;  %v3696_v53 = vpop.f32.mrf.mxu0 }
 0x846   : > { %v3660_v49 = vpop.f32.mrf.mxu2  ;;  %v3743_v23 = vmul.f32 0.35355338, %v3696_v53 }
 0x848   : > { %v7309_v41 = vadd.f32 %v5344_v44, %v3743_v23 }
 0x849   : > { %v3715_v30 = vpop.f32.mrf.mxu1 }
 0x84a   : > { %v3744_v60 = vmul.f32 0.35355338, %v3715_v30  ;;  %v3770_v51 = vsel %vm1938_vm2, %v7309_v41, -inf }
 0x84c   : > { %3771 = vmax.xlane.f32.xlu1 %v3770_v51  ;;  %v3753_v24 = vadd.f32 %v5344_v44, %v3744_v60 }
 0x84d   : > { %v3677_v3 = vpop.f32.mrf.mxu3  ;;  %v3698_v46 = vpop.f32.mrf.mxu0 }
 0x84e   : > { %v3742_v63 = vmul.f32 0.35355338, %v3677_v3  ;;  %v3734_v54 = vpop.f32.mrf.mxu2  ;;  %v3773_v55 = vsel %vm1938_vm2, %v3753_v24, -inf }
 0x84f   : > { %v3745_v4 = vmul.f32 0.35355338, %v3734_v54  ;;  %3774 = vmax.xlane.f32.xlu0 %v3773_v55 }
 0x850   : > { %v3751_v32 = vadd.f32 %v5344_v44, %v3742_v63 }
 0x851   : > { %v3717_v20 = vpop.f32.mrf.mxu1  ;;  %v3754_v10 = vadd.f32 %v5344_v44, %v3745_v4 }
 0x852   : > { %v3767_v9 = vsel %vm1938_vm2, %v3751_v32, -inf }
 0x853   : > { %v3776_v12 = vsel %vm1938_vm2, %v3754_v10, -inf }
 0x854   : > { %3777 = vmax.xlane.f32.xlu2 %v3776_v12  ;;  %3768 = vmax.xlane.f32.xlu1 %v3767_v9 }
 0x855   : > { %v3679_v35 = vpop.f32.mrf.mxu3 }
 0x856   : > { %v3736_v21 = vpop.f32.mrf.mxu2 }
 0x863   : > { %5324 = vrot.lane.b32.xlu0 %v5323_v31, %s6109_s0 }
 0x86b   : > { %5334 = vrot.lane.b32.xlu0 %v5333_v59, %s6109_s0 }
 0x86c   : > { %5319 = vrot.lane.b32.xlu2 %v5318_v36, %s6109_s0 }
 0x86d   : > { %5329 = vrot.lane.b32.xlu1 %v5328_v61, %s6109_s0 }
 0x8ae   : > { %v3760_v38 = vpop.xlane.xlu2 %3759 }
 0x8af   : > { %v3780_v37 = vsub.f32 %v7302_v19, %v3760_v38 }
 0x8b1   : > { %v3789_v34 = vmul.f32 1.442695, %v3780_v37 }
 0x8b2   : > { %v3763_v16 = vpop.xlane.xlu0 %3762 }
 0x8b3   : > { %v3781_v2 = vsub.f32 %v3749_v22, %v3763_v16 }
 0x8b5   : > { %v3791_v6 = vmul.f32 1.442695, %v3781_v2 }
 0x8b6   : > { %v3757_v25 = vpop.xlane.xlu2 %3756 }
 0x8b7   : > { %5388 = vpow2.f32 %v3791_v6  ;;  %v3766_v31 = vpop.xlane.xlu1 %3765  ;;  %v3779_v11 = vsub.f32 %v3747_v26, %v3757_v25 }
 0x8b8   : > { %v3782_v15 = vsub.f32 %v3750_v43, %v3766_v31 }
 0x8b9   : > { %v3787_v62 = vmul.f32 1.442695, %v3779_v11 }
 0x8ba   : > { %v3793_v57 = vmul.f32 1.442695, %v3782_v15 }
 0x8bb   : > { %5390 = vpow2.f32 %v3787_v62 }
 0x8bc   : > { %5392 = vpow2.f32 %v3793_v57 }
 0x8bd   : > { %v7330_v1 = vpop.eup %5388  ;;  %5394 = vpow2.f32 %v3789_v34 }
 0x8be   : > { %v3809_v18 = vsel %vm1938_vm2, %v7330_v1, 0.0 }
 0x8bf   : > { %v3772_v42 = vpop.xlane.xlu1 %3771  ;;  %3810 = vadd.xlane.f32.xlu1 %v3809_v18 }
 0x8c0   : > { %v3784_v26 = vsub.f32 %v7309_v41, %v3772_v42 }
 0x8c1   : > { %v7334_v47 = vpop.eup %5390 }
 0x8c2   : > { %v7336_v44 = vpop.eup %5392  ;;  %v3775_v14 = vpop.xlane.xlu0 %3774  ;;  %v3803_v28 = vsel %vm1938_vm2, %v7334_v47, 0.0  ;;  %v3797_v17 = vmul.f32 1.442695, %v3784_v26 }
 0x8c3   : > { %v3785_v19 = vsub.f32 %v3753_v24, %v3775_v14  ;;  %v3812_v48 = vsel %vm1938_vm2, %v7336_v44, 0.0  ;;  %3804 = vadd.xlane.f32.xlu2 %v3803_v28  ;;  %v7342_v45 = vpop.eup %5394 }
 0x8c4   : > { %3813 = vadd.xlane.f32.xlu0 %v3812_v48  ;;  %v3806_v50 = vsel %vm1938_vm2, %v7342_v45, 0.0 }
 0x8c5   : > { %v3799_v7 = vmul.f32 1.442695, %v3785_v19 }
 0x8c7   : > { %5396 = vpow2.f32 %v3799_v7  ;;  %v3778_v22 = vpop.xlane.xlu2 %3777  ;;  %v3769_v13 = vpop.xlane.xlu1 %3768 }
 0x8c8   : > { %v3786_v58 = vsub.f32 %v3754_v10, %v3778_v22  ;;  %v3783_v33 = vsub.f32 %v3751_v32, %v3769_v13 }
 0x8ca   : > { %v3801_v29 = vmul.f32 1.442695, %v3786_v58  ;;  %v3795_v5 = vmul.f32 1.442695, %v3783_v33 }
 0x8cb   : > { %3807 = vadd.xlane.f32.xlu2 %v3806_v50 }
 0x8cc   : > { %5398 = vpow2.f32 %v3801_v29 }
 0x8cd   : > { %v7347_v39 = vpop.eup %5396  ;;  %5400 = vpow2.f32 %v3795_v5 }
 0x8ce   : > { %v3821_v43 = vsel %vm1938_vm2, %v7347_v39, 0.0  ;;  %5402 = vpow2.f32 %v3797_v17 }
 0x8cf   : > { %3822 = vadd.xlane.f32.xlu1 %v3821_v43  ;;  %v5320_v53 = vpop.permute.xlu2 %5319 }
 0x8d0   : > { %v5321_v30 = vunpack.i.l.bf16 %v5320_v53  ;;  %v5322_v46 = vunpack.i.h.bf16 %v5320_v53 }
 0x8d2   : > { %v7351_v8 = vpop.eup %5398  ;;  %v3356_v24 = vrot.slane %v5321_v30, 4  ;;  %v3368_v9 = vrot.slane %v5322_v46, 4 }
 0x8d3   : > { %v7353_v40 = vpop.eup %5400  ;;  %v3824_v49 = vsel %vm1938_vm2, %v7351_v8, 0.0 }
 0x8d4   : > { %3825 = vadd.xlane.f32.xlu2 %v3824_v49  ;;  %v3815_v23 = vsel %vm1938_vm2, %v7353_v40, 0.0  ;;  %v7359_v51 = vpop.eup %5402 }
 0x8d5   : > { %3816 = vadd.xlane.f32.xlu0 %v3815_v23  ;;  %v5325_v41 = vpop.permute.xlu0 %5324  ;;  %v3818_v54 = vsel %vm1938_vm2, %v7359_v51, 0.0 }
 0x8d6   : > { %v5326_v60 = vunpack.i.l.bf16 %v5325_v41  ;;  %v5327_v55 = vunpack.i.h.bf16 %v5325_v41 }
 0x8d8   : > { %v3354_v3 = vrot.slane %v5326_v60, 4  ;;  %v3357_v63 = vsel %vm1196_vm1, %v5326_v60, %v3356_v24  ;;  %v3380_v38 = vrot.slane %v5327_v55, 4 }
 0x8d9   : > { %v3365_v12 = vperm.slane %v3357_v63, %v6459_v27 }
 0x8da   : > { %v3355_v32 = vsel %vm1196_vm1, %v3354_v3, %v5321_v30 }
 0x8db   : > { %v3361_v16 = vperm.slane %v3355_v32, %v6459_v27  ;;  %v3416_v57 = vrot.slane %v3365_v12, 4 }
 0x8dd   : > { %3819 = vadd.xlane.f32.xlu0 %v3818_v54  ;;  %v5335_v4 = vpop.permute.xlu0 %5334  ;;  %v3404_v42 = vrot.slane %v3361_v16, 4 }
 0x8de   : > { %v5337_v20 = vunpack.i.h.bf16 %v5335_v4  ;;  %v5336_v10 = vunpack.i.l.bf16 %v5335_v4 }
 0x8df   : > { %v5330_v35 = vpop.permute.xlu1 %5329 }
 0x8e0   : > { %v3390_v21 = vrot.slane %v5337_v20, 4  ;;  %v3392_v59 = vrot.slane %v5336_v10, 4  ;;  %v5332_v36 = vunpack.i.h.bf16 %v5330_v35  ;;  %v5331_v61 = vunpack.i.l.bf16 %v5330_v35 }
 0x8e2   : > { %v3391_v2 = vsel %vm1196_vm1, %v3390_v21, %v5336_v10  ;;  %v3393_v6 = vsel %vm1196_vm1, %v5337_v20, %v3392_v59  ;;  %v3366_v25 = vrot.slane %v5332_v36, 4  ;;  %v3369_v31 = vsel %vm1196_vm1, %v5332_v36, %v3368_v9 }
 0x8e3   : > { %v3397_v11 = vperm.slane %v3391_v2, %v6459_v27  ;;  %v3401_v15 = vperm.slane %v3393_v6, %v6459_v27  ;;  %v3377_v37 = vperm.slane %v3369_v31, %v6459_v27  ;;  %v3378_v62 = vrot.slane %v5331_v61, 4 }
 0x8e4   : > { %v3367_v34 = vsel %vm1196_vm1, %v3366_v25, %v5322_v46  ;;  %v3381_v18 = vsel %vm1196_vm1, %v5331_v61, %v3380_v38 }
 0x8e5   : > { %v3438_v14 = vrot.slane %v3401_v15, 4  ;;  %v3373_v28 = vperm.slane %v3367_v34, %v6459_v27  ;;  %v3414_v19 = vrot.slane %v3377_v37, 4  ;;  %v3426_v48 = vrot.slane %v3397_v11, 4 }
 0x8e6   : > { %v3417_v7 = vsel %vm1196_vm1, %v3377_v37, %v3416_v57  ;;  %v3379_v22 = vsel %vm1196_vm1, %v3378_v62, %v5327_v55  ;;  %v3389_v13 = vperm.slane %v3381_v18, %v6459_v27 }
 0x8e7   : > { %v3402_v58 = vrot.slane %v3373_v28, 4  ;;  %v3405_v33 = vsel %vm1196_vm1, %v3373_v28, %v3404_v42  ;;  %v3415_v29 = vsel %vm1196_vm1, %v3414_v19, %v3365_v12  ;;  %v3425_v5 = vperm.slane %v3417_v7, %v6473_v52 }
 0x8e8   : > { %v3413_v50 = vperm.slane %v3405_v33, %v6473_v52  ;;  %v3421_v26 = vperm.slane %v3415_v29, %v6473_v52  ;;  %v3385_v43 = vperm.slane %v3379_v22, %v6459_v27  ;;  %v3439_v17 = vsel %vm1196_vm1, %v3438_v14, %v3389_v13 }
 0x8e9   : > { %v3403_v53 = vsel %vm1196_vm1, %v3402_v58, %v3361_v16  ;;  %v3440_v49 = vrot.slane %v3389_v13, 4  ;;  %v3445_v23 = vperm.slane %v3439_v17, %v6473_v52  ;;  %v3464_v60 = vrot.slane %v3425_v5, 4 }
 0x8ea   : > { %v3409_v41 = vperm.slane %v3403_v53, %v6473_v52  ;;  %v3460_v30 = vrot.slane %v3421_v26, 4  ;;  %v3427_v24 = vsel %vm1196_vm1, %v3426_v48, %v3385_v43  ;;  %v3428_v3 = vrot.slane %v3385_v43, 4 }
 0x8eb   : > { %v3433_v46 = vperm.slane %v3427_v24, %v6473_v52  ;;  %v3441_v63 = vsel %vm1196_vm1, %v3401_v15, %v3440_v49  ;;  %v3458_v54 = vrot.slane %v3445_v23, 4  ;;  %v3456_v4 = vrot.slane %v3413_v50, 4 }
 0x8ec   : > { %v3452_v55 = vrot.slane %v3409_v41, 4  ;;  %v3449_v32 = vperm.slane %v3441_v63, %v6473_v52  ;;  %v3461_v20 = vsel %vm1196_vm1, %v3445_v23, %v3460_v30  ;;  %v3429_v10 = vsel %vm1196_vm1, %v3397_v11, %v3428_v3 }
 0x8ed   : > { %v3450_v9 = vrot.slane %v3433_v46, 4  ;;  %v3459_v12 = vsel %vm1196_vm1, %v3458_v54, %v3421_v26  ;;  %v3504_v35 = vrot.slane %v3461_v20, 4  ;;  %v3437_v21 = vperm.slane %v3429_v10, %v6473_v52 }
 0x8ee   : > { %v3453_v59 = vsel %vm1196_vm1, %v3433_v46, %v3452_v55  ;;  %v3462_v36 = vrot.slane %v3449_v32, 4  ;;  %v3465_v61 = vsel %vm1196_vm1, %v3449_v32, %v3464_v60  ;;  %v3492_v16 = vrot.slane %v3459_v12, 4 }
 0x8ef   : > { %v3480_v38 = vrot.slane %v3453_v59, 4  ;;  %v3502_v2 = vrot.slane %v3465_v61, 4  ;;  %v3451_v6 = vsel %vm1196_vm1, %v3450_v9, %v3409_v41  ;;  %v3454_v25 = vrot.slane %v3437_v21, 4 }
 0x8f0   : > { %v3457_v31 = vsel %vm1196_vm1, %v3437_v21, %v3456_v4  ;;  %v3463_v11 = vsel %vm1196_vm1, %v3462_v36, %v3425_v5  ;;  %v3468_v15 = vrot.slane %v3451_v6, 4  ;;  %v3505_v26 = vsel %vm1196_vm1, %v3465_v61, %v3504_v35 }
 0x8f1   : > { %v3478_v37 = vrot.slane %v3457_v31, 4  ;;  %v3490_v62 = vrot.slane %v3463_v11, 4  ;;  %v3503_v57 = vsel %vm1196_vm1, %v3502_v2, %v3461_v20  ;;  %v3481_v34 = vsel %vm1196_vm1, %v3457_v31, %v3480_v38 }
 0x8f2   : > { %v3455_v18 = vsel %vm1196_vm1, %v3454_v25, %v3413_v50  ;;  %v3509_v42 = vperm.slane %v3503_v57, %v6459_v27  ;;  %v3489_v14 = vperm.slane %v3481_v34, %v6459_v27  ;;  %v3493_v28 = vsel %vm1196_vm1, %v3463_v11, %v3492_v16 }
 0x8f3   : > { %v3466_v19 = vrot.slane %v3455_v18, 4  ;;  %v3479_v48 = vsel %vm1196_vm1, %v3478_v37, %v3453_v59  ;;  %v3491_v7 = vsel %vm1196_vm1, %v3490_v62, %v3459_v12  ;;  %v3469_v22 = vsel %vm1196_vm1, %v3455_v18, %v3468_v15 }
 0x8f4   : > { %v3485_v13 = vperm.slane %v3479_v48, %v6459_v27  ;;  %v3497_v58 = vperm.slane %v3491_v7, %v6459_v27  ;;  %v3538_v33 = vrot.slane %v3509_v42, 4  ;;  %v3477_v29 = vperm.slane %v3469_v22, %v6459_v27 }
 0x8f5   : > { %v3467_v5 = vsel %vm1196_vm1, %v3466_v19, %v3451_v6  ;;  %v3501_v50 = vperm.slane %v3493_v28, %v6459_v27  ;;  %v3526_v43 = vrot.slane %v3489_v14, 4  ;;  %v3513_v30 = vperm.slane %v3505_v26, %v6459_v27 }
 0x8f6   : > { %v3473_v17 = vperm.slane %v3467_v5, %v6459_v27  ;;  %v3514_v53 = vrot.slane %v3485_v13, 4  ;;  %v3539_v49 = vsel %vm1196_vm1, %v3538_v33, %v3497_v58  ;;  %v3540_v23 = vrot.slane %v3497_v58, 4 }
 0x8f7   : > { %v3545_v41 = vperm.slane %v3539_v49, %v6473_v52  ;;  %v3527_v60 = vsel %vm1196_vm1, %v3526_v43, %v3477_v29  ;;  %v3528_v24 = vrot.slane %v3477_v29, 4  ;;  %v3550_v20 = vrot.slane %v3513_v30, 4 }
 0x8f8   : > { %v3515_v3 = vsel %vm1196_vm1, %v3514_v53, %v3473_v17  ;;  %v3516_v46 = vrot.slane %v3473_v17, 4  ;;  %v3541_v63 = vsel %vm1196_vm1, %v3509_v42, %v3540_v23  ;;  %v3533_v54 = vperm.slane %v3527_v60, %v6473_v52 }
 0x8f9   : > { %v3521_v55 = vperm.slane %v3515_v3, %v6473_v52  ;;  %v3562_v4 = vrot.slane %v3545_v41, 4  ;;  %v3549_v32 = vperm.slane %v3541_v63, %v6473_v52  ;;  %v3529_v9 = vsel %vm1196_vm1, %v3489_v14, %v3528_v24 }
 0x8fa   : > { %v3517_v10 = vsel %vm1196_vm1, %v3485_v13, %v3516_v46  ;;  %v3552_v12 = vrot.slane %v3501_v50, 4  ;;  %v3572_v35 = vrot.slane %v3533_v54, 4  ;;  %v3551_v16 = vsel %vm1196_vm1, %v3550_v20, %v3501_v50 }
 0x8fb   : > { %v3563_v21 = vsel %vm1196_vm1, %v3562_v4, %v3521_v55  ;;  %v3564_v59 = vrot.slane %v3521_v55, 4  ;;  %v3525_v36 = vperm.slane %v3517_v10, %v6473_v52  ;;  %v3566_v61 = vrot.slane %v3549_v32, 4 }
 0x8fc   : > { %v3578_v38 = vpack.c.bf16 %v3563_v21, %v3563_v21  ;;  %v3537_v2 = vperm.slane %v3529_v9, %v6473_v52  ;;  %v3553_v6 = vsel %vm1196_vm1, %v3513_v30, %v3552_v12  ;;  %v3557_v11 = vperm.slane %v3551_v16, %v6473_v52 }
 0x8fd   : > { %v3565_v25 = vsel %vm1196_vm1, %v3545_v41, %v3564_v59  ;;  %v3567_v31 = vsel %vm1196_vm1, %v3566_v61, %v3525_v36  ;;  %v3561_v15 = vperm.slane %v3553_v6, %v6473_v52  ;;  %v3568_v34 = vrot.slane %v3525_v36, 4 }
 0x8fe   : > { %v3855_v37 = vsel %vm2206_vm3, %v3578_v38, 0  ;;  %v3579_v62 = vpack.c.bf16 %v3565_v25, %v3565_v25  ;;  %v3580_v57 = vpack.c.bf16 %v3567_v31, %v3567_v31  ;;  %v3570_v18 = vrot.slane %v3557_v11, 4 }
 0x8ff   : > { %3864 = vmatpush.bf16.msrb.mxu3 %v3855_v37  ;;  %v3574_v42 = vrot.slane %v3561_v15, 4  ;;  %v3573_v14 = vsel %vm1196_vm1, %v3557_v11, %v3572_v35  ;;  %v3576_v28 = vrot.slane %v3537_v2, 4  ;;  %v3569_v7 = vsel %vm1196_vm1, %v3549_v32, %v3568_v34 }
 0x900   : > { %v3874_v19 = vsel %vm2206_vm3, %v3579_v62, 0  ;;  %v3893_v48 = vsel %vm2206_vm3, %v3580_v57, 0  ;;  %v3583_v22 = vpack.c.bf16 %v3573_v14, %v3573_v14  ;;  %v3571_v13 = vsel %vm1196_vm1, %v3570_v18, %v3533_v54 }
 0x901   : > { %3883 = vmatpush.bf16.msrb.mxu0 %v3874_v19  ;;  %3902 = vmatpush.bf16.msra.mxu1 %v3893_v48  ;;  %v3575_v58 = vsel %vm1196_vm1, %v3574_v42, %v3537_v2  ;;  %v3581_v33 = vpack.c.bf16 %v3569_v7, %v3569_v7  ;;  %v3582_v29 = vpack.c.bf16 %v3571_v13, %v3571_v13 }
 0x902   : > { %v3584_v5 = vpack.c.bf16 %v3575_v58, %v3575_v58  ;;  %v3950_v50 = vsel %vm2206_vm3, %v3583_v22, 0  ;;  %v3577_v26 = vsel %vm1196_vm1, %v3561_v15, %v3576_v28 }
 0x903   : > { %v3912_v43 = vsel %vm2206_vm3, %v3581_v33, 0  ;;  %v3585_v17 = vpack.c.bf16 %v3577_v26, %v3577_v26  ;;  %v3931_v53 = vsel %vm2206_vm3, %v3582_v29, 0 }
 0x904   : > { %v3969_v49 = vsel %vm2206_vm3, %v3584_v5, 0  ;;  %3921 = vmatpush.bf16.msrb.mxu2 %v3912_v43  ;;  %3940 = vmatpush.bf16.msra.mxu3 %v3931_v53 }
 0x905   : > { %3959 = vmatpush.bf16.msra.mxu0 %v3950_v50  ;;  %3978 = vmatpush.bf16.msrb.mxu1 %v3969_v49  ;;  %v3988_v23 = vsel %vm2206_vm3, %v3585_v17, 0 }
 0x908   : > { %3997 = vmatpush.bf16.msra.mxu2 %v3988_v23 }
 0x932   : > { %v3811_v41 = vpop.xlane.xlu1 %3810 }
 0x933   : > { %5404 = vrcp.f32 %v3811_v41 }
 0x936   : > { %v3805_v30 = vpop.xlane.xlu2 %3804 }
 0x937   : > { %v3814_v60 = vpop.xlane.xlu0 %3813  ;;  %5406 = vrcp.f32 %v3805_v30 }
 0x938   : > { %5408 = vrcp.f32 %v3814_v60 }
 0x939   : > { %v5405_v24 = vpop.eup %5404 }
 0x93a   : > { %v3837_v3 = vmul.f32 %v5405_v24, %v7330_v1 }
 0x93c   : > { %v3845_v46 = vpack.c.bf16 %v3837_v3, %v3837_v3 }
 0x93d   : > { %v5407_v63 = vpop.eup %5406 }
 0x93e   : > { %v5409_v54 = vpop.eup %5408  ;;  %v3835_v55 = vmul.f32 %v5407_v63, %v7334_v47  ;;  %v3808_v4 = vpop.xlane.xlu2 %3807  ;;  %4937 = vmatmul.msk.bf16.vlgmr.msra.gmra.mxu1 %vm1938_vm2, %v3845_v46 }
 0x93f   : > { %v3838_v32 = vmul.f32 %v5409_v54, %v7336_v44  ;;  %5410 = vrcp.f32 %v3808_v4 }
 0x940   : > { %v3843_v20 = vpack.c.bf16 %v3835_v55, %v3835_v55 }
 0x941   : > { %v3846_v10 = vpack.c.bf16 %v3838_v32, %v3838_v32 }
 0x942   : > { %v3823_v9 = vpop.xlane.xlu1 %3822  ;;  %4935 = vmatmul.msk.bf16.vlgmr.msrb.gmra.mxu3 %vm1938_vm2, %v3843_v20 }
 0x943   : > { %5412 = vrcp.f32 %v3823_v9  ;;  %4938 = vmatmul.msk.bf16.vlgmr.msrb.gmra.mxu2 %vm1938_vm2, %v3846_v10 }
 0x945   : > { %v5411_v1 = vpop.eup %5410 }
 0x946   : > { %v3836_v12 = vmul.f32 %v5411_v1, %v7342_v45 }
 0x947   : > { %v3826_v35 = vpop.xlane.xlu2 %3825 }
 0x948   : > { %v3844_v21 = vpack.c.bf16 %v3836_v12, %v3836_v12  ;;  %5414 = vrcp.f32 %v3826_v35  ;;  %v3817_v47 = vpop.xlane.xlu0 %3816 }
 0x949   : > { %v5413_v59 = vpop.eup %5412  ;;  %5416 = vrcp.f32 %v3817_v47 }
 0x94a   : > { %v3841_v44 = vmul.f32 %v5413_v59, %v7347_v39  ;;  %4936 = vmatmul.msk.bf16.vlgmr.msrb.gmra.mxu0 %vm1938_vm2, %v3844_v21 }
 0x94c   : > { %v3849_v36 = vpack.c.bf16 %v3841_v44, %v3841_v44 }
 0x94e   : > { %v5415_v61 = vpop.eup %5414  ;;  %4941 = vmatmul.msk.bf16.vlgmr.msrb.gmra.mxu1 %vm1938_vm2, %v3849_v36 }
 0x94f   : > { %v5417_v38 = vpop.eup %5416  ;;  %v3842_v16 = vmul.f32 %v5415_v61, %v7351_v8 }
 0x950   : > { %v3839_v2 = vmul.f32 %v5417_v38, %v7353_v40  ;;  %v3820_v45 = vpop.xlane.xlu0 %3819 }
 0x951   : > { %v3850_v6 = vpack.c.bf16 %v3842_v16, %v3842_v16  ;;  %5418 = vrcp.f32 %v3820_v45 }
 0x952   : > { %v3847_v25 = vpack.c.bf16 %v3839_v2, %v3839_v2 }
 0x953   : > { %4942 = vmatmul.msk.bf16.vlgmr.msra.gmra.mxu2 %vm1938_vm2, %v3850_v6 }
 0x954   : > { %4939 = vmatmul.msk.bf16.vlgmr.msra.gmra.mxu3 %vm1938_vm2, %v3847_v25 }
 0x957   : > { %v5419_v39 = vpop.eup %5418 }
 0x958   : > { %v3840_v31 = vmul.f32 %v5419_v39, %v7359_v51 }
 0x95a   : > { %v3848_v11 = vpack.c.bf16 %v3840_v31, %v3840_v31 }
 0x95c   : > { %4940 = vmatmul.msk.bf16.vlgmr.msra.gmra.mxu0 %vm1938_vm2, %v3848_v11 }
 0x9bb   : > { %v3904_v15 = vpop.f32.mrf.mxu1 }
 0x9bc   : > { %v4003_v34 = vrot.slane %v3904_v15, 4 }
 0x9c3   : > { %v3906_v37 = vpop.f32.mrf.mxu1 }
 0x9c5   : > { %v3866_v62 = vpop.f32.mrf.mxu3 }
 0x9c6   : > { %v3923_v8 = vpop.f32.mrf.mxu2  ;;  %v4005_v18 = vrot.slane %v3866_v62, 4  ;;  %v4004_v28 = vsel %vm1196_vm1, %v4003_v34, %v3866_v62 }
 0x9c7   : > { %v3885_v57 = vpop.f32.mrf.mxu0  ;;  %v4015_v40 = vrot.slane %v3923_v8, 4  ;;  %v4010_v13 = vperm.slane %v4004_v28, %v6459_v27 }
 0x9c8   : > { %v4017_v42 = vrot.slane %v3885_v57, 4  ;;  %v4006_v51 = vsel %vm1196_vm1, %v3904_v15, %v4005_v18 }
 0x9c9   : > { %v4016_v19 = vsel %vm1196_vm1, %v4015_v40, %v3885_v57  ;;  %v4014_v29 = vperm.slane %v4006_v51, %v6459_v27  ;;  %v4053_v50 = vrot.slane %v4010_v13, 4 }
 0x9ca   : > { %v4018_v7 = vsel %vm1196_vm1, %v3923_v8, %v4017_v42  ;;  %v4022_v33 = vperm.slane %v4016_v19, %v6459_v27 }
 0x9cb   : > { %v3980_v14 = vpop.f32.mrf.mxu1  ;;  %v4026_v5 = vperm.slane %v4018_v7, %v6459_v27  ;;  %v4065_v17 = vrot.slane %v4014_v29, 4 }
 0x9cc   : > { %v4051_v43 = vrot.slane %v4022_v33, 4  ;;  %v4027_v49 = vrot.slane %v3980_v14, 4  ;;  %v4054_v41 = vsel %vm1196_vm1, %v4022_v33, %v4053_v50 }
 0x9cd   : > { %v3868_v48 = vpop.f32.mrf.mxu3  ;;  %v4063_v53 = vrot.slane %v4026_v5, 4  ;;  %v4066_v54 = vsel %vm1196_vm1, %v4026_v5, %v4065_v17  ;;  %v4062_v32 = vperm.slane %v4054_v41, %v6473_v52 }
 0x9ce   : > { %v3925_v22 = vpop.f32.mrf.mxu2  ;;  %v4052_v24 = vsel %vm1196_vm1, %v4051_v43, %v4010_v13  ;;  %v4074_v59 = vperm.slane %v4066_v54, %v6473_v52 }
 0x9cf   : > { %v3887_v58 = vpop.f32.mrf.mxu0  ;;  %v4064_v63 = vsel %vm1196_vm1, %v4063_v53, %v4014_v29  ;;  %v4058_v1 = vperm.slane %v4052_v24, %v6473_v52  ;;  %v4105_v2 = vrot.slane %v4062_v32, 4 }
 0x9d0   : > { %v4070_v47 = vperm.slane %v4064_v63, %v6473_v52  ;;  %v4113_v34 = vrot.slane %v4074_v59, 4 }
 0x9d1   : > { %v4101_v25 = vrot.slane %v4058_v1, 4 }
 0x9d2   : > { %v4109_v40 = vrot.slane %v4070_v47, 4 }
 0x9d3   : > { %v3982_v26 = vpop.f32.mrf.mxu1 }
 0x9d6   : > { %v3999_v23 = vpop.f32.mrf.mxu2 }
 0x9d7   : > { %v3942_v30 = vpop.f32.mrf.mxu3  ;;  %v4039_v60 = vrot.slane %v3999_v23, 4 }
 0x9d8   : > { %v4028_v3 = vsel %vm1196_vm1, %v4027_v49, %v3942_v30  ;;  %v4029_v46 = vrot.slane %v3942_v30, 4 }
 0x9d9   : > { %v4034_v55 = vperm.slane %v4028_v3, %v6459_v27  ;;  %v3961_v4 = vpop.f32.mrf.mxu0 }
 0x9da   : > { %v4030_v20 = vsel %vm1196_vm1, %v3980_v14, %v4029_v46  ;;  %v4040_v10 = vsel %vm1196_vm1, %v4039_v60, %v3961_v4  ;;  %v4041_v9 = vrot.slane %v3961_v4, 4 }
 0x9db   : > { %v4038_v12 = vperm.slane %v4030_v20, %v6459_v27  ;;  %v4077_v35 = vrot.slane %v4034_v55, 4  ;;  %v4046_v21 = vperm.slane %v4040_v10, %v6459_v27 }
 0x9dc   : > { %v4042_v44 = vsel %vm1196_vm1, %v3999_v23, %v4041_v9 }
 0x9dd   : > { %v4089_v36 = vrot.slane %v4038_v12, 4  ;;  %v4050_v61 = vperm.slane %v4042_v44, %v6459_v27  ;;  %v4075_v38 = vrot.slane %v4046_v21, 4  ;;  %v4078_v16 = vsel %vm1196_vm1, %v4046_v21, %v4077_v35 }
 0x9de   : > { %v4086_v45 = vperm.slane %v4078_v16, %v6473_v52  ;;  %v4001_v6 = vpop.f32.mrf.mxu2 }
 0x9df   : > { %v4076_v39 = vsel %vm1196_vm1, %v4075_v38, %v4034_v55  ;;  %v4087_v31 = vrot.slane %v4050_v61, 4  ;;  %v4090_v11 = vsel %vm1196_vm1, %v4050_v61, %v4089_v36  ;;  %v3944_v15 = vpop.f32.mrf.mxu3 }
 0x9e0   : > { %v4082_v37 = vperm.slane %v4076_v39, %v6473_v52  ;;  %v4098_v62 = vperm.slane %v4090_v11, %v6473_v52  ;;  %v4103_v8 = vrot.slane %v4086_v45, 4  ;;  %v4106_v57 = vsel %vm1196_vm1, %v4086_v45, %v4105_v2 }
 0x9e1   : > { %v4088_v18 = vsel %vm1196_vm1, %v4087_v31, %v4038_v12  ;;  %v4127_v42 = vrot.slane %v4106_v57, 4  ;;  %v3963_v14 = vpop.f32.mrf.mxu0 }
 0x9e2   : > { %v4094_v28 = vperm.slane %v4088_v18, %v6473_v52  ;;  %v4099_v19 = vrot.slane %v4082_v37, 4  ;;  %v4102_v48 = vsel %vm1196_vm1, %v4082_v37, %v4101_v25  ;;  %v4104_v51 = vsel %vm1196_vm1, %v4103_v8, %v4062_v32 }
 0x9e3   : > { %v4111_v7 = vrot.slane %v4098_v62, 4  ;;  %v4114_v22 = vsel %vm1196_vm1, %v4098_v62, %v4113_v34  ;;  %v4115_v13 = vrot.slane %v4104_v51, 4  ;;  %v4129_v58 = vrot.slane %v4102_v48, 4 }
 0x9e4   : > { %v4100_v33 = vsel %vm1196_vm1, %v4099_v19, %v4058_v1  ;;  %v4107_v29 = vrot.slane %v4094_v28, 4  ;;  %v4151_v5 = vrot.slane %v4114_v22, 4  ;;  %v4110_v50 = vsel %vm1196_vm1, %v4094_v28, %v4109_v40 }
 0x9e5   : > { %v4112_v26 = vsel %vm1196_vm1, %v4111_v7, %v4074_v59  ;;  %v4116_v43 = vsel %vm1196_vm1, %v4115_v13, %v4100_v33  ;;  %v4128_v17 = vsel %vm1196_vm1, %v4127_v42, %v4102_v48  ;;  %v4153_v53 = vrot.slane %v4110_v50, 4 }
 0x9e6   : > { %v4108_v49 = vsel %vm1196_vm1, %v4107_v29, %v4070_v47  ;;  %v4122_v23 = vperm.slane %v4116_v43, %v6459_v27  ;;  %v4134_v41 = vperm.slane %v4128_v17, %v6459_v27  ;;  %v4139_v30 = vrot.slane %v4112_v26, 4  ;;  %v5034_v43 = vld [vmem:[#allocation19 + $0x18] sm:$0xff]  ;;  %v5033_v17 = vld [vmem:[#allocation19 + $0x10] sm:$0xff] }
 0x9e7   : > { %v4141_v60 = vrot.slane %v4108_v49, 4  ;;  %v4152_v24 = vsel %vm1196_vm1, %v4151_v5, %v4110_v50  ;;  %v4117_v3 = vrot.slane %v4100_v33, 4  ;;  %v4130_v46 = vsel %vm1196_vm1, %v4106_v57, %v4129_v58  ;;  %4306 = vmatpush.bf16.msrb.mxu3 %v5034_v43 }
 0x9e8   : > { %v4140_v63 = vsel %vm1196_vm1, %v4139_v30, %v4108_v49  ;;  %v4158_v54 = vperm.slane %v4152_v24, %v6459_v27  ;;  %v4163_v55 = vrot.slane %v4134_v41, 4  ;;  %v4165_v4 = vrot.slane %v4122_v23, 4 }
 0x9e9   : > { %v4146_v32 = vperm.slane %v4140_v63, %v6459_v27  ;;  %v4118_v20 = vsel %vm1196_vm1, %v4104_v51, %v4117_v3  ;;  %v4138_v10 = vperm.slane %v4130_v46, %v6459_v27  ;;  %v4142_v9 = vsel %vm1196_vm1, %v4112_v26, %v4141_v60 }
 0x9ea   : > { %v4164_v1 = vsel %vm1196_vm1, %v4163_v55, %v4122_v23  ;;  %v4187_v12 = vrot.slane %v4158_v54, 4  ;;  %v4166_v35 = vsel %vm1196_vm1, %v4134_v41, %v4165_v4  ;;  %v4126_v21 = vperm.slane %v4118_v20, %v6459_v27 }
 0x9eb   : > { %v4170_v47 = vperm.slane %v4164_v1, %v6473_v52  ;;  %v4174_v59 = vperm.slane %v4166_v35, %v6473_v52  ;;  %v4189_v44 = vrot.slane %v4146_v32, 4  ;;  %v4150_v61 = vperm.slane %v4142_v9, %v6459_v27  ;;  %4307 = vmatpush.bf16.msrb.mxu3 %v5033_v17  ;;  %v5345_v9 = vld [vmem:[#allocation21] ss:$0 sm:$0xff]  ;;  %v5349_v17 = vld [vmem:[#allocation28] ss:$0 sm:$0xff] }
 0x9ec   : > { %v4188_v36 = vsel %vm1196_vm1, %v4187_v12, %v4146_v32  ;;  %v4154_v38 = vsel %vm1196_vm1, %v4114_v22, %v4153_v53  ;;  %v4175_v16 = vrot.slane %v4138_v10, 4  ;;  %v4177_v8 = vrot.slane %v4126_v21, 4  ;;  %v5031_v53 = vld [vmem:[#allocation19] sm:$0xff] }
 0x9ed   : > { %v4194_v2 = vperm.slane %v4188_v36, %v6473_v52  ;;  %v4213_v45 = vrot.slane %v4170_v47, 4  ;;  %v4190_v6 = vsel %vm1196_vm1, %v4158_v54, %v4189_v44  ;;  %v4217_v25 = vrot.slane %v4174_v59, 4 }
 0x9ee   : > { %v4198_v39 = vperm.slane %v4190_v6, %v6473_v52  ;;  %v4162_v31 = vperm.slane %v4154_v38, %v6459_v27  ;;  %v4176_v11 = vsel %vm1196_vm1, %v4175_v16, %v4126_v21  ;;  %v4201_v18 = vrot.slane %v4150_v61, 4  ;;  %v5038_v16 = vld [vmem:[#allocation25 + $0x18] sm:$0xff]  ;;  %v5035_v6 = vld [vmem:[#allocation25] sm:$0xff] }
 0x9ef   : > { %v4211_v15 = vrot.slane %v4194_v2, 4  ;;  %v4214_v37 = vsel %vm1196_vm1, %v4194_v2, %v4213_v45  ;;  %v4182_v62 = vperm.slane %v4176_v11, %v6473_v52  ;;  %v4178_v7 = vsel %vm1196_vm1, %v4138_v10, %v4177_v8  ;;  %4392 = vmatpush.bf16.msrb.mxu0 %v5038_v16  ;;  %v5037_v2 = vld [vmem:[#allocation25 + $0x10] sm:$0xff]  ;;  %v5036_v45 = vld [vmem:[#allocation25 + $0x8] sm:$0xff] }
 0x9f0   : > { %4228 = vrot.lane.b32.xlu2 %v4214_v37, %s6114_s11  ;;  %v4218_v57 = vsel %vm1196_vm1, %v4198_v39, %v4217_v25  ;;  %v4215_v40 = vrot.slane %v4198_v39, 4  ;;  %v4199_v34 = vrot.slane %v4162_v31, 4  ;;  %v4202_v28 = vsel %vm1196_vm1, %v4162_v31, %v4201_v18 }
 0x9f1   : > { %4236 = vrot.lane.b32.xlu0 %v4218_v57, %s6112_s6  ;;  %v4212_v42 = vsel %vm1196_vm1, %v4211_v15, %v4170_v47  ;;  %v4210_v48 = vperm.slane %v4202_v28, %v6473_v52  ;;  %v4221_v51 = vrot.slane %v4182_v62, 4  ;;  %v4186_v33 = vperm.slane %v4178_v7, %v6473_v52  ;;  %s7673_s6 = sld [smem:[#allocation59_spill]] }
 0x9f2   : > { %v4216_v27 = vsel %vm1196_vm1, %v4215_v40, %v4174_v59  ;;  %v4200_v14 = vsel %vm1196_vm1, %v4199_v34, %v4150_v61 }
 0x9f3   : > { %4232 = vrot.lane.b32.xlu1 %v4216_v27, %s6113_s28  ;;  %v4206_v19 = vperm.slane %v4200_v14, %v6473_v52  ;;  %v4223_v13 = vrot.slane %v4210_v48, 4  ;;  %v4225_v50 = vrot.slane %v4186_v33, 4  ;;  %v5032_v52 = vld [vmem:[#allocation19 + $0x8] sm:$0xff]  ;;  %4393 = vmatpush.bf16.msrb.mxu0 %v5037_v2  ;;  %v5346_v14 = vld [vmem:[#allocation22] ss:$0 sm:$0xff] }
 0x9f4   : > { %4308 = vmatpush.bf16.msrb.mxu3 %v5032_v52 }
 0x9f5   : > { %v4219_v22 = vrot.slane %v4206_v19, 4  ;;  %v4222_v29 = vsel %vm1196_vm1, %v4206_v19, %v4221_v51  ;;  %v4224_v5 = vsel %vm1196_vm1, %v4223_v13, %v4186_v33  ;;  %v4226_v26 = vsel %vm1196_vm1, %v4210_v48, %v4225_v50  ;;  %v5347_v19 = vld [vmem:[#allocation24] ss:$0 sm:$0xff]  ;;  %v5348_v33 = vld [vmem:[#allocation27] ss:$0 sm:$0xff] }
 0x9f7   : > { %v4220_v58 = vsel %vm1196_vm1, %v4219_v22, %v4182_v62  ;;  %4394 = vmatpush.bf16.msrb.mxu0 %v5036_v45  ;;  %s1079_s28 = scalar_lea.vmem %s7673_s6, %s6435_s26 }
 0x9f8   : > { %4240 = vrot.lane.b32.xlu2 %v4220_v58, %s6111_s25  ;;  %4309 = vmatpush.bf16.msrb.mxu3 %v5031_v53  ;;  %s7672_s25 = sld [smem:[#allocation58_spill]] }
 0x9f9   : > { %4244 = vrot.lane.b32.xlu0 %v4222_v29, %s7669_s27 }
 0x9fb   : > { %4248 = vrot.lane.b32.xlu1 %v4224_v5, %s7670_s1  ;;  %4395 = vmatpush.bf16.msrb.mxu0 %v5035_v6 }
 0x9fe   : > { %v5045_v31 = vld [vmem:[%s7672_s25 + $0x30] sm:$0xff]  ;;  %v5044_v15 = vld [vmem:[%s7672_s25 + $0x28] sm:$0xff]  ;;  %v5043_v37 = vld [vmem:[%s7672_s25 + $0x20] sm:$0xff] }
 0x9ff   : > { %v5042_v57 = vld [vmem:[%s7672_s25 + $0x18] sm:$0xff]  ;;  %v5041_v18 = vld [vmem:[%s7672_s25 + $0x10] sm:$0xff]  ;;  %v5040_v13 = vld [vmem:[%s7672_s25 + $0x8] sm:$0xff] }
 0xa00   : > { %4252 = vrot.lane.b32.xlu2 %v4226_v26, %s7671_s8  ;;  %v5039_v58 = vld [vmem:[%s7672_s25] sm:$0xff] }
 0xa4a   : > { %v4229_v49 = vpop.permute.xlu2 %4228 }
 0xa4b   : > { %v4255_v30 = vsel %vm1938_vm2, %v4212_v42, %v4229_v49 }
 0xa52   : > { %v4241_v41 = vpop.permute.xlu2 %4240 }
 0xa5a   : > { %v4253_v4 = vpop.permute.xlu2 %4252 }
 0xa63   : > { %v4237_v23 = vpop.permute.xlu0 %4236 }
 0xa65   : > { %v4233_v60 = vpop.permute.xlu1 %4232 }
 0xa66   : > { %v4256_v24 = vsel %vm2609_vm4, %v4255_v30, %v4233_v60 }
 0xa67   : > { %v4257_v3 = vsel %vm2611_vm5, %v4256_v24, %v4237_v23 }
 0xa68   : > { %v4258_v63 = vsel %vm2613_vm6, %v4257_v3, %v4241_v41 }
 0xa6b   : > { %v4245_v46 = vpop.permute.xlu0 %4244 }
 0xa6c   : > { %v4259_v54 = vsel %vm2615_vm7, %v4258_v63, %v4245_v46 }
 0xa6d   : > { %v4249_v55 = vpop.permute.xlu1 %4248 }
 0xa6e   : > { %v4260_v32 = vsel %vm2617_vm8, %v4259_v54, %v4249_v55 }
 0xa6f   : > { %v4261_v20 = vsel %vm2619_vm9, %v4260_v32, %v4253_v4 }
 0xa70   : > { %v4262_v10 = vpack.c.bf16 %v4261_v20, %v4261_v20 }
 0xa72   : > { %4959 = vmatmul.msk.bf16.vlgmr.msrb.gmra.mxu3 %vm1143_vm0, %v4262_v10 }
 0xaf5   : > { %v4311_v1 = vpop.f32.mrf.mxu3 }
 0xaf6   : > { %v4312_v12 = vadd.f32 %v5345_v9, %v4311_v1 }
 0xaf8   : > { %v4315_v35 = vadd.f32 %v4312_v12, %v6974_v56  ;;  %v5046_v56 = vld [vmem:[%s7672_s25 + $0x38] sm:$0xff] }
 0xaf9   : > { %4471 = vmatpush.bf16.msra.mxu1 %v5046_v56  ;;  %v5350_v12 = vld [vmem:[#allocation30] ss:$0 sm:$0xff] }
 0xafa   : > { %v4318_v21 = vsel %vm1143_vm0, %v4315_v35, 0.0 }
 0xafb   : > { %4319 = vadd.xlane.f32.xlu0 %v4318_v21  ;;  %v5351_v21 = vld [vmem:[#allocation31] ss:$0 sm:$0xff] }
 0xafd   : > { %v4313_v47 = vpop.f32.mrf.mxu3  ;;  %4472 = vmatpush.bf16.msra.mxu1 %v5045_v31 }
 0xb01   : > { %4473 = vmatpush.bf16.msra.mxu1 %v5044_v15 }
 0xb05   : > { %4474 = vmatpush.bf16.msra.mxu1 %v5043_v37 }
 0xb09   : > { %4475 = vmatpush.bf16.msra.mxu1 %v5042_v57 }
 0xb0d   : > { %4476 = vmatpush.bf16.msra.mxu1 %v5041_v18 }
 0xb11   : > { %4477 = vmatpush.bf16.msra.mxu1 %v5040_v13 }
 0xb15   : > { %4478 = vmatpush.bf16.msra.mxu1 %v5039_v58 }
 0xb6e   : > { %v4320_v59 = vpop.xlane.xlu0 %4319 }
 0xb6f   : > { %v4321_v44 = vmul.f32 %v4320_v59, %v6964_v0 }
 0xb71   : > { %v4322_v36 = vsub.f32 %v4315_v35, %v4321_v44 }
 0xb73   : > { %v4323_v61 = vmul.f32 %v4322_v36, %v4322_v36 }
 0xb75   : > { %v4324_v38 = vsel %vm1143_vm0, %v4323_v61, 0.0 }
 0xb76   : > { %4325 = vadd.xlane.f32.xlu1 %v4324_v38 }
 0xbe9   : > { %v4326_v25 = vpop.xlane.xlu1 %4325 }
 0xbea   : > { %v4327_v39 = vmul.f32 %v4326_v25, %v6964_v0 }
 0xbec   : > { %v4328_v11 = vadd.f32 1e-05, %v4327_v39 }
 0xbee   : > { %5420 = vrsqrt.f32 %v4328_v11  ;;  %vm4335_vm15 = vweird.f32 %v4328_v11 }
 0xbf4   : > { %v5421_v62 = vpop.eup %5420 }
 0xbf5   : > { %v4330_v8 = vmul.f32 %v5421_v62, %v4328_v11  ;;  %vm4336_vm14 = vweird.f32 %v5421_v62 }
 0xbf6   : > { %vm4337_vm1 = vmor %vm4335_vm15, %vm4336_vm14 }
 0xbf7   : > { %v4331_v40 = vmul.f32 %v5421_v62, %v4330_v8 }
 0xbf9   : > { %v4332_v34 = vmul.f32 0.5, %v4331_v40 }
 0xbfb   : > { %v4333_v42 = vsub.f32 1.5, %v4332_v34 }
 0xbfd   : > { %v4334_v27 = vmul.f32 %v5421_v62, %v4333_v42 }
 0xbff   : > { %v4338_v28 = vsel %vm4337_vm1, %v5421_v62, %v4334_v27 }
 0xc00   : > { %v4339_v48 = vmul.f32 %v4338_v28, %v4322_v36 }
 0xc02   : > { %v4343_v51 = vmul.f32 %v5346_v14, %v4339_v48 }
 0xc04   : > { %v4347_v7 = vadd.f32 %v5347_v19, %v4343_v51 }
 0xc06   : > { %v4348_v22 = vpack.c.bf16 %v4347_v7, %v4347_v7 }
 0xc08   : > { %4976 = vmatmul.msk.bf16.vlgmr.msrb.gmra.mxu0 %vm1143_vm0, %v4348_v22 }
 0xc85   : > { %v4397_v29 = vpop.f32.mrf.mxu0 }
 0xc86   : > { %v4398_v5 = vadd.f32 %v5348_v33, %v4397_v29 }
 0xc88   : > { %v4401_v50 = vmax.f32 %v4398_v5, 0.0 }
 0xc8a   : > { %v4402_v26 = vpack.c.bf16 %v4401_v50, %v4401_v50 }
 0xc8c   : > { %4479 = vmatmul.bf16.vlgmr.msra.gmra.mxu1 %v4402_v26 }
 0xc8d   : > { %v4399_v43 = vpop.f32.mrf.mxu0 }
 0xd09   : > { %v4480_v52 = vpop.f32.mrf.mxu1 }
 0xd0a   : > { %v4481_v53 = vadd.f32 %v5349_v17, %v4480_v52 }
 0xd0c   : > { %v4484_v49 = vadd.f32 %v4481_v53, %v4347_v7 }
 0xd0e   : > { %v4487_v23 = vsel %vm1143_vm0, %v4484_v49, 0.0 }
 0xd0f   : > { %4488 = vadd.xlane.f32.xlu2 %v4487_v23 }
 0xd11   : > { %v4482_v41 = vpop.f32.mrf.mxu1 }
 0xd82   : > { %v4489_v30 = vpop.xlane.xlu2 %4488 }
 0xd83   : > { %v4490_v60 = vmul.f32 %v4489_v30, %v6964_v0 }
 0xd85   : > { %v4491_v24 = vsub.f32 %v4484_v49, %v4490_v60 }
 0xd87   : > { %v4492_v3 = vmul.f32 %v4491_v24, %v4491_v24 }
 0xd89   : > { %v4493_v46 = vsel %vm1143_vm0, %v4492_v3, 0.0 }
 0xd8a   : > { %4494 = vadd.xlane.f32.xlu0 %v4493_v46 }
 0xdfd   : > { %v4495_v63 = vpop.xlane.xlu0 %4494 }
 0xdfe   : > { %v4496_v54 = vmul.f32 %v4495_v63, %v6964_v0 }
 0xe00   : > { %v4497_v55 = vadd.f32 1e-05, %v4496_v54 }
 0xe02   : > { %5422 = vrsqrt.f32 %v4497_v55  ;;  %vm4504_vm3 = vweird.f32 %v4497_v55 }
 0xe08   : > { %v5423_v4 = vpop.eup %5422 }
 0xe09   : > { %v4499_v32 = vmul.f32 %v5423_v4, %v4497_v55  ;;  %vm4505_vm2 = vweird.f32 %v5423_v4 }
 0xe0a   : > { %vm4506_vm4 = vmor %vm4504_vm3, %vm4505_vm2 }
 0xe0b   : > { %v4500_v20 = vmul.f32 %v5423_v4, %v4499_v32 }
 0xe0d   : > { %v4501_v10 = vmul.f32 0.5, %v4500_v20 }
 0xe0f   : > { %v4502_v9 = vsub.f32 1.5, %v4501_v10 }
 0xe11   : > { %v4503_v1 = vmul.f32 %v5423_v4, %v4502_v9 }
 0xe13   : > { %v4507_v35 = vsel %vm4506_vm4, %v5423_v4, %v4503_v1 }
 0xe14   : > { %v4508_v47 = vmul.f32 %v4507_v35, %v4491_v24 }
 0xe16   : > { %v4512_v59 = vmul.f32 %v5350_v12, %v4508_v47 }
 0xe18   : > { %v4516_v0 = vadd.f32 %v5351_v21, %v4512_v59 }
 0xe1a   : > { %4517 = vst.msk [vmem:[%s1079_s28] sm:$0xff] %vm1143_vm0, %v4516_v0 }
 0xe1b PF: > { %s7674_s11 = sld [smem:[#allocation44_spill]] }
 0xe21   : > { %s46_s29 = sadd.s32 1, %s7674_s11  }
 0xe22   : > { %p43_p7 = scmp.ge.s32.totalorder %s46_s29, 4  }
 0xe24   :  { %45 = sbr.rel (!%p43_p7) target bundleno = 25 (0x19), region = 236 }
 0xe29   :  { %4537 = vsyncpa [#allocation3], 1 }
 0xe2a   :  { %4539 = vsyncpa [#allocation3 + $0x1], 1 }
 0xe2b   :  { %4540 = vsyncpa [#allocation5], 1 }
 0xe2c   :  { %4541 = vsyncpa [#allocation8], 1 }
 0xe2d   :  { %4542 = vsyncpa [#allocation11], 1 }
 0xe2e   :  { %4543 = vsyncpa [#allocation14], 1 }
 0xe2f   :  { %4544 = vsyncpa [#allocation17], 1 }
 0xe30   :  { %4545 = vsyncpa [#allocation20], 1 }
 0xe31   :  { %4546 = vsyncpa [#allocation23], 1 }
 0xe32   :  { %4547 = vsyncpa [#allocation26], 1 }
 0xe33   :  { %4548 = vsyncpa [#allocation29], 1 }
 0xe34   :  { %4549 = vsyncpa [#allocation32], 1 }

// kernel: transformer_forward.7
= control target key start
LH: loop header
LB: loop body
LE: loop exit
PB: predicated region body
PF: predicated region fallthrough
CT: control target
= control target key end

     0   :  { %s7790_s0 = inlined_call_operand.vmem [shape: f32[16,64], index: 0, kind: input, shape index: {}]   ;;  %s7791_s1 = inlined_call_operand.vmem [shape: f32[16,64], index: 1, kind: input, shape index: {}]   ;;  %s7792_s2 = inlined_call_operand.hbm [shape: f32[8,8], index: 2, kind: input, shape index: {}]   ;;  %s7793_s3 = inlined_call_operand.vmem [shape: f32[2,8], index: 3, kind: input, shape index: {}]   ;;  %s7794_s4 = inlined_call_operand.vmem [shape: f32[2,8], index: 4, kind: input, shape index: {}]   ;;  %s7795_s5 = inlined_call_operand.hbm [shape: bf16[64,192], index: 5, kind: input, shape index: {}]   ;;  %s7796_s6 = inlined_call_operand.hbm [shape: f32[1,192], index: 6, kind: input, shape index: {}]   ;;  %s7797_s7 = inlined_call_operand.hbm [shape: bf16[64,64], index: 7, kind: input, shape index: {}]   ;;  %s7798_s8 = inlined_call_operand.hbm [shape: f32[1,64], index: 8, kind: input, shape index: {}]   ;;  %s7799_s9 = inlined_call_operand.hbm [shape: f32[1,64], index: 9, kind: input, shape index: {}]   ;;  %s7800_s10 = inlined_call_operand.hbm [shape: f32[1,64], index: 10, kind: input, shape index: {}]   ;;  %s7801_s11 = inlined_call_operand.hbm [shape: bf16[64,64], index: 11, kind: input, shape index: {}]   ;;  %s7802_s12 = inlined_call_operand.hbm [shape: f32[1,64], index: 12, kind: input, shape index: {}]   ;;  %s7803_s13 = inlined_call_operand.hbm [shape: bf16[64,128], index: 13, kind: input, shape index: {}]   ;;  %s7804_s14 = inlined_call_operand.hbm [shape: f32[1,128], index: 14, kind: input, shape index: {}]   ;;  %s7805_s15 = inlined_call_operand.hbm [shape: bf16[64,64], index: 15, kind: input, shape index: {}]   ;;  %s7806_s16 = inlined_call_operand.hbm [shape: f32[1,64], index: 16, kind: input, shape index: {}]   ;;  %s7807_s17 = inlined_call_operand.hbm [shape: f32[1,64], index: 17, kind: input, shape index: {}]   ;;  %s7808_s18 = inlined_call_operand.hbm [shape: f32[1,64], index: 18, kind: input, shape index: {}]   ;;  %s7809_s19 = inlined_call_operand.hbm [shape: bf16[64,128], index: 19, kind: input, shape index: {}]   ;;  %s7810_s20 = inlined_call_operand.hbm [shape: f32[1,128], index: 20, kind: input, shape index: {}]   ;;  %s7811_s21 = inlined_call_operand.vmem [shape: bf16[128,64], index: 21, kind: input, shape index: {}]   ;;  %s7812_s22 = inlined_call_operand.hbm [shape: f32[1,64], index: 22, kind: input, shape index: {}]   ;;  %s7813_s23 = inlined_call_operand.hbm [shape: f32[1,64], index: 23, kind: input, shape index: {}]   ;;  %s7814_s24 = inlined_call_operand.hbm [shape: f32[1,64], index: 24, kind: input, shape index: {}]   ;;  %s7815_s25 = inlined_call_operand.hbm [shape: bf16[64,128], index: 25, kind: input, shape index: {}]   ;;  %s7816_s26 = inlined_call_operand.hbm [shape: f32[1,128], index: 26, kind: input, shape index: {}]   ;;  %s7817_s27 = inlined_call_operand.vmem [shape: f32[16,128], index: 27, kind: output, shape index: {}]  }
   0x1   :  { %7826 = sst [smem:[#allocation50_spill]] %s7790_s0 }
   0x2   :  { %7827 = sst [smem:[#allocation51_spill]] %s7791_s1 }
   0x3   :  { %7828 = sst [smem:[#allocation52_spill]] %s7792_s2 }
   0x4   :  { %7829 = sst [smem:[#allocation53_spill]] %s7793_s3 }
   0x5   :  { %7830 = sst [smem:[#allocation54_spill]] %s7794_s4 }
   0x6   :  { %7831 = sst [smem:[#allocation55_spill]] %s7795_s5 }
   0x7   :  { %7832 = sst [smem:[#allocation56_spill]] %s7796_s6 }
   0x8   :  { %7833 = sst [smem:[#allocation57_spill]] %s7797_s7 }
   0x9   :  { %7834 = sst [smem:[#allocation58_spill]] %s7798_s8 }
   0xa   :  { %7835 = sst [smem:[#allocation59_spill]] %s7799_s9 }
   0xb   :  { %7836 = sst [smem:[#allocation60_spill]] %s7800_s10 }
   0xc   :  { %7837 = sst [smem:[#allocation61_spill]] %s7801_s11 }
   0xd   :  { %7838 = sst [smem:[#allocation62_spill]] %s7811_s21 }
   0xe   :  { %7839 = sst [smem:[#allocation63_spill]] %s7817_s27 }
   0xf   :  { %32 = vsyncpa [#allocation3], 0 }
  0x10   :  { %33 = vsyncpa [#allocation5], 0 }
  0x11   :  { %34 = vsyncpa [#allocation8], 0 }
  0x12   :  { %35 = vsyncpa [#allocation11], 0 }
  0x13   :  { %36 = vsyncpa [#allocation14], 0 }
  0x14   :  { %37 = vsyncpa [#allocation17], 0 }
  0x15   :  { %38 = vsyncpa [#allocation20], 0 }
  0x16   :  { %39 = vsyncpa [#allocation23], 0 }
  0x17   :  { %40 = vsyncpa [#allocation26], 0 }
  0x18   :  { %41 = vsyncpa [#allocation29], 0 }
  0x19   :  { %42 = vsyncpa [#allocation32], 0 }
  0x1a   :  { %43 = vsyncpa [#allocation35], 0  ;;  %s6417_s7 = smov 0  }
  0x1b LB: > { %7840 = sst [smem:[#allocation48_spill]] %s6231_s7  ;;  %s6423_s4 = sadd.s32 4294967295, %s6231_s7   ;;  %s6231_s7 = sphi %s6417_s7, %s49_s7  }
  0x1c   : > { %p4937_p0 = scmp.ge.s32.totalorder %s6231_s7, 1  ;;  %p657_p1 = scmp.lt.s32.totalorder %s6231_s7, 3 }
  0x1e   : > { %p6427_p2 = pnand %p4937_p0, %p657_p1 }
  0x1f   : > { %p5317_p3 = scmp.eq.s32.totalorder (!%p6427_p2), %s6423_s4, 0  ;;  %s7843_s5 = sld [smem:[#allocation55_spill]] (!%p6427_p2) }
  0x20   : > { %s7841_s8 = scalar_select %p6427_p2, 1, 0 }
  0x21   : > { %661 = sbr.rel (%p6427_p2) target bundleno = 96 (0x60), region = 12  ;;  %s6233_s0 = smov (!%p6427_p2), [#allocation4]  }
  0x22   : > { %7842 = sst [smem:[#allocation49_spill]] %s7841_s8  ;;  %s688_s10 = sshll.u32 (!%p6427_p2), %s6233_s0, 4  ;;  %s689_s10 = int_to_ptr.vmem [resolvable:$true] %s688_s10 }
  0x23   : > { %s6234_s29 = smov (!%p6427_p2), 128   ;;  %s6235_s1 = smov (!%p6427_p2), 8  }
  0x24   : > { %s7844_s2 = sld [smem:[#allocation57_spill]] (!%p6427_p2)  ;;  %s6236_s7 = smov (!%p6427_p2), [#allocation7]  }
  0x25   : > { %s686_s28 = sshll.u32 (!%p6427_p2), %s7843_s5, 4  ;;  %s714_s27 = sshll.u32 (!%p6427_p2), %s6236_s7, 4  ;;  %s687_s28 = int_to_ptr.hbm [resolvable:$true] %s686_s28  ;;  %s715_s27 = int_to_ptr.vmem [resolvable:$true] %s714_s27 }
  0x26   : > { %5232 = dma.hbm_to_vmem [thread:$0]  (%p5317_p3), %s687_s28, 1024, %s689_s10, [#allocation5], %s6234_s29, %s6234_s29, %s6235_s1  }
  0x27   : > { %s7845_s5 = sld [smem:[#allocation59_spill]]  ;;  %s7821_s0 = smov 64  }
  0x28   : > { %s6238_s8 = smov 4   ;;  %s6239_s28 = smov [#allocation10]  }
  0x29   : > { %s741_s10 = sshll.u32 %s6239_s28, 4  ;;  %s7846_s6 = sld [smem:[#allocation61_spill]]  ;;  %s742_s10 = int_to_ptr.vmem [resolvable:$true] %s741_s10 }
  0x2a   : > { %s712_s3 = sshll.u32 %s7844_s2, 4  ;;  %s788_s30 = sshll.u32 %s7803_s13, 4  ;;  %s713_s3 = int_to_ptr.hbm [resolvable:$true] %s712_s3  ;;  %s789_s30 = int_to_ptr.hbm [resolvable:$true] %s788_s30 }
  0x2b   : > { %5236 = dma.hbm_to_vmem [thread:$0]  (%p5317_p3), %s713_s3, 512, %s715_s27, [#allocation8], %s7821_s0, %s7821_s0, %s6238_s8  }
  0x2c   : > { %s6240_s9 = smov [#allocation13]   ;;  %s6241_s27 = smov [#allocation16]  }
  0x2d   : > { %s739_s21 = sshll.u32 %s7845_s5, 4  ;;  %s764_s5 = sshll.u32 %s6240_s9, 4  ;;  %s740_s21 = int_to_ptr.hbm [resolvable:$true] %s739_s21  ;;  %s765_s5 = int_to_ptr.vmem [resolvable:$true] %s764_s5 }
  0x2e   : > { %5240 = dma.hbm_to_vmem [thread:$0]  (%p5317_p3), %s740_s21, 16, %s742_s10, [#allocation11]  }
  0x2f   : > { %s762_s7 = sshll.u32 %s7846_s6, 4  ;;  %s790_s3 = sshll.u32 %s6241_s27, 4  ;;  %s763_s7 = int_to_ptr.hbm [resolvable:$true] %s762_s7  ;;  %s791_s3 = int_to_ptr.vmem [resolvable:$true] %s790_s3 }
  0x30   : > { %5244 = dma.hbm_to_vmem [thread:$0]  (%p5317_p3), %s763_s7, 512, %s765_s5, [#allocation14], %s7821_s0, %s7821_s0, %s6238_s8  }
  0x31   : > { %s814_s21 = sshll.u32 %s7805_s15, 4  ;;  %s841_s6 = sshll.u32 %s7807_s17, 4  ;;  %s815_s21 = int_to_ptr.hbm [resolvable:$true] %s814_s21  ;;  %s842_s6 = int_to_ptr.hbm [resolvable:$true] %s841_s6 }
  0x32   : > { %5248 = dma.hbm_to_vmem [thread:$0]  (%p5317_p3), %s789_s30, 512, %s791_s3, [#allocation17], %s7821_s0, %s7821_s0, %s6238_s8  }
  0x33   : > { %s6242_s11 = smov [#allocation19]   ;;  %s6243_s2 = smov [#allocation22]  }
  0x34   : > { %s816_s7 = sshll.u32 %s6242_s11, 4  ;;  %s843_s9 = sshll.u32 %s6243_s2, 4  ;;  %s817_s7 = int_to_ptr.vmem [resolvable:$true] %s816_s7  ;;  %s844_s9 = int_to_ptr.vmem [resolvable:$true] %s843_s9 }
  0x35   : > { %5252 = dma.hbm_to_vmem [thread:$0]  (%p5317_p3), %s815_s21, 512, %s817_s7, [#allocation20], %s7821_s0, %s7821_s0, %s6238_s8  }
  0x36   : > { %s864_s30 = sshll.u32 %s7809_s19, 4  ;;  %s894_s29 = sshll.u32 %s7812_s22, 4  ;;  %s865_s30 = int_to_ptr.hbm [resolvable:$true] %s864_s30  ;;  %s895_s29 = int_to_ptr.hbm [resolvable:$true] %s894_s29 }
  0x37   : > { %5256 = dma.hbm_to_vmem [thread:$0]  (%p5317_p3), %s842_s6, 16, %s844_s9, [#allocation23]  }
  0x38   : > { %s6244_s10 = smov [#allocation25]   ;;  %s6245_s21 = smov [#allocation28]  }
  0x39   : > { %s866_s1 = sshll.u32 %s6244_s10, 4  ;;  %s896_s11 = sshll.u32 %s6245_s21, 4  ;;  %s867_s1 = int_to_ptr.vmem [resolvable:$true] %s866_s1  ;;  %s897_s11 = int_to_ptr.vmem [resolvable:$true] %s896_s11 }
  0x3a   : > { %5260 = dma.hbm_to_vmem [thread:$0]  (%p5317_p3), %s865_s30, 512, %s867_s1, [#allocation26], %s7821_s0, %s7821_s0, %s6238_s8  }
  0x3b   : > { %s918_s6 = sshll.u32 %s7814_s24, 4  ;;  %s6246_s9 = smov [#allocation31]   ;;  %s919_s6 = int_to_ptr.hbm [resolvable:$true] %s918_s6 }
  0x3c   : > { %5264 = dma.hbm_to_vmem [thread:$0]  (%p5317_p3), %s895_s29, 16, %s897_s11, [#allocation29]  }
  0x3d   : > { %s920_s5 = sshll.u32 %s6246_s9, 4  ;;  %s7847_s28 = sld [smem:[#allocation52_spill]]  ;;  %s921_s5 = int_to_ptr.vmem [resolvable:$true] %s920_s5 }
  0x3e   : > { %5268 = dma.hbm_to_vmem [thread:$0]  (%p5317_p3), %s919_s6, 16, %s921_s5, [#allocation32]  }
  0x3f   : > { %s7848_s21 = sld [smem:[#allocation56_spill]]  ;;  %s6247_s2 = smov [#allocation2]  }
  0x40   : > { %s671_s0 = sshll.u32 %s6247_s2, 4  ;;  %s6248_s29 = smov [#allocation6]   ;;  %s672_s0 = int_to_ptr.vmem [resolvable:$true] %s671_s0 }
  0x41   : > { %s703_s11 = sshll.u32 %s6248_s29, 4  ;;  %s7849_s3 = sld [smem:[#allocation58_spill]]  ;;  %s704_s11 = int_to_ptr.vmem [resolvable:$true] %s703_s11 }
  0x42   : > { %s7850_s30 = sld [smem:[#allocation60_spill]]  ;;  %s777_s27 = sshll.u32 %s7802_s12, 4  ;;  %s778_s27 = int_to_ptr.hbm [resolvable:$true] %s777_s27 }
  0x43   : > { %s669_s10 = sshll.u32 %s7847_s28, 4  ;;  %s6251_s6 = smov [#allocation15]   ;;  %s670_s10 = int_to_ptr.hbm [resolvable:$true] %s669_s10 }
  0x44   : > { %5230 = dma.hbm_to_vmem [thread:$0]  (%p5317_p3), %s670_s10, 128, %s672_s0, [#allocation3]  }
  0x45   : > { %s701_s7 = sshll.u32 %s7848_s21, 4  ;;  %s6249_s21 = smov [#allocation9]   ;;  %s702_s7 = int_to_ptr.hbm [resolvable:$true] %s701_s7 }
  0x46   : > { %5234 = dma.hbm_to_vmem [thread:$0]  (%p5317_p3), %s702_s7, 32, %s704_s11, [#allocation5]  }
  0x47   : > { %s727_s28 = sshll.u32 %s7849_s3, 4  ;;  %s729_s2 = sshll.u32 %s6249_s21, 4  ;;  %s728_s28 = int_to_ptr.hbm [resolvable:$true] %s727_s28  ;;  %s730_s2 = int_to_ptr.vmem [resolvable:$true] %s729_s2 }
  0x48   : > { %s751_s1 = sshll.u32 %s7850_s30, 4  ;;  %s6250_s0 = smov [#allocation12]   ;;  %s752_s1 = int_to_ptr.hbm [resolvable:$true] %s751_s1 }
  0x49   : > { %5238 = dma.hbm_to_vmem [thread:$0]  (%p5317_p3), %s728_s28, 16, %s730_s2, [#allocation8]  }
  0x4a   : > { %s753_s10 = sshll.u32 %s6250_s0, 4  ;;  %s803_s3 = sshll.u32 %s7804_s14, 4  ;;  %s754_s10 = int_to_ptr.vmem [resolvable:$true] %s753_s10  ;;  %s804_s3 = int_to_ptr.hbm [resolvable:$true] %s803_s3 }
  0x4b   : > { %5242 = dma.hbm_to_vmem [thread:$0]  (%p5317_p3), %s752_s1, 16, %s754_s10, [#allocation11]  }
  0x4c   : > { %s779_s5 = sshll.u32 %s6251_s6, 4  ;;  %s6252_s28 = smov [#allocation18]   ;;  %s780_s5 = int_to_ptr.vmem [resolvable:$true] %s779_s5 }
  0x4d   : > { %5246 = dma.hbm_to_vmem [thread:$0]  (%p5317_p3), %s778_s27, 16, %s780_s5, [#allocation14]  }
  0x4e   : > { %s805_s30 = sshll.u32 %s6252_s28, 4  ;;  %s829_s0 = sshll.u32 %s7806_s16, 4  ;;  %s806_s30 = int_to_ptr.vmem [resolvable:$true] %s805_s30  ;;  %s830_s0 = int_to_ptr.hbm [resolvable:$true] %s829_s0 }
  0x4f   : > { %5250 = dma.hbm_to_vmem [thread:$0]  (%p5317_p3), %s804_s3, 16, %s806_s30, [#allocation17]  }
  0x50   : > { %s853_s29 = sshll.u32 %s7808_s18, 4  ;;  %s6253_s9 = smov [#allocation21]   ;;  %s854_s29 = int_to_ptr.hbm [resolvable:$true] %s853_s29 }
  0x51   : > { %s831_s7 = sshll.u32 %s6253_s9, 4  ;;  %s6254_s27 = smov [#allocation24]   ;;  %s832_s7 = int_to_ptr.vmem [resolvable:$true] %s831_s7 }
  0x52   : > { %5254 = dma.hbm_to_vmem [thread:$0]  (%p5317_p3), %s830_s0, 16, %s832_s7, [#allocation20]  }
  0x53   : > { %s855_s11 = sshll.u32 %s6254_s27, 4  ;;  %s879_s28 = sshll.u32 %s7810_s20, 4  ;;  %s856_s11 = int_to_ptr.vmem [resolvable:$true] %s855_s11  ;;  %s880_s28 = int_to_ptr.hbm [resolvable:$true] %s879_s28 }
  0x54   : > { %5258 = dma.hbm_to_vmem [thread:$0]  (%p5317_p3), %s854_s29, 16, %s856_s11, [#allocation23]  }
  0x55   : > { %s906_s21 = sshll.u32 %s7813_s23, 4  ;;  %s6255_s2 = smov [#allocation27]   ;;  %s907_s21 = int_to_ptr.hbm [resolvable:$true] %s906_s21 }
  0x56   : > { %s881_s1 = sshll.u32 %s6255_s2, 4  ;;  %s6256_s0 = smov [#allocation30]   ;;  %s882_s1 = int_to_ptr.vmem [resolvable:$true] %s881_s1 }
  0x57   : > { %5262 = dma.hbm_to_vmem [thread:$0]  (%p5317_p3), %s880_s28, 16, %s882_s1, [#allocation26]  }
  0x58   : > { %s908_s10 = sshll.u32 %s6256_s0, 4  ;;  %s929_s27 = sshll.u32 %s7815_s25, 4  ;;  %s909_s10 = int_to_ptr.vmem [resolvable:$true] %s908_s10  ;;  %s930_s27 = int_to_ptr.hbm [resolvable:$true] %s929_s27 }
  0x59   : > { %5266 = dma.hbm_to_vmem [thread:$0]  (%p5317_p3), %s907_s21, 16, %s909_s10, [#allocation29]  }
  0x5a   : > { %s944_s6 = sshll.u32 %s7816_s26, 4  ;;  %s6257_s5 = smov [#allocation33]   ;;  %s945_s6 = int_to_ptr.hbm [resolvable:$true] %s944_s6 }
  0x5b   : > { %s931_s3 = sshll.u32 %s6257_s5, 4  ;;  %s7851_s28 = smov 64   ;;  %s932_s3 = int_to_ptr.vmem [resolvable:$true] %s931_s3 }
  0x5c   : > { %5270 = dma.hbm_to_vmem [thread:$0]  (%p5317_p3), %s930_s27, 512, %s932_s3, [#allocation32], %s7851_s28, %s7851_s28, %s6238_s8  }
  0x5d   : > { %s6258_s30 = smov [#allocation34]  }
  0x5e   : > { %s946_s2 = sshll.u32 %s6258_s30, 4  ;;  %s947_s2 = int_to_ptr.vmem [resolvable:$true] %s946_s2 }
  0x5f   : > { %5272 = dma.hbm_to_vmem [thread:$0]  (%p5317_p3), %s945_s6, 16, %s947_s2, [#allocation35]  }
  0x60 PF: > { %973 = sbr.rel (%p6427_p2) target bundleno = 3758 (0xeae), region = 128  ;;  %p5339_p4 = scmp.eq.s32.totalorder (!%p6427_p2), %s6423_s4, 0 }
  0x65   : > { %6182 = dma.done.wait (%p5339_p4), [#allocation3], 128  }
  0x66   : > { %6184 = vsyncadd (%p5339_p4), [#allocation3], 4294967168 }
  0x67   : > { %6186 = dma.done.wait (%p5339_p4), [#allocation5], 1056  }
  0x68   : > { %6188 = vsyncadd (%p5339_p4), [#allocation5], 4294966240 }
  0x69   : > { %6190 = dma.done.wait (%p5339_p4), [#allocation8], 528  }
  0x6a   : > { %6192 = vsyncadd (%p5339_p4), [#allocation8], 4294966768 }
  0x6b   : > { %6194 = dma.done.wait (%p5339_p4), [#allocation11], 32  }
  0x6c   : > { %6196 = vsyncadd (%p5339_p4), [#allocation11], 4294967264 }
  0x6d   : > { %6198 = dma.done.wait (%p5339_p4), [#allocation14], 528  }
  0x6e   : > { %6200 = vsyncadd (%p5339_p4), [#allocation14], 4294966768 }
  0x6f   : > { %6202 = dma.done.wait (%p5339_p4), [#allocation17], 528  }
  0x70   : > { %6204 = vsyncadd (%p5339_p4), [#allocation17], 4294966768 }
  0x71   : > { %6206 = dma.done.wait (%p5339_p4), [#allocation20], 528  }
  0x72   : > { %6208 = vsyncadd (%p5339_p4), [#allocation20], 4294966768 }
  0x73   : > { %6210 = dma.done.wait (%p5339_p4), [#allocation23], 32  }
  0x74   : > { %6212 = vsyncadd (%p5339_p4), [#allocation23], 4294967264 }
  0x75   : > { %6214 = dma.done.wait (%p5339_p4), [#allocation26], 528  }
  0x76   : > { %6216 = vsyncadd (%p5339_p4), [#allocation26], 4294966768 }
  0x77   : > { %6218 = dma.done.wait (%p5339_p4), [#allocation29], 32  }
  0x78   : > { %6220 = vsyncadd (%p5339_p4), [#allocation29], 4294967264 }
  0x79   : > { %6222 = dma.done.wait (%p5339_p4), [#allocation32], 528  }
  0x7a   : > { %6224 = vsyncadd (%p5339_p4), [#allocation32], 4294966768 }
  0x7b   : > { %6226 = dma.done.wait (%p5339_p4), [#allocation35], 16  }
  0x7c   : > { %6228 = vsyncadd (%p5339_p4), [#allocation35], 4294967280  ;;  %p1153_p5 = scmp.lt.s32.totalorder %s6423_s4, 1  ;;  %v5013_v0 = vld [vmem:[#allocation4 + $0x30] sm:$0xf]  ;;  %s7853_s9 = sld [smem:[#allocation50_spill]] }
  0x7d   : > { %v5196_v1 = vld [vmem:[#allocation4 + $0x34] sm:$0xf0]  ;;  %v5005_v2 = vld [vmem:[#allocation4 + $0x20] sm:$0xf]  ;;  %v5194_v4 = vld [vmem:[#allocation4 + $0x24] sm:$0xf0] }
  0x7e   : > { %s1154_s8 = scalar_select %p1153_p5, %s6423_s4, 1  ;;  %v5014_v3 = vor.u32 %v5196_v1, %v5013_v0  ;;  %v5006_v5 = vor.u32 %v5194_v4, %v5005_v2  ;;  %v4997_v6 = vld [vmem:[#allocation4 + $0x10] sm:$0xf]  ;;  %v5192_v7 = vld [vmem:[#allocation4 + $0x14] sm:$0xf0]  ;;  %vm1228_vm0 = vcmask 523264  }
  0x7f   : > { %v4998_v8 = vor.u32 %v5192_v7, %v4997_v6  ;;  %v4989_v9 = vld [vmem:[#allocation4] sm:$0xf]  ;;  %v5190_v10 = vld [vmem:[#allocation4 + $0x4] sm:$0xf0]  ;;  %s6259_s27 = smov 96   ;;  %s6260_s29 = smov 80  }
  0x80   : > { %1236 = vmatpush.bf16.msra.mxu0 %v5014_v3  ;;  %s6615_s1 = sshll.u32 %s1154_s8, 3  ;;  %v4990_v11 = vor.u32 %v5190_v10, %v4989_v9  ;;  %v6628_v14 = vld [vmem:[#allocation6] sm:$0x3]  ;;  %s6261_s11 = smov 112   ;;  %vm1281_vm1 = vcmask 1047556   ;;  %vm2023_vm2 = vcmask 64512  }
  0x81   : > { %v1184_v15 = vperm.slane %v6628_v14, 0  ;;  %s6262_s6 = smov 72   ;;  %s6263_s5 = smov 120   ;;  %v6266_v21 = vmov 1983009808   ;;  %vm2291_vm3 = vcmask 1043456  }
  0x82   : > { %s6621_s7 = scalar_lea.vmem %s7853_s9, %s6615_s1  ;;  %s6264_s3 = smov 104   ;;  %v1286_v22 = vunpack.c.l.s4 %v6266_v21  ;;  %v6268_v40 = vmov 1934713408   ;;  %vm2694_vm4 = vcmask 130048   ;;  %vm2696_vm5 = vcmask 195584  }
  0x83   : > { %v1166_v12 = vld [vmem:[%s6621_s7] sm:$0xff]  ;;  %s6265_s28 = smov 88   ;;  %s6267_s30 = smov 64   ;;  %v1334_v41 = vunpack.c.l.s4 %v6268_v40  ;;  %vm2698_vm6 = vcmask 261120   ;;  %vm2700_vm7 = vcmask 326656   ;;  %vm2702_vm8 = vcmask 392192  }
  0x84   : > { %1237 = vmatpush.bf16.msra.mxu0 %v5006_v5  ;;  %v6624_v13 = vpack.c.bf16 %v1166_v12, %v1166_v12  ;;  %v6640_v31 = vunpack.c.0.s8 %v1286_v22  ;;  %s7854_s8 = sld [smem:[#allocation53_spill]]  ;;  %s7822_s10 = smov 16   ;;  %vm2704_vm9 = vcmask 457728  }
  0x85   : > { %v6653_v51 = vunpack.c.0.s8 %v1334_v41  ;;  %s6270_s9 = smov 8   ;;  %s6271_s2 = smov 24  }
  0x86   : > { %s7824_s21 = smov 48  }
  0x88   : > { %1238 = vmatpush.bf16.msra.mxu0 %v4998_v8 }
  0x8a   : > { %s1169_s0 = scalar_lea.vmem %s7854_s8, %s6423_s4  ;;  %s6273_s8 = smov 32  }
  0x8c   : > { %1239 = vmatpush.bf16.msra.mxu0 %v4990_v11 }
  0x8f   : > { %5019 = vmatmul.msk.bf16.vlgmr.msra.gmra.mxu0 %vm1228_vm0, %v6624_v13 }
 0x10c   : > { %v1241_v16 = vpop.f32.mrf.mxu0 }
 0x10d   : > { %v1242_v17 = vadd.f32 %v1241_v16, %v1184_v15 }
 0x10f   : > { %1268 = vrot.lane.b32.xlu2 %v1242_v17, %s6259_s27  ;;  %1274 = vrot.lane.b32.xlu1 %v1242_v17, %s6260_s29  ;;  %v1283_v30 = vrot.slane %v1242_v17, 4 }
 0x110   : > { %1262 = vrot.lane.b32.xlu0 %v1242_v17, %s6261_s11 }
 0x114   : > { %v1243_v18 = vpop.f32.mrf.mxu0 }
 0x117   : > { %1277 = vrot.lane.b32.xlu2 %v1242_v17, %s6262_s6  ;;  %1259 = vrot.lane.b32.xlu1 %v1242_v17, %s6263_s5 }
 0x118   : > { %1265 = vrot.lane.b32.xlu0 %v1242_v17, %s6264_s3 }
 0x120   : > { %1271 = vrot.lane.b32.xlu0 %v1242_v17, %s6265_s28 }
 0x169   : > { %v1269_v19 = vpop.permute.xlu2 %1268 }
 0x16a   : > { %v1307_v20 = vrot.slane %v1269_v19, 4 }
 0x171   : > { %v1278_v48 = vpop.permute.xlu2 %1277 }
 0x172   : > { %v1317_v57 = vrot.slane %v1278_v48, 4 }
 0x181   : > { %v1275_v23 = vpop.permute.xlu1 %1274 }
 0x182   : > { %v1305_v24 = vrot.slane %v1275_v23, 4  ;;  %v1308_v25 = vsel %vm1281_vm1, %v1275_v23, %v1307_v20  ;;  %v1263_v26 = vpop.permute.xlu0 %1262 }
 0x183   : > { %v1280_v27 = vrot.slane %v1263_v26, 4  ;;  %v5413_v28 = vpack.i.bf16 %v1242_v17, %v1263_v26  ;;  %v1284_v32 = vsel %vm1281_vm1, %v1263_v26, %v1283_v30  ;;  %v1316_v58 = vperm.slane %v1308_v25, %v6640_v31 }
 0x184   : > { %v1306_v29 = vsel %vm1281_vm1, %v1305_v24, %v1269_v19  ;;  %v1292_v34 = vperm.slane %v1284_v32, %v6640_v31 }
 0x185   : > { %5414 = vrot.lane.b32.xlu1 %v5413_v28, %s6267_s30  ;;  %v1282_v33 = vsel %vm1281_vm1, %v1280_v27, %v1242_v17  ;;  %v1312_v54 = vperm.slane %v1306_v29, %v6640_v31  ;;  %v1367_v5 = vrot.slane %v1316_v58, 4 }
 0x186   : > { %v1288_v36 = vperm.slane %v1282_v33, %v6640_v31  ;;  %v1343_v45 = vrot.slane %v1292_v34, 4 }
 0x187   : > { %v1355_v1 = vrot.slane %v1312_v54, 4 }
 0x188   : > { %v1331_v49 = vrot.slane %v1288_v36, 4 }
 0x189   : > { %v1260_v35 = vpop.permute.xlu1 %1259 }
 0x18a   : > { %v1295_v37 = vrot.slane %v1260_v35, 4  ;;  %v5423_v38 = vpack.i.bf16 %v1269_v19, %v1260_v35  ;;  %v1266_v39 = vpop.permute.xlu0 %1265 }
 0x18b   : > { %v1293_v42 = vrot.slane %v1266_v39, 4  ;;  %v5418_v43 = vpack.i.bf16 %v1275_v23, %v1266_v39 }
 0x18c   : > { %v1296_v44 = vsel %vm1281_vm1, %v1266_v39, %v1295_v37  ;;  %5424 = vrot.lane.b32.xlu0 %v5423_v38, %s6267_s30 }
 0x18d   : > { %v1294_v46 = vsel %vm1281_vm1, %v1293_v42, %v1260_v35  ;;  %v1304_v47 = vperm.slane %v1296_v44, %v6640_v31  ;;  %5419 = vrot.lane.b32.xlu2 %v5418_v43, %s6267_s30 }
 0x18e   : > { %v1300_v50 = vperm.slane %v1294_v46, %v6640_v31 }
 0x18f   : > { %v1341_v52 = vrot.slane %v1304_v47, 4  ;;  %v1344_v53 = vsel %vm1281_vm1, %v1304_v47, %v1343_v45 }
 0x190   : > { %v1329_v55 = vrot.slane %v1300_v50, 4  ;;  %v1332_v56 = vsel %vm1281_vm1, %v1300_v50, %v1331_v49  ;;  %v1352_v6 = vperm.slane %v1344_v53, %v6653_v51 }
 0x191   : > { %v1342_v59 = vsel %vm1281_vm1, %v1341_v52, %v1292_v34  ;;  %v1340_v62 = vperm.slane %v1332_v56, %v6653_v51 }
 0x192   : > { %v1330_v60 = vsel %vm1281_vm1, %v1329_v55, %v1288_v36  ;;  %v1272_v61 = vpop.permute.xlu0 %1271  ;;  %v1348_v8 = vperm.slane %v1342_v59, %v6653_v51  ;;  %v1391_v25 = vrot.slane %v1352_v6, 4 }
 0x193   : > { %v1318_v63 = vsel %vm1281_vm1, %v1317_v57, %v1272_v61  ;;  %v1319_v0 = vrot.slane %v1272_v61, 4  ;;  %v1336_v2 = vperm.slane %v1330_v60, %v6653_v51  ;;  %v5428_v4 = vpack.i.bf16 %v1272_v61, %v1278_v48 }
 0x194   : > { %v1324_v3 = vperm.slane %v1318_v63, %v6640_v31  ;;  %v1383_v12 = vrot.slane %v1340_v62, 4  ;;  %v1387_v24 = vrot.slane %v1348_v8, 4 }
 0x195   : > { %v1320_v7 = vsel %vm1281_vm1, %v1278_v48, %v1319_v0  ;;  %5429 = vrot.lane.b32.xlu1 %v5428_v4, %s6267_s30  ;;  %v1379_v16 = vrot.slane %v1336_v2, 4 }
 0x196   : > { %v1328_v9 = vperm.slane %v1320_v7, %v6640_v31  ;;  %v1353_v10 = vrot.slane %v1324_v3, 4  ;;  %v1356_v11 = vsel %vm1281_vm1, %v1324_v3, %v1355_v1 }
 0x197   : > { %v1364_v15 = vperm.slane %v1356_v11, %v6653_v51 }
 0x198   : > { %v1354_v17 = vsel %vm1281_vm1, %v1353_v10, %v1312_v54  ;;  %v1365_v18 = vrot.slane %v1328_v9, 4  ;;  %v1368_v19 = vsel %vm1281_vm1, %v1328_v9, %v1367_v5 }
 0x199   : > { %v1360_v20 = vperm.slane %v1354_v17, %v6653_v51  ;;  %v1376_v21 = vperm.slane %v1368_v19, %v6653_v51  ;;  %v1381_v22 = vrot.slane %v1364_v15, 4  ;;  %v1384_v23 = vsel %vm1281_vm1, %v1364_v15, %v1383_v12 }
 0x19a   : > { %v1366_v26 = vsel %vm1281_vm1, %v1365_v18, %v1316_v58  ;;  %v1405_v27 = vrot.slane %v1384_v23, 4 }
 0x19b   : > { %v1372_v28 = vperm.slane %v1366_v26, %v6653_v51  ;;  %v1377_v29 = vrot.slane %v1360_v20, 4  ;;  %v1380_v30 = vsel %vm1281_vm1, %v1360_v20, %v1379_v16  ;;  %v1382_v32 = vsel %vm1281_vm1, %v1381_v22, %v1340_v62 }
 0x19c   : > { %v1389_v33 = vrot.slane %v1376_v21, 4  ;;  %v1393_v34 = vrot.slane %v1382_v32, 4  ;;  %v1407_v35 = vrot.slane %v1380_v30, 4  ;;  %v1392_v36 = vsel %vm1281_vm1, %v1376_v21, %v1391_v25 }
 0x19d   : > { %v1385_v37 = vrot.slane %v1372_v28, 4  ;;  %v1388_v38 = vsel %vm1281_vm1, %v1372_v28, %v1387_v24  ;;  %v1429_v39 = vrot.slane %v1392_v36, 4  ;;  %v1378_v40 = vsel %vm1281_vm1, %v1377_v29, %v1336_v2 }
 0x19e   : > { %v1408_v41 = vsel %vm1281_vm1, %v1384_v23, %v1407_v35  ;;  %v1390_v42 = vsel %vm1281_vm1, %v1389_v33, %v1352_v6  ;;  %v1431_v43 = vrot.slane %v1388_v38, 4  ;;  %v1394_v44 = vsel %vm1281_vm1, %v1393_v34, %v1378_v40 }
 0x19f   : > { %v1416_v45 = vperm.slane %v1408_v41, %v6640_v31  ;;  %v1386_v46 = vsel %vm1281_vm1, %v1385_v37, %v1348_v8  ;;  %v1395_v47 = vrot.slane %v1378_v40, 4  ;;  %v1400_v48 = vperm.slane %v1394_v44, %v6640_v31  ;;  %v5015_v44 = vld [vmem:[#allocation4 + $0x38] sm:$0xf0] }
 0x1a0   : > { %v1432_v49 = vsel %vm1281_vm1, %v1392_v36, %v1431_v43  ;;  %v1406_v50 = vsel %vm1281_vm1, %v1405_v27, %v1380_v30  ;;  %v1417_v52 = vrot.slane %v1390_v42, 4  ;;  %v1419_v53 = vrot.slane %v1386_v46, 4  ;;  %v5195_v43 = vld [vmem:[#allocation4 + $0x34] sm:$0xf] }
 0x1a1   : > { %v1412_v54 = vperm.slane %v1406_v50, %v6640_v31  ;;  %v1430_v55 = vsel %vm1281_vm1, %v1429_v39, %v1388_v38  ;;  %v1443_v56 = vrot.slane %v1400_v48, 4  ;;  %v1396_v57 = vsel %vm1281_vm1, %v1382_v32, %v1395_v47  ;;  %v5007_v47 = vld [vmem:[#allocation4 + $0x28] sm:$0xf0]  ;;  %v4999_v50 = vld [vmem:[#allocation4 + $0x18] sm:$0xf0] }
 0x1a2   : > { %v1418_v58 = vsel %vm1281_vm1, %v1417_v52, %v1386_v46  ;;  %v1436_v59 = vperm.slane %v1430_v55, %v6640_v31  ;;  %v1404_v60 = vperm.slane %v1396_v57, %v6640_v31  ;;  %v1420_v61 = vsel %vm1281_vm1, %v1390_v42, %v1419_v53  ;;  %v5193_v46 = vld [vmem:[#allocation4 + $0x24] sm:$0xf] }
 0x1a3   : > { %v1424_v62 = vperm.slane %v1418_v58, %v6640_v31  ;;  %v1441_v63 = vrot.slane %v1412_v54, 4  ;;  %v1428_v0 = vperm.slane %v1420_v61, %v6640_v31  ;;  %v1440_v1 = vperm.slane %v1432_v49, %v6640_v31  ;;  %v5191_v49 = vld [vmem:[#allocation4 + $0x14] sm:$0xf]  ;;  %v5189_v53 = vld [vmem:[#allocation4 + $0x4] sm:$0xf] }
 0x1a4   : > { %v1465_v2 = vrot.slane %v1436_v59, 4  ;;  %v1453_v3 = vrot.slane %v1416_v45, 4  ;;  %v1455_v4 = vrot.slane %v1404_v60, 4  ;;  %v1444_v5 = vsel %vm1281_vm1, %v1412_v54, %v1443_v56  ;;  %v4991_v54 = vld [vmem:[#allocation4 + $0x8] sm:$0xf0] }
 0x1a5   : > { %v1442_v6 = vsel %vm1281_vm1, %v1441_v63, %v1400_v48  ;;  %v1467_v7 = vrot.slane %v1424_v62, 4  ;;  %v1477_v8 = vrot.slane %v1440_v1, 4  ;;  %v1479_v9 = vrot.slane %v1428_v0, 4 }
 0x1a6   : > { %v1448_v10 = vperm.slane %v1442_v6, %v6653_v51  ;;  %v1466_v11 = vsel %vm1281_vm1, %v1465_v2, %v1424_v62  ;;  %v1454_v12 = vsel %vm1281_vm1, %v1453_v3, %v1404_v60  ;;  %v1452_v15 = vperm.slane %v1444_v5, %v6653_v51 }
 0x1a7   : > { %v1472_v16 = vperm.slane %v1466_v11, %v6653_v51  ;;  %v1460_v17 = vperm.slane %v1454_v12, %v6653_v51  ;;  %v1478_v18 = vsel %vm1281_vm1, %v1477_v8, %v1428_v0  ;;  %v1468_v19 = vsel %vm1281_vm1, %v1436_v59, %v1467_v7 }
 0x1a8   : > { %v1491_v20 = vrot.slane %v1448_v10, 4  ;;  %v1484_v21 = vperm.slane %v1478_v18, %v6653_v51  ;;  %v1476_v22 = vperm.slane %v1468_v19, %v6653_v51  ;;  %v1495_v23 = vrot.slane %v1452_v15, 4 }
 0x1a9   : > { %v1489_v24 = vrot.slane %v1472_v16, 4  ;;  %v1499_v25 = vrot.slane %v1460_v17, 4  ;;  %v1456_v26 = vsel %vm1281_vm1, %v1416_v45, %v1455_v4  ;;  %v1480_v27 = vsel %vm1281_vm1, %v1440_v1, %v1479_v9 }
 0x1aa   : > { %v6717_v28 = vsel %vm1281_vm1, %v1472_v16, %v1491_v20  ;;  %v1497_v29 = vrot.slane %v1484_v21, 4  ;;  %v1493_v30 = vrot.slane %v1476_v22, 4  ;;  %v6720_v32 = vsel %vm1281_vm1, %v1476_v22, %v1495_v23 }
 0x1ab   : > { %v6723_v33 = vsel %vm1281_vm1, %v1489_v24, %v1448_v10  ;;  %v6726_v34 = vsel %vm1281_vm1, %v1484_v21, %v1499_v25  ;;  %v1464_v37 = vperm.slane %v1456_v26, %v6653_v51  ;;  %v1488_v38 = vperm.slane %v1480_v27, %v6653_v51 }
 0x1ac   : > { %v6729_v35 = vsel %vm1281_vm1, %v1497_v29, %v1460_v17  ;;  %v6732_v36 = vsel %vm1281_vm1, %v1493_v30, %v1452_v15  ;;  %v5018_v45 = vor.u32 %v5195_v43, %v5015_v44  ;;  %v5010_v48 = vor.u32 %v5193_v46, %v5007_v47 }
 0x1ad   : > { %v1501_v39 = vrot.slane %v1488_v38, 4  ;;  %v1503_v40 = vrot.slane %v1464_v37, 4  ;;  %v5002_v52 = vor.u32 %v5191_v49, %v4999_v50  ;;  %v4994_v55 = vor.u32 %v5189_v53, %v4991_v54 }
 0x1ae   : > { %1249 = vmatpush.bf16.msra.mxu1 %v5018_v45 }
 0x1af   : > { %v6737_v41 = vsel %vm1281_vm1, %v1501_v39, %v1464_v37  ;;  %v6740_v42 = vsel %vm1281_vm1, %v1488_v38, %v1503_v40 }
 0x1b2   : > { %1250 = vmatpush.bf16.msra.mxu1 %v5010_v48 }
 0x1b6   : > { %1251 = vmatpush.bf16.msra.mxu1 %v5002_v52 }
 0x1ba   : > { %1252 = vmatpush.bf16.msra.mxu1 %v4994_v55 }
 0x1bd   : > { %5020 = vmatmul.msk.bf16.vlgmr.msra.gmra.mxu1 %vm1228_vm0, %v6624_v13 }
 0x1e7   : > { %v5420_v57 = vpop.permute.xlu2 %5419 }
 0x1e8   : > { %v5421_v60 = vunpack.i.l.bf16 %v5420_v57  ;;  %v5422_v0 = vunpack.i.h.bf16 %v5420_v57 }
 0x1ea   : > { %v1549_v1 = vrot.slane %v5421_v60, 4  ;;  %v1561_v8 = vrot.slane %v5422_v0, 4 }
 0x1f7   : > { %v5415_v56 = vpop.permute.xlu1 %5414 }
 0x1f8   : > { %v5416_v58 = vunpack.i.l.bf16 %v5415_v56  ;;  %v5417_v59 = vunpack.i.h.bf16 %v5415_v56 }
 0x1fa   : > { %v1537_v61 = vrot.slane %v5416_v58, 4  ;;  %v1539_v62 = vrot.slane %v5417_v59, 4 }
 0x1fc   : > { %v1538_v4 = vsel %vm1281_vm1, %v1537_v61, %v5417_v59  ;;  %v1540_v7 = vsel %vm1281_vm1, %v5416_v58, %v1539_v62 }
 0x1fd   : > { %v1544_v11 = vperm.slane %v1538_v4, %v6640_v31  ;;  %v1548_v15 = vperm.slane %v1540_v7, %v6640_v31 }
 0x1fe   : > { %v5425_v63 = vpop.permute.xlu0 %5424 }
 0x1ff   : > { %v5427_v2 = vunpack.i.h.bf16 %v5425_v63  ;;  %v5426_v3 = vunpack.i.l.bf16 %v5425_v63  ;;  %v1587_v19 = vrot.slane %v1544_v11, 4  ;;  %v1599_v23 = vrot.slane %v1548_v15, 4 }
 0x201   : > { %v1550_v5 = vsel %vm1281_vm1, %v1549_v1, %v5426_v3  ;;  %v1551_v6 = vrot.slane %v5426_v3, 4  ;;  %v1563_v13 = vrot.slane %v5427_v2, 4  ;;  %v1562_v16 = vsel %vm1281_vm1, %v1561_v8, %v5427_v2 }
 0x202   : > { %v1556_v10 = vperm.slane %v1550_v5, %v6640_v31  ;;  %v1568_v20 = vperm.slane %v1562_v16, %v6640_v31 }
 0x203   : > { %v1552_v9 = vsel %vm1281_vm1, %v5421_v60, %v1551_v6  ;;  %v1564_v17 = vsel %vm1281_vm1, %v5422_v0, %v1563_v13 }
 0x204   : > { %v1560_v12 = vperm.slane %v1552_v9, %v6640_v31  ;;  %v1585_v18 = vrot.slane %v1556_v10, 4  ;;  %v1572_v24 = vperm.slane %v1564_v17, %v6640_v31  ;;  %v1588_v27 = vsel %vm1281_vm1, %v1556_v10, %v1587_v19 }
 0x205   : > { %v1611_v39 = vrot.slane %v1568_v20, 4  ;;  %v1596_v44 = vperm.slane %v1588_v27, %v6653_v51 }
 0x206   : > { %v1597_v21 = vrot.slane %v1560_v12, 4  ;;  %v1586_v29 = vsel %vm1281_vm1, %v1585_v18, %v1544_v11  ;;  %v1600_v30 = vsel %vm1281_vm1, %v1560_v12, %v1599_v23  ;;  %v1623_v43 = vrot.slane %v1572_v24, 4 }
 0x207   : > { %v5430_v22 = vpop.permute.xlu1 %5429  ;;  %v1592_v47 = vperm.slane %v1586_v29, %v6653_v51  ;;  %v1608_v48 = vperm.slane %v1600_v30, %v6653_v51  ;;  %v1639_v57 = vrot.slane %v1596_v44, 4 }
 0x208   : > { %v5432_v25 = vunpack.i.h.bf16 %v5430_v22  ;;  %v5431_v26 = vunpack.i.l.bf16 %v5430_v22  ;;  %v1598_v40 = vsel %vm1281_vm1, %v1597_v21, %v1548_v15 }
 0x209   : > { %v1604_v52 = vperm.slane %v1598_v40, %v6653_v51  ;;  %v1635_v60 = vrot.slane %v1592_v47, 4  ;;  %v1647_v61 = vrot.slane %v1608_v48, 4 }
 0x20a   : > { %v1575_v37 = vrot.slane %v5432_v25, 4  ;;  %v1573_v38 = vrot.slane %v5431_v26, 4 }
 0x20b   : > { %v1643_v4 = vrot.slane %v1604_v52, 4 }
 0x20c   : > { %v1574_v45 = vsel %vm1281_vm1, %v1573_v38, %v5432_v25  ;;  %v1576_v46 = vsel %vm1281_vm1, %v5431_v26, %v1575_v37 }
 0x20d   : > { %v1580_v49 = vperm.slane %v1574_v45, %v6640_v31  ;;  %v1584_v50 = vperm.slane %v1576_v46, %v6640_v31 }
 0x20f   : > { %v1609_v53 = vrot.slane %v1580_v49, 4  ;;  %v1612_v54 = vsel %vm1281_vm1, %v1580_v49, %v1611_v39  ;;  %v1621_v55 = vrot.slane %v1584_v50, 4  ;;  %v1624_v56 = vsel %vm1281_vm1, %v1584_v50, %v1623_v43 }
 0x210   : > { %v1620_v58 = vperm.slane %v1612_v54, %v6653_v51  ;;  %v1632_v59 = vperm.slane %v1624_v56, %v6653_v51 }
 0x211   : > { %v1610_v62 = vsel %vm1281_vm1, %v1609_v53, %v1568_v20  ;;  %v1622_v63 = vsel %vm1281_vm1, %v1621_v55, %v1572_v24 }
 0x212   : > { %v1616_v0 = vperm.slane %v1610_v62, %v6653_v51  ;;  %v1628_v1 = vperm.slane %v1622_v63, %v6653_v51  ;;  %v1637_v2 = vrot.slane %v1620_v58, 4  ;;  %v1640_v3 = vsel %vm1281_vm1, %v1620_v58, %v1639_v57 }
 0x213   : > { %v1645_v5 = vrot.slane %v1632_v59, 4  ;;  %v1648_v6 = vsel %vm1281_vm1, %v1632_v59, %v1647_v61  ;;  %v1661_v7 = vrot.slane %v1640_v3, 4 }
 0x214   : > { %v1633_v13 = vrot.slane %v1616_v0, 4  ;;  %v1641_v8 = vrot.slane %v1628_v1, 4  ;;  %v1685_v9 = vrot.slane %v1648_v6, 4  ;;  %v1636_v10 = vsel %vm1281_vm1, %v1616_v0, %v1635_v60 }
 0x215   : > { %v1646_v11 = vsel %vm1281_vm1, %v1645_v5, %v1608_v48  ;;  %v1638_v12 = vsel %vm1281_vm1, %v1637_v2, %v1596_v44  ;;  %v1644_v15 = vsel %vm1281_vm1, %v1628_v1, %v1643_v4  ;;  %v1662_v16 = vsel %vm1281_vm1, %v1661_v7, %v1636_v10 }
 0x216   : > { %v1634_v17 = vsel %vm1281_vm1, %v1633_v13, %v1592_v47  ;;  %v1642_v18 = vsel %vm1281_vm1, %v1641_v8, %v1604_v52  ;;  %v1649_v19 = vrot.slane %v1638_v12, 4  ;;  %v1663_v20 = vrot.slane %v1636_v10, 4 }
 0x217   : > { %v1651_v21 = vrot.slane %v1634_v17, 4  ;;  %v1668_v22 = vperm.slane %v1662_v16, %v6640_v31  ;;  %v1673_v23 = vrot.slane %v1646_v11, 4  ;;  %v1675_v24 = vrot.slane %v1642_v18, 4 }
 0x218   : > { %v1650_v25 = vsel %vm1281_vm1, %v1649_v19, %v1634_v17  ;;  %v1686_v26 = vsel %vm1281_vm1, %v1685_v9, %v1644_v15  ;;  %v1687_v27 = vrot.slane %v1644_v15, 4  ;;  %v1664_v29 = vsel %vm1281_vm1, %v1640_v3, %v1663_v20 }
 0x219   : > { %v1656_v30 = vperm.slane %v1650_v25, %v6640_v31  ;;  %v1674_v37 = vsel %vm1281_vm1, %v1673_v23, %v1642_v18  ;;  %v1692_v38 = vperm.slane %v1686_v26, %v6640_v31  ;;  %v1697_v39 = vrot.slane %v1668_v22, 4 }
 0x21a   : > { %v1680_v40 = vperm.slane %v1674_v37, %v6640_v31  ;;  %v1652_v43 = vsel %vm1281_vm1, %v1638_v12, %v1651_v21  ;;  %v1672_v44 = vperm.slane %v1664_v29, %v6640_v31  ;;  %v1676_v45 = vsel %vm1281_vm1, %v1646_v11, %v1675_v24 }
 0x21b   : > { %v1698_v46 = vsel %vm1281_vm1, %v1697_v39, %v1656_v30  ;;  %v1721_v47 = vrot.slane %v1692_v38, 4  ;;  %v1699_v48 = vrot.slane %v1656_v30, 4  ;;  %v1660_v49 = vperm.slane %v1652_v43, %v6640_v31 }
 0x21c   : > { %v1704_v50 = vperm.slane %v1698_v46, %v6653_v51  ;;  %v1723_v52 = vrot.slane %v1680_v40, 4  ;;  %v1684_v53 = vperm.slane %v1676_v45, %v6640_v31  ;;  %v1688_v54 = vsel %vm1281_vm1, %v1648_v6, %v1687_v27 }
 0x21d   : > { %v1722_v55 = vsel %vm1281_vm1, %v1721_v47, %v1680_v40  ;;  %v1700_v56 = vsel %vm1281_vm1, %v1668_v22, %v1699_v48  ;;  %v1696_v57 = vperm.slane %v1688_v54, %v6640_v31  ;;  %v1709_v58 = vrot.slane %v1672_v44, 4 }
 0x21e   : > { %v1728_v59 = vperm.slane %v1722_v55, %v6653_v51  ;;  %v1747_v60 = vrot.slane %v1704_v50, 4  ;;  %v1708_v61 = vperm.slane %v1700_v56, %v6653_v51  ;;  %v1724_v62 = vsel %vm1281_vm1, %v1692_v38, %v1723_v52 }
 0x21f   : > { %v1732_v63 = vperm.slane %v1724_v62, %v6653_v51  ;;  %v1710_v0 = vsel %vm1281_vm1, %v1709_v58, %v1660_v49  ;;  %v1711_v1 = vrot.slane %v1660_v49, 4  ;;  %v1733_v2 = vrot.slane %v1696_v57, 4 }
 0x220   : > { %v1745_v3 = vrot.slane %v1728_v59, 4  ;;  %v1748_v4 = vsel %vm1281_vm1, %v1728_v59, %v1747_v60  ;;  %v1751_v5 = vrot.slane %v1708_v61, 4  ;;  %v1716_v6 = vperm.slane %v1710_v0, %v6653_v51 }
 0x221   : > { %v1762_v7 = vpack.c.bf16 %v1748_v4, %v1748_v4  ;;  %v1749_v13 = vrot.slane %v1732_v63, 4  ;;  %v1734_v8 = vsel %vm1281_vm1, %v1733_v2, %v1684_v53  ;;  %v1735_v9 = vrot.slane %v1684_v53, 4 }
 0x222   : > { %v1746_v10 = vsel %vm1281_vm1, %v1745_v3, %v1704_v50  ;;  %v1752_v11 = vsel %vm1281_vm1, %v1732_v63, %v1751_v5  ;;  %v1740_v12 = vperm.slane %v1734_v8, %v6653_v51  ;;  %v1755_v15 = vrot.slane %v1716_v6, 4 }
 0x223   : > { %v1761_v16 = vpack.c.bf16 %v1746_v10, %v1746_v10  ;;  %v2047_v17 = vsel %vm2023_vm2, %v1762_v7, 0  ;;  %v1750_v18 = vsel %vm1281_vm1, %v1749_v13, %v1708_v61  ;;  %v1764_v19 = vpack.c.bf16 %v1752_v11, %v1752_v11 }
 0x224   : > { %2056 = vmatpush.bf16.xpose.msra.mxu3 %v2047_v17  ;;  %v1763_v20 = vpack.c.bf16 %v1750_v18, %v1750_v18  ;;  %v1753_v21 = vrot.slane %v1740_v12, 4  ;;  %v1756_v22 = vsel %vm1281_vm1, %v1740_v12, %v1755_v15  ;;  %v1712_v27 = vsel %vm1281_vm1, %v1672_v44, %v1711_v1 }
 0x225   : > { %v2028_v23 = vsel %vm2023_vm2, %v1761_v16, 0  ;;  %v2085_v24 = vsel %vm2023_vm2, %v1764_v19, 0  ;;  %v1736_v29 = vsel %vm1281_vm1, %v1696_v57, %v1735_v9  ;;  %v1766_v37 = vpack.c.bf16 %v1756_v22, %v1756_v22 }
 0x226   : > { %2037 = vmatpush.bf16.xpose.msra.mxu2 %v2028_v23  ;;  %v2066_v25 = vsel %vm2023_vm2, %v1763_v20, 0  ;;  %v1754_v26 = vsel %vm1281_vm1, %v1753_v21, %v1716_v6  ;;  %v1744_v38 = vperm.slane %v1736_v29, %v6653_v51  ;;  %v1506_v40 = vpack.c.bf16 %v6717_v28, %v6717_v28 }
 0x227   : > { %v1765_v30 = vpack.c.bf16 %v1754_v26, %v1754_v26  ;;  %v1720_v43 = vperm.slane %v1712_v27, %v6653_v51  ;;  %v1505_v44 = vpack.c.bf16 %v6723_v33, %v6723_v33  ;;  %v2123_v46 = vsel %vm2023_vm2, %v1766_v37, 0 }
 0x228   : > { %v1757_v45 = vrot.slane %v1744_v38, 4  ;;  %v1509_v28 = vpack.c.bf16 %v6729_v35, %v6729_v35  ;;  %v1508_v53 = vpack.c.bf16 %v6720_v32, %v6720_v32  ;;  %v1507_v54 = vpack.c.bf16 %v6732_v36, %v6732_v36 }
 0x229   : > { %v2104_v39 = vsel %vm2023_vm2, %v1765_v30, 0  ;;  %v1759_v33 = vrot.slane %v1720_v43, 4  ;;  %v1510_v55 = vpack.c.bf16 %v6726_v34, %v6726_v34  ;;  %v1511_v56 = vpack.c.bf16 %v6737_v41, %v6737_v41  ;;  %v5473_v41 = vld [vmem:[%s1169_s0] ss:$0 sm:$0xff]  ;;  %s7825_s0 = smov 40  }
 0x22a   : > { %2113 = vmatpush.bf16.xpose.msrb.mxu0 %v2104_v39  ;;  %v1758_v47 = vsel %vm1281_vm1, %v1757_v45, %v1720_v43  ;;  %v1512_v32 = vpack.c.bf16 %v6740_v42, %v6740_v42  ;;  %v1185_v36 = vperm.slane %v6628_v14, 1  ;;  %v1168_v42 = vld [vmem:[#allocation2] sm:$0xff] }
 0x22b   : > { %5022 = vmatmul.msk.bf16.vlgmr.msra.gmra.mxu3 %vm2023_vm2, %v1506_v40  ;;  %v1767_v48 = vpack.c.bf16 %v1758_v47, %v1758_v47  ;;  %v1760_v50 = vsel %vm1281_vm1, %v1744_v38, %v1759_v33  ;;  %v1172_v59 = vadd.f32 %v5473_v41, %v1168_v42 }
 0x22c   : > { %2094 = vmatpush.bf16.xpose.msrb.mxu3 %v2085_v24  ;;  %v1768_v52 = vpack.c.bf16 %v1760_v50, %v1760_v50 }
 0x22d   : > { %5021 = vmatmul.msk.bf16.vlgmr.msra.gmra.mxu2 %vm2023_vm2, %v1505_v44  ;;  %v2142_v49 = vsel %vm2023_vm2, %v1767_v48, 0 }
 0x22e   : > { %2075 = vmatpush.bf16.xpose.msrb.mxu2 %v2066_v25  ;;  %v2161_v35 = vsel %vm2023_vm2, %v1768_v52, 0 }
 0x231   : > { %5025 = vmatmul.msk.bf16.vlgmr.msrb.gmra.mxu0 %vm2023_vm2, %v1509_v28 }
 0x234   : > { %2132 = vmatpush.bf16.xpose.msra.mxu3 %v2123_v46 }
 0x236   : > { %2151 = vmatpush.bf16.xpose.msra.mxu2 %v2142_v49 }
 0x23a   : > { %v1254_v57 = vpop.f32.mrf.mxu1 }
 0x23b   : > { %5024 = vmatmul.msk.bf16.vlgmr.msrb.gmra.mxu3 %vm2023_vm2, %v1508_v53  ;;  %v6861_v58 = vadd.f32 %v1254_v57, %v1185_v36 }
 0x23c   : > { %2170 = vmatpush.bf16.xpose.msrb.mxu3 %v2161_v35 }
 0x23d   : > { %5023 = vmatmul.msk.bf16.vlgmr.msrb.gmra.mxu2 %vm2023_vm2, %v1507_v54  ;;  %1782 = vrot.lane.b32.xlu1 %v6861_v58, %s6265_s28 }
 0x23e   : > { %1779 = vrot.lane.b32.xlu0 %v6861_v58, %s6259_s27  ;;  %1785 = vrot.lane.b32.xlu2 %v6861_v58, %s6260_s29 }
 0x242   : > { %v1256_v34 = vpop.f32.mrf.mxu1 }
 0x246   : > { %1770 = vrot.lane.b32.xlu0 %v6861_v58, %s6263_s5 }
 0x24b   : > { %5026 = vmatmul.msk.bf16.vlgmr.msra.gmra.mxu3 %vm2023_vm2, %v1510_v55 }
 0x24d   : > { %5027 = vmatmul.msk.bf16.vlgmr.msra.gmra.mxu2 %vm2023_vm2, %v1511_v56 }
 0x25b   : > { %5028 = vmatmul.msk.bf16.vlgmr.msrb.gmra.mxu3 %vm2023_vm2, %v1512_v32 }
 0x298   : > { %v6888_v39 = vpop.permute.xlu2 %1785 }
 0x2ae   : > { %v2115_v14 = vpop.f32.mrf.mxu0  ;;  %v2058_v60 = vpop.f32.mrf.mxu3 }
 0x2af   : > { %v2180_v61 = vmul.f32 0.35355338, %v2115_v14  ;;  %v2177_v62 = vmul.f32 0.35355338, %v2058_v60  ;;  %v6900_v49 = vpop.permute.xlu1 %1782 }
 0x2b0   : > { %v2039_v63 = vpop.f32.mrf.mxu2  ;;  %v6885_v30 = vpop.permute.xlu0 %1779 }
 0x2b1   : > { %v6871_v0 = vadd.f32 %v2180_v61, %v1172_v59  ;;  %v6873_v1 = vadd.f32 %v2177_v62, %v1172_v59  ;;  %v2176_v2 = vmul.f32 0.35355338, %v2039_v63  ;;  %v1817_v38 = vrot.slane %v6885_v30, 4 }
 0x2b3   : > { %v2204_v3 = vsel %vm2023_vm2, %v6871_v0, -inf  ;;  %v2195_v4 = vsel %vm2023_vm2, %v6873_v1, -inf  ;;  %v2184_v7 = vadd.f32 %v2176_v2, %v1172_v59  ;;  %v6892_v40 = vsel %vm1281_vm1, %v6888_v39, %v1817_v38 }
 0x2b4   : > { %2205 = vmax.xlane.f32.xlu1 %v2204_v3  ;;  %2196 = vmax.xlane.f32.xlu2 %v2195_v4  ;;  %v1815_v38 = vrot.slane %v6888_v39, 4  ;;  %v1826_v39 = vperm.slane %v6892_v40, %v6640_v31 }
 0x2b5   : > { %v2192_v8 = vsel %vm2023_vm2, %v2184_v7, -inf }
 0x2b6   : > { %v2117_v5 = vpop.f32.mrf.mxu0  ;;  %v2060_v6 = vpop.f32.mrf.mxu3 }
 0x2b8   : > { %v2041_v13 = vpop.f32.mrf.mxu2  ;;  %v6902_v33 = vpop.permute.xlu0 %1770 }
 0x2bc   : > { %2193 = vmax.xlane.f32.xlu1 %v2192_v8 }
 0x2be   : > { %v2096_v9 = vpop.f32.mrf.mxu3 }
 0x2bf   : > { %v2179_v10 = vmul.f32 0.35355338, %v2096_v9 }
 0x2c0   : > { %v2077_v11 = vpop.f32.mrf.mxu2 }
 0x2c1   : > { %v2178_v12 = vmul.f32 0.35355338, %v2077_v11  ;;  %v2187_v15 = vadd.f32 %v2179_v10, %v1172_v59 }
 0x2c3   : > { %v2201_v16 = vsel %vm2023_vm2, %v2187_v15, -inf  ;;  %v2186_v17 = vadd.f32 %v2178_v12, %v1172_v59 }
 0x2c4   : > { %2202 = vmax.xlane.f32.xlu0 %v2201_v16 }
 0x2c5   : > { %v2198_v18 = vsel %vm2023_vm2, %v2186_v17, -inf }
 0x2c6   : > { %2199 = vmax.xlane.f32.xlu2 %v2198_v18  ;;  %v2098_v19 = vpop.f32.mrf.mxu3 }
 0x2c8   : > { %v2079_v20 = vpop.f32.mrf.mxu2 }
 0x2ce   : > { %v2134_v21 = vpop.f32.mrf.mxu3 }
 0x2cf   : > { %v2181_v25 = vmul.f32 0.35355338, %v2134_v21 }
 0x2d0   : > { %v2153_v22 = vpop.f32.mrf.mxu2 }
 0x2d1   : > { %v2182_v23 = vmul.f32 0.35355338, %v2153_v22  ;;  %v2189_v37 = vadd.f32 %v2181_v25, %v1172_v59  ;;  %v1805_v22 = vrot.slane %v6902_v33, 4 }
 0x2d3   : > { %v2190_v24 = vadd.f32 %v2182_v23, %v1172_v59  ;;  %v2207_v43 = vsel %vm2023_vm2, %v2189_v37, -inf  ;;  %v1793_v23 = vrot.slane %v6861_v58, 4 }
 0x2d5   : > { %1773 = vrot.lane.b32.xlu1 %v6861_v58, %s6261_s11  ;;  %v2210_v26 = vsel %vm2023_vm2, %v2190_v24, -inf }
 0x2d6   : > { %2211 = vmax.xlane.f32.xlu2 %v2210_v26  ;;  %v2136_v27 = vpop.f32.mrf.mxu3 }
 0x2d8   : > { %v2155_v29 = vpop.f32.mrf.mxu2 }
 0x2de   : > { %2208 = vmax.xlane.f32.xlu2 %v2207_v43  ;;  %v2172_v45 = vpop.f32.mrf.mxu3 }
 0x2df   : > { %v2183_v44 = vmul.f32 0.35355338, %v2172_v45 }
 0x2e1   : > { %v2191_v46 = vadd.f32 %v2183_v44, %v1172_v59 }
 0x2e3   : > { %v2213_v47 = vsel %vm2023_vm2, %v2191_v46, -inf }
 0x2e4   : > { %2214 = vmax.xlane.f32.xlu0 %v2213_v47 }
 0x2e6   : > { %v2174_v48 = vpop.f32.mrf.mxu3 }
 0x2f6   : > { %1776 = vrot.lane.b32.xlu2 %v6861_v58, %s6264_s3 }
 0x2f8   : > { %1788 = vrot.lane.b32.xlu0 %v6861_v58, %s6262_s6 }
 0x327   : > { %v2206_v28 = vpop.xlane.xlu1 %2205  ;;  %v2197_v53 = vpop.xlane.xlu2 %2196 }
 0x328   : > { %v2217_v41 = vsub.f32 %v6873_v1, %v2197_v53  ;;  %v2220_v62 = vsub.f32 %v6871_v0, %v2206_v28 }
 0x32a   : > { %v2226_v59 = vmul.f32 1.442695, %v2217_v41  ;;  %v2232_v1 = vmul.f32 1.442695, %v2220_v62  ;;  %v1877_v41 = vrot.slane %v1826_v39, 4 }
 0x32f   : > { %v2194_v50 = vpop.xlane.xlu1 %2193 }
 0x330   : > { %v2216_v52 = vsub.f32 %v2184_v7, %v2194_v50 }
 0x332   : > { %v2224_v54 = vmul.f32 1.442695, %v2216_v52 }
 0x334   : > { %5488 = vpow2.f32 %v2224_v54  ;;  %v1829_v54 = vrot.slane %v6900_v49, 4 }
 0x337   : > { %v2203_v35 = vpop.xlane.xlu0 %2202 }
 0x338   : > { %v2219_v55 = vsub.f32 %v2187_v15, %v2203_v35 }
 0x339   : > { %v2200_v56 = vpop.xlane.xlu2 %2199 }
 0x33a   : > { %v6904_v32 = vpop.eup %5488  ;;  %v2230_v36 = vmul.f32 1.442695, %v2219_v55  ;;  %v2218_v57 = vsub.f32 %v2186_v17, %v2200_v56 }
 0x33b   : > { %v2240_v34 = vsel %vm2023_vm2, %v6904_v32, 0.0 }
 0x33c   : > { %5490 = vpow2.f32 %v2230_v36  ;;  %v2228_v42 = vmul.f32 1.442695, %v2218_v57  ;;  %2241 = vadd.xlane.f32.xlu2 %v2240_v34 }
 0x33e   : > { %5492 = vpow2.f32 %v2228_v42 }
 0x33f   : > { %5494 = vpow2.f32 %v2226_v59 }
 0x340   : > { %5496 = vpow2.f32 %v2232_v1 }
 0x342   : > { %v6909_v14 = vpop.eup %5490 }
 0x343   : > { %v2249_v60 = vsel %vm2023_vm2, %v6909_v14, 0.0 }
 0x344   : > { %v6913_v61 = vpop.eup %5492  ;;  %2250 = vadd.xlane.f32.xlu0 %v2249_v60 }
 0x345   : > { %v2246_v63 = vsel %vm2023_vm2, %v6913_v61, 0.0  ;;  %v6918_v3 = vpop.eup %5494 }
 0x346   : > { %2247 = vadd.xlane.f32.xlu1 %v2246_v63  ;;  %v2243_v6 = vsel %vm2023_vm2, %v6918_v3, 0.0  ;;  %v6922_v0 = vpop.eup %5496 }
 0x347   : > { %v2252_v10 = vsel %vm2023_vm2, %v6922_v0, 0.0  ;;  %v1774_v16 = vpop.permute.xlu1 %1773 }
 0x348   : > { %v1791_v20 = vrot.slane %v1774_v16, 4  ;;  %v1794_v25 = vsel %vm1281_vm1, %v1774_v16, %v1793_v23 }
 0x349   : > { %v2212_v2 = vpop.xlane.xlu2 %2211  ;;  %v1802_v43 = vperm.slane %v1794_v25, %v6640_v31 }
 0x34a   : > { %v2222_v4 = vsub.f32 %v2190_v24, %v2212_v2  ;;  %v1792_v27 = vsel %vm1281_vm1, %v1791_v20, %v6861_v58  ;;  %v1816_v58 = vsel %vm1281_vm1, %v1815_v38, %v6885_v30 }
 0x34b   : > { %v1798_v44 = vperm.slane %v1792_v27, %v6640_v31  ;;  %v1853_v48 = vrot.slane %v1802_v43, 4  ;;  %v1822_v53 = vperm.slane %v1816_v58, %v6640_v31 }
 0x34c   : > { %v2236_v5 = vmul.f32 1.442695, %v2222_v4 }
 0x34d   : > { %v1865_v59 = vrot.slane %v1822_v53, 4 }
 0x34e   : > { %5498 = vpow2.f32 %v2236_v5  ;;  %2244 = vadd.xlane.f32.xlu1 %v2243_v6 }
 0x351   : > { %v2209_v7 = vpop.xlane.xlu2 %2208 }
 0x352   : > { %v2221_v13 = vsub.f32 %v2189_v37, %v2209_v7 }
 0x354   : > { %v6924_v8 = vpop.eup %5498  ;;  %v2234_v9 = vmul.f32 1.442695, %v2221_v13 }
 0x355   : > { %v2258_v11 = vsel %vm2023_vm2, %v6924_v8, 0.0 }
 0x356   : > { %5500 = vpow2.f32 %v2234_v9  ;;  %2253 = vadd.xlane.f32.xlu1 %v2252_v10  ;;  %2259 = vadd.xlane.f32.xlu0 %v2258_v11 }
 0x357   : > { %v2215_v12 = vpop.xlane.xlu0 %2214 }
 0x358   : > { %v2223_v15 = vsub.f32 %v2191_v46, %v2215_v12 }
 0x359   : > { %v1777_v17 = vpop.permute.xlu2 %1776 }
 0x35a   : > { %v2238_v18 = vmul.f32 1.442695, %v2223_v15  ;;  %v1803_v21 = vrot.slane %v1777_v17, 4  ;;  %v1806_v26 = vsel %vm1281_vm1, %v1777_v17, %v1805_v22 }
 0x35b   : > { %v1814_v45 = vperm.slane %v1806_v26, %v6640_v31 }
 0x35c   : > { %v6930_v19 = vpop.eup %5500  ;;  %5502 = vpow2.f32 %v2238_v18  ;;  %v1804_v29 = vsel %vm1281_vm1, %v1803_v21, %v6902_v33  ;;  %v1841_v33 = vrot.slane %v1798_v44, 4 }
 0x35d   : > { %v2255_v24 = vsel %vm2023_vm2, %v6930_v19, 0.0  ;;  %v1810_v46 = vperm.slane %v1804_v29, %v6640_v31  ;;  %v1851_v28 = vrot.slane %v1814_v45, 4  ;;  %v1854_v52 = vsel %vm1281_vm1, %v1814_v45, %v1853_v48 }
 0x35e   : > { %2256 = vadd.xlane.f32.xlu0 %v2255_v24  ;;  %v1862_v36 = vperm.slane %v1854_v52, %v6653_v51 }
 0x35f   : > { %v1839_v50 = vrot.slane %v1810_v46, 4  ;;  %v1842_v35 = vsel %vm1281_vm1, %v1810_v46, %v1841_v33  ;;  %v1852_v55 = vsel %vm1281_vm1, %v1851_v28, %v1802_v43 }
 0x360   : > { %v1850_v40 = vperm.slane %v1842_v35, %v6653_v51  ;;  %v1858_v60 = vperm.slane %v1852_v55, %v6653_v51  ;;  %v1901_v5 = vrot.slane %v1862_v36, 4 }
 0x361   : > { %v1840_v30 = vsel %vm1281_vm1, %v1839_v50, %v1798_v44 }
 0x362   : > { %v6942_v37 = vpop.eup %5502  ;;  %v1846_v63 = vperm.slane %v1840_v30, %v6653_v51  ;;  %v1893_v7 = vrot.slane %v1850_v40, 4  ;;  %v1897_v17 = vrot.slane %v1858_v60, 4 }
 0x363   : > { %v2261_v47 = vsel %vm2023_vm2, %v6942_v37, 0.0 }
 0x364   : > { %2262 = vadd.xlane.f32.xlu2 %v2261_v47  ;;  %v1889_v16 = vrot.slane %v1846_v63, 4 }
 0x36a   : > { %v1789_v56 = vpop.permute.xlu0 %1788 }
 0x36b   : > { %v1827_v57 = vrot.slane %v1789_v56, 4  ;;  %v1830_v34 = vsel %vm1281_vm1, %v1789_v56, %v1829_v54 }
 0x36c   : > { %v1838_v42 = vperm.slane %v1830_v34, %v6640_v31 }
 0x36d   : > { %v1828_v62 = vsel %vm1281_vm1, %v1827_v57, %v6900_v49 }
 0x36e   : > { %v1834_v1 = vperm.slane %v1828_v62, %v6640_v31  ;;  %v1875_v2 = vrot.slane %v1838_v42, 4  ;;  %v1878_v4 = vsel %vm1281_vm1, %v1838_v42, %v1877_v41 }
 0x36f   : > { %v1886_v6 = vperm.slane %v1878_v4, %v6653_v51 }
 0x370   : > { %v1863_v13 = vrot.slane %v1834_v1, 4  ;;  %v1866_v9 = vsel %vm1281_vm1, %v1834_v1, %v1865_v59  ;;  %v1876_v10 = vsel %vm1281_vm1, %v1875_v2, %v1826_v39 }
 0x371   : > { %v1874_v11 = vperm.slane %v1866_v9, %v6653_v51  ;;  %v1882_v49 = vperm.slane %v1876_v10, %v6653_v51  ;;  %v1899_v12 = vrot.slane %v1886_v6, 4  ;;  %v1902_v15 = vsel %vm1281_vm1, %v1886_v6, %v1901_v5 }
 0x372   : > { %v1864_v18 = vsel %vm1281_vm1, %v1863_v13, %v1822_v53  ;;  %v1939_v20 = vrot.slane %v1902_v15, 4 }
 0x373   : > { %v1870_v21 = vperm.slane %v1864_v18, %v6653_v51  ;;  %v1891_v22 = vrot.slane %v1874_v11, 4  ;;  %v1894_v23 = vsel %vm1281_vm1, %v1874_v11, %v1893_v7  ;;  %v1895_v24 = vrot.slane %v1882_v49, 4 }
 0x374   : > { %v1898_v25 = vsel %vm1281_vm1, %v1882_v49, %v1897_v17  ;;  %v1900_v26 = vsel %vm1281_vm1, %v1899_v12, %v1862_v36  ;;  %v1915_v27 = vrot.slane %v1894_v23, 4 }
 0x375   : > { %v1887_v29 = vrot.slane %v1870_v21, 4  ;;  %v1890_v38 = vsel %vm1281_vm1, %v1870_v21, %v1889_v16  ;;  %v1892_v43 = vsel %vm1281_vm1, %v1891_v22, %v1850_v40  ;;  %v1896_v45 = vsel %vm1281_vm1, %v1895_v24, %v1858_v60 }
 0x376   : > { %v1903_v44 = vrot.slane %v1892_v43, 4  ;;  %v1917_v46 = vrot.slane %v1890_v38, 4  ;;  %v1927_v47 = vrot.slane %v1900_v26, 4  ;;  %v1929_v58 = vrot.slane %v1896_v45, 4 }
 0x377   : > { %v1940_v48 = vsel %vm1281_vm1, %v1939_v20, %v1898_v25  ;;  %v1941_v28 = vrot.slane %v1898_v25, 4  ;;  %v1888_v33 = vsel %vm1281_vm1, %v1887_v29, %v1846_v63  ;;  %v1916_v50 = vsel %vm1281_vm1, %v1915_v27, %v1890_v38 }
 0x378   : > { %v1930_v39 = vsel %vm1281_vm1, %v1900_v26, %v1929_v58  ;;  %v1946_v52 = vperm.slane %v1940_v48, %v6640_v31  ;;  %v1904_v53 = vsel %vm1281_vm1, %v1903_v44, %v1888_v33  ;;  %v1905_v54 = vrot.slane %v1888_v33, 4 }
 0x379   : > { %v1942_v35 = vsel %vm1281_vm1, %v1902_v15, %v1941_v28  ;;  %v1910_v55 = vperm.slane %v1904_v53, %v6640_v31  ;;  %v1922_v56 = vperm.slane %v1916_v50, %v6640_v31  ;;  %v1928_v30 = vsel %vm1281_vm1, %v1927_v47, %v1896_v45 }
 0x37a   : > { %v1950_v36 = vperm.slane %v1942_v35, %v6640_v31  ;;  %v1934_v57 = vperm.slane %v1928_v30, %v6640_v31  ;;  %v1975_v34 = vrot.slane %v1946_v52, 4  ;;  %v1906_v41 = vsel %vm1281_vm1, %v1892_v43, %v1905_v54 }
 0x37b   : > { %v1951_v40 = vrot.slane %v1922_v56, 4  ;;  %v1953_v42 = vrot.slane %v1910_v55, 4  ;;  %v1914_v59 = vperm.slane %v1906_v41, %v6640_v31  ;;  %v1918_v60 = vsel %vm1281_vm1, %v1894_v23, %v1917_v46 }
 0x37c   : > { %v1976_v62 = vsel %vm1281_vm1, %v1975_v34, %v1934_v57  ;;  %v1977_v63 = vrot.slane %v1934_v57, 4  ;;  %v1926_v1 = vperm.slane %v1918_v60, %v6640_v31  ;;  %v1938_v2 = vperm.slane %v1930_v39, %v6640_v31 }
 0x37d   : > { %v1952_v4 = vsel %vm1281_vm1, %v1951_v40, %v1910_v55  ;;  %v1982_v5 = vperm.slane %v1976_v62, %v6653_v51  ;;  %v1954_v6 = vsel %vm1281_vm1, %v1922_v56, %v1953_v42  ;;  %v1987_v7 = vrot.slane %v1950_v36, 4 }
 0x37e   : > { %v1958_v13 = vperm.slane %v1952_v4, %v6653_v51  ;;  %v1962_v9 = vperm.slane %v1954_v6, %v6653_v51  ;;  %v1978_v10 = vsel %vm1281_vm1, %v1946_v52, %v1977_v63  ;;  %v1963_v11 = vrot.slane %v1926_v1, 4 }
 0x37f   : > { %v1999_v49 = vrot.slane %v1982_v5, 4  ;;  %v1986_v12 = vperm.slane %v1978_v10, %v6653_v51  ;;  %v1988_v15 = vsel %vm1281_vm1, %v1987_v7, %v1938_v2  ;;  %v1965_v16 = vrot.slane %v1914_v59, 4 }
 0x380   : > { %v2001_v17 = vrot.slane %v1958_v13, 4  ;;  %v1964_v18 = vsel %vm1281_vm1, %v1963_v11, %v1914_v59  ;;  %v1994_v20 = vperm.slane %v1988_v15, %v6653_v51  ;;  %v2005_v21 = vrot.slane %v1962_v9, 4 }
 0x381   : > { %v2000_v22 = vsel %vm1281_vm1, %v1999_v49, %v1958_v13  ;;  %v2003_v23 = vrot.slane %v1986_v12, 4  ;;  %v1970_v24 = vperm.slane %v1964_v18, %v6653_v51  ;;  %v1966_v25 = vsel %vm1281_vm1, %v1926_v1, %v1965_v16 }
 0x382   : > { %v2015_v26 = vpack.c.bf16 %v2000_v22, %v2000_v22  ;;  %v2002_v27 = vsel %vm1281_vm1, %v1982_v5, %v2001_v17  ;;  %v2007_v29 = vrot.slane %v1994_v20, 4  ;;  %v2006_v38 = vsel %vm1281_vm1, %v1986_v12, %v2005_v21 }
 0x383   : > { %v2016_v43 = vpack.c.bf16 %v2002_v27, %v2002_v27  ;;  %v2004_v45 = vsel %vm1281_vm1, %v2003_v23, %v1962_v9  ;;  %v2018_v44 = vpack.c.bf16 %v2006_v38, %v2006_v38  ;;  %v2009_v46 = vrot.slane %v1970_v24, 4 }
 0x384   : > { %v2293_v47 = vsel %vm2291_vm3, %v2015_v26, 0  ;;  %v2017_v58 = vpack.c.bf16 %v2004_v45, %v2004_v45  ;;  %v2008_v48 = vsel %vm1281_vm1, %v2007_v29, %v1970_v24  ;;  %v1974_v28 = vperm.slane %v1966_v25, %v6653_v51 }
 0x385   : > { %2302 = vmatpush.bf16.msra.mxu0 %v2293_v47  ;;  %v2312_v33 = vsel %vm2291_vm3, %v2016_v43, 0  ;;  %v2019_v50 = vpack.c.bf16 %v2008_v48, %v2008_v48  ;;  %v2350_v39 = vsel %vm2291_vm3, %v2018_v44, 0  ;;  %v2010_v52 = vsel %vm1281_vm1, %v1994_v20, %v2009_v46 }
 0x386   : > { %2321 = vmatpush.bf16.msrb.mxu1 %v2312_v33  ;;  %v2331_v53 = vsel %vm2291_vm3, %v2017_v58, 0  ;;  %2359 = vmatpush.bf16.msra.mxu3 %v2350_v39  ;;  %v2020_v54 = vpack.c.bf16 %v2010_v52, %v2010_v52  ;;  %v1989_v35 = vrot.slane %v1938_v2, 4  ;;  %v2013_v56 = vrot.slane %v1974_v28, 4 }
 0x387   : > { %2340 = vmatpush.bf16.msrb.mxu2 %v2331_v53  ;;  %v2369_v55 = vsel %vm2291_vm3, %v2019_v50, 0 }
 0x388   : > { %v2388_v30 = vsel %vm2291_vm3, %v2020_v54, 0  ;;  %v1990_v57 = vsel %vm1281_vm1, %v1950_v36, %v1989_v35 }
 0x389   : > { %2378 = vmatpush.bf16.msrb.mxu0 %v2369_v55  ;;  %v1998_v34 = vperm.slane %v1990_v57, %v6653_v51 }
 0x38a   : > { %2397 = vmatpush.bf16.msra.mxu1 %v2388_v30 }
 0x38b   : > { %v2011_v41 = vrot.slane %v1998_v34, 4  ;;  %v2014_v40 = vsel %vm1281_vm1, %v1998_v34, %v2013_v56 }
 0x38c   : > { %v2022_v42 = vpack.c.bf16 %v2014_v40, %v2014_v40 }
 0x38d   : > { %v2012_v59 = vsel %vm1281_vm1, %v2011_v41, %v1974_v28 }
 0x38e   : > { %v2021_v60 = vpack.c.bf16 %v2012_v59, %v2012_v59  ;;  %v2426_v62 = vsel %vm2291_vm3, %v2022_v42, 0 }
 0x38f   : > { %2435 = vmatpush.bf16.msrb.mxu3 %v2426_v62 }
 0x390   : > { %v2407_v63 = vsel %vm2291_vm3, %v2021_v60, 0 }
 0x391   : > { %2416 = vmatpush.bf16.msra.mxu2 %v2407_v63 }
 0x3af   : > { %v2242_v1 = vpop.xlane.xlu2 %2241 }
 0x3b0   : > { %5504 = vrcp.f32 %v2242_v1 }
 0x3b6   : > { %v5505_v2 = vpop.eup %5504 }
 0x3b7   : > { %v2272_v36 = vmul.f32 %v5505_v2, %v6904_v32  ;;  %v2251_v4 = vpop.xlane.xlu0 %2250 }
 0x3b8   : > { %5506 = vrcp.f32 %v2251_v4 }
 0x3b9   : > { %v2280_v5 = vpack.c.bf16 %v2272_v36, %v2272_v36  ;;  %v2248_v6 = vpop.xlane.xlu1 %2247 }
 0x3ba   : > { %5508 = vrcp.f32 %v2248_v6 }
 0x3bb   : > { %5029 = vmatmul.msk.bf16.vlgmr.msra.gmra.mxu0 %vm2023_vm2, %v2280_v5 }
 0x3be   : > { %v5507_v7 = vpop.eup %5506 }
 0x3bf   : > { %v2275_v13 = vmul.f32 %v5507_v7, %v6909_v14 }
 0x3c0   : > { %v5509_v9 = vpop.eup %5508 }
 0x3c1   : > { %v2283_v10 = vpack.c.bf16 %v2275_v13, %v2275_v13  ;;  %v2274_v11 = vmul.f32 %v5509_v9, %v6913_v61  ;;  %v2245_v49 = vpop.xlane.xlu1 %2244 }
 0x3c2   : > { %5510 = vrcp.f32 %v2245_v49 }
 0x3c3   : > { %v2282_v12 = vpack.c.bf16 %v2274_v11, %v2274_v11  ;;  %5032 = vmatmul.msk.bf16.vlgmr.msra.gmra.mxu3 %vm2023_vm2, %v2283_v10 }
 0x3c5   : > { %5031 = vmatmul.msk.bf16.vlgmr.msrb.gmra.mxu2 %vm2023_vm2, %v2282_v12 }
 0x3c8   : > { %v5511_v32 = vpop.eup %5510 }
 0x3c9   : > { %v2273_v15 = vmul.f32 %v5511_v32, %v6918_v3  ;;  %v2254_v16 = vpop.xlane.xlu1 %2253  ;;  %v2260_v17 = vpop.xlane.xlu0 %2259 }
 0x3ca   : > { %5512 = vrcp.f32 %v2254_v16 }
 0x3cb   : > { %5514 = vrcp.f32 %v2260_v17  ;;  %v2281_v18 = vpack.c.bf16 %v2273_v15, %v2273_v15 }
 0x3cd   : > { %5030 = vmatmul.msk.bf16.vlgmr.msrb.gmra.mxu1 %vm2023_vm2, %v2281_v18 }
 0x3d0   : > { %v5513_v14 = vpop.eup %5512 }
 0x3d1   : > { %v5515_v20 = vpop.eup %5514  ;;  %v2276_v61 = vmul.f32 %v5513_v14, %v6922_v0  ;;  %v2257_v21 = vpop.xlane.xlu0 %2256 }
 0x3d2   : > { %v2278_v22 = vmul.f32 %v5515_v20, %v6924_v8  ;;  %5516 = vrcp.f32 %v2257_v21 }
 0x3d3   : > { %v2284_v23 = vpack.c.bf16 %v2276_v61, %v2276_v61 }
 0x3d4   : > { %v2286_v24 = vpack.c.bf16 %v2278_v22, %v2278_v22 }
 0x3d5   : > { %5033 = vmatmul.msk.bf16.vlgmr.msrb.gmra.mxu0 %vm2023_vm2, %v2284_v23 }
 0x3d6   : > { %5035 = vmatmul.msk.bf16.vlgmr.msra.gmra.mxu2 %vm2023_vm2, %v2286_v24 }
 0x3d7   : > { %v2263_v3 = vpop.xlane.xlu2 %2262 }
 0x3d8   : > { %v5517_v25 = vpop.eup %5516  ;;  %5518 = vrcp.f32 %v2263_v3 }
 0x3d9   : > { %v2277_v26 = vmul.f32 %v5517_v25, %v6930_v19 }
 0x3db   : > { %v2285_v27 = vpack.c.bf16 %v2277_v26, %v2277_v26 }
 0x3dd   : > { %5034 = vmatmul.msk.bf16.vlgmr.msra.gmra.mxu1 %vm2023_vm2, %v2285_v27 }
 0x3de   : > { %v5519_v29 = vpop.eup %5518 }
 0x3df   : > { %v2279_v0 = vmul.f32 %v5519_v29, %v6942_v37 }
 0x3e1   : > { %v2287_v38 = vpack.c.bf16 %v2279_v0, %v2279_v0 }
 0x3e3   : > { %5036 = vmatmul.msk.bf16.vlgmr.msrb.gmra.mxu3 %vm2023_vm2, %v2287_v38 }
 0x438   : > { %v2304_v8 = vpop.f32.mrf.mxu0 }
 0x439   : > { %v2443_v39 = vrot.slane %v2304_v8, 4 }
 0x440   : > { %v2306_v43 = vpop.f32.mrf.mxu0 }
 0x446   : > { %v2361_v45 = vpop.f32.mrf.mxu3 }
 0x447   : > { %v2453_v19 = vrot.slane %v2361_v45, 4 }
 0x448   : > { %v2342_v44 = vpop.f32.mrf.mxu2 }
 0x449   : > { %v2441_v33 = vrot.slane %v2342_v44, 4  ;;  %v2444_v35 = vsel %vm1281_vm1, %v2342_v44, %v2443_v39 }
 0x44a   : > { %v2323_v46 = vpop.f32.mrf.mxu1  ;;  %v2452_v57 = vperm.slane %v2444_v35, %v6640_v31 }
 0x44b   : > { %v2455_v50 = vrot.slane %v2323_v46, 4  ;;  %v2442_v53 = vsel %vm1281_vm1, %v2441_v33, %v2304_v8  ;;  %v2454_v55 = vsel %vm1281_vm1, %v2453_v19, %v2323_v46 }
 0x44c   : > { %v2448_v30 = vperm.slane %v2442_v53, %v6640_v31  ;;  %v2460_v34 = vperm.slane %v2454_v55, %v6640_v31  ;;  %v2503_v63 = vrot.slane %v2452_v57, 4 }
 0x44d   : > { %v2456_v56 = vsel %vm1281_vm1, %v2361_v45, %v2455_v50 }
 0x44e   : > { %v2363_v47 = vpop.f32.mrf.mxu3  ;;  %v2464_v41 = vperm.slane %v2456_v56, %v6640_v31  ;;  %v2491_v59 = vrot.slane %v2448_v30, 4  ;;  %v2489_v1 = vrot.slane %v2460_v34, 4 }
 0x450   : > { %v2344_v58 = vpop.f32.mrf.mxu2  ;;  %v2501_v2 = vrot.slane %v2464_v41, 4  ;;  %v2504_v5 = vsel %vm1281_vm1, %v2464_v41, %v2503_v63  ;;  %v2492_v7 = vsel %vm1281_vm1, %v2460_v34, %v2491_v59  ;;  %v2490_v9 = vsel %vm1281_vm1, %v2489_v1, %v2448_v30 }
 0x451   : > { %v2512_v12 = vperm.slane %v2504_v5, %v6653_v51  ;;  %v2500_v16 = vperm.slane %v2492_v7, %v6653_v51  ;;  %v2496_v14 = vperm.slane %v2490_v9, %v6653_v51 }
 0x452   : > { %v2325_v48 = vpop.f32.mrf.mxu1  ;;  %v2380_v28 = vpop.f32.mrf.mxu0  ;;  %v2502_v10 = vsel %vm1281_vm1, %v2501_v2, %v2452_v57 }
 0x453   : > { %v2467_v40 = vrot.slane %v2380_v28, 4  ;;  %v2508_v20 = vperm.slane %v2502_v10, %v6653_v51  ;;  %v2551_v3 = vrot.slane %v2512_v12, 4  ;;  %v2543_v26 = vrot.slane %v2500_v16, 4 }
 0x454   : > { %v2539_v44 = vrot.slane %v2496_v14, 4 }
 0x455   : > { %v2547_v46 = vrot.slane %v2508_v20, 4 }
 0x459   : > { %v2418_v52 = vpop.f32.mrf.mxu2 }
 0x45a   : > { %v2382_v37 = vpop.f32.mrf.mxu0  ;;  %v2399_v54 = vpop.f32.mrf.mxu1  ;;  %v2465_v42 = vrot.slane %v2418_v52, 4  ;;  %v2468_v60 = vsel %vm1281_vm1, %v2418_v52, %v2467_v40 }
 0x45b   : > { %v2476_v6 = vperm.slane %v2468_v60, %v6640_v31  ;;  %v2479_v13 = vrot.slane %v2399_v54, 4 }
 0x45c   : > { %v2466_v4 = vsel %vm1281_vm1, %v2465_v42, %v2380_v28 }
 0x45d   : > { %v2472_v11 = vperm.slane %v2466_v4, %v6640_v31  ;;  %v2527_v17 = vrot.slane %v2476_v6, 4 }
 0x45f   : > { %v2515_v21 = vrot.slane %v2472_v11, 4 }
 0x461   : > { %v2420_v62 = vpop.f32.mrf.mxu2 }
 0x462   : > { %v2401_v36 = vpop.f32.mrf.mxu1 }
 0x466   : > { %v2437_v49 = vpop.f32.mrf.mxu3 }
 0x467   : > { %v2477_v32 = vrot.slane %v2437_v49, 4  ;;  %v2480_v15 = vsel %vm1281_vm1, %v2437_v49, %v2479_v13 }
 0x468   : > { %v2488_v18 = vperm.slane %v2480_v15, %v6640_v31 }
 0x469   : > { %v2478_v61 = vsel %vm1281_vm1, %v2477_v32, %v2399_v54 }
 0x46a   : > { %v2484_v22 = vperm.slane %v2478_v61, %v6640_v31  ;;  %v2525_v23 = vrot.slane %v2488_v18, 4  ;;  %v2528_v24 = vsel %vm1281_vm1, %v2488_v18, %v2527_v17 }
 0x46b   : > { %v2536_v25 = vperm.slane %v2528_v24, %v6653_v51 }
 0x46c   : > { %v2513_v27 = vrot.slane %v2484_v22, 4  ;;  %v2516_v29 = vsel %vm1281_vm1, %v2484_v22, %v2515_v21  ;;  %v2526_v0 = vsel %vm1281_vm1, %v2525_v23, %v2476_v6 }
 0x46d   : > { %v2524_v38 = vperm.slane %v2516_v29, %v6653_v51  ;;  %v2532_v8 = vperm.slane %v2526_v0, %v6653_v51  ;;  %v2549_v43 = vrot.slane %v2536_v25, 4  ;;  %v2552_v45 = vsel %vm1281_vm1, %v2536_v25, %v2551_v3 }
 0x46e   : > { %v2514_v47 = vsel %vm1281_vm1, %v2513_v27, %v2472_v11  ;;  %v2439_v58 = vpop.f32.mrf.mxu3  ;;  %v2589_v52 = vrot.slane %v2552_v45, 4 }
 0x46f   : > { %v2520_v48 = vperm.slane %v2514_v47, %v6653_v51  ;;  %v2541_v28 = vrot.slane %v2524_v38, 4  ;;  %v2544_v33 = vsel %vm1281_vm1, %v2524_v38, %v2543_v26  ;;  %v2545_v19 = vrot.slane %v2532_v8, 4 }
 0x470   : > { %v2548_v50 = vsel %vm1281_vm1, %v2532_v8, %v2547_v46  ;;  %v2550_v39 = vsel %vm1281_vm1, %v2549_v43, %v2512_v12  ;;  %v2565_v53 = vrot.slane %v2544_v33, 4 }
 0x471   : > { %v2537_v37 = vrot.slane %v2520_v48, 4  ;;  %v2542_v54 = vsel %vm1281_vm1, %v2541_v28, %v2500_v16  ;;  %v2546_v35 = vsel %vm1281_vm1, %v2545_v19, %v2508_v20  ;;  %v2577_v55 = vrot.slane %v2550_v39, 4 }
 0x472   : > { %v2579_v56 = vrot.slane %v2546_v35, 4  ;;  %v2591_v30 = vrot.slane %v2548_v50, 4  ;;  %v2540_v57 = vsel %vm1281_vm1, %v2520_v48, %v2539_v44  ;;  %v2553_v34 = vrot.slane %v2542_v54, 4 }
 0x473   : > { %v2538_v41 = vsel %vm1281_vm1, %v2537_v37, %v2496_v14  ;;  %v2566_v40 = vsel %vm1281_vm1, %v2565_v53, %v2540_v57  ;;  %v2567_v42 = vrot.slane %v2540_v57, 4  ;;  %v2578_v59 = vsel %vm1281_vm1, %v2577_v55, %v2546_v35  ;;  %v5199_v57 = vld [vmem:[#allocation7 + $0x10] sm:$0xff] }
 0x474   : > { %v2554_v60 = vsel %vm1281_vm1, %v2553_v34, %v2538_v41  ;;  %v2555_v62 = vrot.slane %v2538_v41, 4  ;;  %v2572_v63 = vperm.slane %v2566_v40, %v6640_v31  ;;  %v2584_v1 = vperm.slane %v2578_v59, %v6640_v31  ;;  %v5198_v34 = vld [vmem:[#allocation7 + $0x8] sm:$0xff]  ;;  %v5197_v41 = vld [vmem:[#allocation7] sm:$0xff] }
 0x475   : > { %v2560_v2 = vperm.slane %v2554_v60, %v6640_v31  ;;  %v2590_v36 = vsel %vm1281_vm1, %v2589_v52, %v2548_v50  ;;  %v2568_v4 = vsel %vm1281_vm1, %v2544_v33, %v2567_v42  ;;  %v2580_v5 = vsel %vm1281_vm1, %v2550_v39, %v2579_v56 }
 0x476   : > { %v2596_v6 = vperm.slane %v2590_v36, %v6640_v31  ;;  %v2627_v7 = vrot.slane %v2584_v1, 4  ;;  %v2601_v13 = vrot.slane %v2572_v63, 4  ;;  %v2556_v9 = vsel %vm1281_vm1, %v2542_v54, %v2555_v62 }
 0x477   : > { %v2603_v10 = vrot.slane %v2560_v2, 4  ;;  %v2564_v11 = vperm.slane %v2556_v9, %v6640_v31  ;;  %v2576_v49 = vperm.slane %v2568_v4, %v6640_v31  ;;  %v2588_v12 = vperm.slane %v2580_v5, %v6640_v31 }
 0x478   : > { %v2628_v32 = vsel %vm1281_vm1, %v2596_v6, %v2627_v7  ;;  %v2602_v15 = vsel %vm1281_vm1, %v2601_v13, %v2560_v2  ;;  %v2625_v16 = vrot.slane %v2596_v6, 4  ;;  %v2592_v17 = vsel %vm1281_vm1, %v2552_v45, %v2591_v30  ;;  %v5200_v30 = vld [vmem:[#allocation7 + $0x18] sm:$0xff] }
 0x479   : > { %v2604_v18 = vsel %vm1281_vm1, %v2572_v63, %v2603_v10  ;;  %v2636_v14 = vperm.slane %v2628_v32, %v6653_v51  ;;  %v2608_v20 = vperm.slane %v2602_v15, %v6653_v51  ;;  %v2600_v61 = vperm.slane %v2592_v17, %v6640_v31  ;;  %2750 = vmatpush.bf16.msra.mxu0 %v5200_v30  ;;  %v5474_v10 = vld [vmem:[#allocation9] ss:$0 sm:$0xff] }
 0x47a   : > { %v2612_v21 = vperm.slane %v2604_v18, %v6653_v51  ;;  %v2626_v22 = vsel %vm1281_vm1, %v2625_v16, %v2584_v1  ;;  %v2615_v23 = vrot.slane %v2564_v11, 4  ;;  %v2639_v24 = vrot.slane %v2588_v12, 4  ;;  %v5208_v18 = vld [vmem:[#allocation16 + $0x18] sm:$0xff] }
 0x47b   : > { %v2653_v3 = vrot.slane %v2636_v14, 4  ;;  %v2632_v25 = vperm.slane %v2626_v22, %v6653_v51  ;;  %v2651_v26 = vrot.slane %v2608_v20, 4  ;;  %v2613_v27 = vrot.slane %v2576_v49, 4  ;;  %2898 = vmatpush.bf16.msrb.mxu2 %v5208_v18 }
 0x47c   : > { %v2655_v29 = vrot.slane %v2612_v21, 4  ;;  %v2640_v0 = vsel %vm1281_vm1, %v2600_v61, %v2639_v24  ;;  %v2637_v38 = vrot.slane %v2600_v61, 4  ;;  %v2616_v44 = vsel %vm1281_vm1, %v2576_v49, %v2615_v23 }
 0x47d   : > { %v2654_v8 = vsel %vm1281_vm1, %v2653_v3, %v2612_v21  ;;  %v2649_v43 = vrot.slane %v2632_v25, 4  ;;  %v2652_v45 = vsel %vm1281_vm1, %v2632_v25, %v2651_v26  ;;  %v2648_v47 = vperm.slane %v2640_v0, %v6653_v51  ;;  %2751 = vmatpush.bf16.msra.mxu0 %v5199_v57  ;;  %v5206_v0 = vld [vmem:[#allocation16 + $0x8] sm:$0xff] }
 0x47e   : > { %2670 = vrot.lane.b32.xlu1 %v2654_v8, %s7822_s10  ;;  %2666 = vrot.lane.b32.xlu2 %v2652_v45, %s6270_s9  ;;  %v2656_v46 = vsel %vm1281_vm1, %v2636_v14, %v2655_v29  ;;  %v2614_v58 = vsel %vm1281_vm1, %v2613_v27, %v2564_v11  ;;  %v2638_v28 = vsel %vm1281_vm1, %v2637_v38, %v2588_v12  ;;  %s7823_s10 = smov 56   ;;  %v5560_v12 = vld [vmem:[%s6621_s7] sm:$0xff]  ;;  %v6276_v17 = vmov 64.0   ;;  %v5205_v8 = vld [vmem:[#allocation16] sm:$0xff]  ;;  %v5204_v45 = vld [vmem:[#allocation13 + $0x18] sm:$0xff] }
 0x47f   : > { %2674 = vrot.lane.b32.xlu0 %v2656_v46, %s6271_s2  ;;  %v2620_v48 = vperm.slane %v2614_v58, %v6653_v51  ;;  %v2650_v33 = vsel %vm1281_vm1, %v2649_v43, %v2608_v20  ;;  %v2644_v19 = vperm.slane %v2638_v28, %v6653_v51  ;;  %v2624_v50 = vperm.slane %v2616_v44, %v6653_v51  ;;  %v5207_v14 = vld [vmem:[#allocation16 + $0x10] sm:$0xff]  ;;  %v5202_v46 = vld [vmem:[#allocation13 + $0x8] sm:$0xff]  ;;  %v5201_v28 = vld [vmem:[#allocation13] sm:$0xff] }
 0x480   : > { %v2661_v39 = vrot.slane %v2648_v47, 4  ;;  %5520 = vrcp.f32 %v6276_v17  ;;  %2899 = vmatpush.bf16.msrb.mxu2 %v5207_v14  ;;  %2845 = vmatpush.bf16.msrb.mxu1 %v5204_v45  ;;  %v5203_v44 = vld [vmem:[#allocation13 + $0x10] sm:$0xff] }
 0x481   : > { %v2657_v52 = vrot.slane %v2644_v19, 4  ;;  %v2659_v53 = vrot.slane %v2620_v48, 4  ;;  %v2663_v55 = vrot.slane %v2624_v50, 4  ;;  %2752 = vmatpush.bf16.msra.mxu0 %v5198_v34  ;;  %v5477_v34 = vld [vmem:[#allocation18] ss:$0 sm:$0xff] }
 0x482   : > { %v2662_v37 = vsel %vm1281_vm1, %v2661_v39, %v2624_v50 }
 0x483   : > { %v2658_v54 = vsel %vm1281_vm1, %v2657_v52, %v2620_v48  ;;  %v2660_v35 = vsel %vm1281_vm1, %v2644_v19, %v2659_v53  ;;  %v2664_v56 = vsel %vm1281_vm1, %v2648_v47, %v2663_v55 }
 0x484   : > { %2900 = vmatpush.bf16.msrb.mxu2 %v5206_v0  ;;  %2846 = vmatpush.bf16.msrb.mxu1 %v5203_v44 }
 0x485   : > { %2753 = vmatpush.bf16.msra.mxu0 %v5197_v41 }
 0x486   : > { %2686 = vrot.lane.b32.xlu1 %v2662_v37, %s7824_s21  ;;  %2678 = vrot.lane.b32.xlu2 %v2658_v54, %s6273_s8  ;;  %v5521_v20 = vpop.eup %5520  ;;  %s7855_s21 = sld [smem:[#allocation51_spill]]  ;;  %v5475_v37 = vld [vmem:[#allocation10] ss:$0 sm:$0xff] }
 0x487   : > { %2682 = vrot.lane.b32.xlu0 %v2660_v35, %s7825_s0  ;;  %v2766_v61 = vmul.f32 64.0, %v5521_v20  ;;  %vm2770_vm10 = vweird.f32 %v5521_v20  ;;  %v5476_v35 = vld [vmem:[#allocation12] ss:$0 sm:$0xff] }
 0x488   : > { %2901 = vmatpush.bf16.msrb.mxu2 %v5205_v8  ;;  %2847 = vmatpush.bf16.msrb.mxu1 %v5202_v46 }
 0x489   : > { %v2767_v21 = vsub.f32 1.0, %v2766_v61 }
 0x48b   : > { %v2768_v22 = vmul.f32 %v5521_v20, %v2767_v21 }
 0x48c   : > { %s1160_s0 = scalar_lea.vmem %s7855_s21, %s6615_s1  ;;  %2848 = vmatpush.bf16.msrb.mxu1 %v5201_v28  ;;  %s7862_s21 = sld [smem:[#allocation63_spill]] }
 0x48d   : > { %v2769_v23 = vadd.f32 %v5521_v20, %v2768_v22  ;;  %v1167_v38 = vld [vmem:[%s1160_s0] sm:$0xff] }
 0x48e   : > { %2690 = vrot.lane.b32.xlu2 %v2664_v56, %s7823_s10  ;;  %v2854_v43 = vpack.c.bf16 %v1167_v38, %v1167_v38 }
 0x48f   : > { %v7147_v24 = vsel %vm2770_vm10, %v5521_v20, %v2769_v23 }
 0x490   : > { %5087 = vmatmul.msk.bf16.vlgmr.msrb.gmra.mxu2 %vm1228_vm0, %v2854_v43 }
 0x4d8   : > { %v2667_v40 = vpop.permute.xlu2 %2666 }
 0x4d9   : > { %v2693_v62 = vsel %vm2023_vm2, %v2650_v33, %v2667_v40 }
 0x4e0   : > { %v2679_v59 = vpop.permute.xlu2 %2678 }
 0x4e8   : > { %v2691_v6 = vpop.permute.xlu2 %2690 }
 0x4f0   : > { %v2671_v42 = vpop.permute.xlu1 %2670 }
 0x4f1   : > { %v2675_v60 = vpop.permute.xlu0 %2674  ;;  %v2695_v63 = vsel %vm2694_vm4, %v2693_v62, %v2671_v42 }
 0x4f2   : > { %v2697_v1 = vsel %vm2696_vm5, %v2695_v63, %v2675_v60 }
 0x4f3   : > { %v2699_v36 = vsel %vm2698_vm6, %v2697_v1, %v2679_v59  ;;  %v5478_v59 = vld [vmem:[#allocation15] ss:$0 sm:$0xff] }
 0x4f8   : > { %v2687_v4 = vpop.permute.xlu1 %2686 }
 0x4f9   : > { %v2683_v2 = vpop.permute.xlu0 %2682 }
 0x4fa   : > { %v2701_v5 = vsel %vm2700_vm7, %v2699_v36, %v2683_v2 }
 0x4fb   : > { %v2703_v7 = vsel %vm2702_vm8, %v2701_v5, %v2687_v4 }
 0x4fc   : > { %v2705_v13 = vsel %vm2704_vm9, %v2703_v7, %v2691_v6 }
 0x4fd   : > { %v2706_v9 = vpack.c.bf16 %v2705_v13, %v2705_v13 }
 0x4ff   : > { %5053 = vmatmul.msk.bf16.vlgmr.msra.gmra.mxu0 %vm1228_vm0, %v2706_v9 }
 0x513   : > { %v2903_v41 = vpop.f32.mrf.mxu2 }
 0x514   : > { %v7162_v40 = vadd.f32 %v5477_v34, %v2903_v41 }
 0x516   : > { %3168 = vrot.lane.b32.xlu2 %v7162_v40, %s6264_s3  ;;  %v3185_v13 = vrot.slane %v7162_v40, 4 }
 0x51b   : > { %v2905_v42 = vpop.f32.mrf.mxu2 }
 0x570   : > { %v7178_v2 = vpop.permute.xlu2 %3168 }
 0x57c   : > { %v2755_v11 = vpop.f32.mrf.mxu0 }
 0x57d   : > { %v2756_v49 = vadd.f32 %v5474_v10, %v2755_v11  ;;  %v3195_v10 = vrot.slane %v7178_v2, 4 }
 0x57f   : > { %v2759_v32 = vadd.f32 %v5560_v12, %v2756_v49 }
 0x581   : > { %v2762_v15 = vsel %vm1228_vm0, %v2759_v32, 0.0 }
 0x582   : > { %2763 = vadd.xlane.f32.xlu0 %v2762_v15 }
 0x584   : > { %v2757_v16 = vpop.f32.mrf.mxu0 }
 0x596   : > { %3174 = vrot.lane.b32.xlu0 %v7162_v40, %s6265_s28 }
 0x5f5   : > { %v2764_v3 = vpop.xlane.xlu0 %2763 }
 0x5f6   : > { %v2772_v25 = vmul.f32 %v7147_v24, %v2764_v3 }
 0x5f8   : > { %v2773_v26 = vsub.f32 %v2759_v32, %v2772_v25 }
 0x5fa   : > { %v2774_v27 = vmul.f32 %v2773_v26, %v2773_v26 }
 0x5fc   : > { %v2775_v29 = vsel %vm1228_vm0, %v2774_v27, 0.0 }
 0x5fd   : > { %2776 = vadd.xlane.f32.xlu1 %v2775_v29 }
 0x608   : > { %v7195_v12 = vpop.permute.xlu0 %3174 }
 0x609   : > { %v3221_v20 = vrot.slane %v7195_v12, 4 }
 0x616   : > { %3180 = vrot.lane.b32.xlu1 %v7162_v40, %s6262_s6 }
 0x670   : > { %v2777_v47 = vpop.xlane.xlu1 %2776 }
 0x671   : > { %v2778_v58 = vmul.f32 %v2777_v47, %v7147_v24 }
 0x673   : > { %v2779_v48 = vadd.f32 1e-05, %v2778_v58 }
 0x675   : > { %5522 = vrsqrt.f32 %v2779_v48  ;;  %vm2786_vm12 = vweird.f32 %v2779_v48 }
 0x67b   : > { %v5523_v33 = vpop.eup %5522 }
 0x67c   : > { %v2781_v19 = vmul.f32 %v5523_v33, %v2779_v48  ;;  %vm2787_vm11 = vweird.f32 %v5523_v33 }
 0x67d   : > { %vm2788_vm13 = vmor %vm2786_vm12, %vm2787_vm11 }
 0x67e   : > { %v2782_v50 = vmul.f32 %v5523_v33, %v2781_v19 }
 0x680   : > { %v2783_v39 = vmul.f32 0.5, %v2782_v50 }
 0x682   : > { %v2784_v52 = vsub.f32 1.5, %v2783_v39 }
 0x684   : > { %v2785_v53 = vmul.f32 %v5523_v33, %v2784_v52 }
 0x686   : > { %v2789_v54 = vsel %vm2788_vm13, %v5523_v33, %v2785_v53 }
 0x687   : > { %v2790_v55 = vmul.f32 %v2789_v54, %v2773_v26 }
 0x688   : > { %v7189_v9 = vpop.permute.xlu1 %3180 }
 0x689   : > { %v2794_v56 = vmul.f32 %v5475_v37, %v2790_v55  ;;  %v3219_v16 = vrot.slane %v7189_v9, 4  ;;  %v3222_v0 = vsel %vm1281_vm1, %v7189_v9, %v3221_v20 }
 0x68a   : > { %v3230_v58 = vperm.slane %v3222_v0, %v6640_v31 }
 0x68b   : > { %v7157_v30 = vadd.f32 %v5476_v35, %v2794_v56  ;;  %v3220_v25 = vsel %vm1281_vm1, %v3219_v16, %v7195_v12 }
 0x68c   : > { %v3226_v8 = vperm.slane %v3220_v25, %v6640_v31  ;;  %v3267_v42 = vrot.slane %v3230_v58, 4 }
 0x68d   : > { %v2801_v57 = vpack.c.bf16 %v7157_v30, %v7157_v30 }
 0x68e   : > { %v3255_v53 = vrot.slane %v3226_v8, 4 }
 0x68f   : > { %5070 = vmatmul.msk.bf16.vlgmr.msrb.gmra.mxu1 %vm1228_vm0, %v2801_v57 }
 0x70c   : > { %v2850_v60 = vpop.f32.mrf.mxu1 }
 0x70d   : > { %v2851_v62 = vadd.f32 %v5478_v59, %v2850_v60 }
 0x70f   : > { %2926 = vrot.lane.b32.xlu0 %v2851_v62, %s6262_s6  ;;  %v5433_v63 = vpack.i.bf16 %v2851_v62, %v7162_v40  ;;  %v2931_v27 = vrot.slane %v2851_v62, 4 }
 0x711   : > { %5434 = vrot.lane.b32.xlu2 %v5433_v63, %s6263_s5  ;;  %s7858_s5 = smov 40  }
 0x714   : > { %v2852_v1 = vpop.f32.mrf.mxu1 }
 0x719   : > { %5439 = vrot.lane.b32.xlu2 %v5433_v63, %s6261_s11  ;;  %s7856_s11 = sld [smem:[#allocation54_spill]] }
 0x71f   : > { %s2799_s6 = scalar_lea.vmem %s7856_s11, %s6423_s4  ;;  %s7857_s4 = smov 16  }
 0x721   : > { %5444 = vrot.lane.b32.xlu2 %v5433_v63, %s6259_s27 }
 0x729   : > { %5449 = vrot.lane.b32.xlu2 %v5433_v63, %s6260_s29 }
 0x731   : > { %2914 = vrot.lane.b32.xlu2 %v2851_v62, %s6264_s3  ;;  %s7859_s3 = smov 48  }
 0x739   : > { %2920 = vrot.lane.b32.xlu2 %v2851_v62, %s6265_s28  ;;  %s7860_s28 = smov 56  }
 0x76b   : > { %v7180_v36 = vpop.permute.xlu2 %5434 }
 0x76c   : > { %v7183_v4 = vunpack.i.l.bf16 %v7180_v36  ;;  %v5437_v50 = vunpack.i.h.bf16 %v7180_v36 }
 0x76e   : > { %v3197_v7 = vrot.slane %v7183_v4, 4  ;;  %v3196_v32 = vsel %vm1281_vm1, %v3195_v10, %v7183_v4  ;;  %v2943_v1 = vrot.slane %v5437_v50, 4 }
 0x76f   : > { %v3202_v61 = vperm.slane %v3196_v32, %v6640_v31 }
 0x770   : > { %v3198_v17 = vsel %vm1281_vm1, %v7178_v2, %v3197_v7 }
 0x771   : > { %v3206_v22 = vperm.slane %v3198_v17, %v6640_v31  ;;  %v3231_v38 = vrot.slane %v3202_v61, 4 }
 0x773   : > { %v5440_v5 = vpop.permute.xlu2 %5439  ;;  %v3243_v45 = vrot.slane %v3206_v22, 4 }
 0x774   : > { %v7185_v6 = vunpack.i.l.bf16 %v5440_v5  ;;  %v5442_v15 = vunpack.i.h.bf16 %v5440_v5 }
 0x776   : > { %v3183_v11 = vrot.slane %v7185_v6, 4  ;;  %v3186_v49 = vsel %vm1281_vm1, %v7185_v6, %v3185_v13  ;;  %v2929_v23 = vrot.slane %v5442_v15, 4  ;;  %v2932_v46 = vsel %vm1281_vm1, %v5442_v15, %v2931_v27 }
 0x777   : > { %v3194_v14 = vperm.slane %v3186_v49, %v6640_v31  ;;  %v7229_v52 = vperm.slane %v2932_v46, %v6640_v31 }
 0x778   : > { %v3184_v18 = vsel %vm1281_vm1, %v3183_v11, %v7162_v40  ;;  %v2930_v44 = vsel %vm1281_vm1, %v2929_v23, %v2851_v62 }
 0x779   : > { %v3190_v3 = vperm.slane %v3184_v18, %v6640_v31  ;;  %v3245_v29 = vrot.slane %v3194_v14, 4  ;;  %v3244_v28 = vsel %vm1281_vm1, %v3243_v45, %v3194_v14  ;;  %v7226_v39 = vperm.slane %v2930_v44, %v6640_v31 }
 0x77a   : > { %v3250_v34 = vperm.slane %v3244_v28, %v6653_v51  ;;  %v2991_v10 = vrot.slane %v7229_v52, 4 }
 0x77b   : > { %v5445_v21 = vpop.permute.xlu2 %5444  ;;  %v3233_v47 = vrot.slane %v3190_v3, 4  ;;  %v3232_v48 = vsel %vm1281_vm1, %v3231_v38, %v3190_v3  ;;  %v3246_v33 = vsel %vm1281_vm1, %v3206_v22, %v3245_v29  ;;  %v2979_v13 = vrot.slane %v7226_v39, 4 }
 0x77c   : > { %v7211_v26 = vunpack.i.l.bf16 %v5445_v21  ;;  %v5447_v19 = vunpack.i.h.bf16 %v5445_v21  ;;  %v7236_v57 = vperm.slane %v3232_v48, %v6653_v51  ;;  %v3254_v41 = vperm.slane %v3246_v33, %v6653_v51 }
 0x77d   : > { %v3234_v54 = vsel %vm1281_vm1, %v3202_v61, %v3233_v47  ;;  %v3289_v32 = vrot.slane %v3250_v34, 4 }
 0x77e   : > { %v5458_v43 = vpack.i.bf16 %v7211_v26, %v7185_v6  ;;  %v3209_v35 = vrot.slane %v7211_v26, 4  ;;  %v2955_v59 = vrot.slane %v5447_v19, 4  ;;  %v3242_v36 = vperm.slane %v3234_v54, %v6653_v51 }
 0x77f   : > { %v3281_v18 = vrot.slane %v7236_v57, 4  ;;  %v3293_v14 = vrot.slane %v3254_v41, 4 }
 0x780   : > { %v3285_v21 = vrot.slane %v3242_v36, 4 }
 0x781   : > { %v2927_v22 = vpop.permute.xlu0 %2926 }
 0x782   : > { %v2965_v28 = vrot.slane %v2927_v22, 4 }
 0x783   : > { %v5450_v37 = vpop.permute.xlu2 %5449 }
 0x784   : > { %v5452_v55 = vunpack.i.h.bf16 %v5450_v37  ;;  %v7233_v56 = vunpack.i.l.bf16 %v5450_v37 }
 0x786   : > { %v2953_v60 = vrot.slane %v5452_v55, 4  ;;  %v3207_v62 = vrot.slane %v7233_v56, 4  ;;  %v3210_v63 = vsel %vm1281_vm1, %v7233_v56, %v3209_v35  ;;  %v5463_v7 = vpack.i.bf16 %v7178_v2, %v7233_v56 }
 0x787   : > { %v3218_v5 = vperm.slane %v3210_v63, %v6640_v31  ;;  %v2956_v11 = vsel %vm1281_vm1, %v5452_v55, %v2955_v59 }
 0x788   : > { %v3208_v49 = vsel %vm1281_vm1, %v3207_v62, %v7211_v26  ;;  %v2954_v15 = vsel %vm1281_vm1, %v2953_v60, %v5447_v19  ;;  %v7258_v23 = vperm.slane %v2956_v11, %v6640_v31 }
 0x789   : > { %v3214_v16 = vperm.slane %v3208_v49, %v6640_v31  ;;  %v3268_v17 = vsel %vm1281_vm1, %v3267_v42, %v3218_v5  ;;  %v3269_v20 = vrot.slane %v3218_v5, 4  ;;  %v2960_v29 = vperm.slane %v2954_v15, %v6640_v31 }
 0x78a   : > { %v3274_v61 = vperm.slane %v3268_v17, %v6653_v51  ;;  %v3015_v37 = vrot.slane %v7258_v23, 4 }
 0x78b   : > { %v3256_v3 = vsel %vm1281_vm1, %v3255_v53, %v3214_v16  ;;  %v3257_v25 = vrot.slane %v3214_v16, 4  ;;  %v2915_v27 = vpop.permute.xlu2 %2914  ;;  %v3270_v38 = vsel %vm1281_vm1, %v3230_v58, %v3269_v20  ;;  %v3003_v35 = vrot.slane %v2960_v29, 4 }
 0x78c   : > { %v3262_v0 = vperm.slane %v3256_v3, %v6653_v51  ;;  %v3287_v45 = vrot.slane %v3274_v61, 4  ;;  %v3278_v46 = vperm.slane %v3270_v38, %v6653_v51  ;;  %v7267_v47 = vsel %vm1281_vm1, %v3274_v61, %v3289_v32 }
 0x78d   : > { %v3258_v44 = vsel %vm1281_vm1, %v3226_v8, %v3257_v25  ;;  %v2941_v48 = vrot.slane %v2915_v27, 4  ;;  %v2944_v53 = vsel %vm1281_vm1, %v2915_v27, %v2943_v1  ;;  %v3333_v42 = vrot.slane %v7267_v47, 4 }
 0x78e   : > { %v3266_v33 = vperm.slane %v3258_v44, %v6653_v51  ;;  %v7271_v19 = vsel %vm1281_vm1, %v3287_v45, %v3250_v34  ;;  %v3291_v58 = vrot.slane %v3278_v46, 4  ;;  %v7276_v54 = vsel %vm1281_vm1, %v3278_v46, %v3293_v14 }
 0x78f   : > { %v2942_v8 = vsel %vm1281_vm1, %v2941_v48, %v5437_v50  ;;  %v3279_v60 = vrot.slane %v3262_v0, 4  ;;  %v3321_v62 = vrot.slane %v7271_v19, 4  ;;  %v2952_v63 = vperm.slane %v2944_v53, %v6640_v31 }
 0x790   : > { %v3283_v55 = vrot.slane %v3266_v33, 4  ;;  %v2948_v59 = vperm.slane %v2942_v8, %v6640_v31  ;;  %v7282_v34 = vsel %vm1281_vm1, %v3266_v33, %v3285_v21  ;;  %v7287_v1 = vsel %vm1281_vm1, %v3291_v58, %v3254_v41 }
 0x791   : > { %v3331_v5 = vrot.slane %v7276_v54, 4  ;;  %v2989_v32 = vrot.slane %v2952_v63, 4  ;;  %v2992_v15 = vsel %vm1281_vm1, %v2952_v63, %v2991_v10  ;;  %v7306_v10 = vsel %vm1281_vm1, %v3279_v60, %v7236_v57 }
 0x792   : > { %v2977_v50 = vrot.slane %v2948_v59, 4  ;;  %v2980_v11 = vsel %vm1281_vm1, %v2948_v59, %v2979_v13  ;;  %v7294_v17 = vsel %vm1281_vm1, %v3283_v55, %v3242_v36  ;;  %v3000_v41 = vperm.slane %v2992_v15, %v6653_v51 }
 0x793   : > { %v2988_v49 = vperm.slane %v2980_v11, %v6653_v51  ;;  %v2921_v16 = vpop.permute.xlu2 %2920  ;;  %v2990_v13 = vsel %vm1281_vm1, %v2989_v32, %v7229_v52  ;;  %v3319_v36 = vrot.slane %v7287_v1, 4  ;;  %v7312_v27 = vsel %vm1281_vm1, %v3262_v0, %v3281_v18 }
 0x794   : > { %v2978_v14 = vsel %vm1281_vm1, %v2977_v50, %v7226_v39  ;;  %v2966_v20 = vsel %vm1281_vm1, %v2965_v28, %v2921_v16  ;;  %v2967_v61 = vrot.slane %v2921_v16, 4  ;;  %v2996_v39 = vperm.slane %v2990_v13, %v6653_v51 }
 0x795   : > { %v2984_v21 = vperm.slane %v2978_v14, %v6653_v51  ;;  %v2972_v3 = vperm.slane %v2966_v20, %v6640_v31  ;;  %v3295_v44 = vrot.slane %v7294_v17, 4  ;;  %v3332_v57 = vsel %vm1281_vm1, %v3331_v5, %v7267_v47 }
 0x796   : > { %v2968_v25 = vsel %vm1281_vm1, %v2927_v22, %v2967_v61  ;;  %v3031_v46 = vrot.slane %v2988_v49, 4  ;;  %v3039_v48 = vrot.slane %v3000_v41, 4  ;;  %v3035_v55 = vrot.slane %v2996_v39, 4 }
 0x797   : > { %v2976_v38 = vperm.slane %v2968_v25, %v6640_v31  ;;  %v3001_v45 = vrot.slane %v2972_v3, 4  ;;  %v3004_v52 = vsel %vm1281_vm1, %v2972_v3, %v3003_v35  ;;  %v3027_v33 = vrot.slane %v2984_v21, 4 }
 0x798   : > { %v3012_v28 = vperm.slane %v3004_v52, %v6653_v51  ;;  %v3296_v63 = vsel %vm1281_vm1, %v3295_v44, %v7306_v10  ;;  %v3307_v16 = vrot.slane %v7282_v34, 4 }
 0x799   : > { %v3002_v22 = vsel %vm1281_vm1, %v3001_v45, %v2960_v29  ;;  %v3013_v53 = vrot.slane %v2976_v38, 4  ;;  %v3016_v18 = vsel %vm1281_vm1, %v2976_v38, %v3015_v37 }
 0x79a   : > { %v3008_v0 = vperm.slane %v3002_v22, %v6653_v51  ;;  %v3024_v58 = vperm.slane %v3016_v18, %v6653_v51  ;;  %v3029_v8 = vrot.slane %v3012_v28, 4  ;;  %v3032_v35 = vsel %vm1281_vm1, %v3012_v28, %v3031_v46 }
 0x79b   : > { %v3014_v59 = vsel %vm1281_vm1, %v3013_v53, %v7258_v23  ;;  %v3053_v60 = vrot.slane %v3032_v35, 4  ;;  %v3309_v22 = vrot.slane %v7312_v27, 4 }
 0x79c   : > { %v3020_v29 = vperm.slane %v3014_v59, %v6653_v51  ;;  %v3025_v5 = vrot.slane %v3008_v0, 4  ;;  %v3028_v37 = vsel %vm1281_vm1, %v3008_v0, %v3027_v33  ;;  %v3030_v50 = vsel %vm1281_vm1, %v3029_v8, %v2988_v49 }
 0x79d   : > { %v3037_v11 = vrot.slane %v3024_v58, 4  ;;  %v3041_v32 = vrot.slane %v3030_v50, 4  ;;  %v3054_v15 = vsel %vm1281_vm1, %v3053_v60, %v3028_v37  ;;  %v3040_v20 = vsel %vm1281_vm1, %v3024_v58, %v3039_v48 }
 0x79e   : > { %v3026_v14 = vsel %vm1281_vm1, %v3025_v5, %v2984_v21  ;;  %v3033_v23 = vrot.slane %v3020_v29, 4  ;;  %v3055_v61 = vrot.slane %v3028_v37, 4  ;;  %v3036_v13 = vsel %vm1281_vm1, %v3020_v29, %v3035_v55 }
 0x79f   : > { %v7338_v3 = vsel %vm1281_vm1, %v3037_v11, %v3000_v41  ;;  %v3042_v25 = vsel %vm1281_vm1, %v3041_v32, %v3026_v14  ;;  %v3043_v49 = vrot.slane %v3026_v14, 4  ;;  %v7349_v52 = vperm.slane %v3054_v15, %v6640_v31 }
 0x7a0   : > { %v7342_v38 = vsel %vm1281_vm1, %v3033_v23, %v2996_v39  ;;  %v7345_v45 = vperm.slane %v3042_v25, %v6640_v31  ;;  %v3056_v21 = vsel %vm1281_vm1, %v3032_v35, %v3055_v61  ;;  %v3077_v46 = vrot.slane %v3040_v20, 4 }
 0x7a1   : > { %v3044_v44 = vsel %vm1281_vm1, %v3030_v50, %v3043_v49  ;;  %v3297_v41 = vrot.slane %v7306_v10, 4  ;;  %v3302_v48 = vperm.slane %v3296_v63, %v6640_v31  ;;  %v7355_v28 = vperm.slane %v3056_v21, %v6640_v31 }
 0x7a2   : > { %v3065_v39 = vrot.slane %v7338_v3, 4  ;;  %v3079_v33 = vrot.slane %v3036_v13, 4  ;;  %v7360_v53 = vperm.slane %v3044_v44, %v6640_v31  ;;  %v3067_v18 = vrot.slane %v7342_v38, 4 }
 0x7a3   : > { %v3078_v0 = vsel %vm1281_vm1, %v3077_v46, %v3036_v13  ;;  %v3308_v10 = vsel %vm1281_vm1, %v3307_v16, %v7312_v27  ;;  %v3089_v8 = vrot.slane %v7349_v52, 4  ;;  %v3091_v35 = vrot.slane %v7345_v45, 4 }
 0x7a4   : > { %v7367_v58 = vsel %vm1281_vm1, %v3040_v20, %v3079_v33  ;;  %v3314_v55 = vperm.slane %v3308_v10, %v6640_v31  ;;  %v7373_v59 = vperm.slane %v3078_v0, %v6640_v31  ;;  %v3320_v60 = vsel %vm1281_vm1, %v3319_v36, %v7271_v19 }
 0x7a5   : > { %v3338_v63 = vperm.slane %v3332_v57, %v6640_v31  ;;  %v3298_v27 = vsel %vm1281_vm1, %v7294_v17, %v3297_v41  ;;  %v3326_v29 = vperm.slane %v3320_v60, %v6640_v31  ;;  %v3310_v50 = vsel %vm1281_vm1, %v7282_v34, %v3309_v22 }
 0x7a6   : > { %v3343_v5 = vrot.slane %v3314_v55, 4  ;;  %v3306_v37 = vperm.slane %v3298_v27, %v6640_v31  ;;  %v3318_v32 = vperm.slane %v3310_v50, %v6640_v31  ;;  %v3322_v36 = vsel %vm1281_vm1, %v7287_v1, %v3321_v62 }
 0x7a7   : > { %v3367_v11 = vrot.slane %v3338_v63, 4  ;;  %v3334_v17 = vsel %vm1281_vm1, %v7276_v54, %v3333_v42  ;;  %v3330_v15 = vperm.slane %v3322_v36, %v6640_v31  ;;  %v3345_v34 = vrot.slane %v3302_v48, 4 }
 0x7a8   : > { %v3344_v57 = vsel %vm1281_vm1, %v3343_v5, %v3302_v48  ;;  %v3342_v16 = vperm.slane %v3334_v17, %v6640_v31  ;;  %v3355_v19 = vrot.slane %v3318_v32, 4  ;;  %v3369_v20 = vrot.slane %v3326_v29, 4 }
 0x7a9   : > { %v3350_v14 = vperm.slane %v3344_v57, %v6653_v51  ;;  %v3368_v23 = vsel %vm1281_vm1, %v3367_v11, %v3326_v29  ;;  %v3346_v47 = vsel %vm1281_vm1, %v3314_v55, %v3345_v34  ;;  %v3357_v61 = vrot.slane %v3306_v37, 4 }
 0x7aa   : > { %v3374_v62 = vperm.slane %v3368_v23, %v6653_v51  ;;  %v3379_v1 = vrot.slane %v3342_v16, 4  ;;  %v3356_v54 = vsel %vm1281_vm1, %v3355_v19, %v3306_v37  ;;  %v3354_v13 = vperm.slane %v3346_v47, %v6653_v51 }
 0x7ab   : > { %v3393_v42 = vrot.slane %v3350_v14, 4  ;;  %v3370_v25 = vsel %vm1281_vm1, %v3338_v63, %v3369_v20  ;;  %v3362_v21 = vperm.slane %v3356_v54, %v6653_v51  ;;  %v3358_v33 = vsel %vm1281_vm1, %v3318_v32, %v3357_v61 }
 0x7ac   : > { %v3391_v49 = vrot.slane %v3374_v62, 4  ;;  %v3380_v44 = vsel %vm1281_vm1, %v3379_v1, %v3330_v15  ;;  %v3378_v46 = vperm.slane %v3370_v25, %v6653_v51  ;;  %v3381_v22 = vrot.slane %v3330_v15, 4 }
 0x7ad   : > { %v3386_v41 = vperm.slane %v3380_v44, %v6653_v51  ;;  %v3394_v48 = vsel %vm1281_vm1, %v3374_v62, %v3393_v42  ;;  %v3401_v60 = vrot.slane %v3362_v21, 4  ;;  %v3366_v29 = vperm.slane %v3358_v33, %v6653_v51 }
 0x7ae   : > { %v3392_v0 = vsel %vm1281_vm1, %v3391_v49, %v3350_v14  ;;  %v3408_v10 = vpack.c.bf16 %v3394_v48, %v3394_v48  ;;  %v3395_v55 = vrot.slane %v3378_v46, 4  ;;  %v3382_v5 = vsel %vm1281_vm1, %v3342_v16, %v3381_v22 }
 0x7af   : > { %v3407_v63 = vpack.c.bf16 %v3392_v0, %v3392_v0  ;;  %v3399_v27 = vrot.slane %v3386_v41, 4  ;;  %v3402_v11 = vsel %vm1281_vm1, %v3386_v41, %v3401_v60  ;;  %v3390_v32 = vperm.slane %v3382_v5, %v6653_v51 }
 0x7b0   : > { %v3694_v37 = vsel %vm2023_vm2, %v3408_v10, 0  ;;  %v3396_v50 = vsel %vm1281_vm1, %v3395_v55, %v3354_v13  ;;  %v3412_v15 = vpack.c.bf16 %v3402_v11, %v3402_v11  ;;  %v3397_v23 = vrot.slane %v3354_v13, 4 }
 0x7b1   : > { %v3675_v36 = vsel %vm2023_vm2, %v3407_v63, 0  ;;  %v3400_v17 = vsel %vm1281_vm1, %v3399_v27, %v3362_v21  ;;  %3703 = vmatpush.bf16.xpose.msrb.mxu0 %v3694_v37  ;;  %v3409_v57 = vpack.c.bf16 %v3396_v50, %v3396_v50  ;;  %v3403_v14 = vrot.slane %v3390_v32, 4 }
 0x7b2   : > { %3684 = vmatpush.bf16.xpose.msra.mxu3 %v3675_v36  ;;  %v3411_v34 = vpack.c.bf16 %v3400_v17, %v3400_v17  ;;  %v3405_v16 = vrot.slane %v3366_v29, 4  ;;  %v3770_v20 = vsel %vm2023_vm2, %v3412_v15, 0  ;;  %v3066_v62 = vsel %vm1281_vm1, %v3065_v39, %v7342_v38 }
 0x7b3   : > { %v3713_v19 = vsel %vm2023_vm2, %v3409_v57, 0  ;;  %v3090_v1 = vsel %vm1281_vm1, %v3089_v8, %v7345_v45  ;;  %v3404_v61 = vsel %vm1281_vm1, %v3403_v14, %v3366_v29  ;;  %v3398_v54 = vsel %vm1281_vm1, %v3378_v46, %v3397_v23 }
 0x7b4   : > { %v3751_v47 = vsel %vm2023_vm2, %v3411_v34, 0  ;;  %3722 = vmatpush.bf16.xpose.msra.mxu1 %v3713_v19  ;;  %v3406_v42 = vsel %vm1281_vm1, %v3390_v32, %v3405_v16  ;;  %v3413_v13 = vpack.c.bf16 %v3404_v61, %v3404_v61  ;;  %v3410_v25 = vpack.c.bf16 %v3398_v54, %v3398_v54 }
 0x7b5   : > { %v3414_v49 = vpack.c.bf16 %v3406_v42, %v3406_v42  ;;  %v3072_v39 = vperm.slane %v3066_v62, %v6640_v31  ;;  %v3068_v8 = vsel %vm1281_vm1, %v7338_v3, %v3067_v18  ;;  %v3096_v21 = vperm.slane %v3090_v1, %v6653_v51 }
 0x7b6   : > { %v3113_v44 = vrot.slane %v7373_v59, 4  ;;  %v3092_v46 = vsel %vm1281_vm1, %v7349_v52, %v3091_v35  ;;  %v3088_v41 = vperm.slane %v7367_v58, %v6640_v31  ;;  %v3789_v48 = vsel %vm2023_vm2, %v3413_v13, 0 }
 0x7b7   : > { %v3732_v33 = vsel %vm2023_vm2, %v3410_v25, 0  ;;  %v3100_v38 = vperm.slane %v3092_v46, %v6653_v51  ;;  %v3808_v3 = vsel %vm2023_vm2, %v3414_v49, 0  ;;  %v3139_v22 = vrot.slane %v3096_v21, 4 }
 0x7b8   : > { %3741 = vmatpush.bf16.xpose.msra.mxu2 %v3732_v33  ;;  %v3114_v18 = vsel %vm1281_vm1, %v3113_v44, %v3072_v39  ;;  %v3115_v45 = vrot.slane %v3072_v39, 4  ;;  %v3101_v58 = vrot.slane %v7355_v28, 4  ;;  %v3076_v10 = vperm.slane %v3068_v8, %v6640_v31 }
 0x7b9   : > { %3779 = vmatpush.bf16.xpose.msra.mxu0 %v3770_v20  ;;  %v3120_v52 = vperm.slane %v3114_v18, %v6653_v51  ;;  %v3143_v35 = vrot.slane %v3100_v38, 4  ;;  %v3103_v27 = vrot.slane %v7360_v53, 4  ;;  %v3125_v5 = vrot.slane %v3088_v41, 4 }
 0x7ba   : > { %3760 = vmatpush.bf16.xpose.msrb.mxu3 %v3751_v47  ;;  %v3116_v0 = vsel %vm1281_vm1, %v7373_v59, %v3115_v45  ;;  %v3102_v36 = vsel %vm1281_vm1, %v3101_v58, %v7360_v53  ;;  %v3127_v17 = vrot.slane %v3076_v10, 4 }
 0x7bb   : > { %v3140_v55 = vsel %vm1281_vm1, %v3120_v52, %v3139_v22  ;;  %v3137_v60 = vrot.slane %v3120_v52, 4  ;;  %v3124_v63 = vperm.slane %v3116_v0, %v6653_v51  ;;  %v3126_v34 = vsel %vm1281_vm1, %v3125_v5, %v3076_v10 }
 0x7bc   : > { %3798 = vmatpush.bf16.xpose.msrb.mxu1 %v3789_v48  ;;  %v3154_v29 = vpack.c.bf16 %v3140_v55, %v3140_v55  ;;  %v3104_v14 = vsel %vm1281_vm1, %v7355_v28, %v3103_v27  ;;  %v3108_v23 = vperm.slane %v3102_v36, %v6653_v51  ;;  %v3128_v53 = vsel %vm1281_vm1, %v3088_v41, %v3127_v17 }
 0x7bd   : > { %v3138_v37 = vsel %vm1281_vm1, %v3137_v60, %v3096_v21  ;;  %v3144_v50 = vsel %vm1281_vm1, %v3124_v63, %v3143_v35  ;;  %v3141_v11 = vrot.slane %v3124_v63, 4  ;;  %v3132_v16 = vperm.slane %v3126_v34, %v6653_v51  ;;  %v5479_v21 = vld [vmem:[%s2799_s6] ss:$0 sm:$0xff] }
 0x7be   : > { %5089 = vmatmul.msk.bf16.vlgmr.msrb.gmra.mxu0 %vm2023_vm2, %v3154_v29  ;;  %v3153_v59 = vpack.c.bf16 %v3138_v37, %v3138_v37  ;;  %v3156_v32 = vpack.c.bf16 %v3144_v50, %v3144_v50  ;;  %v3112_v19 = vperm.slane %v3104_v14, %v6653_v51  ;;  %v3147_v20 = vrot.slane %v3108_v23, 4 }
 0x7bf   : > { %v3142_v57 = vsel %vm1281_vm1, %v3141_v11, %v3100_v38  ;;  %v3136_v62 = vperm.slane %v3128_v53, %v6653_v51  ;;  %v3145_v1 = vrot.slane %v3132_v16, 4 }
 0x7c0   : > { %3817 = vmatpush.bf16.xpose.msrb.mxu2 %v3808_v3  ;;  %5088 = vmatmul.msk.bf16.vlgmr.msra.gmra.mxu3 %vm2023_vm2, %v3153_v59  ;;  %v3155_v15 = vpack.c.bf16 %v3142_v57, %v3142_v57  ;;  %v3151_v47 = vrot.slane %v3112_v19, 4  ;;  %v3148_v28 = vsel %vm1281_vm1, %v3132_v16, %v3147_v20 }
 0x7c1   : > { %5091 = vmatmul.msk.bf16.vlgmr.msra.gmra.mxu2 %vm2023_vm2, %v3156_v32  ;;  %v3149_v61 = vrot.slane %v3136_v62, 4  ;;  %v3146_v54 = vsel %vm1281_vm1, %v3145_v1, %v3108_v23  ;;  %v3158_v13 = vpack.c.bf16 %v3148_v28, %v3148_v28  ;;  %v5468_v28 = vpack.i.bf16 %v7189_v9, %v7195_v12 }
 0x7c2   : > { %5090 = vmatmul.msk.bf16.vlgmr.msra.gmra.mxu1 %vm2023_vm2, %v3155_v15  ;;  %v3152_v42 = vsel %vm1281_vm1, %v3136_v62, %v3151_v47  ;;  %v3157_v49 = vpack.c.bf16 %v3146_v54, %v3146_v54 }
 0x7c3   : > { %v3150_v25 = vsel %vm1281_vm1, %v3149_v61, %v3112_v19  ;;  %v3160_v39 = vpack.c.bf16 %v3152_v42, %v3152_v42  ;;  %v5453_v61 = vpack.i.bf16 %v7183_v4, %v7162_v40 }
 0x7c4   : > { %v3159_v8 = vpack.c.bf16 %v3150_v25, %v3150_v25 }
 0x7ce   : > { %5093 = vmatmul.msk.bf16.vlgmr.msra.gmra.mxu0 %vm2023_vm2, %v3158_v13 }
 0x7d0   : > { %5092 = vmatmul.msk.bf16.vlgmr.msrb.gmra.mxu3 %vm2023_vm2, %v3157_v49 }
 0x7d1   : > { %5095 = vmatmul.msk.bf16.vlgmr.msrb.gmra.mxu2 %vm2023_vm2, %v3160_v39 }
 0x7d2   : > { %5094 = vmatmul.msk.bf16.vlgmr.msrb.gmra.mxu1 %vm2023_vm2, %v3159_v8 }
 0x83b   : > { %v3705_v44 = vpop.f32.mrf.mxu0 }
 0x83c   : > { %v3824_v46 = vmul.f32 0.35355338, %v3705_v44 }
 0x83e   : > { %v7487_v41 = vadd.f32 %v5479_v21, %v3824_v46 }
 0x83f   : > { %v3724_v48 = vpop.f32.mrf.mxu1 }
 0x840   : > { %v3825_v33 = vmul.f32 0.35355338, %v3724_v48  ;;  %v3843_v38 = vsel %vm2023_vm2, %v7487_v41, -inf }
 0x841   : > { %3844 = vmax.xlane.f32.xlu2 %v3843_v38 }
 0x842   : > { %v3834_v3 = vadd.f32 %v5479_v21, %v3825_v33 }
 0x843   : > { %v3686_v18 = vpop.f32.mrf.mxu3  ;;  %v3707_v22 = vpop.f32.mrf.mxu0 }
 0x844   : > { %v3823_v45 = vmul.f32 0.35355338, %v3686_v18  ;;  %v3743_v52 = vpop.f32.mrf.mxu2  ;;  %v3846_v35 = vsel %vm2023_vm2, %v3834_v3, -inf }
 0x845   : > { %v3826_v58 = vmul.f32 0.35355338, %v3743_v52  ;;  %3847 = vmax.xlane.f32.xlu0 %v3846_v35 }
 0x846   : > { %v3832_v0 = vadd.f32 %v5479_v21, %v3823_v45 }
 0x847   : > { %v3726_v10 = vpop.f32.mrf.mxu1  ;;  %v3835_v55 = vadd.f32 %v5479_v21, %v3826_v58 }
 0x848   : > { %v3840_v60 = vsel %vm2023_vm2, %v3832_v0, -inf }
 0x849   : > { %v3849_v63 = vsel %vm2023_vm2, %v3835_v55, -inf  ;;  %3841 = vmax.xlane.f32.xlu2 %v3840_v60 }
 0x84a   : > { %3850 = vmax.xlane.f32.xlu1 %v3849_v63 }
 0x84b   : > { %v3688_v27 = vpop.f32.mrf.mxu3  ;;  %v3781_v29 = vpop.f32.mrf.mxu0 }
 0x84c   : > { %v3745_v5 = vpop.f32.mrf.mxu2  ;;  %v3828_v37 = vmul.f32 0.35355338, %v3781_v29 }
 0x84e   : > { %v7494_v50 = vadd.f32 %v5479_v21, %v3828_v37 }
 0x84f   : > { %v3800_v11 = vpop.f32.mrf.mxu1 }
 0x850   : > { %v3829_v59 = vmul.f32 0.35355338, %v3800_v11  ;;  %v3855_v32 = vsel %vm2023_vm2, %v7494_v50, -inf }
 0x852   : > { %3856 = vmax.xlane.f32.xlu1 %v3855_v32  ;;  %v3838_v36 = vadd.f32 %v5479_v21, %v3829_v59 }
 0x853   : > { %v3762_v17 = vpop.f32.mrf.mxu3  ;;  %v3783_v57 = vpop.f32.mrf.mxu0 }
 0x854   : > { %v3827_v15 = vmul.f32 0.35355338, %v3762_v17  ;;  %v3819_v34 = vpop.f32.mrf.mxu2  ;;  %v3858_v14 = vsel %vm2023_vm2, %v3838_v36, -inf }
 0x855   : > { %v3830_v23 = vmul.f32 0.35355338, %v3819_v34  ;;  %3859 = vmax.xlane.f32.xlu0 %v3858_v14 }
 0x856   : > { %v3836_v53 = vadd.f32 %v5479_v21, %v3827_v15 }
 0x857   : > { %v3802_v16 = vpop.f32.mrf.mxu1  ;;  %v3839_v19 = vadd.f32 %v5479_v21, %v3830_v23 }
 0x858   : > { %v3852_v20 = vsel %vm2023_vm2, %v3836_v53, -inf }
 0x859   : > { %v3861_v62 = vsel %vm2023_vm2, %v3839_v19, -inf }
 0x85a   : > { %3862 = vmax.xlane.f32.xlu2 %v3861_v62  ;;  %3853 = vmax.xlane.f32.xlu1 %v3852_v20 }
 0x85b   : > { %v3764_v1 = vpop.f32.mrf.mxu3 }
 0x85c   : > { %v3821_v47 = vpop.f32.mrf.mxu2 }
 0x869   : > { %5459 = vrot.lane.b32.xlu0 %v5458_v43, %s6267_s30 }
 0x871   : > { %5469 = vrot.lane.b32.xlu0 %v5468_v28, %s6267_s30 }
 0x872   : > { %5454 = vrot.lane.b32.xlu2 %v5453_v61, %s6267_s30 }
 0x873   : > { %5464 = vrot.lane.b32.xlu1 %v5463_v7, %s6267_s30 }
 0x8b4   : > { %v3845_v54 = vpop.xlane.xlu2 %3844 }
 0x8b5   : > { %v3865_v40 = vsub.f32 %v7487_v41, %v3845_v54 }
 0x8b7   : > { %v3874_v39 = vmul.f32 1.442695, %v3865_v40 }
 0x8b8   : > { %v3848_v42 = vpop.xlane.xlu0 %3847 }
 0x8b9   : > { %v3866_v13 = vsub.f32 %v3834_v3, %v3848_v42 }
 0x8bb   : > { %v3876_v6 = vmul.f32 1.442695, %v3866_v13 }
 0x8bc   : > { %v3842_v26 = vpop.xlane.xlu2 %3841 }
 0x8bd   : > { %5524 = vpow2.f32 %v3876_v6  ;;  %v3851_v43 = vpop.xlane.xlu1 %3850  ;;  %v3864_v9 = vsub.f32 %v3832_v0, %v3842_v26 }
 0x8be   : > { %v3867_v12 = vsub.f32 %v3835_v55, %v3851_v43 }
 0x8bf   : > { %v3872_v4 = vmul.f32 1.442695, %v3864_v9 }
 0x8c0   : > { %v3878_v25 = vmul.f32 1.442695, %v3867_v12 }
 0x8c1   : > { %5526 = vpow2.f32 %v3872_v4 }
 0x8c2   : > { %5528 = vpow2.f32 %v3878_v25 }
 0x8c3   : > { %v7516_v49 = vpop.eup %5524  ;;  %5530 = vpow2.f32 %v3874_v39 }
 0x8c4   : > { %v3894_v2 = vsel %vm2023_vm2, %v7516_v49, 0.0 }
 0x8c5   : > { %v3857_v56 = vpop.xlane.xlu1 %3856  ;;  %3895 = vadd.xlane.f32.xlu1 %v3894_v2 }
 0x8c6   : > { %v3869_v58 = vsub.f32 %v7494_v50, %v3857_v56 }
 0x8c7   : > { %v7520_v7 = vpop.eup %5526 }
 0x8c8   : > { %v7522_v8 = vpop.eup %5528  ;;  %v3860_v21 = vpop.xlane.xlu0 %3859  ;;  %v3888_v44 = vsel %vm2023_vm2, %v7520_v7, 0.0  ;;  %v3882_v55 = vmul.f32 1.442695, %v3869_v58 }
 0x8c9   : > { %v3870_v46 = vsub.f32 %v3838_v36, %v3860_v21  ;;  %v3897_v41 = vsel %vm2023_vm2, %v7522_v8, 0.0  ;;  %3889 = vadd.xlane.f32.xlu2 %v3888_v44  ;;  %v7528_v33 = vpop.eup %5530 }
 0x8ca   : > { %3898 = vadd.xlane.f32.xlu0 %v3897_v41  ;;  %v3891_v35 = vsel %vm2023_vm2, %v7528_v33, 0.0 }
 0x8cb   : > { %v3884_v48 = vmul.f32 1.442695, %v3870_v46 }
 0x8cd   : > { %5532 = vpow2.f32 %v3884_v48  ;;  %v3863_v38 = vpop.xlane.xlu2 %3862  ;;  %v3854_v3 = vpop.xlane.xlu1 %3853 }
 0x8ce   : > { %v3871_v18 = vsub.f32 %v3839_v19, %v3863_v38  ;;  %v3868_v22 = vsub.f32 %v3836_v53, %v3854_v3 }
 0x8d0   : > { %v3886_v45 = vmul.f32 1.442695, %v3871_v18  ;;  %v3880_v52 = vmul.f32 1.442695, %v3868_v22 }
 0x8d1   : > { %3892 = vadd.xlane.f32.xlu2 %v3891_v35 }
 0x8d2   : > { %5534 = vpow2.f32 %v3886_v45 }
 0x8d3   : > { %v7533_v0 = vpop.eup %5532  ;;  %5536 = vpow2.f32 %v3880_v52 }
 0x8d4   : > { %v3906_v10 = vsel %vm2023_vm2, %v7533_v0, 0.0  ;;  %5538 = vpow2.f32 %v3882_v55 }
 0x8d5   : > { %3907 = vadd.xlane.f32.xlu1 %v3906_v10  ;;  %v5455_v27 = vpop.permute.xlu2 %5454 }
 0x8d6   : > { %v5456_v50 = vunpack.i.l.bf16 %v5455_v27  ;;  %v5457_v17 = vunpack.i.h.bf16 %v5455_v27 }
 0x8d8   : > { %v7537_v60 = vpop.eup %5534  ;;  %v3441_v32 = vrot.slane %v5456_v50, 4  ;;  %v3453_v19 = vrot.slane %v5457_v17, 4 }
 0x8d9   : > { %v7539_v63 = vpop.eup %5536  ;;  %v3909_v29 = vsel %vm2023_vm2, %v7537_v60, 0.0 }
 0x8da   : > { %3910 = vadd.xlane.f32.xlu2 %v3909_v29  ;;  %v3900_v5 = vsel %vm2023_vm2, %v7539_v63, 0.0  ;;  %v7545_v59 = vpop.eup %5538 }
 0x8db   : > { %3901 = vadd.xlane.f32.xlu0 %v3900_v5  ;;  %v5460_v37 = vpop.permute.xlu0 %5459  ;;  %v3903_v15 = vsel %vm2023_vm2, %v7545_v59, 0.0 }
 0x8dc   : > { %v5461_v11 = vunpack.i.l.bf16 %v5460_v37  ;;  %v5462_v34 = vunpack.i.h.bf16 %v5460_v37 }
 0x8de   : > { %v3439_v36 = vrot.slane %v5461_v11, 4  ;;  %v3442_v57 = vsel %vm1281_vm1, %v5461_v11, %v3441_v32  ;;  %v3465_v54 = vrot.slane %v5462_v34, 4 }
 0x8df   : > { %v3450_v20 = vperm.slane %v3442_v57, %v6640_v31 }
 0x8e0   : > { %v3440_v23 = vsel %vm1281_vm1, %v3439_v36, %v5456_v50 }
 0x8e1   : > { %v3446_v42 = vperm.slane %v3440_v23, %v6640_v31  ;;  %v3501_v25 = vrot.slane %v3450_v20, 4 }
 0x8e3   : > { %3904 = vadd.xlane.f32.xlu0 %v3903_v15  ;;  %v5470_v14 = vpop.permute.xlu0 %5469  ;;  %v3489_v56 = vrot.slane %v3446_v42, 4 }
 0x8e4   : > { %v5472_v53 = vunpack.i.h.bf16 %v5470_v14  ;;  %v5471_v16 = vunpack.i.l.bf16 %v5470_v14 }
 0x8e5   : > { %v5465_v62 = vpop.permute.xlu1 %5464 }
 0x8e6   : > { %v3475_v1 = vrot.slane %v5472_v53, 4  ;;  %v3477_v47 = vrot.slane %v5471_v16, 4  ;;  %v5467_v28 = vunpack.i.h.bf16 %v5465_v62  ;;  %v5466_v61 = vunpack.i.l.bf16 %v5465_v62 }
 0x8e8   : > { %v3476_v13 = vsel %vm1281_vm1, %v3475_v1, %v5471_v16  ;;  %v3478_v6 = vsel %vm1281_vm1, %v5472_v53, %v3477_v47  ;;  %v3451_v26 = vrot.slane %v5467_v28, 4  ;;  %v3454_v43 = vsel %vm1281_vm1, %v5467_v28, %v3453_v19 }
 0x8e9   : > { %v3482_v9 = vperm.slane %v3476_v13, %v6640_v31  ;;  %v3486_v12 = vperm.slane %v3478_v6, %v6640_v31  ;;  %v3462_v40 = vperm.slane %v3454_v43, %v6640_v31  ;;  %v3463_v4 = vrot.slane %v5466_v61, 4 }
 0x8ea   : > { %v3452_v39 = vsel %vm1281_vm1, %v3451_v26, %v5457_v17  ;;  %v3466_v2 = vsel %vm1281_vm1, %v5466_v61, %v3465_v54 }
 0x8eb   : > { %v3523_v21 = vrot.slane %v3486_v12, 4  ;;  %v3458_v44 = vperm.slane %v3452_v39, %v6640_v31  ;;  %v3499_v46 = vrot.slane %v3462_v40, 4  ;;  %v3511_v41 = vrot.slane %v3482_v9, 4 }
 0x8ec   : > { %v3502_v48 = vsel %vm1281_vm1, %v3462_v40, %v3501_v25  ;;  %v3464_v38 = vsel %vm1281_vm1, %v3463_v4, %v5462_v34  ;;  %v3474_v3 = vperm.slane %v3466_v2, %v6640_v31 }
 0x8ed   : > { %v3487_v18 = vrot.slane %v3458_v44, 4  ;;  %v3490_v22 = vsel %vm1281_vm1, %v3458_v44, %v3489_v56  ;;  %v3500_v45 = vsel %vm1281_vm1, %v3499_v46, %v3450_v20  ;;  %v3510_v52 = vperm.slane %v3502_v48, %v6653_v51 }
 0x8ee   : > { %v3498_v35 = vperm.slane %v3490_v22, %v6653_v51  ;;  %v3506_v58 = vperm.slane %v3500_v45, %v6653_v51  ;;  %v3470_v10 = vperm.slane %v3464_v38, %v6640_v31  ;;  %v3524_v55 = vsel %vm1281_vm1, %v3523_v21, %v3474_v3 }
 0x8ef   : > { %v3488_v27 = vsel %vm1281_vm1, %v3487_v18, %v3446_v42  ;;  %v3525_v29 = vrot.slane %v3474_v3, 4  ;;  %v3530_v5 = vperm.slane %v3524_v55, %v6653_v51  ;;  %v3549_v11 = vrot.slane %v3510_v52, 4 }
 0x8f0   : > { %v3494_v37 = vperm.slane %v3488_v27, %v6653_v51  ;;  %v3545_v50 = vrot.slane %v3506_v58, 4  ;;  %v3512_v32 = vsel %vm1281_vm1, %v3511_v41, %v3470_v10  ;;  %v3513_v36 = vrot.slane %v3470_v10, 4 }
 0x8f1   : > { %v3518_v17 = vperm.slane %v3512_v32, %v6653_v51  ;;  %v3526_v57 = vsel %vm1281_vm1, %v3486_v12, %v3525_v29  ;;  %v3543_v15 = vrot.slane %v3530_v5, 4  ;;  %v3541_v14 = vrot.slane %v3498_v35, 4 }
 0x8f2   : > { %v3537_v34 = vrot.slane %v3494_v37, 4  ;;  %v3534_v23 = vperm.slane %v3526_v57, %v6653_v51  ;;  %v3546_v53 = vsel %vm1281_vm1, %v3530_v5, %v3545_v50  ;;  %v3514_v16 = vsel %vm1281_vm1, %v3482_v9, %v3513_v36 }
 0x8f3   : > { %v3535_v19 = vrot.slane %v3518_v17, 4  ;;  %v3544_v20 = vsel %vm1281_vm1, %v3543_v15, %v3506_v58  ;;  %v3589_v62 = vrot.slane %v3546_v53, 4  ;;  %v3522_v1 = vperm.slane %v3514_v16, %v6653_v51 }
 0x8f4   : > { %v3538_v47 = vsel %vm1281_vm1, %v3518_v17, %v3537_v34  ;;  %v3547_v28 = vrot.slane %v3534_v23, 4  ;;  %v3550_v61 = vsel %vm1281_vm1, %v3534_v23, %v3549_v11  ;;  %v3577_v42 = vrot.slane %v3544_v20, 4 }
 0x8f5   : > { %v3565_v54 = vrot.slane %v3538_v47, 4  ;;  %v3587_v13 = vrot.slane %v3550_v61, 4  ;;  %v3536_v6 = vsel %vm1281_vm1, %v3535_v19, %v3494_v37  ;;  %v3539_v26 = vrot.slane %v3522_v1, 4 }
 0x8f6   : > { %v3542_v43 = vsel %vm1281_vm1, %v3522_v1, %v3541_v14  ;;  %v3548_v9 = vsel %vm1281_vm1, %v3547_v28, %v3510_v52  ;;  %v3553_v12 = vrot.slane %v3536_v6, 4  ;;  %v3590_v58 = vsel %vm1281_vm1, %v3550_v61, %v3589_v62 }
 0x8f7   : > { %v3563_v40 = vrot.slane %v3542_v43, 4  ;;  %v3575_v4 = vrot.slane %v3548_v9, 4  ;;  %v3588_v25 = vsel %vm1281_vm1, %v3587_v13, %v3546_v53  ;;  %v3566_v39 = vsel %vm1281_vm1, %v3542_v43, %v3565_v54 }
 0x8f8   : > { %v3540_v2 = vsel %vm1281_vm1, %v3539_v26, %v3498_v35  ;;  %v3594_v56 = vperm.slane %v3588_v25, %v6640_v31  ;;  %v3574_v21 = vperm.slane %v3566_v39, %v6640_v31  ;;  %v3578_v44 = vsel %vm1281_vm1, %v3548_v9, %v3577_v42 }
 0x8f9   : > { %v3551_v46 = vrot.slane %v3540_v2, 4  ;;  %v3564_v41 = vsel %vm1281_vm1, %v3563_v40, %v3538_v47  ;;  %v3576_v48 = vsel %vm1281_vm1, %v3575_v4, %v3544_v20  ;;  %v3554_v38 = vsel %vm1281_vm1, %v3540_v2, %v3553_v12 }
 0x8fa   : > { %v3570_v3 = vperm.slane %v3564_v41, %v6640_v31  ;;  %v3582_v18 = vperm.slane %v3576_v48, %v6640_v31  ;;  %v3623_v22 = vrot.slane %v3594_v56, 4  ;;  %v3562_v45 = vperm.slane %v3554_v38, %v6640_v31 }
 0x8fb   : > { %v3552_v52 = vsel %vm1281_vm1, %v3551_v46, %v3536_v6  ;;  %v3586_v35 = vperm.slane %v3578_v44, %v6640_v31  ;;  %v3611_v10 = vrot.slane %v3574_v21, 4  ;;  %v3598_v50 = vperm.slane %v3590_v58, %v6640_v31 }
 0x8fc   : > { %v3558_v55 = vperm.slane %v3552_v52, %v6640_v31  ;;  %v3599_v27 = vrot.slane %v3570_v3, 4  ;;  %v3624_v29 = vsel %vm1281_vm1, %v3623_v22, %v3582_v18  ;;  %v3625_v5 = vrot.slane %v3582_v18, 4 }
 0x8fd   : > { %v3630_v37 = vperm.slane %v3624_v29, %v6653_v51  ;;  %v3612_v11 = vsel %vm1281_vm1, %v3611_v10, %v3562_v45  ;;  %v3613_v32 = vrot.slane %v3562_v45, 4  ;;  %v3635_v53 = vrot.slane %v3598_v50, 4 }
 0x8fe   : > { %v3600_v36 = vsel %vm1281_vm1, %v3599_v27, %v3558_v55  ;;  %v3601_v17 = vrot.slane %v3558_v55, 4  ;;  %v3626_v57 = vsel %vm1281_vm1, %v3594_v56, %v3625_v5  ;;  %v3618_v15 = vperm.slane %v3612_v11, %v6653_v51 }
 0x8ff   : > { %v3606_v34 = vperm.slane %v3600_v36, %v6653_v51  ;;  %v3647_v14 = vrot.slane %v3630_v37, 4  ;;  %v3634_v23 = vperm.slane %v3626_v57, %v6653_v51  ;;  %v3614_v19 = vsel %vm1281_vm1, %v3574_v21, %v3613_v32 }
 0x900   : > { %v3602_v16 = vsel %vm1281_vm1, %v3570_v3, %v3601_v17  ;;  %v3637_v20 = vrot.slane %v3586_v35, 4  ;;  %v3657_v62 = vrot.slane %v3618_v15, 4  ;;  %v3636_v42 = vsel %vm1281_vm1, %v3635_v53, %v3586_v35 }
 0x901   : > { %v3648_v1 = vsel %vm1281_vm1, %v3647_v14, %v3606_v34  ;;  %v3649_v47 = vrot.slane %v3606_v34, 4  ;;  %v3610_v28 = vperm.slane %v3602_v16, %v6653_v51  ;;  %v3651_v61 = vrot.slane %v3634_v23, 4 }
 0x902   : > { %v3663_v54 = vpack.c.bf16 %v3648_v1, %v3648_v1  ;;  %v3622_v13 = vperm.slane %v3614_v19, %v6653_v51  ;;  %v3638_v6 = vsel %vm1281_vm1, %v3598_v50, %v3637_v20  ;;  %v3642_v9 = vperm.slane %v3636_v42, %v6653_v51 }
 0x903   : > { %v3650_v26 = vsel %vm1281_vm1, %v3630_v37, %v3649_v47  ;;  %v3652_v43 = vsel %vm1281_vm1, %v3651_v61, %v3610_v28  ;;  %v3646_v12 = vperm.slane %v3638_v6, %v6653_v51  ;;  %v3653_v39 = vrot.slane %v3610_v28, 4 }
 0x904   : > { %v3940_v40 = vsel %vm2291_vm3, %v3663_v54, 0  ;;  %v3664_v4 = vpack.c.bf16 %v3650_v26, %v3650_v26  ;;  %v3665_v25 = vpack.c.bf16 %v3652_v43, %v3652_v43  ;;  %v3655_v2 = vrot.slane %v3642_v9, 4 }
 0x905   : > { %3949 = vmatpush.bf16.msra.mxu3 %v3940_v40  ;;  %v3659_v56 = vrot.slane %v3646_v12, 4  ;;  %v3658_v21 = vsel %vm1281_vm1, %v3642_v9, %v3657_v62  ;;  %v3661_v44 = vrot.slane %v3622_v13, 4  ;;  %v3654_v48 = vsel %vm1281_vm1, %v3634_v23, %v3653_v39 }
 0x906   : > { %v3959_v46 = vsel %vm2291_vm3, %v3664_v4, 0  ;;  %v3978_v41 = vsel %vm2291_vm3, %v3665_v25, 0  ;;  %v3668_v38 = vpack.c.bf16 %v3658_v21, %v3658_v21  ;;  %v3656_v3 = vsel %vm1281_vm1, %v3655_v2, %v3618_v15 }
 0x907   : > { %3968 = vmatpush.bf16.msrb.mxu0 %v3959_v46  ;;  %3987 = vmatpush.bf16.msra.mxu1 %v3978_v41  ;;  %v3660_v18 = vsel %vm1281_vm1, %v3659_v56, %v3622_v13  ;;  %v3666_v22 = vpack.c.bf16 %v3654_v48, %v3654_v48  ;;  %v3667_v45 = vpack.c.bf16 %v3656_v3, %v3656_v3 }
 0x908   : > { %v3669_v52 = vpack.c.bf16 %v3660_v18, %v3660_v18  ;;  %v4035_v35 = vsel %vm2291_vm3, %v3668_v38, 0  ;;  %v3662_v58 = vsel %vm1281_vm1, %v3646_v12, %v3661_v44 }
 0x909   : > { %v3997_v10 = vsel %vm2291_vm3, %v3666_v22, 0  ;;  %v3670_v55 = vpack.c.bf16 %v3662_v58, %v3662_v58  ;;  %v4016_v27 = vsel %vm2291_vm3, %v3667_v45, 0 }
 0x90a   : > { %v4054_v29 = vsel %vm2291_vm3, %v3669_v52, 0  ;;  %4006 = vmatpush.bf16.msra.mxu2 %v3997_v10  ;;  %4025 = vmatpush.bf16.msrb.mxu3 %v4016_v27 }
 0x90b   : > { %4044 = vmatpush.bf16.msra.mxu0 %v4035_v35  ;;  %4063 = vmatpush.bf16.msrb.mxu1 %v4054_v29  ;;  %v4073_v5 = vsel %vm2291_vm3, %v3670_v55, 0 }
 0x90e   : > { %4082 = vmatpush.bf16.msrb.mxu2 %v4073_v5 }
 0x938   : > { %v3896_v37 = vpop.xlane.xlu1 %3895 }
 0x939   : > { %5540 = vrcp.f32 %v3896_v37 }
 0x93c   : > { %v3890_v50 = vpop.xlane.xlu2 %3889 }
 0x93d   : > { %v3899_v11 = vpop.xlane.xlu0 %3898  ;;  %5542 = vrcp.f32 %v3890_v50 }
 0x93e   : > { %5544 = vrcp.f32 %v3899_v11 }
 0x93f   : > { %v5541_v32 = vpop.eup %5540 }
 0x940   : > { %v3922_v36 = vmul.f32 %v5541_v32, %v7516_v49 }
 0x942   : > { %v3930_v17 = vpack.c.bf16 %v3922_v36, %v3922_v36 }
 0x943   : > { %v5543_v57 = vpop.eup %5542 }
 0x944   : > { %v5545_v15 = vpop.eup %5544  ;;  %v3920_v34 = vmul.f32 %v5543_v57, %v7520_v7  ;;  %v3893_v14 = vpop.xlane.xlu2 %3892  ;;  %5098 = vmatmul.msk.bf16.vlgmr.msra.gmra.mxu1 %vm2023_vm2, %v3930_v17 }
 0x945   : > { %v3923_v23 = vmul.f32 %v5545_v15, %v7522_v8  ;;  %5546 = vrcp.f32 %v3893_v14 }
 0x946   : > { %v3928_v53 = vpack.c.bf16 %v3920_v34, %v3920_v34 }
 0x947   : > { %v3931_v16 = vpack.c.bf16 %v3923_v23, %v3923_v23 }
 0x948   : > { %v3908_v19 = vpop.xlane.xlu1 %3907  ;;  %5096 = vmatmul.msk.bf16.vlgmr.msra.gmra.mxu3 %vm2023_vm2, %v3928_v53 }
 0x949   : > { %5548 = vrcp.f32 %v3908_v19  ;;  %5099 = vmatmul.msk.bf16.vlgmr.msra.gmra.mxu2 %vm2023_vm2, %v3931_v16 }
 0x94b   : > { %v5547_v49 = vpop.eup %5546 }
 0x94c   : > { %v3921_v20 = vmul.f32 %v5547_v49, %v7528_v33 }
 0x94d   : > { %v3911_v62 = vpop.xlane.xlu2 %3910 }
 0x94e   : > { %v3929_v1 = vpack.c.bf16 %v3921_v20, %v3921_v20  ;;  %5550 = vrcp.f32 %v3911_v62  ;;  %v3902_v7 = vpop.xlane.xlu0 %3901 }
 0x94f   : > { %v5549_v47 = vpop.eup %5548  ;;  %5552 = vrcp.f32 %v3902_v7 }
 0x950   : > { %v3926_v8 = vmul.f32 %v5549_v47, %v7533_v0  ;;  %5097 = vmatmul.msk.bf16.vlgmr.msrb.gmra.mxu0 %vm2023_vm2, %v3929_v1 }
 0x952   : > { %v3934_v28 = vpack.c.bf16 %v3926_v8, %v3926_v8 }
 0x954   : > { %v5551_v61 = vpop.eup %5550  ;;  %5102 = vmatmul.msk.bf16.vlgmr.msrb.gmra.mxu1 %vm2023_vm2, %v3934_v28 }
 0x955   : > { %v5553_v54 = vpop.eup %5552  ;;  %v3927_v42 = vmul.f32 %v5551_v61, %v7537_v60 }
 0x956   : > { %v3924_v13 = vmul.f32 %v5553_v54, %v7539_v63  ;;  %v3905_v33 = vpop.xlane.xlu0 %3904 }
 0x957   : > { %v3935_v6 = vpack.c.bf16 %v3927_v42, %v3927_v42  ;;  %5554 = vrcp.f32 %v3905_v33 }
 0x958   : > { %v3932_v26 = vpack.c.bf16 %v3924_v13, %v3924_v13 }
 0x959   : > { %5103 = vmatmul.msk.bf16.vlgmr.msrb.gmra.mxu2 %vm2023_vm2, %v3935_v6 }
 0x95a   : > { %5100 = vmatmul.msk.bf16.vlgmr.msrb.gmra.mxu3 %vm2023_vm2, %v3932_v26 }
 0x95d   : > { %v5555_v0 = vpop.eup %5554 }
 0x95e   : > { %v3925_v43 = vmul.f32 %v5555_v0, %v7545_v59 }
 0x960   : > { %v3933_v9 = vpack.c.bf16 %v3925_v43, %v3925_v43 }
 0x962   : > { %5101 = vmatmul.msk.bf16.vlgmr.msra.gmra.mxu0 %vm2023_vm2, %v3933_v9 }
 0x9c1   : > { %v3989_v12 = vpop.f32.mrf.mxu1 }
 0x9c2   : > { %v4088_v39 = vrot.slane %v3989_v12, 4 }
 0x9c9   : > { %v3991_v40 = vpop.f32.mrf.mxu1 }
 0x9cb   : > { %v3951_v4 = vpop.f32.mrf.mxu3 }
 0x9cc   : > { %v4008_v60 = vpop.f32.mrf.mxu2  ;;  %v4090_v2 = vrot.slane %v3951_v4, 4  ;;  %v4089_v44 = vsel %vm1281_vm1, %v4088_v39, %v3951_v4 }
 0x9cd   : > { %v3970_v25 = vpop.f32.mrf.mxu0  ;;  %v4100_v63 = vrot.slane %v4008_v60, 4  ;;  %v4095_v3 = vperm.slane %v4089_v44, %v6640_v31 }
 0x9ce   : > { %v4102_v56 = vrot.slane %v3970_v25, 4  ;;  %v4091_v59 = vsel %vm1281_vm1, %v3989_v12, %v4090_v2 }
 0x9cf   : > { %v4101_v46 = vsel %vm1281_vm1, %v4100_v63, %v3970_v25  ;;  %v4099_v45 = vperm.slane %v4091_v59, %v6640_v31  ;;  %v4138_v35 = vrot.slane %v4095_v3, 4 }
 0x9d0   : > { %v4103_v48 = vsel %vm1281_vm1, %v4008_v60, %v4102_v56  ;;  %v4107_v22 = vperm.slane %v4101_v46, %v6640_v31 }
 0x9d1   : > { %v4065_v21 = vpop.f32.mrf.mxu1  ;;  %v4111_v52 = vperm.slane %v4103_v48, %v6640_v31  ;;  %v4150_v55 = vrot.slane %v4099_v45, 4 }
 0x9d2   : > { %v4136_v10 = vrot.slane %v4107_v22, 4  ;;  %v4112_v29 = vrot.slane %v4065_v21, 4  ;;  %v4139_v37 = vsel %vm1281_vm1, %v4107_v22, %v4138_v35 }
 0x9d3   : > { %v3953_v41 = vpop.f32.mrf.mxu3  ;;  %v4148_v27 = vrot.slane %v4111_v52, 4  ;;  %v4151_v15 = vsel %vm1281_vm1, %v4111_v52, %v4150_v55  ;;  %v4147_v23 = vperm.slane %v4139_v37, %v6653_v51 }
 0x9d4   : > { %v4010_v38 = vpop.f32.mrf.mxu2  ;;  %v4137_v32 = vsel %vm1281_vm1, %v4136_v10, %v4095_v3  ;;  %v4159_v47 = vperm.slane %v4151_v15, %v6653_v51 }
 0x9d5   : > { %v3972_v18 = vpop.f32.mrf.mxu0  ;;  %v4149_v57 = vsel %vm1281_vm1, %v4148_v27, %v4099_v45  ;;  %v4143_v49 = vperm.slane %v4137_v32, %v6653_v51  ;;  %v4190_v13 = vrot.slane %v4147_v23, 4 }
 0x9d6   : > { %v4155_v7 = vperm.slane %v4149_v57, %v6653_v51  ;;  %v4198_v39 = vrot.slane %v4159_v47, 4 }
 0x9d7   : > { %v4186_v26 = vrot.slane %v4143_v49, 4 }
 0x9d8   : > { %v4194_v63 = vrot.slane %v4155_v7, 4 }
 0x9d9   : > { %v4067_v58 = vpop.f32.mrf.mxu1 }
 0x9dc   : > { %v4084_v5 = vpop.f32.mrf.mxu2 }
 0x9dd   : > { %v4027_v50 = vpop.f32.mrf.mxu3  ;;  %v4124_v11 = vrot.slane %v4084_v5, 4 }
 0x9de   : > { %v4113_v36 = vsel %vm1281_vm1, %v4112_v29, %v4027_v50  ;;  %v4114_v17 = vrot.slane %v4027_v50, 4 }
 0x9df   : > { %v4119_v34 = vperm.slane %v4113_v36, %v6640_v31  ;;  %v4046_v14 = vpop.f32.mrf.mxu0 }
 0x9e0   : > { %v4115_v53 = vsel %vm1281_vm1, %v4065_v21, %v4114_v17  ;;  %v4125_v16 = vsel %vm1281_vm1, %v4124_v11, %v4046_v14  ;;  %v4126_v19 = vrot.slane %v4046_v14, 4 }
 0x9e1   : > { %v4123_v20 = vperm.slane %v4115_v53, %v6640_v31  ;;  %v4162_v62 = vrot.slane %v4119_v34, 4  ;;  %v4131_v1 = vperm.slane %v4125_v16, %v6640_v31 }
 0x9e2   : > { %v4127_v8 = vsel %vm1281_vm1, %v4084_v5, %v4126_v19 }
 0x9e3   : > { %v4174_v28 = vrot.slane %v4123_v20, 4  ;;  %v4135_v61 = vperm.slane %v4127_v8, %v6640_v31  ;;  %v4160_v54 = vrot.slane %v4131_v1, 4  ;;  %v4163_v42 = vsel %vm1281_vm1, %v4131_v1, %v4162_v62 }
 0x9e4   : > { %v4171_v33 = vperm.slane %v4163_v42, %v6653_v51  ;;  %v4086_v6 = vpop.f32.mrf.mxu2 }
 0x9e5   : > { %v4161_v0 = vsel %vm1281_vm1, %v4160_v54, %v4119_v34  ;;  %v4172_v43 = vrot.slane %v4135_v61, 4  ;;  %v4175_v9 = vsel %vm1281_vm1, %v4135_v61, %v4174_v28  ;;  %v4029_v12 = vpop.f32.mrf.mxu3 }
 0x9e6   : > { %v4167_v40 = vperm.slane %v4161_v0, %v6653_v51  ;;  %v4183_v4 = vperm.slane %v4175_v9, %v6653_v51  ;;  %v4188_v60 = vrot.slane %v4171_v33, 4  ;;  %v4191_v25 = vsel %vm1281_vm1, %v4171_v33, %v4190_v13 }
 0x9e7   : > { %v4173_v2 = vsel %vm1281_vm1, %v4172_v43, %v4123_v20  ;;  %v4212_v56 = vrot.slane %v4191_v25, 4  ;;  %v4048_v21 = vpop.f32.mrf.mxu0 }
 0x9e8   : > { %v4179_v44 = vperm.slane %v4173_v2, %v6653_v51  ;;  %v4184_v46 = vrot.slane %v4167_v40, 4  ;;  %v4187_v41 = vsel %vm1281_vm1, %v4167_v40, %v4186_v26  ;;  %v4189_v59 = vsel %vm1281_vm1, %v4188_v60, %v4147_v23 }
 0x9e9   : > { %v4196_v48 = vrot.slane %v4183_v4, 4  ;;  %v4199_v38 = vsel %vm1281_vm1, %v4183_v4, %v4198_v39  ;;  %v4200_v3 = vrot.slane %v4189_v59, 4  ;;  %v4214_v18 = vrot.slane %v4187_v41, 4 }
 0x9ea   : > { %v4185_v22 = vsel %vm1281_vm1, %v4184_v46, %v4143_v49  ;;  %v4192_v45 = vrot.slane %v4179_v44, 4  ;;  %v4236_v52 = vrot.slane %v4199_v38, 4  ;;  %v4195_v35 = vsel %vm1281_vm1, %v4179_v44, %v4194_v63 }
 0x9eb   : > { %v4197_v58 = vsel %vm1281_vm1, %v4196_v48, %v4159_v47  ;;  %v4201_v10 = vsel %vm1281_vm1, %v4200_v3, %v4185_v22  ;;  %v4213_v55 = vsel %vm1281_vm1, %v4212_v56, %v4187_v41  ;;  %v4238_v27 = vrot.slane %v4195_v35, 4 }
 0x9ec   : > { %v4193_v29 = vsel %vm1281_vm1, %v4192_v45, %v4155_v7  ;;  %v4207_v5 = vperm.slane %v4201_v10, %v6640_v31  ;;  %v4219_v37 = vperm.slane %v4213_v55, %v6640_v31  ;;  %v4224_v50 = vrot.slane %v4197_v58, 4  ;;  %v5212_v10 = vld [vmem:[#allocation19 + $0x18] sm:$0xff]  ;;  %v5211_v55 = vld [vmem:[#allocation19 + $0x10] sm:$0xff] }
 0x9ed   : > { %v4226_v11 = vrot.slane %v4193_v29, 4  ;;  %v4237_v32 = vsel %vm1281_vm1, %v4236_v52, %v4195_v35  ;;  %v4202_v36 = vrot.slane %v4185_v22, 4  ;;  %v4215_v17 = vsel %vm1281_vm1, %v4191_v25, %v4214_v18  ;;  %4391 = vmatpush.bf16.msra.mxu3 %v5212_v10 }
 0x9ee   : > { %v4225_v57 = vsel %vm1281_vm1, %v4224_v50, %v4193_v29  ;;  %v4243_v15 = vperm.slane %v4237_v32, %v6640_v31  ;;  %v4248_v34 = vrot.slane %v4219_v37, 4  ;;  %v4250_v14 = vrot.slane %v4207_v5, 4 }
 0x9ef   : > { %v4231_v23 = vperm.slane %v4225_v57, %v6640_v31  ;;  %v4203_v53 = vsel %vm1281_vm1, %v4189_v59, %v4202_v36  ;;  %v4223_v16 = vperm.slane %v4215_v17, %v6640_v31  ;;  %v4227_v19 = vsel %vm1281_vm1, %v4197_v58, %v4226_v11 }
 0x9f0   : > { %v4249_v49 = vsel %vm1281_vm1, %v4248_v34, %v4207_v5  ;;  %v4272_v20 = vrot.slane %v4243_v15, 4  ;;  %v4251_v62 = vsel %vm1281_vm1, %v4219_v37, %v4250_v14  ;;  %v4211_v1 = vperm.slane %v4203_v53, %v6640_v31 }
 0x9f1   : > { %v4255_v7 = vperm.slane %v4249_v49, %v6653_v51  ;;  %v4259_v47 = vperm.slane %v4251_v62, %v6653_v51  ;;  %v4274_v8 = vrot.slane %v4231_v23, 4  ;;  %v4235_v61 = vperm.slane %v4227_v19, %v6640_v31  ;;  %4392 = vmatpush.bf16.msra.mxu3 %v5211_v55  ;;  %v5480_v19 = vld [vmem:[#allocation21] ss:$0 sm:$0xff]  ;;  %v5484_v55 = vld [vmem:[#allocation28] ss:$0 sm:$0xff] }
 0x9f2   : > { %v4273_v28 = vsel %vm1281_vm1, %v4272_v20, %v4231_v23  ;;  %v4239_v54 = vsel %vm1281_vm1, %v4199_v38, %v4238_v27  ;;  %v4260_v42 = vrot.slane %v4223_v16, 4  ;;  %v4262_v60 = vrot.slane %v4211_v1, 4  ;;  %v5209_v27 = vld [vmem:[#allocation19] sm:$0xff] }
 0x9f3   : > { %v4279_v13 = vperm.slane %v4273_v28, %v6653_v51  ;;  %v4298_v33 = vrot.slane %v4255_v7, 4  ;;  %v4275_v6 = vsel %vm1281_vm1, %v4243_v15, %v4274_v8  ;;  %v4302_v26 = vrot.slane %v4259_v47, 4 }
 0x9f4   : > { %v4283_v0 = vperm.slane %v4275_v6, %v6653_v51  ;;  %v4247_v43 = vperm.slane %v4239_v54, %v6640_v31  ;;  %v4261_v9 = vsel %vm1281_vm1, %v4260_v42, %v4211_v1  ;;  %v4286_v2 = vrot.slane %v4235_v61, 4  ;;  %v5216_v42 = vld [vmem:[#allocation25 + $0x18] sm:$0xff]  ;;  %v5213_v6 = vld [vmem:[#allocation25] sm:$0xff] }
 0x9f5   : > { %v4296_v12 = vrot.slane %v4279_v13, 4  ;;  %v4299_v40 = vsel %vm1281_vm1, %v4279_v13, %v4298_v33  ;;  %v4267_v4 = vperm.slane %v4261_v9, %v6653_v51  ;;  %v4263_v48 = vsel %vm1281_vm1, %v4223_v16, %v4262_v60  ;;  %4477 = vmatpush.bf16.msrb.mxu0 %v5216_v42  ;;  %v5215_v13 = vld [vmem:[#allocation25 + $0x10] sm:$0xff]  ;;  %v5214_v33 = vld [vmem:[#allocation25 + $0x8] sm:$0xff] }
 0x9f6   : > { %4313 = vrot.lane.b32.xlu2 %v4299_v40, %s6270_s9  ;;  %v4303_v25 = vsel %vm1281_vm1, %v4283_v0, %v4302_v26  ;;  %v4300_v63 = vrot.slane %v4283_v0, 4  ;;  %v4284_v39 = vrot.slane %v4247_v43, 4  ;;  %v4287_v44 = vsel %vm1281_vm1, %v4247_v43, %v4286_v2  ;;  %s7861_s9 = sld [smem:[#allocation62_spill]] }
 0x9f7   : > { %4321 = vrot.lane.b32.xlu0 %v4303_v25, %s6271_s2  ;;  %v4297_v56 = vsel %vm1281_vm1, %v4296_v12, %v4255_v7  ;;  %v4295_v41 = vperm.slane %v4287_v44, %v6653_v51  ;;  %v4306_v59 = vrot.slane %v4267_v4, 4  ;;  %v4271_v22 = vperm.slane %v4263_v48, %v6653_v51 }
 0x9f8   : > { %v4301_v31 = vsel %vm1281_vm1, %v4300_v63, %v4259_v47  ;;  %v4285_v21 = vsel %vm1281_vm1, %v4284_v39, %v4235_v61 }
 0x9f9   : > { %4317 = vrot.lane.b32.xlu1 %v4301_v31, %s7857_s4  ;;  %v4291_v46 = vperm.slane %v4285_v21, %v6653_v51  ;;  %v4308_v3 = vrot.slane %v4295_v41, 4  ;;  %v4310_v35 = vrot.slane %v4271_v22, 4  ;;  %v5210_v51 = vld [vmem:[#allocation19 + $0x8] sm:$0xff]  ;;  %4478 = vmatpush.bf16.msrb.mxu0 %v5215_v13  ;;  %v5481_v21 = vld [vmem:[#allocation22] ss:$0 sm:$0xff] }
 0x9fa   : > { %4393 = vmatpush.bf16.msra.mxu3 %v5210_v51  ;;  %v5487_v13 = vld [vmem:[#allocation34] ss:$0 sm:$0xff] }
 0x9fb   : > { %v4304_v38 = vrot.slane %v4291_v46, 4  ;;  %v4307_v45 = vsel %vm1281_vm1, %v4291_v46, %v4306_v59  ;;  %v4309_v52 = vsel %vm1281_vm1, %v4308_v3, %v4271_v22  ;;  %v4311_v58 = vsel %vm1281_vm1, %v4295_v41, %v4310_v35  ;;  %v5482_v46 = vld [vmem:[#allocation24] ss:$0 sm:$0xff]  ;;  %v5483_v22 = vld [vmem:[#allocation27] ss:$0 sm:$0xff] }
 0x9fc   : > { %v5223_v43 = vld [vmem:[%s7861_s9 + $0x30] sm:$0xff]  ;;  %v5222_v12 = vld [vmem:[%s7861_s9 + $0x28] sm:$0xff]  ;;  %v5221_v40 = vld [vmem:[%s7861_s9 + $0x20] sm:$0xff] }
 0x9fd   : > { %v4305_v18 = vsel %vm1281_vm1, %v4304_v38, %v4267_v4  ;;  %4479 = vmatpush.bf16.msrb.mxu0 %v5214_v33  ;;  %v5220_v25 = vld [vmem:[%s7861_s9 + $0x18] sm:$0xff]  ;;  %v5219_v2 = vld [vmem:[%s7861_s9 + $0x10] sm:$0xff]  ;;  %v5218_v3 = vld [vmem:[%s7861_s9 + $0x8] sm:$0xff] }
 0x9fe   : > { %4325 = vrot.lane.b32.xlu2 %v4305_v18, %s6273_s8  ;;  %4394 = vmatpush.bf16.msra.mxu3 %v5209_v27  ;;  %v5217_v18 = vld [vmem:[%s7861_s9] sm:$0xff]  ;;  %s1164_s8 = scalar_lea.vmem %s7862_s21, %s6615_s1 }
 0x9ff   : > { %4329 = vrot.lane.b32.xlu0 %v4307_v45, %s7858_s5 }
 0xa01   : > { %4333 = vrot.lane.b32.xlu1 %v4309_v52, %s7859_s3  ;;  %4480 = vmatpush.bf16.msrb.mxu0 %v5213_v6 }
 0xa06   : > { %4337 = vrot.lane.b32.xlu2 %v4311_v58, %s7860_s28 }
 0xa50   : > { %v4314_v29 = vpop.permute.xlu2 %4313 }
 0xa51   : > { %v4340_v50 = vsel %vm2023_vm2, %v4297_v56, %v4314_v29 }
 0xa58   : > { %v4326_v37 = vpop.permute.xlu2 %4325 }
 0xa60   : > { %v4338_v14 = vpop.permute.xlu2 %4337 }
 0xa69   : > { %v4322_v5 = vpop.permute.xlu0 %4321 }
 0xa6b   : > { %v4318_v11 = vpop.permute.xlu1 %4317 }
 0xa6c   : > { %v4341_v32 = vsel %vm2694_vm4, %v4340_v50, %v4318_v11 }
 0xa6d   : > { %v4342_v36 = vsel %vm2696_vm5, %v4341_v32, %v4322_v5 }
 0xa6e   : > { %v4343_v57 = vsel %vm2698_vm6, %v4342_v36, %v4326_v37 }
 0xa71   : > { %v4330_v17 = vpop.permute.xlu0 %4329 }
 0xa72   : > { %v4344_v15 = vsel %vm2700_vm7, %v4343_v57, %v4330_v17  ;;  %v5228_v57 = vld [vmem:[#allocation33 + $0x18] sm:$0xff] }
 0xa73   : > { %v4334_v34 = vpop.permute.xlu1 %4333  ;;  %4646 = vmatpush.bf16.msra.mxu2 %v5228_v57 }
 0xa74   : > { %v4345_v23 = vsel %vm2702_vm8, %v4344_v15, %v4334_v34  ;;  %v5227_v15 = vld [vmem:[#allocation33 + $0x10] sm:$0xff]  ;;  %v5226_v34 = vld [vmem:[#allocation33 + $0x8] sm:$0xff] }
 0xa75   : > { %v4346_v53 = vsel %vm2704_vm9, %v4345_v23, %v4338_v14  ;;  %v5225_v14 = vld [vmem:[#allocation33] sm:$0xff] }
 0xa76   : > { %v4347_v16 = vpack.c.bf16 %v4346_v53, %v4346_v53 }
 0xa77   : > { %4647 = vmatpush.bf16.msra.mxu2 %v5227_v15 }
 0xa78   : > { %5120 = vmatmul.msk.bf16.vlgmr.msra.gmra.mxu3 %vm1228_vm0, %v4347_v16 }
 0xa7b   : > { %4648 = vmatpush.bf16.msra.mxu2 %v5226_v34 }
 0xa7f   : > { %4649 = vmatpush.bf16.msra.mxu2 %v5225_v14 }
 0xafb   : > { %v4396_v49 = vpop.f32.mrf.mxu3 }
 0xafc   : > { %v4397_v20 = vadd.f32 %v5480_v19, %v4396_v49 }
 0xafe   : > { %v4400_v62 = vadd.f32 %v4397_v20, %v7157_v30  ;;  %v5224_v30 = vld [vmem:[%s7861_s9 + $0x38] sm:$0xff] }
 0xaff   : > { %4556 = vmatpush.bf16.msra.mxu1 %v5224_v30 }
 0xb00   : > { %v4403_v1 = vsel %vm1228_vm0, %v4400_v62, 0.0 }
 0xb01   : > { %4404 = vadd.xlane.f32.xlu0 %v4403_v1 }
 0xb03   : > { %v4398_v7 = vpop.f32.mrf.mxu3  ;;  %4557 = vmatpush.bf16.msra.mxu1 %v5223_v43 }
 0xb07   : > { %4558 = vmatpush.bf16.msra.mxu1 %v5222_v12 }
 0xb0b   : > { %4559 = vmatpush.bf16.msra.mxu1 %v5221_v40 }
 0xb0f   : > { %4560 = vmatpush.bf16.msra.mxu1 %v5220_v25 }
 0xb13   : > { %4561 = vmatpush.bf16.msra.mxu1 %v5219_v2 }
 0xb17   : > { %4562 = vmatpush.bf16.msra.mxu1 %v5218_v3 }
 0xb1b   : > { %4563 = vmatpush.bf16.msra.mxu1 %v5217_v18 }
 0xb74   : > { %v4405_v47 = vpop.xlane.xlu0 %4404 }
 0xb75   : > { %v4406_v8 = vmul.f32 %v4405_v47, %v7147_v24  ;;  %v5485_v47 = vld [vmem:[#allocation30] ss:$0 sm:$0xff] }
 0xb77   : > { %v4407_v28 = vsub.f32 %v4400_v62, %v4406_v8 }
 0xb79   : > { %v4408_v61 = vmul.f32 %v4407_v28, %v4407_v28 }
 0xb7b   : > { %v4409_v54 = vsel %vm1228_vm0, %v4408_v61, 0.0  ;;  %v5486_v61 = vld [vmem:[#allocation31] ss:$0 sm:$0xff] }
 0xb7c   : > { %4410 = vadd.xlane.f32.xlu1 %v4409_v54 }
 0xbef   : > { %v4411_v26 = vpop.xlane.xlu1 %4410 }
 0xbf0   : > { %v4412_v0 = vmul.f32 %v4411_v26, %v7147_v24 }
 0xbf2   : > { %v4413_v9 = vadd.f32 1e-05, %v4412_v0 }
 0xbf4   : > { %5556 = vrsqrt.f32 %v4413_v9  ;;  %vm4420_vm15 = vweird.f32 %v4413_v9 }
 0xbfa   : > { %v5557_v4 = vpop.eup %5556 }
 0xbfb   : > { %v4415_v60 = vmul.f32 %v5557_v4, %v4413_v9  ;;  %vm4421_vm14 = vweird.f32 %v5557_v4 }
 0xbfc   : > { %vm4422_vm1 = vmor %vm4420_vm15, %vm4421_vm14 }
 0xbfd   : > { %v4416_v63 = vmul.f32 %v5557_v4, %v4415_v60 }
 0xbff   : > { %v4417_v39 = vmul.f32 0.5, %v4416_v63 }
 0xc01   : > { %v4418_v56 = vsub.f32 1.5, %v4417_v39 }
 0xc03   : > { %v4419_v31 = vmul.f32 %v5557_v4, %v4418_v56 }
 0xc05   : > { %v4423_v44 = vsel %vm4422_vm1, %v5557_v4, %v4419_v31 }
 0xc06   : > { %v4424_v41 = vmul.f32 %v4423_v44, %v4407_v28 }
 0xc08   : > { %v4428_v59 = vmul.f32 %v5481_v21, %v4424_v41 }
 0xc0a   : > { %v4432_v48 = vadd.f32 %v5482_v46, %v4428_v59 }
 0xc0c   : > { %v4433_v38 = vpack.c.bf16 %v4432_v48, %v4432_v48 }
 0xc0e   : > { %5137 = vmatmul.msk.bf16.vlgmr.msrb.gmra.mxu0 %vm1228_vm0, %v4433_v38 }
 0xc8b   : > { %v4482_v45 = vpop.f32.mrf.mxu0 }
 0xc8c   : > { %v4483_v52 = vadd.f32 %v5483_v22, %v4482_v45 }
 0xc8e   : > { %v4486_v35 = vmax.f32 %v4483_v52, 0.0 }
 0xc90   : > { %v4487_v58 = vpack.c.bf16 %v4486_v35, %v4486_v35 }
 0xc92   : > { %4564 = vmatmul.bf16.vlgmr.msra.gmra.mxu1 %v4487_v58 }
 0xc93   : > { %v4484_v10 = vpop.f32.mrf.mxu0 }
 0xd0f   : > { %v4565_v51 = vpop.f32.mrf.mxu1 }
 0xd10   : > { %v4566_v27 = vadd.f32 %v5484_v55, %v4565_v51 }
 0xd12   : > { %v4569_v29 = vadd.f32 %v4566_v27, %v4432_v48 }
 0xd14   : > { %v4572_v5 = vsel %vm1228_vm0, %v4569_v29, 0.0 }
 0xd15   : > { %4573 = vadd.xlane.f32.xlu2 %v4572_v5 }
 0xd17   : > { %v4567_v37 = vpop.f32.mrf.mxu1 }
 0xd88   : > { %v4574_v50 = vpop.xlane.xlu2 %4573 }
 0xd89   : > { %v4575_v11 = vmul.f32 %v4574_v50, %v7147_v24 }
 0xd8b   : > { %v4576_v32 = vsub.f32 %v4569_v29, %v4575_v11 }
 0xd8d   : > { %v4577_v36 = vmul.f32 %v4576_v32, %v4576_v32 }
 0xd8f   : > { %v4578_v17 = vsel %vm1228_vm0, %v4577_v36, 0.0 }
 0xd90   : > { %4579 = vadd.xlane.f32.xlu0 %v4578_v17 }
 0xe03   : > { %v4580_v23 = vpop.xlane.xlu0 %4579 }
 0xe04   : > { %v4581_v53 = vmul.f32 %v4580_v23, %v7147_v24 }
 0xe06   : > { %v4582_v16 = vadd.f32 1e-05, %v4581_v53 }
 0xe08   : > { %5558 = vrsqrt.f32 %v4582_v16  ;;  %vm4589_vm3 = vweird.f32 %v4582_v16 }
 0xe0e   : > { %v5559_v19 = vpop.eup %5558 }
 0xe0f   : > { %v4584_v49 = vmul.f32 %v5559_v19, %v4582_v16  ;;  %vm4590_vm2 = vweird.f32 %v5559_v19 }
 0xe10   : > { %vm4591_vm4 = vmor %vm4589_vm3, %vm4590_vm2 }
 0xe11   : > { %v4585_v20 = vmul.f32 %v5559_v19, %v4584_v49 }
 0xe13   : > { %v4586_v62 = vmul.f32 0.5, %v4585_v20 }
 0xe15   : > { %v4587_v1 = vsub.f32 1.5, %v4586_v62 }
 0xe17   : > { %v4588_v7 = vmul.f32 %v5559_v19, %v4587_v1 }
 0xe19   : > { %v4592_v8 = vsel %vm4591_vm4, %v5559_v19, %v4588_v7 }
 0xe1a   : > { %v4593_v28 = vmul.f32 %v4592_v8, %v4576_v32 }
 0xe1c   : > { %v4597_v54 = vmul.f32 %v5485_v47, %v4593_v28 }
 0xe1e   : > { %v4601_v42 = vadd.f32 %v5486_v61, %v4597_v54 }
 0xe20   : > { %v4602_v24 = vpack.c.bf16 %v4601_v42, %v4601_v42 }
 0xe22   : > { %5186 = vmatmul.msk.bf16.vlgmr.msra.gmra.mxu2 %vm1228_vm0, %v4602_v24 }
 0xea5   : > { %v4651_v33 = vpop.f32.mrf.mxu2 }
 0xea6   : > { %v4652_v6 = vadd.f32 %v5487_v13, %v4651_v33 }
 0xea8   : > { %4655 = vst [vmem:[%s1164_s8] sm:$0xff] %v4652_v6 }
 0xead   : > { %v4653_v30 = vpop.f32.mrf.mxu2 }
 0xeae PF: > { %s7863_s0 = sld [smem:[#allocation48_spill]] }
 0xeb4   : > { %s49_s7 = sadd.s32 1, %s7863_s0  }
 0xeb5   : > { %p46_p6 = scmp.ge.s32.totalorder %s49_s7, 4  }
 0xeb7   :  { %48 = sbr.rel (!%p46_p6) target bundleno = 27 (0x1b), region = 252 }
 0xebc   :  { %4675 = vsyncpa [#allocation3], 1 }
 0xebd   :  { %4677 = vsyncpa [#allocation3 + $0x1], 1 }
 0xebe   :  { %4678 = vsyncpa [#allocation5], 1 }
 0xebf   :  { %4679 = vsyncpa [#allocation8], 1 }
 0xec0   :  { %4680 = vsyncpa [#allocation11], 1 }
 0xec1   :  { %4681 = vsyncpa [#allocation14], 1 }
 0xec2   :  { %4682 = vsyncpa [#allocation17], 1 }
 0xec3   :  { %4683 = vsyncpa [#allocation20], 1 }
 0xec4   :  { %4684 = vsyncpa [#allocation23], 1 }
 0xec5   :  { %4685 = vsyncpa [#allocation26], 1 }
 0xec6   :  { %4686 = vsyncpa [#allocation29], 1 }
 0xec7   :  { %4687 = vsyncpa [#allocation32], 1 }
 0xec8   :  { %4688 = vsyncpa [#allocation35], 1 }

</bundles_post_ra>
